<compile_context>
chip_gen: v7x
topology: tpu7x:2x2x1
jax: 0.10.0
libtpu: 0.0.40
codegen_flags: <defaults>
</compile_context>

<pallas_src>
import functools
import math

import jax
import jax.numpy as jnp
from jax.experimental import pallas as pl
from jax.experimental.pallas import tpu as pltpu


# ---------------------------------------------------------------------------
# In-kernel helpers (VMEM-resident 2-D tiles; f32 VPU math, bf16 MXU inputs)
# ---------------------------------------------------------------------------

def _bf16(x):
    return x.astype(jnp.bfloat16)


def _layer_norm(z, g, b):
    # VITS LayerNorm over channels, eps=1e-5 (f32 statistics).
    mu = jnp.mean(z, axis=-1, keepdims=True)
    zc = z - mu
    var = jnp.mean(zc * zc, axis=-1, keepdims=True)
    return zc * jax.lax.rsqrt(var + 1e-5) * g + b


def _mha_block(x_q, x_kv, wqkv_ref, bqkv_ref, wo, bo, q_valid, k_valid, n_heads):
    """Masked multi-head attention on VMEM tiles.

    x_q: (Tq, C) f32, x_kv: (Tk, C) f32.
    wqkv_ref: (3, C, C) bf16 ref (stacked q/k/v weights), bqkv_ref: (3, 1, C) f32 ref.
    wo: (C, C) bf16, bo: (1, C) f32.  q_valid: (Tq, 1) bool, k_valid: (1, Tk) bool.
    """
    C = x_q.shape[-1]
    Dh = C // n_heads
    scale = 1.0 / math.sqrt(Dh)
    xq = _bf16(x_q)
    xk = _bf16(x_kv)
    q = jnp.dot(xq, wqkv_ref[0], preferred_element_type=jnp.float32) + bqkv_ref[0]
    k = jnp.dot(xk, wqkv_ref[1], preferred_element_type=jnp.float32) + bqkv_ref[1]
    v = jnp.dot(xk, wqkv_ref[2], preferred_element_type=jnp.float32) + bqkv_ref[2]
    smask = jnp.logical_and(q_valid, k_valid)                     # (Tq, Tk)
    ctx = []
    for h in range(n_heads):                                      # static unroll over heads
        lo, hi = h * Dh, (h + 1) * Dh
        qh = _bf16(q[:, lo:hi] * scale)
        kh = _bf16(k[:, lo:hi])
        vh = _bf16(v[:, lo:hi])
        s = jax.lax.dot_general(qh, kh, (((1,), (1,)), ((), ())),
                                preferred_element_type=jnp.float32)   # (Tq, Tk)
        s = jnp.where(smask, s, -1e4)                                 # masked_fill(mask==0, -1e4)
        s = s - jnp.max(s, axis=-1, keepdims=True)
        p = jnp.exp(s)
        p = p * pl.reciprocal(jnp.sum(p, axis=-1, keepdims=True), approx=True)
        ctx.append(jnp.dot(_bf16(p), vh, preferred_element_type=jnp.float32))
    ctx = jnp.concatenate(ctx, axis=-1)                           # (Tq, C)
    return jnp.dot(_bf16(ctx), wo, preferred_element_type=jnp.float32) + bo


def _conv3(z, w_ref, bias):
    """kernel_size-3 'same' Conv1d over time as three shifted MXU matmuls.
    z: (T, Cin) f32 (already time-masked), w_ref: (3, Cin, Cout) bf16 taps, bias: (1, Cout) f32."""
    zero = jnp.zeros((1, z.shape[1]), z.dtype)
    zprev = jnp.concatenate([zero, z[:-1, :]], axis=0)            # row t = z[t-1]
    znext = jnp.concatenate([z[1:, :], zero], axis=0)             # row t = z[t+1]
    acc = jnp.dot(_bf16(zprev), w_ref[0], preferred_element_type=jnp.float32)
    acc = acc + jnp.dot(_bf16(z), w_ref[1], preferred_element_type=jnp.float32)
    acc = acc + jnp.dot(_bf16(znext), w_ref[2], preferred_element_type=jnp.float32)
    return acc + bias


def _ffn_block(x, tmask, w1_ref, b1, w2_ref, b2):
    """attentions.FFN: conv1d(3)(x*mask) -> relu -> conv1d(3)(h*mask) -> *mask (eval mode)."""
    xm = jnp.where(tmask, x, 0.0)
    h = jnp.maximum(_conv3(xm, w1_ref, b1), 0.0)
    hm = jnp.where(tmask, h, 0.0)
    y = _conv3(hm, w2_ref, b2)
    return jnp.where(tmask, y, 0.0)


# ---------------------------------------------------------------------------
# Pallas kernels
# ---------------------------------------------------------------------------

def _encoder_layer_kernel(len_ref, x_ref, wqkv_ref, bqkv_ref, wo_ref, bo_ref,
                          g1_ref, be1_ref, w1_ref, b1_ref, w2_ref, b2_ref,
                          g2_ref, be2_ref, o_ref, *, n_heads, mask_in, mask_out):
    """One full attentions.Encoder layer (MHA -> add+LN -> FFN -> add+LN) per batch element."""
    b = pl.program_id(0)
    L = len_ref[b]
    x = x_ref[0]                                                  # (T, C) f32
    T = x.shape[0]
    q_valid = jax.lax.broadcasted_iota(jnp.int32, (T, 1), 0) < L  # time mask (queries)
    k_valid = jax.lax.broadcasted_iota(jnp.int32, (1, T), 1) < L  # time mask (keys)

    if mask_in:                                                   # encoder-entry x * x_mask
        x = jnp.where(q_valid, x, 0.0)

    y = _mha_block(x, x, wqkv_ref, bqkv_ref, wo_ref[...], bo_ref[...],
                   q_valid, k_valid, n_heads)
    x = _layer_norm(x + y, g1_ref[...], be1_ref[...])

    y = _ffn_block(x, q_valid, w1_ref, b1_ref[...], w2_ref, b2_ref[...])
    x = _layer_norm(x + y, g2_ref[...], be2_ref[...])

    if mask_out:                                                  # encoder-exit x * x_mask
        x = jnp.where(q_valid, x, 0.0)
    o_ref[0] = x.astype(o_ref.dtype)


def pallas_encoder_layer(x, lengths, p, n_heads, *, mask_in, mask_out):
    B, T, C = x.shape
    Fc = p["w1"].shape[2]
    row = lambda i, l: (i, 0, 0)
    c2 = lambda i, l: (0, 0)
    c3 = lambda i, l: (0, 0, 0)
    gs = pltpu.PrefetchScalarGridSpec(
        num_scalar_prefetch=1,
        grid=(B,),
        in_specs=[
            pl.BlockSpec((1, T, C), row),        # x
            pl.BlockSpec((3, C, C), c3),         # wqkv (bf16)
            pl.BlockSpec((3, 1, C), c3),         # bqkv
            pl.BlockSpec((C, C), c2),            # wo (bf16)
            pl.BlockSpec((1, C), c2),            # bo
            pl.BlockSpec((1, C), c2),            # ln1 gamma
            pl.BlockSpec((1, C), c2),            # ln1 beta
            pl.BlockSpec((3, C, Fc), c3),        # ffn conv1 taps (bf16)
            pl.BlockSpec((1, Fc), c2),           # ffn conv1 bias
            pl.BlockSpec((3, Fc, C), c3),        # ffn conv2 taps (bf16)
            pl.BlockSpec((1, C), c2),            # ffn conv2 bias
            pl.BlockSpec((1, C), c2),            # ln2 gamma
            pl.BlockSpec((1, C), c2),            # ln2 beta
        ],
        out_specs=pl.BlockSpec((1, T, C), row),
    )
    return pl.pallas_call(
        functools.partial(_encoder_layer_kernel, n_heads=n_heads,
                          mask_in=mask_in, mask_out=mask_out),
        out_shape=jax.ShapeDtypeStruct((B, T, C), jnp.float32),
        grid_spec=gs,
        compiler_params=pltpu.CompilerParams(dimension_semantics=("parallel",)),
    )(lengths, x, p["wqkv"], p["bqkv"], p["wo"], p["bo"], p["g1"], p["be1"],
      p["w1"], p["b1"], p["w2"], p["b2"], p["g2"], p["be2"])


def _masked_linear_kernel(len_ref, x_ref, w_ref, b_ref, o_ref, *, mask_in, mask_out):
    """1x1 Conv1d: (optional x*mask) @ W + b (optional *mask)."""
    b = pl.program_id(0)
    L = len_ref[b]
    x = x_ref[0]                                                  # (T, Cin)
    T = x.shape[0]
    valid = jax.lax.broadcasted_iota(jnp.int32, (T, 1), 0) < L
    if mask_in:
        x = jnp.where(valid, x, 0.0)
    y = jnp.dot(_bf16(x), w_ref[...], preferred_element_type=jnp.float32) + b_ref[...]
    if mask_out:
        y = jnp.where(valid, y, 0.0)
    o_ref[0] = y.astype(o_ref.dtype)


def pallas_masked_linear(x, lengths, w, b, *, mask_in, mask_out):
    B, T, Cin = x.shape
    Cout = w.shape[1]
    gs = pltpu.PrefetchScalarGridSpec(
        num_scalar_prefetch=1,
        grid=(B,),
        in_specs=[
            pl.BlockSpec((1, T, Cin), lambda i, l: (i, 0, 0)),
            pl.BlockSpec((Cin, Cout), lambda i, l: (0, 0)),
            pl.BlockSpec((1, Cout), lambda i, l: (0, 0)),
        ],
        out_specs=pl.BlockSpec((1, T, Cout), lambda i, l: (i, 0, 0)),
    )
    return pl.pallas_call(
        functools.partial(_masked_linear_kernel, mask_in=mask_in, mask_out=mask_out),
        out_shape=jax.ShapeDtypeStruct((B, T, Cout), jnp.float32),
        grid_spec=gs,
        compiler_params=pltpu.CompilerParams(dimension_semantics=("parallel",)),
    )(lengths, x, w, b)


def _mrte_kernel(ylen_ref, tlen_ref, ssl_ref, text_ref, ge_ref,
                 wpre_ref, bpre_ref, wtpre_ref, btpre_ref,
                 wqkv_ref, bqkv_ref, wo_ref, bo_ref,
                 wpost_ref, bpost_ref, o_ref, *, n_heads):
    """MRTE: c_pre(ssl*mask), text_pre(text*mask), cross-attn(ssl queries text) + ssl_h + ge,
    c_post(x*mask) — all in one kernel per batch element."""
    b = pl.program_id(0)
    Ly = ylen_ref[b]
    Lt = tlen_ref[b]
    ssl = ssl_ref[0]                                              # (Ty, H)
    txt = text_ref[0]                                             # (Tt, H)
    Ty = ssl.shape[0]
    Tt = txt.shape[0]
    y_valid = jax.lax.broadcasted_iota(jnp.int32, (Ty, 1), 0) < Ly        # ssl/query mask
    t_valid_col = jax.lax.broadcasted_iota(jnp.int32, (Tt, 1), 0) < Lt    # text mask (rows)
    t_valid_row = jax.lax.broadcasted_iota(jnp.int32, (1, Tt), 1) < Lt    # text/key mask

    ssl_h = jnp.dot(_bf16(jnp.where(y_valid, ssl, 0.0)), wpre_ref[...],
                    preferred_element_type=jnp.float32) + bpre_ref[...]   # (Ty, Cm)
    txt_h = jnp.dot(_bf16(jnp.where(t_valid_col, txt, 0.0)), wtpre_ref[...],
                    preferred_element_type=jnp.float32) + btpre_ref[...]  # (Tt, Cm)

    attn = _mha_block(jnp.where(y_valid, ssl_h, 0.0),
                      jnp.where(t_valid_col, txt_h, 0.0),
                      wqkv_ref, bqkv_ref, wo_ref[...], bo_ref[...],
                      y_valid, t_valid_row, n_heads)
    x = attn + ssl_h + ge_ref[0]                                  # ge broadcast over time
    out = jnp.dot(_bf16(jnp.where(y_valid, x, 0.0)), wpost_ref[...],
                  preferred_element_type=jnp.float32) + bpost_ref[...]
    o_ref[0] = out.astype(o_ref.dtype)


def pallas_mrte(ssl_enc, y_lengths, text_enc, text_lengths, ge, p, n_heads):
    B, Ty, H = ssl_enc.shape
    Tt = text_enc.shape[1]
    Cm = p["wqkv"].shape[-1]
    row = lambda i, yl, tl: (i, 0, 0)
    c2 = lambda i, yl, tl: (0, 0)
    c3 = lambda i, yl, tl: (0, 0, 0)
    gs = pltpu.PrefetchScalarGridSpec(
        num_scalar_prefetch=2,
        grid=(B,),
        in_specs=[
            pl.BlockSpec((1, Ty, H), row),       # ssl_enc
            pl.BlockSpec((1, Tt, H), row),       # text_enc
            pl.BlockSpec((1, 1, Cm), row),       # ge
            pl.BlockSpec((H, Cm), c2),           # c_pre w (bf16)
            pl.BlockSpec((1, Cm), c2),           # c_pre b
            pl.BlockSpec((H, Cm), c2),           # text_pre w (bf16)
            pl.BlockSpec((1, Cm), c2),           # text_pre b
            pl.BlockSpec((3, Cm, Cm), c3),       # attn wqkv (bf16)
            pl.BlockSpec((3, 1, Cm), c3),        # attn bqkv
            pl.BlockSpec((Cm, Cm), c2),          # attn wo (bf16)
            pl.BlockSpec((1, Cm), c2),           # attn bo
            pl.BlockSpec((Cm, H), c2),           # c_post w (bf16)
            pl.BlockSpec((1, H), c2),            # c_post b
        ],
        out_specs=pl.BlockSpec((1, Ty, H), row),
    )
    return pl.pallas_call(
        functools.partial(_mrte_kernel, n_heads=n_heads),
        out_shape=jax.ShapeDtypeStruct((B, Ty, H), jnp.float32),
        grid_spec=gs,
        compiler_params=pltpu.CompilerParams(dimension_semantics=("parallel",)),
    )(y_lengths, text_lengths, ssl_enc, text_enc, ge,
      p["c_pre"]["w"], p["c_pre"]["b"], p["text_pre"]["w"], p["text_pre"]["b"],
      p["wqkv"], p["bqkv"], p["wo"], p["bo"], p["c_post"]["w"], p["c_post"]["b"])


# ---------------------------------------------------------------------------
# Model wiring (plain JAX glue: transposes, embedding gather, output split)
# ---------------------------------------------------------------------------

def run_encoder(x, lengths, layers, n_heads):
    """attentions.Encoder (eval mode): one fused pallas_call per layer."""
    n = len(layers)
    for li, p in enumerate(layers):
        x = pallas_encoder_layer(x, lengths, p, n_heads,
                                 mask_in=(li == 0), mask_out=(li == n - 1))
    return x


def text_encoder_forward(params, cfg, y, y_lengths, text, text_lengths, ge):
    """y:(B,768,T_y) NCT, text:(B,T_text) int32, ge:(B,mrte_hidden,1) -> PyTorch-layout outputs."""
    B, _, T_y = y.shape
    y_btc = jnp.transpose(y, (0, 2, 1)).astype(jnp.float32)       # (B, T_y, 768)
    ge_btc = jnp.transpose(ge, (0, 2, 1)).astype(jnp.float32)     # (B, 1, Cm)
    y_lengths = y_lengths.astype(jnp.int32)
    text_lengths = text_lengths.astype(jnp.int32)
    nh = cfg["n_heads"]

    # ssl_proj(y * y_mask) * y_mask, then encoder_ssl
    h = pallas_masked_linear(y_btc, y_lengths, params["ssl_proj"]["w"], params["ssl_proj"]["b"],
                             mask_in=True, mask_out=True)
    h = run_encoder(h, y_lengths, params["encoder_ssl"], nh)

    # text embedding (gather) + encoder_text (layer-0 applies text * text_mask in-kernel)
    t = jnp.take(params["text_embedding"], text, axis=0)          # (B, T_text, H)
    t = run_encoder(t, text_lengths, params["encoder_text"], nh)

    # MRTE cross-attention, then encoder2 (layer-0 applies y * y_mask in-kernel)
    h = pallas_mrte(h, y_lengths, t, text_lengths, ge_btc, params["mrte"], cfg["mrte_n_heads"])
    h = run_encoder(h, y_lengths, params["encoder2"], nh)

    # final projection + split into (m, logs)
    stats = pallas_masked_linear(h, y_lengths, params["proj"]["w"], params["proj"]["b"],
                                 mask_in=False, mask_out=True)
    m = stats[..., : cfg["out_channels"]]
    logs = stats[..., cfg["out_channels"]:]

    y_mask = (jnp.arange(T_y)[None, :] < y_lengths[:, None]).astype(jnp.float32)[:, None, :]
    to_nct = lambda a: jnp.transpose(a, (0, 2, 1))
    return to_nct(h), to_nct(m), to_nct(logs), y_mask


# ---------------------------------------------------------------------------
# Deterministic parameter init (kernel layouts; bf16 matmul weights, f32 biases/LN)
# ---------------------------------------------------------------------------

def _init_dense(key, cin, cout, scale=0.02):
    # == torch 1x1 Conv1d weight W[o,i,0] stored transposed as (cin, cout)
    return {"w": (jax.random.normal(key, (cin, cout), jnp.float32) * scale).astype(jnp.bfloat16),
            "b": jnp.zeros((1, cout), jnp.float32)}


def _init_mha(key, channels, scale=0.02):
    k0, k1 = jax.random.split(key, 2)
    return {"wqkv": (jax.random.normal(k0, (3, channels, channels), jnp.float32) * scale
                     ).astype(jnp.bfloat16),
            "bqkv": jnp.zeros((3, 1, channels), jnp.float32),
            "wo": (jax.random.normal(k1, (channels, channels), jnp.float32) * scale
                   ).astype(jnp.bfloat16),
            "bo": jnp.zeros((1, channels), jnp.float32)}


def _init_conv3(key, cin, cout, k, scale=0.02):
    # == torch Conv1d weight W[o,i,j] stored as taps (k, cin, cout), taps[j] = W[:, :, j].T
    assert k == 3, "fused FFN kernel implements kernel_size=3 only"  # TODO(synk): general k
    return {"w": (jax.random.normal(key, (k, cin, cout), jnp.float32) * scale).astype(jnp.bfloat16),
            "b": jnp.zeros((1, cout), jnp.float32)}


def _init_encoder(key, n_layers, hidden, filt, kernel_size):
    layers = []
    for lk in jax.random.split(key, n_layers):
        k1, k2, k3 = jax.random.split(lk, 3)
        mha = _init_mha(k1, hidden)
        c1 = _init_conv3(k2, hidden, filt, kernel_size)
        c2 = _init_conv3(k3, filt, hidden, kernel_size)
        layers.append({
            "wqkv": mha["wqkv"], "bqkv": mha["bqkv"], "wo": mha["wo"], "bo": mha["bo"],
            "g1": jnp.ones((1, hidden), jnp.float32), "be1": jnp.zeros((1, hidden), jnp.float32),
            "w1": c1["w"], "b1": c1["b"], "w2": c2["w"], "b2": c2["b"],
            "g2": jnp.ones((1, hidden), jnp.float32), "be2": jnp.zeros((1, hidden), jnp.float32),
        })
    return layers


def init_text_encoder(key, cfg):
    ks = jax.random.split(key, 9)
    mrte_mha = _init_mha(ks[6], cfg["mrte_hidden"])
    return {
        "ssl_proj": _init_dense(ks[0], cfg["ssl_dim"], cfg["hidden_channels"]),
        "encoder_ssl": _init_encoder(ks[1], cfg["n_layers"] // 2, cfg["hidden_channels"],
                                     cfg["filter_channels"], cfg["kernel_size"]),
        "encoder_text": _init_encoder(ks[2], cfg["n_layers"], cfg["hidden_channels"],
                                      cfg["filter_channels"], cfg["kernel_size"]),
        # synthetic vocab in place of get_symbols()
        "text_embedding": jax.random.normal(ks[3], (cfg["n_symbols"], cfg["hidden_channels"]),
                                            jnp.float32) * 0.02,
        "mrte": {
            "c_pre": _init_dense(ks[4], cfg["hidden_channels"], cfg["mrte_hidden"]),
            "text_pre": _init_dense(ks[5], cfg["hidden_channels"], cfg["mrte_hidden"]),
            "wqkv": mrte_mha["wqkv"], "bqkv": mrte_mha["bqkv"],
            "wo": mrte_mha["wo"], "bo": mrte_mha["bo"],
            "c_post": _init_dense(ks[7], cfg["mrte_hidden"], cfg["hidden_channels"]),
        },
        "encoder2": _init_encoder(ks[8], cfg["n_layers"] // 2, cfg["hidden_channels"],
                                  cfg["filter_channels"], cfg["kernel_size"]),
        "proj": _init_dense(jax.random.fold_in(key, 123), cfg["hidden_channels"],
                            cfg["out_channels"] * 2),
    }


# ---------------------------------------------------------------------------
# main
# ---------------------------------------------------------------------------

if __name__ == "__main__":
    cfg = dict(
        out_channels=32,
        hidden_channels=64,
        filter_channels=128,
        n_heads=2,
        n_layers=2,          # encoder_ssl / encoder2 use n_layers // 2
        kernel_size=3,
        p_dropout=0.1,       # eval mode -> identity
        ssl_dim=768,         # nn.Conv1d(768, hidden, 1)
        n_symbols=100,       # synthetic stand-in for len(get_symbols())
        mrte_hidden=128,
        mrte_n_heads=4,
    )

    key = jax.random.PRNGKey(0)
    kp, ky, kt, kg = jax.random.split(key, 4)
    params = init_text_encoder(kp, cfg)

    B, T_y, T_text = 2, 16, 8
    y = jax.random.normal(ky, (B, cfg["ssl_dim"], T_y), jnp.float32)        # (B, 768, T) NCT
    y_lengths = jnp.array([16, 12], jnp.int32)
    text = jax.random.randint(kt, (B, T_text), 0, cfg["n_symbols"], jnp.int32)
    text_lengths = jnp.array([8, 5], jnp.int32)
    ge = jax.random.normal(kg, (B, cfg["mrte_hidden"], 1), jnp.float32)

    fwd = jax.jit(functools.partial(text_encoder_forward, params, cfg))
    out_y, m, logs, y_mask = fwd(y, y_lengths, text, text_lengths, ge)
    jax.block_until_ready((out_y, m, logs, y_mask))

    assert out_y.shape == (B, cfg["hidden_channels"], T_y)
    assert m.shape == (B, cfg["out_channels"], T_y)
    assert logs.shape == (B, cfg["out_channels"], T_y)
    assert y_mask.shape == (B, 1, T_y)
    assert bool(jnp.all(jnp.isfinite(out_y))) and bool(jnp.all(jnp.isfinite(m)))
    print("KERNEL_OK")
</pallas_src>

<mosaic_0001>
module attributes {stable_mosaic.version = 11 : i64} {
  func.func @_masked_linear_kernel(%arg0: i32, %arg1: memref<2xi32, #tpu.memory_space<smem>>, %arg2: memref<1x16x768xf32, #tpu.memory_space<vmem>>, %arg3: memref<768x64xbf16, #tpu.memory_space<vmem>>, %arg4: memref<1x64xf32, #tpu.memory_space<vmem>>, %arg5: memref<1x16x64xf32, #tpu.memory_space<vmem>>) attributes {dimension_semantics = [#tpu.dimension_semantics<parallel>], iteration_bounds = array<i64: 2>, scalar_prefetch = 1 : i64, scratch_operands = 0 : i64, tpu.core_type = #tpu.core_type<tc>, window_params = [{transform_indices = @transform_0, window_bounds = array<i64: 1, 16, 768>}, {pipeline_mode = #tpu.pipeline_mode<synchronous>, transform_indices = @transform_1, window_bounds = array<i64: 768, 64>}, {pipeline_mode = #tpu.pipeline_mode<synchronous>, transform_indices = @transform_2, window_bounds = array<i64: 1, 64>}, {transform_indices = @transform_3, window_bounds = array<i64: 1, 16, 64>}]} {
    %0 = arith.index_cast %arg0 : i32 to index
    %1 = memref.load %arg1[%0] : memref<2xi32, #tpu.memory_space<smem>>
    %c0 = arith.constant 0 : index
    %c0_0 = arith.constant 0 : index
    %c0_1 = arith.constant 0 : index
    %2 = vector.load %arg2[%c0, %c0_0, %c0_1] : memref<1x16x768xf32, #tpu.memory_space<vmem>>, vector<1x16x768xf32>
    %3 = vector.shape_cast %2 : vector<1x16x768xf32> to vector<16x768xf32>
    %4 = tpu.iota {dimensions = array<i32: 0>} : vector<16x1xi32>
    %5 = vector.broadcast %1 : i32 to vector<16x1xi32>
    %6 = arith.cmpi slt, %4, %5 : vector<16x1xi32>
    %cst = arith.constant 0.000000e+00 : f32
    %7 = vector.shape_cast %6 : vector<16x1xi1> to vector<16x1xi1>
    %8 = vector.broadcast %7 : vector<16x1xi1> to vector<16x768xi1>
    %9 = vector.broadcast %cst : f32 to vector<16x768xf32>
    %10 = arith.select %8, %3, %9 : vector<16x768xi1>, vector<16x768xf32>
    %11 = arith.truncf %10 : vector<16x768xf32> to vector<16x768xbf16>
    %c0_2 = arith.constant 0 : index
    %c0_3 = arith.constant 0 : index
    %12 = vector.load %arg3[%c0_2, %c0_3] : memref<768x64xbf16, #tpu.memory_space<vmem>>, vector<768x64xbf16>
    %cst_4 = arith.constant dense<0.000000e+00> : vector<16x64xf32>
    %13 = tpu.matmul %11, %12, %cst_4 {dimension_numbers = #tpu.dot_dimension_numbers<[1], [0], [0], [1], [0, 0, 1, 1], [], []>} : vector<16x768xbf16>, vector<768x64xbf16>, vector<16x64xf32> -> vector<16x64xf32>
    %c0_5 = arith.constant 0 : index
    %c0_6 = arith.constant 0 : index
    %14 = vector.load %arg4[%c0_5, %c0_6] : memref<1x64xf32, #tpu.memory_space<vmem>>, vector<1x64xf32>
    %15 = vector.broadcast %14 : vector<1x64xf32> to vector<16x64xf32>
    %16 = arith.addf %13, %15 : vector<16x64xf32>
    %cst_7 = arith.constant 0.000000e+00 : f32
    %17 = vector.shape_cast %6 : vector<16x1xi1> to vector<16x1xi1>
    %18 = vector.broadcast %17 : vector<16x1xi1> to vector<16x64xi1>
    %19 = vector.broadcast %cst_7 : f32 to vector<16x64xf32>
    %20 = arith.select %18, %16, %19 : vector<16x64xi1>, vector<16x64xf32>
    %c0_8 = arith.constant 0 : index
    %c0_9 = arith.constant 0 : index
    %c0_10 = arith.constant 0 : index
    %21 = vector.load %arg5[%c0_8, %c0_9, %c0_10] : memref<1x16x64xf32, #tpu.memory_space<vmem>>, vector<1x16x64xf32>
    %22 = vector.shape_cast %21 : vector<1x16x64xf32> to vector<16x64xf32>
    %23 = vector.shape_cast %20 : vector<16x64xf32> to vector<1x16x64xf32>
    tpu.vector_store %arg5[%c0_8, %c0_9, %c0_10], %23 {strides = array<i32>} : memref<1x16x64xf32, #tpu.memory_space<vmem>>, vector<1x16x64xf32>,
    return
  }
  func.func @transform_0(%arg0: i32, %arg1: memref<2xi32, #tpu.memory_space<smem>>) -> (i32, i32, i32) {
    %c0_i32 = arith.constant 0 : i32
    %c0_i32_0 = arith.constant 0 : i32
    %c0_i32_1 = arith.constant 0 : i32
    return %arg0, %c0_i32, %c0_i32_0 : i32, i32, i32
  }
  func.func @transform_1(%arg0: i32, %arg1: memref<2xi32, #tpu.memory_space<smem>>) -> (i32, i32) {
    %c0_i32 = arith.constant 0 : i32
    %c0_i32_0 = arith.constant 0 : i32
    %c0_i32_1 = arith.constant 0 : i32
    return %c0_i32, %c0_i32_0 : i32, i32
  }
  func.func @transform_2(%arg0: i32, %arg1: memref<2xi32, #tpu.memory_space<smem>>) -> (i32, i32) {
    %c0_i32 = arith.constant 0 : i32
    %c0_i32_0 = arith.constant 0 : i32
    %c0_i32_1 = arith.constant 0 : i32
    return %c0_i32, %c0_i32_0 : i32, i32
  }
  func.func @transform_3(%arg0: i32, %arg1: memref<2xi32, #tpu.memory_space<smem>>) -> (i32, i32, i32) {
    %c0_i32 = arith.constant 0 : i32
    %c0_i32_0 = arith.constant 0 : i32
    %c0_i32_1 = arith.constant 0 : i32
    return %arg0, %c0_i32, %c0_i32_0 : i32, i32, i32
  }
}

module attributes {stable_mosaic.version = 11 : i64} {
  func.func @_encoder_layer_kernel(%arg0: i32, %arg1: memref<2xi32, #tpu.memory_space<smem>>, %arg2: memref<1x8x64xf32, #tpu.memory_space<vmem>>, %arg3: memref<3x64x64xbf16, #tpu.memory_space<vmem>>, %arg4: memref<3x1x64xf32, #tpu.memory_space<vmem>>, %arg5: memref<64x64xbf16, #tpu.memory_space<vmem>>, %arg6: memref<1x64xf32, #tpu.memory_space<vmem>>, %arg7: memref<1x64xf32, #tpu.memory_space<vmem>>, %arg8: memref<1x64xf32, #tpu.memory_space<vmem>>, %arg9: memref<3x64x128xbf16, #tpu.memory_space<vmem>>, %arg10: memref<1x128xf32, #tpu.memory_space<vmem>>, %arg11: memref<3x128x64xbf16, #tpu.memory_space<vmem>>, %arg12: memref<1x64xf32, #tpu.memory_space<vmem>>, %arg13: memref<1x64xf32, #tpu.memory_space<vmem>>, %arg14: memref<1x64xf32, #tpu.memory_space<vmem>>, %arg15: memref<1x8x64xf32, #tpu.memory_space<vmem>>) attributes {dimension_semantics = [#tpu.dimension_semantics<parallel>], iteration_bounds = array<i64: 2>, scalar_prefetch = 1 : i64, scratch_operands = 0 : i64, tpu.core_type = #tpu.core_type<tc>, window_params = [{transform_indices = @transform_0, window_bounds = array<i64: 1, 8, 64>}, {pipeline_mode = #tpu.pipeline_mode<synchronous>, transform_indices = @transform_1, window_bounds = array<i64: 3, 64, 64>}, {pipeline_mode = #tpu.pipeline_mode<synchronous>, transform_indices = @transform_2, window_bounds = array<i64: 3, 1, 64>}, {pipeline_mode = #tpu.pipeline_mode<synchronous>, transform_indices = @transform_3, window_bounds = array<i64: 64, 64>}, {pipeline_mode = #tpu.pipeline_mode<synchronous>, transform_indices = @transform_4, window_bounds = array<i64: 1, 64>}, {pipeline_mode = #tpu.pipeline_mode<synchronous>, transform_indices = @transform_5, window_bounds = array<i64: 1, 64>}, {pipeline_mode = #tpu.pipeline_mode<synchronous>, transform_indices = @transform_6, window_bounds = array<i64: 1, 64>}, {pipeline_mode = #tpu.pipeline_mode<synchronous>, transform_indices = @transform_7, window_bounds = array<i64: 3, 64, 128>}, {pipeline_mode = #tpu.pipeline_mode<synchronous>, transform_indices = @transform_8, window_bounds = array<i64: 1, 128>}, {pipeline_mode = #tpu.pipeline_mode<synchronous>, transform_indices = @transform_9, window_bounds = array<i64: 3, 128, 64>}, {pipeline_mode = #tpu.pipeline_mode<synchronous>, transform_indices = @transform_10, window_bounds = array<i64: 1, 64>}, {pipeline_mode = #tpu.pipeline_mode<synchronous>, transform_indices = @transform_11, window_bounds = array<i64: 1, 64>}, {pipeline_mode = #tpu.pipeline_mode<synchronous>, transform_indices = @transform_12, window_bounds = array<i64: 1, 64>}, {transform_indices = @transform_13, window_bounds = array<i64: 1, 8, 64>}]} {
    %0 = arith.index_cast %arg0 : i32 to index
    %1 = memref.load %arg1[%0] : memref<2xi32, #tpu.memory_space<smem>>
    %c0 = arith.constant 0 : index
    %c0_0 = arith.constant 0 : index
    %c0_1 = arith.constant 0 : index
    %2 = vector.load %arg2[%c0, %c0_0, %c0_1] : memref<1x8x64xf32, #tpu.memory_space<vmem>>, vector<1x8x64xf32>
    %3 = vector.shape_cast %2 : vector<1x8x64xf32> to vector<8x64xf32>
    %4 = tpu.iota {dimensions = array<i32: 0>} : vector<8x1xi32>
    %5 = vector.broadcast %1 : i32 to vector<8x1xi32>
    %6 = arith.cmpi slt, %4, %5 : vector<8x1xi32>
    %7 = tpu.iota {dimensions = array<i32: 1>} : vector<1x8xi32>
    %8 = vector.broadcast %1 : i32 to vector<1x8xi32>
    %9 = arith.cmpi slt, %7, %8 : vector<1x8xi32>
    %c0_2 = arith.constant 0 : index
    %c0_3 = arith.constant 0 : index
    %10 = vector.load %arg5[%c0_2, %c0_3] : memref<64x64xbf16, #tpu.memory_space<vmem>>, vector<64x64xbf16>
    %c0_4 = arith.constant 0 : index
    %c0_5 = arith.constant 0 : index
    %11 = vector.load %arg6[%c0_4, %c0_5] : memref<1x64xf32, #tpu.memory_space<vmem>>, vector<1x64xf32>
    %12 = arith.truncf %3 : vector<8x64xf32> to vector<8x64xbf16>
    %13 = arith.truncf %3 : vector<8x64xf32> to vector<8x64xbf16>
    %c0_6 = arith.constant 0 : index
    %c0_7 = arith.constant 0 : index
    %c0_8 = arith.constant 0 : index
    %14 = vector.load %arg3[%c0_6, %c0_7, %c0_8] : memref<3x64x64xbf16, #tpu.memory_space<vmem>>, vector<1x64x64xbf16>
    %15 = vector.shape_cast %14 : vector<1x64x64xbf16> to vector<64x64xbf16>
    %cst = arith.constant dense<0.000000e+00> : vector<8x64xf32>
    %16 = tpu.matmul %12, %15, %cst {dimension_numbers = #tpu.dot_dimension_numbers<[1], [0], [0], [1], [0, 0, 1, 1], [], []>} : vector<8x64xbf16>, vector<64x64xbf16>, vector<8x64xf32> -> vector<8x64xf32>
    %c0_9 = arith.constant 0 : index
    %c0_10 = arith.constant 0 : index
    %c0_11 = arith.constant 0 : index
    %17 = vector.load %arg4[%c0_9, %c0_10, %c0_11] : memref<3x1x64xf32, #tpu.memory_space<vmem>>, vector<1x1x64xf32>
    %18 = vector.shape_cast %17 : vector<1x1x64xf32> to vector<1x64xf32>
    %19 = vector.broadcast %18 : vector<1x64xf32> to vector<8x64xf32>
    %20 = arith.addf %16, %19 : vector<8x64xf32>
    %c1 = arith.constant 1 : index
    %c0_12 = arith.constant 0 : index
    %c0_13 = arith.constant 0 : index
    %21 = vector.load %arg3[%c1, %c0_12, %c0_13] : memref<3x64x64xbf16, #tpu.memory_space<vmem>>, vector<1x64x64xbf16>
    %22 = vector.shape_cast %21 : vector<1x64x64xbf16> to vector<64x64xbf16>
    %cst_14 = arith.constant dense<0.000000e+00> : vector<8x64xf32>
    %23 = tpu.matmul %13, %22, %cst_14 {dimension_numbers = #tpu.dot_dimension_numbers<[1], [0], [0], [1], [0, 0, 1, 1], [], []>} : vector<8x64xbf16>, vector<64x64xbf16>, vector<8x64xf32> -> vector<8x64xf32>
    %c1_15 = arith.constant 1 : index
    %c0_16 = arith.constant 0 : index
    %c0_17 = arith.constant 0 : index
    %24 = vector.load %arg4[%c1_15, %c0_16, %c0_17] : memref<3x1x64xf32, #tpu.memory_space<vmem>>, vector<1x1x64xf32>
    %25 = vector.shape_cast %24 : vector<1x1x64xf32> to vector<1x64xf32>
    %26 = vector.broadcast %25 : vector<1x64xf32> to vector<8x64xf32>
    %27 = arith.addf %23, %26 : vector<8x64xf32>
    %c2 = arith.constant 2 : index
    %c0_18 = arith.constant 0 : index
    %c0_19 = arith.constant 0 : index
    %28 = vector.load %arg3[%c2, %c0_18, %c0_19] : memref<3x64x64xbf16, #tpu.memory_space<vmem>>, vector<1x64x64xbf16>
    %29 = vector.shape_cast %28 : vector<1x64x64xbf16> to vector<64x64xbf16>
    %cst_20 = arith.constant dense<0.000000e+00> : vector<8x64xf32>
    %30 = tpu.matmul %13, %29, %cst_20 {dimension_numbers = #tpu.dot_dimension_numbers<[1], [0], [0], [1], [0, 0, 1, 1], [], []>} : vector<8x64xbf16>, vector<64x64xbf16>, vector<8x64xf32> -> vector<8x64xf32>
    %c2_21 = arith.constant 2 : index
    %c0_22 = arith.constant 0 : index
    %c0_23 = arith.constant 0 : index
    %31 = vector.load %arg4[%c2_21, %c0_22, %c0_23] : memref<3x1x64xf32, #tpu.memory_space<vmem>>, vector<1x1x64xf32>
    %32 = vector.shape_cast %31 : vector<1x1x64xf32> to vector<1x64xf32>
    %33 = vector.broadcast %32 : vector<1x64xf32> to vector<8x64xf32>
    %34 = arith.addf %30, %33 : vector<8x64xf32>
    %35 = vector.broadcast %6 : vector<8x1xi1> to vector<8x8xi1>
    %36 = vector.broadcast %9 : vector<1x8xi1> to vector<8x8xi1>
    %37 = arith.andi %35, %36 : vector<8x8xi1>
    %38 = vector.extract_strided_slice %20 {offsets = [0, 0], sizes = [8, 32], strides = [1, 1]} : vector<8x64xf32> to vector<8x32xf32>
    %cst_24 = arith.constant 0.176776692 : f32
    %39 = vector.broadcast %cst_24 : f32 to vector<8x32xf32>
    %40 = arith.mulf %38, %39 : vector<8x32xf32>
    %41 = arith.truncf %40 : vector<8x32xf32> to vector<8x32xbf16>
    %42 = vector.extract_strided_slice %27 {offsets = [0, 0], sizes = [8, 32], strides = [1, 1]} : vector<8x64xf32> to vector<8x32xf32>
    %43 = arith.truncf %42 : vector<8x32xf32> to vector<8x32xbf16>
    %44 = vector.extract_strided_slice %34 {offsets = [0, 0], sizes = [8, 32], strides = [1, 1]} : vector<8x64xf32> to vector<8x32xf32>
    %45 = arith.truncf %44 : vector<8x32xf32> to vector<8x32xbf16>
    %cst_25 = arith.constant dense<0.000000e+00> : vector<8x8xf32>
    %46 = tpu.matmul %41, %43, %cst_25 {dimension_numbers = #tpu.dot_dimension_numbers<[1], [1], [0], [0], [0, 0, 1, 0], [], []>} : vector<8x32xbf16>, vector<8x32xbf16>, vector<8x8xf32> -> vector<8x8xf32>
    %cst_26 = arith.constant -1.000000e+04 : f32
    %47 = vector.broadcast %cst_26 : f32 to vector<8x8xf32>
    %48 = arith.select %37, %46, %47 : vector<8x8xi1>, vector<8x8xf32>
    %cst_27 = arith.constant dense<0xFF800000> : vector<8xf32>
    %49 = vector.multi_reduction <maximumf>, %48, %cst_27 [1] : vector<8x8xf32> to vector<8xf32>
    %50 = vector.shape_cast %49 : vector<8xf32> to vector<8x1xf32>
    %51 = vector.broadcast %50 : vector<8x1xf32> to vector<8x8xf32>
    %52 = arith.subf %48, %51 : vector<8x8xf32>
    %53 = math.exp %52 : vector<8x8xf32>
    %cst_28 = arith.constant dense<0.000000e+00> : vector<8xf32>
    %54 = vector.multi_reduction <add>, %53, %cst_28 [1] : vector<8x8xf32> to vector<8xf32>
    %55 = vector.shape_cast %54 : vector<8xf32> to vector<8x1xf32>
    %56 = tpu.reciprocal %55 {approx = true} : vector<8x1xf32> -> vector<8x1xf32>
    %57 = vector.broadcast %56 : vector<8x1xf32> to vector<8x8xf32>
    %58 = arith.mulf %53, %57 : vector<8x8xf32>
    %59 = arith.truncf %58 : vector<8x8xf32> to vector<8x8xbf16>
    %cst_29 = arith.constant dense<0.000000e+00> : vector<8x32xf32>
    %60 = tpu.matmul %59, %45, %cst_29 {dimension_numbers = #tpu.dot_dimension_numbers<[1], [0], [0], [1], [0, 0, 1, 1], [], []>} : vector<8x8xbf16>, vector<8x32xbf16>, vector<8x32xf32> -> vector<8x32xf32>
    %61 = vector.extract_strided_slice %20 {offsets = [0, 32], sizes = [8, 32], strides = [1, 1]} : vector<8x64xf32> to vector<8x32xf32>
    %cst_30 = arith.constant 0.176776692 : f32
    %62 = vector.broadcast %cst_30 : f32 to vector<8x32xf32>
    %63 = arith.mulf %61, %62 : vector<8x32xf32>
    %64 = arith.truncf %63 : vector<8x32xf32> to vector<8x32xbf16>
    %65 = vector.extract_strided_slice %27 {offsets = [0, 32], sizes = [8, 32], strides = [1, 1]} : vector<8x64xf32> to vector<8x32xf32>
    %66 = arith.truncf %65 : vector<8x32xf32> to vector<8x32xbf16>
    %67 = vector.extract_strided_slice %34 {offsets = [0, 32], sizes = [8, 32], strides = [1, 1]} : vector<8x64xf32> to vector<8x32xf32>
    %68 = arith.truncf %67 : vector<8x32xf32> to vector<8x32xbf16>
    %cst_31 = arith.constant dense<0.000000e+00> : vector<8x8xf32>
    %69 = tpu.matmul %64, %66, %cst_31 {dimension_numbers = #tpu.dot_dimension_numbers<[1], [1], [0], [0], [0, 0, 1, 0], [], []>} : vector<8x32xbf16>, vector<8x32xbf16>, vector<8x8xf32> -> vector<8x8xf32>
    %cst_32 = arith.constant -1.000000e+04 : f32
    %70 = vector.broadcast %cst_32 : f32 to vector<8x8xf32>
    %71 = arith.select %37, %69, %70 : vector<8x8xi1>, vector<8x8xf32>
    %cst_33 = arith.constant dense<0xFF800000> : vector<8xf32>
    %72 = vector.multi_reduction <maximumf>, %71, %cst_33 [1] : vector<8x8xf32> to vector<8xf32>
    %73 = vector.shape_cast %72 : vector<8xf32> to vector<8x1xf32>
    %74 = vector.broadcast %73 : vector<8x1xf32> to vector<8x8xf32>
    %75 = arith.subf %71, %74 : vector<8x8xf32>
    %76 = math.exp %75 : vector<8x8xf32>
    %cst_34 = arith.constant dense<0.000000e+00> : vector<8xf32>
    %77 = vector.multi_reduction <add>, %76, %cst_34 [1] : vector<8x8xf32> to vector<8xf32>
    %78 = vector.shape_cast %77 : vector<8xf32> to vector<8x1xf32>
    %79 = tpu.reciprocal %78 {approx = true} : vector<8x1xf32> -> vector<8x1xf32>
    %80 = vector.broadcast %79 : vector<8x1xf32> to vector<8x8xf32>
    %81 = arith.mulf %76, %80 : vector<8x8xf32>
    %82 = arith.truncf %81 : vector<8x8xf32> to vector<8x8xbf16>
    %cst_35 = arith.constant dense<0.000000e+00> : vector<8x32xf32>
    %83 = tpu.matmul %82, %68, %cst_35 {dimension_numbers = #tpu.dot_dimension_numbers<[1], [0], [0], [1], [0, 0, 1, 1], [], []>} : vector<8x8xbf16>, vector<8x32xbf16>, vector<8x32xf32> -> vector<8x32xf32>
    %84 = tpu.concatenate %60, %83 in 1 : vector<8x32xf32>, vector<8x32xf32> -> vector<8x64xf32>
    %85 = arith.truncf %84 : vector<8x64xf32> to vector<8x64xbf16>
    %cst_36 = arith.constant dense<0.000000e+00> : vector<8x64xf32>
    %86 = tpu.matmul %85, %10, %cst_36 {dimension_numbers = #tpu.dot_dimension_numbers<[1], [0], [0], [1], [0, 0, 1, 1], [], []>} : vector<8x64xbf16>, vector<64x64xbf16>, vector<8x64xf32> -> vector<8x64xf32>
    %87 = vector.broadcast %11 : vector<1x64xf32> to vector<8x64xf32>
    %88 = arith.addf %86, %87 : vector<8x64xf32>
    %89 = arith.addf %3, %88 : vector<8x64xf32>
    %c0_37 = arith.constant 0 : index
    %c0_38 = arith.constant 0 : index
    %90 = vector.load %arg7[%c0_37, %c0_38] : memref<1x64xf32, #tpu.memory_space<vmem>>, vector<1x64xf32>
    %c0_39 = arith.constant 0 : index
    %c0_40 = arith.constant 0 : index
    %91 = vector.load %arg8[%c0_39, %c0_40] : memref<1x64xf32, #tpu.memory_space<vmem>>, vector<1x64xf32>
    %cst_41 = arith.constant dense<0.000000e+00> : vector<8xf32>
    %92 = vector.multi_reduction <add>, %89, %cst_41 [1] : vector<8x64xf32> to vector<8xf32>
    %93 = vector.shape_cast %92 : vector<8xf32> to vector<8x1xf32>
    %cst_42 = arith.constant 6.400000e+01 : f32
    %94 = vector.broadcast %cst_42 : f32 to vector<8x1xf32>
    %95 = arith.divf %93, %94 : vector<8x1xf32>
    %96 = vector.broadcast %95 : vector<8x1xf32> to vector<8x64xf32>
    %97 = arith.subf %89, %96 : vector<8x64xf32>
    %98 = arith.mulf %97, %97 : vector<8x64xf32>
    %cst_43 = arith.constant dense<0.000000e+00> : vector<8xf32>
    %99 = vector.multi_reduction <add>, %98, %cst_43 [1] : vector<8x64xf32> to vector<8xf32>
    %100 = vector.shape_cast %99 : vector<8xf32> to vector<8x1xf32>
    %cst_44 = arith.constant 6.400000e+01 : f32
    %101 = vector.broadcast %cst_44 : f32 to vector<8x1xf32>
    %102 = arith.divf %100, %101 : vector<8x1xf32>
    %cst_45 = arith.constant 9.99999974E-6 : f32
    %103 = vector.broadcast %cst_45 : f32 to vector<8x1xf32>
    %104 = arith.addf %102, %103 : vector<8x1xf32>
    %105 = math.rsqrt %104 : vector<8x1xf32>
    %106 = vector.broadcast %105 : vector<8x1xf32> to vector<8x64xf32>
    %107 = arith.mulf %97, %106 : vector<8x64xf32>
    %108 = vector.broadcast %90 : vector<1x64xf32> to vector<8x64xf32>
    %109 = arith.mulf %107, %108 : vector<8x64xf32>
    %110 = vector.broadcast %91 : vector<1x64xf32> to vector<8x64xf32>
    %111 = arith.addf %109, %110 : vector<8x64xf32>
    %c0_46 = arith.constant 0 : index
    %c0_47 = arith.constant 0 : index
    %112 = vector.load %arg10[%c0_46, %c0_47] : memref<1x128xf32, #tpu.memory_space<vmem>>, vector<1x128xf32>
    %c0_48 = arith.constant 0 : index
    %c0_49 = arith.constant 0 : index
    %113 = vector.load %arg12[%c0_48, %c0_49] : memref<1x64xf32, #tpu.memory_space<vmem>>, vector<1x64xf32>
    %cst_50 = arith.constant 0.000000e+00 : f32
    %114 = vector.shape_cast %6 : vector<8x1xi1> to vector<8x1xi1>
    %115 = vector.broadcast %114 : vector<8x1xi1> to vector<8x64xi1>
    %116 = vector.broadcast %cst_50 : f32 to vector<8x64xf32>
    %117 = arith.select %115, %111, %116 : vector<8x64xi1>, vector<8x64xf32>
    %cst_51 = arith.constant 0.000000e+00 : f32
    %118 = vector.broadcast %cst_51 : f32 to vector<1x64xf32>
    %119 = vector.extract_strided_slice %117 {offsets = [0, 0], sizes = [7, 64], strides = [1, 1]} : vector<8x64xf32> to vector<7x64xf32>
    %120 = tpu.concatenate %118, %119 in 0 : vector<1x64xf32>, vector<7x64xf32> -> vector<8x64xf32>
    %121 = vector.extract_strided_slice %117 {offsets = [1, 0], sizes = [7, 64], strides = [1, 1]} : vector<8x64xf32> to vector<7x64xf32>
    %122 = tpu.concatenate %121, %118 in 0 : vector<7x64xf32>, vector<1x64xf32> -> vector<8x64xf32>
    %123 = arith.truncf %120 : vector<8x64xf32> to vector<8x64xbf16>
    %c0_52 = arith.constant 0 : index
    %c0_53 = arith.constant 0 : index
    %c0_54 = arith.constant 0 : index
    %124 = vector.load %arg9[%c0_52, %c0_53, %c0_54] : memref<3x64x128xbf16, #tpu.memory_space<vmem>>, vector<1x64x128xbf16>
    %125 = vector.shape_cast %124 : vector<1x64x128xbf16> to vector<64x128xbf16>
    %cst_55 = arith.constant dense<0.000000e+00> : vector<8x128xf32>
    %126 = tpu.matmul %123, %125, %cst_55 {dimension_numbers = #tpu.dot_dimension_numbers<[1], [0], [0], [1], [0, 0, 1, 1], [], []>} : vector<8x64xbf16>, vector<64x128xbf16>, vector<8x128xf32> -> vector<8x128xf32>
    %127 = arith.truncf %117 : vector<8x64xf32> to vector<8x64xbf16>
    %c1_56 = arith.constant 1 : index
    %c0_57 = arith.constant 0 : index
    %c0_58 = arith.constant 0 : index
    %128 = vector.load %arg9[%c1_56, %c0_57, %c0_58] : memref<3x64x128xbf16, #tpu.memory_space<vmem>>, vector<1x64x128xbf16>
    %129 = vector.shape_cast %128 : vector<1x64x128xbf16> to vector<64x128xbf16>
    %cst_59 = arith.constant dense<0.000000e+00> : vector<8x128xf32>
    %130 = tpu.matmul %127, %129, %cst_59 {dimension_numbers = #tpu.dot_dimension_numbers<[1], [0], [0], [1], [0, 0, 1, 1], [], []>} : vector<8x64xbf16>, vector<64x128xbf16>, vector<8x128xf32> -> vector<8x128xf32>
    %131 = arith.addf %126, %130 : vector<8x128xf32>
    %132 = arith.truncf %122 : vector<8x64xf32> to vector<8x64xbf16>
    %c2_60 = arith.constant 2 : index
    %c0_61 = arith.constant 0 : index
    %c0_62 = arith.constant 0 : index
    %133 = vector.load %arg9[%c2_60, %c0_61, %c0_62] : memref<3x64x128xbf16, #tpu.memory_space<vmem>>, vector<1x64x128xbf16>
    %134 = vector.shape_cast %133 : vector<1x64x128xbf16> to vector<64x128xbf16>
    %cst_63 = arith.constant dense<0.000000e+00> : vector<8x128xf32>
    %135 = tpu.matmul %132, %134, %cst_63 {dimension_numbers = #tpu.dot_dimension_numbers<[1], [0], [0], [1], [0, 0, 1, 1], [], []>} : vector<8x64xbf16>, vector<64x128xbf16>, vector<8x128xf32> -> vector<8x128xf32>
    %136 = arith.addf %131, %135 : vector<8x128xf32>
    %137 = vector.broadcast %112 : vector<1x128xf32> to vector<8x128xf32>
    %138 = arith.addf %136, %137 : vector<8x128xf32>
    %cst_64 = arith.constant 0.000000e+00 : f32
    %139 = vector.broadcast %cst_64 : f32 to vector<8x128xf32>
    %140 = arith.maximumf %138, %139 : vector<8x128xf32>
    %cst_65 = arith.constant 0.000000e+00 : f32
    %141 = vector.shape_cast %6 : vector<8x1xi1> to vector<8x1xi1>
    %142 = vector.broadcast %141 : vector<8x1xi1> to vector<8x128xi1>
    %143 = vector.broadcast %cst_65 : f32 to vector<8x128xf32>
    %144 = arith.select %142, %140, %143 : vector<8x128xi1>, vector<8x128xf32>
    %cst_66 = arith.constant 0.000000e+00 : f32
    %145 = vector.broadcast %cst_66 : f32 to vector<1x128xf32>
    %146 = vector.extract_strided_slice %144 {offsets = [0, 0], sizes = [7, 128], strides = [1, 1]} : vector<8x128xf32> to vector<7x128xf32>
    %147 = tpu.concatenate %145, %146 in 0 : vector<1x128xf32>, vector<7x128xf32> -> vector<8x128xf32>
    %148 = vector.extract_strided_slice %144 {offsets = [1, 0], sizes = [7, 128], strides = [1, 1]} : vector<8x128xf32> to vector<7x128xf32>
    %149 = tpu.concatenate %148, %145 in 0 : vector<7x128xf32>, vector<1x128xf32> -> vector<8x128xf32>
    %150 = arith.truncf %147 : vector<8x128xf32> to vector<8x128xbf16>
    %c0_67 = arith.constant 0 : index
    %c0_68 = arith.constant 0 : index
    %c0_69 = arith.constant 0 : index
    %151 = vector.load %arg11[%c0_67, %c0_68, %c0_69] : memref<3x128x64xbf16, #tpu.memory_space<vmem>>, vector<1x128x64xbf16>
    %152 = vector.shape_cast %151 : vector<1x128x64xbf16> to vector<128x64xbf16>
    %cst_70 = arith.constant dense<0.000000e+00> : vector<8x64xf32>
    %153 = tpu.matmul %150, %152, %cst_70 {dimension_numbers = #tpu.dot_dimension_numbers<[1], [0], [0], [1], [0, 0, 1, 1], [], []>} : vector<8x128xbf16>, vector<128x64xbf16>, vector<8x64xf32> -> vector<8x64xf32>
    %154 = arith.truncf %144 : vector<8x128xf32> to vector<8x128xbf16>
    %c1_71 = arith.constant 1 : index
    %c0_72 = arith.constant 0 : index
    %c0_73 = arith.constant 0 : index
    %155 = vector.load %arg11[%c1_71, %c0_72, %c0_73] : memref<3x128x64xbf16, #tpu.memory_space<vmem>>, vector<1x128x64xbf16>
    %156 = vector.shape_cast %155 : vector<1x128x64xbf16> to vector<128x64xbf16>
    %cst_74 = arith.constant dense<0.000000e+00> : vector<8x64xf32>
    %157 = tpu.matmul %154, %156, %cst_74 {dimension_numbers = #tpu.dot_dimension_numbers<[1], [0], [0], [1], [0, 0, 1, 1], [], []>} : vector<8x128xbf16>, vector<128x64xbf16>, vector<8x64xf32> -> vector<8x64xf32>
    %158 = arith.addf %153, %157 : vector<8x64xf32>
    %159 = arith.truncf %149 : vector<8x128xf32> to vector<8x128xbf16>
    %c2_75 = arith.constant 2 : index
    %c0_76 = arith.constant 0 : index
    %c0_77 = arith.constant 0 : index
    %160 = vector.load %arg11[%c2_75, %c0_76, %c0_77] : memref<3x128x64xbf16, #tpu.memory_space<vmem>>, vector<1x128x64xbf16>
    %161 = vector.shape_cast %160 : vector<1x128x64xbf16> to vector<128x64xbf16>
    %cst_78 = arith.constant dense<0.000000e+00> : vector<8x64xf32>
    %162 = tpu.matmul %159, %161, %cst_78 {dimension_numbers = #tpu.dot_dimension_numbers<[1], [0], [0], [1], [0, 0, 1, 1], [], []>} : vector<8x128xbf16>, vector<128x64xbf16>, vector<8x64xf32> -> vector<8x64xf32>
    %163 = arith.addf %158, %162 : vector<8x64xf32>
    %164 = vector.broadcast %113 : vector<1x64xf32> to vector<8x64xf32>
    %165 = arith.addf %163, %164 : vector<8x64xf32>
    %cst_79 = arith.constant 0.000000e+00 : f32
    %166 = vector.shape_cast %6 : vector<8x1xi1> to vector<8x1xi1>
    %167 = vector.broadcast %166 : vector<8x1xi1> to vector<8x64xi1>
    %168 = vector.broadcast %cst_79 : f32 to vector<8x64xf32>
    %169 = arith.select %167, %165, %168 : vector<8x64xi1>, vector<8x64xf32>
    %170 = arith.addf %111, %169 : vector<8x64xf32>
    %c0_80 = arith.constant 0 : index
    %c0_81 = arith.constant 0 : index
    %171 = vector.load %arg13[%c0_80, %c0_81] : memref<1x64xf32, #tpu.memory_space<vmem>>, vector<1x64xf32>
    %c0_82 = arith.constant 0 : index
    %c0_83 = arith.constant 0 : index
    %172 = vector.load %arg14[%c0_82, %c0_83] : memref<1x64xf32, #tpu.memory_space<vmem>>, vector<1x64xf32>
    %cst_84 = arith.constant dense<0.000000e+00> : vector<8xf32>
    %173 = vector.multi_reduction <add>, %170, %cst_84 [1] : vector<8x64xf32> to vector<8xf32>
    %174 = vector.shape_cast %173 : vector<8xf32> to vector<8x1xf32>
    %cst_85 = arith.constant 6.400000e+01 : f32
    %175 = vector.broadcast %cst_85 : f32 to vector<8x1xf32>
    %176 = arith.divf %174, %175 : vector<8x1xf32>
    %177 = vector.broadcast %176 : vector<8x1xf32> to vector<8x64xf32>
    %178 = arith.subf %170, %177 : vector<8x64xf32>
    %179 = arith.mulf %178, %178 : vector<8x64xf32>
    %cst_86 = arith.constant dense<0.000000e+00> : vector<8xf32>
    %180 = vector.multi_reduction <add>, %179, %cst_86 [1] : vector<8x64xf32> to vector<8xf32>
    %181 = vector.shape_cast %180 : vector<8xf32> to vector<8x1xf32>
    %cst_87 = arith.constant 6.400000e+01 : f32
    %182 = vector.broadcast %cst_87 : f32 to vector<8x1xf32>
    %183 = arith.divf %181, %182 : vector<8x1xf32>
    %cst_88 = arith.constant 9.99999974E-6 : f32
    %184 = vector.broadcast %cst_88 : f32 to vector<8x1xf32>
    %185 = arith.addf %183, %184 : vector<8x1xf32>
    %186 = math.rsqrt %185 : vector<8x1xf32>
    %187 = vector.broadcast %186 : vector<8x1xf32> to vector<8x64xf32>
    %188 = arith.mulf %178, %187 : vector<8x64xf32>
    %189 = vector.broadcast %171 : vector<1x64xf32> to vector<8x64xf32>
    %190 = arith.mulf %188, %189 : vector<8x64xf32>
    %191 = vector.broadcast %172 : vector<1x64xf32> to vector<8x64xf32>
    %192 = arith.addf %190, %191 : vector<8x64xf32>
    %cst_89 = arith.constant 0.000000e+00 : f32
    %193 = vector.shape_cast %6 : vector<8x1xi1> to vector<8x1xi1>
    %194 = vector.broadcast %193 : vector<8x1xi1> to vector<8x64xi1>
    %195 = vector.broadcast %cst_89 : f32 to vector<8x64xf32>
    %196 = arith.select %194, %192, %195 : vector<8x64xi1>, vector<8x64xf32>
    %c0_90 = arith.constant 0 : index
    %c0_91 = arith.constant 0 : index
    %c0_92 = arith.constant 0 : index
    %197 = vector.load %arg15[%c0_90, %c0_91, %c0_92] : memref<1x8x64xf32, #tpu.memory_space<vmem>>, vector<1x8x64xf32>
    %198 = vector.shape_cast %197 : vector<1x8x64xf32> to vector<8x64xf32>
    %199 = vector.shape_cast %196 : vector<8x64xf32> to vector<1x8x64xf32>
    tpu.vector_store %arg15[%c0_90, %c0_91, %c0_92], %199 {strides = array<i32>} : memref<1x8x64xf32, #tpu.memory_space<vmem>>, vector<1x8x64xf32>,
    return
  }
  func.func @transform_0(%arg0: i32, %arg1: memref<2xi32, #tpu.memory_space<smem>>) -> (i32, i32, i32) {
    %c0_i32 = arith.constant 0 : i32
    %c0_i32_0 = arith.constant 0 : i32
    %c0_i32_1 = arith.constant 0 : i32
    return %arg0, %c0_i32, %c0_i32_0 : i32, i32, i32
  }
  func.func @transform_1(%arg0: i32, %arg1: memref<2xi32, #tpu.memory_space<smem>>) -> (i32, i32, i32) {
    %c0_i32 = arith.constant 0 : i32
    %c0_i32_0 = arith.constant 0 : i32
    %c0_i32_1 = arith.constant 0 : i32
    %c0_i32_2 = arith.constant 0 : i32
    return %c0_i32, %c0_i32_0, %c0_i32_1 : i32, i32, i32
  }
  func.func @transform_2(%arg0: i32, %arg1: memref<2xi32, #tpu.memory_space<smem>>) -> (i32, i32, i32) {
    %c0_i32 = arith.constant 0 : i32
    %c0_i32_0 = arith.constant 0 : i32
    %c0_i32_1 = arith.constant 0 : i32
    %c0_i32_2 = arith.constant 0 : i32
    return %c0_i32, %c0_i32_0, %c0_i32_1 : i32, i32, i32
  }
  func.func @transform_3(%arg0: i32, %arg1: memref<2xi32, #tpu.memory_space<smem>>) -> (i32, i32) {
    %c0_i32 = arith.constant 0 : i32
    %c0_i32_0 = arith.constant 0 : i32
    %c0_i32_1 = arith.constant 0 : i32
    return %c0_i32, %c0_i32_0 : i32, i32
  }
  func.func @transform_4(%arg0: i32, %arg1: memref<2xi32, #tpu.memory_space<smem>>) -> (i32, i32) {
    %c0_i32 = arith.constant 0 : i32
    %c0_i32_0 = arith.constant 0 : i32
    %c0_i32_1 = arith.constant 0 : i32
    return %c0_i32, %c0_i32_0 : i32, i32
  }
  func.func @transform_5(%arg0: i32, %arg1: memref<2xi32, #tpu.memory_space<smem>>) -> (i32, i32) {
    %c0_i32 = arith.constant 0 : i32
    %c0_i32_0 = arith.constant 0 : i32
    %c0_i32_1 = arith.constant 0 : i32
    return %c0_i32, %c0_i32_0 : i32, i32
  }
  func.func @transform_6(%arg0: i32, %arg1: memref<2xi32, #tpu.memory_space<smem>>) -> (i32, i32) {
    %c0_i32 = arith.constant 0 : i32
    %c0_i32_0 = arith.constant 0 : i32
    %c0_i32_1 = arith.constant 0 : i32
    return %c0_i32, %c0_i32_0 : i32, i32
  }
  func.func @transform_7(%arg0: i32, %arg1: memref<2xi32, #tpu.memory_space<smem>>) -> (i32, i32, i32) {
    %c0_i32 = arith.constant 0 : i32
    %c0_i32_0 = arith.constant 0 : i32
    %c0_i32_1 = arith.constant 0 : i32
    %c0_i32_2 = arith.constant 0 : i32
    return %c0_i32, %c0_i32_0, %c0_i32_1 : i32, i32, i32
  }
  func.func @transform_8(%arg0: i32, %arg1: memref<2xi32, #tpu.memory_space<smem>>) -> (i32, i32) {
    %c0_i32 = arith.constant 0 : i32
    %c0_i32_0 = arith.constant 0 : i32
    %c0_i32_1 = arith.constant 0 : i32
    return %c0_i32, %c0_i32_0 : i32, i32
  }
  func.func @transform_9(%arg0: i32, %arg1: memref<2xi32, #tpu.memory_space<smem>>) -> (i32, i32, i32) {
    %c0_i32 = arith.constant 0 : i32
    %c0_i32_0 = arith.constant 0 : i32
    %c0_i32_1 = arith.constant 0 : i32
    %c0_i32_2 = arith.constant 0 : i32
    return %c0_i32, %c0_i32_0, %c0_i32_1 : i32, i32, i32
  }
  func.func @transform_10(%arg0: i32, %arg1: memref<2xi32, #tpu.memory_space<smem>>) -> (i32, i32) {
    %c0_i32 = arith.constant 0 : i32
    %c0_i32_0 = arith.constant 0 : i32
    %c0_i32_1 = arith.constant 0 : i32
    return %c0_i32, %c0_i32_0 : i32, i32
  }
  func.func @transform_11(%arg0: i32, %arg1: memref<2xi32, #tpu.memory_space<smem>>) -> (i32, i32) {
    %c0_i32 = arith.constant 0 : i32
    %c0_i32_0 = arith.constant 0 : i32
    %c0_i32_1 = arith.constant 0 : i32
    return %c0_i32, %c0_i32_0 : i32, i32
  }
  func.func @transform_12(%arg0: i32, %arg1: memref<2xi32, #tpu.memory_space<smem>>) -> (i32, i32) {
    %c0_i32 = arith.constant 0 : i32
    %c0_i32_0 = arith.constant 0 : i32
    %c0_i32_1 = arith.constant 0 : i32
    return %c0_i32, %c0_i32_0 : i32, i32
  }
  func.func @transform_13(%arg0: i32, %arg1: memref<2xi32, #tpu.memory_space<smem>>) -> (i32, i32, i32) {
    %c0_i32 = arith.constant 0 : i32
    %c0_i32_0 = arith.constant 0 : i32
    %c0_i32_1 = arith.constant 0 : i32
    return %arg0, %c0_i32, %c0_i32_0 : i32, i32, i32
  }
}

module attributes {stable_mosaic.version = 11 : i64} {
  func.func @_encoder_layer_kernel(%arg0: i32, %arg1: memref<2xi32, #tpu.memory_space<smem>>, %arg2: memref<1x8x64xf32, #tpu.memory_space<vmem>>, %arg3: memref<3x64x64xbf16, #tpu.memory_space<vmem>>, %arg4: memref<3x1x64xf32, #tpu.memory_space<vmem>>, %arg5: memref<64x64xbf16, #tpu.memory_space<vmem>>, %arg6: memref<1x64xf32, #tpu.memory_space<vmem>>, %arg7: memref<1x64xf32, #tpu.memory_space<vmem>>, %arg8: memref<1x64xf32, #tpu.memory_space<vmem>>, %arg9: memref<3x64x128xbf16, #tpu.memory_space<vmem>>, %arg10: memref<1x128xf32, #tpu.memory_space<vmem>>, %arg11: memref<3x128x64xbf16, #tpu.memory_space<vmem>>, %arg12: memref<1x64xf32, #tpu.memory_space<vmem>>, %arg13: memref<1x64xf32, #tpu.memory_space<vmem>>, %arg14: memref<1x64xf32, #tpu.memory_space<vmem>>, %arg15: memref<1x8x64xf32, #tpu.memory_space<vmem>>) attributes {dimension_semantics = [#tpu.dimension_semantics<parallel>], iteration_bounds = array<i64: 2>, scalar_prefetch = 1 : i64, scratch_operands = 0 : i64, tpu.core_type = #tpu.core_type<tc>, window_params = [{transform_indices = @transform_0, window_bounds = array<i64: 1, 8, 64>}, {pipeline_mode = #tpu.pipeline_mode<synchronous>, transform_indices = @transform_1, window_bounds = array<i64: 3, 64, 64>}, {pipeline_mode = #tpu.pipeline_mode<synchronous>, transform_indices = @transform_2, window_bounds = array<i64: 3, 1, 64>}, {pipeline_mode = #tpu.pipeline_mode<synchronous>, transform_indices = @transform_3, window_bounds = array<i64: 64, 64>}, {pipeline_mode = #tpu.pipeline_mode<synchronous>, transform_indices = @transform_4, window_bounds = array<i64: 1, 64>}, {pipeline_mode = #tpu.pipeline_mode<synchronous>, transform_indices = @transform_5, window_bounds = array<i64: 1, 64>}, {pipeline_mode = #tpu.pipeline_mode<synchronous>, transform_indices = @transform_6, window_bounds = array<i64: 1, 64>}, {pipeline_mode = #tpu.pipeline_mode<synchronous>, transform_indices = @transform_7, window_bounds = array<i64: 3, 64, 128>}, {pipeline_mode = #tpu.pipeline_mode<synchronous>, transform_indices = @transform_8, window_bounds = array<i64: 1, 128>}, {pipeline_mode = #tpu.pipeline_mode<synchronous>, transform_indices = @transform_9, window_bounds = array<i64: 3, 128, 64>}, {pipeline_mode = #tpu.pipeline_mode<synchronous>, transform_indices = @transform_10, window_bounds = array<i64: 1, 64>}, {pipeline_mode = #tpu.pipeline_mode<synchronous>, transform_indices = @transform_11, window_bounds = array<i64: 1, 64>}, {pipeline_mode = #tpu.pipeline_mode<synchronous>, transform_indices = @transform_12, window_bounds = array<i64: 1, 64>}, {transform_indices = @transform_13, window_bounds = array<i64: 1, 8, 64>}]} {
    %0 = arith.index_cast %arg0 : i32 to index
    %1 = memref.load %arg1[%0] : memref<2xi32, #tpu.memory_space<smem>>
    %c0 = arith.constant 0 : index
    %c0_0 = arith.constant 0 : index
    %c0_1 = arith.constant 0 : index
    %2 = vector.load %arg2[%c0, %c0_0, %c0_1] : memref<1x8x64xf32, #tpu.memory_space<vmem>>, vector<1x8x64xf32>
    %3 = vector.shape_cast %2 : vector<1x8x64xf32> to vector<8x64xf32>
    %4 = tpu.iota {dimensions = array<i32: 0>} : vector<8x1xi32>
    %5 = vector.broadcast %1 : i32 to vector<8x1xi32>
    %6 = arith.cmpi slt, %4, %5 : vector<8x1xi32>
    %7 = tpu.iota {dimensions = array<i32: 1>} : vector<1x8xi32>
    %8 = vector.broadcast %1 : i32 to vector<1x8xi32>
    %9 = arith.cmpi slt, %7, %8 : vector<1x8xi32>
    %cst = arith.constant 0.000000e+00 : f32
    %10 = vector.shape_cast %6 : vector<8x1xi1> to vector<8x1xi1>
    %11 = vector.broadcast %10 : vector<8x1xi1> to vector<8x64xi1>
    %12 = vector.broadcast %cst : f32 to vector<8x64xf32>
    %13 = arith.select %11, %3, %12 : vector<8x64xi1>, vector<8x64xf32>
    %c0_2 = arith.constant 0 : index
    %c0_3 = arith.constant 0 : index
    %14 = vector.load %arg5[%c0_2, %c0_3] : memref<64x64xbf16, #tpu.memory_space<vmem>>, vector<64x64xbf16>
    %c0_4 = arith.constant 0 : index
    %c0_5 = arith.constant 0 : index
    %15 = vector.load %arg6[%c0_4, %c0_5] : memref<1x64xf32, #tpu.memory_space<vmem>>, vector<1x64xf32>
    %16 = arith.truncf %13 : vector<8x64xf32> to vector<8x64xbf16>
    %17 = arith.truncf %13 : vector<8x64xf32> to vector<8x64xbf16>
    %c0_6 = arith.constant 0 : index
    %c0_7 = arith.constant 0 : index
    %c0_8 = arith.constant 0 : index
    %18 = vector.load %arg3[%c0_6, %c0_7, %c0_8] : memref<3x64x64xbf16, #tpu.memory_space<vmem>>, vector<1x64x64xbf16>
    %19 = vector.shape_cast %18 : vector<1x64x64xbf16> to vector<64x64xbf16>
    %cst_9 = arith.constant dense<0.000000e+00> : vector<8x64xf32>
    %20 = tpu.matmul %16, %19, %cst_9 {dimension_numbers = #tpu.dot_dimension_numbers<[1], [0], [0], [1], [0, 0, 1, 1], [], []>} : vector<8x64xbf16>, vector<64x64xbf16>, vector<8x64xf32> -> vector<8x64xf32>
    %c0_10 = arith.constant 0 : index
    %c0_11 = arith.constant 0 : index
    %c0_12 = arith.constant 0 : index
    %21 = vector.load %arg4[%c0_10, %c0_11, %c0_12] : memref<3x1x64xf32, #tpu.memory_space<vmem>>, vector<1x1x64xf32>
    %22 = vector.shape_cast %21 : vector<1x1x64xf32> to vector<1x64xf32>
    %23 = vector.broadcast %22 : vector<1x64xf32> to vector<8x64xf32>
    %24 = arith.addf %20, %23 : vector<8x64xf32>
    %c1 = arith.constant 1 : index
    %c0_13 = arith.constant 0 : index
    %c0_14 = arith.constant 0 : index
    %25 = vector.load %arg3[%c1, %c0_13, %c0_14] : memref<3x64x64xbf16, #tpu.memory_space<vmem>>, vector<1x64x64xbf16>
    %26 = vector.shape_cast %25 : vector<1x64x64xbf16> to vector<64x64xbf16>
    %cst_15 = arith.constant dense<0.000000e+00> : vector<8x64xf32>
    %27 = tpu.matmul %17, %26, %cst_15 {dimension_numbers = #tpu.dot_dimension_numbers<[1], [0], [0], [1], [0, 0, 1, 1], [], []>} : vector<8x64xbf16>, vector<64x64xbf16>, vector<8x64xf32> -> vector<8x64xf32>
    %c1_16 = arith.constant 1 : index
    %c0_17 = arith.constant 0 : index
    %c0_18 = arith.constant 0 : index
    %28 = vector.load %arg4[%c1_16, %c0_17, %c0_18] : memref<3x1x64xf32, #tpu.memory_space<vmem>>, vector<1x1x64xf32>
    %29 = vector.shape_cast %28 : vector<1x1x64xf32> to vector<1x64xf32>
    %30 = vector.broadcast %29 : vector<1x64xf32> to vector<8x64xf32>
    %31 = arith.addf %27, %30 : vector<8x64xf32>
    %c2 = arith.constant 2 : index
    %c0_19 = arith.constant 0 : index
    %c0_20 = arith.constant 0 : index
    %32 = vector.load %arg3[%c2, %c0_19, %c0_20] : memref<3x64x64xbf16, #tpu.memory_space<vmem>>, vector<1x64x64xbf16>
    %33 = vector.shape_cast %32 : vector<1x64x64xbf16> to vector<64x64xbf16>
    %cst_21 = arith.constant dense<0.000000e+00> : vector<8x64xf32>
    %34 = tpu.matmul %17, %33, %cst_21 {dimension_numbers = #tpu.dot_dimension_numbers<[1], [0], [0], [1], [0, 0, 1, 1], [], []>} : vector<8x64xbf16>, vector<64x64xbf16>, vector<8x64xf32> -> vector<8x64xf32>
    %c2_22 = arith.constant 2 : index
    %c0_23 = arith.constant 0 : index
    %c0_24 = arith.constant 0 : index
    %35 = vector.load %arg4[%c2_22, %c0_23, %c0_24] : memref<3x1x64xf32, #tpu.memory_space<vmem>>, vector<1x1x64xf32>
    %36 = vector.shape_cast %35 : vector<1x1x64xf32> to vector<1x64xf32>
    %37 = vector.broadcast %36 : vector<1x64xf32> to vector<8x64xf32>
    %38 = arith.addf %34, %37 : vector<8x64xf32>
    %39 = vector.broadcast %6 : vector<8x1xi1> to vector<8x8xi1>
    %40 = vector.broadcast %9 : vector<1x8xi1> to vector<8x8xi1>
    %41 = arith.andi %39, %40 : vector<8x8xi1>
    %42 = vector.extract_strided_slice %24 {offsets = [0, 0], sizes = [8, 32], strides = [1, 1]} : vector<8x64xf32> to vector<8x32xf32>
    %cst_25 = arith.constant 0.176776692 : f32
    %43 = vector.broadcast %cst_25 : f32 to vector<8x32xf32>
    %44 = arith.mulf %42, %43 : vector<8x32xf32>
    %45 = arith.truncf %44 : vector<8x32xf32> to vector<8x32xbf16>
    %46 = vector.extract_strided_slice %31 {offsets = [0, 0], sizes = [8, 32], strides = [1, 1]} : vector<8x64xf32> to vector<8x32xf32>
    %47 = arith.truncf %46 : vector<8x32xf32> to vector<8x32xbf16>
    %48 = vector.extract_strided_slice %38 {offsets = [0, 0], sizes = [8, 32], strides = [1, 1]} : vector<8x64xf32> to vector<8x32xf32>
    %49 = arith.truncf %48 : vector<8x32xf32> to vector<8x32xbf16>
    %cst_26 = arith.constant dense<0.000000e+00> : vector<8x8xf32>
    %50 = tpu.matmul %45, %47, %cst_26 {dimension_numbers = #tpu.dot_dimension_numbers<[1], [1], [0], [0], [0, 0, 1, 0], [], []>} : vector<8x32xbf16>, vector<8x32xbf16>, vector<8x8xf32> -> vector<8x8xf32>
    %cst_27 = arith.constant -1.000000e+04 : f32
    %51 = vector.broadcast %cst_27 : f32 to vector<8x8xf32>
    %52 = arith.select %41, %50, %51 : vector<8x8xi1>, vector<8x8xf32>
    %cst_28 = arith.constant dense<0xFF800000> : vector<8xf32>
    %53 = vector.multi_reduction <maximumf>, %52, %cst_28 [1] : vector<8x8xf32> to vector<8xf32>
    %54 = vector.shape_cast %53 : vector<8xf32> to vector<8x1xf32>
    %55 = vector.broadcast %54 : vector<8x1xf32> to vector<8x8xf32>
    %56 = arith.subf %52, %55 : vector<8x8xf32>
    %57 = math.exp %56 : vector<8x8xf32>
    %cst_29 = arith.constant dense<0.000000e+00> : vector<8xf32>
    %58 = vector.multi_reduction <add>, %57, %cst_29 [1] : vector<8x8xf32> to vector<8xf32>
    %59 = vector.shape_cast %58 : vector<8xf32> to vector<8x1xf32>
    %60 = tpu.reciprocal %59 {approx = true} : vector<8x1xf32> -> vector<8x1xf32>
    %61 = vector.broadcast %60 : vector<8x1xf32> to vector<8x8xf32>
    %62 = arith.mulf %57, %61 : vector<8x8xf32>
    %63 = arith.truncf %62 : vector<8x8xf32> to vector<8x8xbf16>
    %cst_30 = arith.constant dense<0.000000e+00> : vector<8x32xf32>
    %64 = tpu.matmul %63, %49, %cst_30 {dimension_numbers = #tpu.dot_dimension_numbers<[1], [0], [0], [1], [0, 0, 1, 1], [], []>} : vector<8x8xbf16>, vector<8x32xbf16>, vector<8x32xf32> -> vector<8x32xf32>
    %65 = vector.extract_strided_slice %24 {offsets = [0, 32], sizes = [8, 32], strides = [1, 1]} : vector<8x64xf32> to vector<8x32xf32>
    %cst_31 = arith.constant 0.176776692 : f32
    %66 = vector.broadcast %cst_31 : f32 to vector<8x32xf32>
    %67 = arith.mulf %65, %66 : vector<8x32xf32>
    %68 = arith.truncf %67 : vector<8x32xf32> to vector<8x32xbf16>
    %69 = vector.extract_strided_slice %31 {offsets = [0, 32], sizes = [8, 32], strides = [1, 1]} : vector<8x64xf32> to vector<8x32xf32>
    %70 = arith.truncf %69 : vector<8x32xf32> to vector<8x32xbf16>
    %71 = vector.extract_strided_slice %38 {offsets = [0, 32], sizes = [8, 32], strides = [1, 1]} : vector<8x64xf32> to vector<8x32xf32>
    %72 = arith.truncf %71 : vector<8x32xf32> to vector<8x32xbf16>
    %cst_32 = arith.constant dense<0.000000e+00> : vector<8x8xf32>
    %73 = tpu.matmul %68, %70, %cst_32 {dimension_numbers = #tpu.dot_dimension_numbers<[1], [1], [0], [0], [0, 0, 1, 0], [], []>} : vector<8x32xbf16>, vector<8x32xbf16>, vector<8x8xf32> -> vector<8x8xf32>
    %cst_33 = arith.constant -1.000000e+04 : f32
    %74 = vector.broadcast %cst_33 : f32 to vector<8x8xf32>
    %75 = arith.select %41, %73, %74 : vector<8x8xi1>, vector<8x8xf32>
    %cst_34 = arith.constant dense<0xFF800000> : vector<8xf32>
    %76 = vector.multi_reduction <maximumf>, %75, %cst_34 [1] : vector<8x8xf32> to vector<8xf32>
    %77 = vector.shape_cast %76 : vector<8xf32> to vector<8x1xf32>
    %78 = vector.broadcast %77 : vector<8x1xf32> to vector<8x8xf32>
    %79 = arith.subf %75, %78 : vector<8x8xf32>
    %80 = math.exp %79 : vector<8x8xf32>
    %cst_35 = arith.constant dense<0.000000e+00> : vector<8xf32>
    %81 = vector.multi_reduction <add>, %80, %cst_35 [1] : vector<8x8xf32> to vector<8xf32>
    %82 = vector.shape_cast %81 : vector<8xf32> to vector<8x1xf32>
    %83 = tpu.reciprocal %82 {approx = true} : vector<8x1xf32> -> vector<8x1xf32>
    %84 = vector.broadcast %83 : vector<8x1xf32> to vector<8x8xf32>
    %85 = arith.mulf %80, %84 : vector<8x8xf32>
    %86 = arith.truncf %85 : vector<8x8xf32> to vector<8x8xbf16>
    %cst_36 = arith.constant dense<0.000000e+00> : vector<8x32xf32>
    %87 = tpu.matmul %86, %72, %cst_36 {dimension_numbers = #tpu.dot_dimension_numbers<[1], [0], [0], [1], [0, 0, 1, 1], [], []>} : vector<8x8xbf16>, vector<8x32xbf16>, vector<8x32xf32> -> vector<8x32xf32>
    %88 = tpu.concatenate %64, %87 in 1 : vector<8x32xf32>, vector<8x32xf32> -> vector<8x64xf32>
    %89 = arith.truncf %88 : vector<8x64xf32> to vector<8x64xbf16>
    %cst_37 = arith.constant dense<0.000000e+00> : vector<8x64xf32>
    %90 = tpu.matmul %89, %14, %cst_37 {dimension_numbers = #tpu.dot_dimension_numbers<[1], [0], [0], [1], [0, 0, 1, 1], [], []>} : vector<8x64xbf16>, vector<64x64xbf16>, vector<8x64xf32> -> vector<8x64xf32>
    %91 = vector.broadcast %15 : vector<1x64xf32> to vector<8x64xf32>
    %92 = arith.addf %90, %91 : vector<8x64xf32>
    %93 = arith.addf %13, %92 : vector<8x64xf32>
    %c0_38 = arith.constant 0 : index
    %c0_39 = arith.constant 0 : index
    %94 = vector.load %arg7[%c0_38, %c0_39] : memref<1x64xf32, #tpu.memory_space<vmem>>, vector<1x64xf32>
    %c0_40 = arith.constant 0 : index
    %c0_41 = arith.constant 0 : index
    %95 = vector.load %arg8[%c0_40, %c0_41] : memref<1x64xf32, #tpu.memory_space<vmem>>, vector<1x64xf32>
    %cst_42 = arith.constant dense<0.000000e+00> : vector<8xf32>
    %96 = vector.multi_reduction <add>, %93, %cst_42 [1] : vector<8x64xf32> to vector<8xf32>
    %97 = vector.shape_cast %96 : vector<8xf32> to vector<8x1xf32>
    %cst_43 = arith.constant 6.400000e+01 : f32
    %98 = vector.broadcast %cst_43 : f32 to vector<8x1xf32>
    %99 = arith.divf %97, %98 : vector<8x1xf32>
    %100 = vector.broadcast %99 : vector<8x1xf32> to vector<8x64xf32>
    %101 = arith.subf %93, %100 : vector<8x64xf32>
    %102 = arith.mulf %101, %101 : vector<8x64xf32>
    %cst_44 = arith.constant dense<0.000000e+00> : vector<8xf32>
    %103 = vector.multi_reduction <add>, %102, %cst_44 [1] : vector<8x64xf32> to vector<8xf32>
    %104 = vector.shape_cast %103 : vector<8xf32> to vector<8x1xf32>
    %cst_45 = arith.constant 6.400000e+01 : f32
    %105 = vector.broadcast %cst_45 : f32 to vector<8x1xf32>
    %106 = arith.divf %104, %105 : vector<8x1xf32>
    %cst_46 = arith.constant 9.99999974E-6 : f32
    %107 = vector.broadcast %cst_46 : f32 to vector<8x1xf32>
    %108 = arith.addf %106, %107 : vector<8x1xf32>
    %109 = math.rsqrt %108 : vector<8x1xf32>
    %110 = vector.broadcast %109 : vector<8x1xf32> to vector<8x64xf32>
    %111 = arith.mulf %101, %110 : vector<8x64xf32>
    %112 = vector.broadcast %94 : vector<1x64xf32> to vector<8x64xf32>
    %113 = arith.mulf %111, %112 : vector<8x64xf32>
    %114 = vector.broadcast %95 : vector<1x64xf32> to vector<8x64xf32>
    %115 = arith.addf %113, %114 : vector<8x64xf32>
    %c0_47 = arith.constant 0 : index
    %c0_48 = arith.constant 0 : index
    %116 = vector.load %arg10[%c0_47, %c0_48] : memref<1x128xf32, #tpu.memory_space<vmem>>, vector<1x128xf32>
    %c0_49 = arith.constant 0 : index
    %c0_50 = arith.constant 0 : index
    %117 = vector.load %arg12[%c0_49, %c0_50] : memref<1x64xf32, #tpu.memory_space<vmem>>, vector<1x64xf32>
    %cst_51 = arith.constant 0.000000e+00 : f32
    %118 = vector.shape_cast %6 : vector<8x1xi1> to vector<8x1xi1>
    %119 = vector.broadcast %118 : vector<8x1xi1> to vector<8x64xi1>
    %120 = vector.broadcast %cst_51 : f32 to vector<8x64xf32>
    %121 = arith.select %119, %115, %120 : vector<8x64xi1>, vector<8x64xf32>
    %cst_52 = arith.constant 0.000000e+00 : f32
    %122 = vector.broadcast %cst_52 : f32 to vector<1x64xf32>
    %123 = vector.extract_strided_slice %121 {offsets = [0, 0], sizes = [7, 64], strides = [1, 1]} : vector<8x64xf32> to vector<7x64xf32>
    %124 = tpu.concatenate %122, %123 in 0 : vector<1x64xf32>, vector<7x64xf32> -> vector<8x64xf32>
    %125 = vector.extract_strided_slice %121 {offsets = [1, 0], sizes = [7, 64], strides = [1, 1]} : vector<8x64xf32> to vector<7x64xf32>
    %126 = tpu.concatenate %125, %122 in 0 : vector<7x64xf32>, vector<1x64xf32> -> vector<8x64xf32>
    %127 = arith.truncf %124 : vector<8x64xf32> to vector<8x64xbf16>
    %c0_53 = arith.constant 0 : index
    %c0_54 = arith.constant 0 : index
    %c0_55 = arith.constant 0 : index
    %128 = vector.load %arg9[%c0_53, %c0_54, %c0_55] : memref<3x64x128xbf16, #tpu.memory_space<vmem>>, vector<1x64x128xbf16>
    %129 = vector.shape_cast %128 : vector<1x64x128xbf16> to vector<64x128xbf16>
    %cst_56 = arith.constant dense<0.000000e+00> : vector<8x128xf32>
    %130 = tpu.matmul %127, %129, %cst_56 {dimension_numbers = #tpu.dot_dimension_numbers<[1], [0], [0], [1], [0, 0, 1, 1], [], []>} : vector<8x64xbf16>, vector<64x128xbf16>, vector<8x128xf32> -> vector<8x128xf32>
    %131 = arith.truncf %121 : vector<8x64xf32> to vector<8x64xbf16>
    %c1_57 = arith.constant 1 : index
    %c0_58 = arith.constant 0 : index
    %c0_59 = arith.constant 0 : index
    %132 = vector.load %arg9[%c1_57, %c0_58, %c0_59] : memref<3x64x128xbf16, #tpu.memory_space<vmem>>, vector<1x64x128xbf16>
    %133 = vector.shape_cast %132 : vector<1x64x128xbf16> to vector<64x128xbf16>
    %cst_60 = arith.constant dense<0.000000e+00> : vector<8x128xf32>
    %134 = tpu.matmul %131, %133, %cst_60 {dimension_numbers = #tpu.dot_dimension_numbers<[1], [0], [0], [1], [0, 0, 1, 1], [], []>} : vector<8x64xbf16>, vector<64x128xbf16>, vector<8x128xf32> -> vector<8x128xf32>
    %135 = arith.addf %130, %134 : vector<8x128xf32>
    %136 = arith.truncf %126 : vector<8x64xf32> to vector<8x64xbf16>
    %c2_61 = arith.constant 2 : index
    %c0_62 = arith.constant 0 : index
    %c0_63 = arith.constant 0 : index
    %137 = vector.load %arg9[%c2_61, %c0_62, %c0_63] : memref<3x64x128xbf16, #tpu.memory_space<vmem>>, vector<1x64x128xbf16>
    %138 = vector.shape_cast %137 : vector<1x64x128xbf16> to vector<64x128xbf16>
    %cst_64 = arith.constant dense<0.000000e+00> : vector<8x128xf32>
    %139 = tpu.matmul %136, %138, %cst_64 {dimension_numbers = #tpu.dot_dimension_numbers<[1], [0], [0], [1], [0, 0, 1, 1], [], []>} : vector<8x64xbf16>, vector<64x128xbf16>, vector<8x128xf32> -> vector<8x128xf32>
    %140 = arith.addf %135, %139 : vector<8x128xf32>
    %141 = vector.broadcast %116 : vector<1x128xf32> to vector<8x128xf32>
    %142 = arith.addf %140, %141 : vector<8x128xf32>
    %cst_65 = arith.constant 0.000000e+00 : f32
    %143 = vector.broadcast %cst_65 : f32 to vector<8x128xf32>
    %144 = arith.maximumf %142, %143 : vector<8x128xf32>
    %cst_66 = arith.constant 0.000000e+00 : f32
    %145 = vector.shape_cast %6 : vector<8x1xi1> to vector<8x1xi1>
    %146 = vector.broadcast %145 : vector<8x1xi1> to vector<8x128xi1>
    %147 = vector.broadcast %cst_66 : f32 to vector<8x128xf32>
    %148 = arith.select %146, %144, %147 : vector<8x128xi1>, vector<8x128xf32>
    %cst_67 = arith.constant 0.000000e+00 : f32
    %149 = vector.broadcast %cst_67 : f32 to vector<1x128xf32>
    %150 = vector.extract_strided_slice %148 {offsets = [0, 0], sizes = [7, 128], strides = [1, 1]} : vector<8x128xf32> to vector<7x128xf32>
    %151 = tpu.concatenate %149, %150 in 0 : vector<1x128xf32>, vector<7x128xf32> -> vector<8x128xf32>
    %152 = vector.extract_strided_slice %148 {offsets = [1, 0], sizes = [7, 128], strides = [1, 1]} : vector<8x128xf32> to vector<7x128xf32>
    %153 = tpu.concatenate %152, %149 in 0 : vector<7x128xf32>, vector<1x128xf32> -> vector<8x128xf32>
    %154 = arith.truncf %151 : vector<8x128xf32> to vector<8x128xbf16>
    %c0_68 = arith.constant 0 : index
    %c0_69 = arith.constant 0 : index
    %c0_70 = arith.constant 0 : index
    %155 = vector.load %arg11[%c0_68, %c0_69, %c0_70] : memref<3x128x64xbf16, #tpu.memory_space<vmem>>, vector<1x128x64xbf16>
    %156 = vector.shape_cast %155 : vector<1x128x64xbf16> to vector<128x64xbf16>
    %cst_71 = arith.constant dense<0.000000e+00> : vector<8x64xf32>
    %157 = tpu.matmul %154, %156, %cst_71 {dimension_numbers = #tpu.dot_dimension_numbers<[1], [0], [0], [1], [0, 0, 1, 1], [], []>} : vector<8x128xbf16>, vector<128x64xbf16>, vector<8x64xf32> -> vector<8x64xf32>
    %158 = arith.truncf %148 : vector<8x128xf32> to vector<8x128xbf16>
    %c1_72 = arith.constant 1 : index
    %c0_73 = arith.constant 0 : index
    %c0_74 = arith.constant 0 : index
    %159 = vector.load %arg11[%c1_72, %c0_73, %c0_74] : memref<3x128x64xbf16, #tpu.memory_space<vmem>>, vector<1x128x64xbf16>
    %160 = vector.shape_cast %159 : vector<1x128x64xbf16> to vector<128x64xbf16>
    %cst_75 = arith.constant dense<0.000000e+00> : vector<8x64xf32>
    %161 = tpu.matmul %158, %160, %cst_75 {dimension_numbers = #tpu.dot_dimension_numbers<[1], [0], [0], [1], [0, 0, 1, 1], [], []>} : vector<8x128xbf16>, vector<128x64xbf16>, vector<8x64xf32> -> vector<8x64xf32>
    %162 = arith.addf %157, %161 : vector<8x64xf32>
    %163 = arith.truncf %153 : vector<8x128xf32> to vector<8x128xbf16>
    %c2_76 = arith.constant 2 : index
    %c0_77 = arith.constant 0 : index
    %c0_78 = arith.constant 0 : index
    %164 = vector.load %arg11[%c2_76, %c0_77, %c0_78] : memref<3x128x64xbf16, #tpu.memory_space<vmem>>, vector<1x128x64xbf16>
    %165 = vector.shape_cast %164 : vector<1x128x64xbf16> to vector<128x64xbf16>
    %cst_79 = arith.constant dense<0.000000e+00> : vector<8x64xf32>
    %166 = tpu.matmul %163, %165, %cst_79 {dimension_numbers = #tpu.dot_dimension_numbers<[1], [0], [0], [1], [0, 0, 1, 1], [], []>} : vector<8x128xbf16>, vector<128x64xbf16>, vector<8x64xf32> -> vector<8x64xf32>
    %167 = arith.addf %162, %166 : vector<8x64xf32>
    %168 = vector.broadcast %117 : vector<1x64xf32> to vector<8x64xf32>
    %169 = arith.addf %167, %168 : vector<8x64xf32>
    %cst_80 = arith.constant 0.000000e+00 : f32
    %170 = vector.shape_cast %6 : vector<8x1xi1> to vector<8x1xi1>
    %171 = vector.broadcast %170 : vector<8x1xi1> to vector<8x64xi1>
    %172 = vector.broadcast %cst_80 : f32 to vector<8x64xf32>
    %173 = arith.select %171, %169, %172 : vector<8x64xi1>, vector<8x64xf32>
    %174 = arith.addf %115, %173 : vector<8x64xf32>
    %c0_81 = arith.constant 0 : index
    %c0_82 = arith.constant 0 : index
    %175 = vector.load %arg13[%c0_81, %c0_82] : memref<1x64xf32, #tpu.memory_space<vmem>>, vector<1x64xf32>
    %c0_83 = arith.constant 0 : index
    %c0_84 = arith.constant 0 : index
    %176 = vector.load %arg14[%c0_83, %c0_84] : memref<1x64xf32, #tpu.memory_space<vmem>>, vector<1x64xf32>
    %cst_85 = arith.constant dense<0.000000e+00> : vector<8xf32>
    %177 = vector.multi_reduction <add>, %174, %cst_85 [1] : vector<8x64xf32> to vector<8xf32>
    %178 = vector.shape_cast %177 : vector<8xf32> to vector<8x1xf32>
    %cst_86 = arith.constant 6.400000e+01 : f32
    %179 = vector.broadcast %cst_86 : f32 to vector<8x1xf32>
    %180 = arith.divf %178, %179 : vector<8x1xf32>
    %181 = vector.broadcast %180 : vector<8x1xf32> to vector<8x64xf32>
    %182 = arith.subf %174, %181 : vector<8x64xf32>
    %183 = arith.mulf %182, %182 : vector<8x64xf32>
    %cst_87 = arith.constant dense<0.000000e+00> : vector<8xf32>
    %184 = vector.multi_reduction <add>, %183, %cst_87 [1] : vector<8x64xf32> to vector<8xf32>
    %185 = vector.shape_cast %184 : vector<8xf32> to vector<8x1xf32>
    %cst_88 = arith.constant 6.400000e+01 : f32
    %186 = vector.broadcast %cst_88 : f32 to vector<8x1xf32>
    %187 = arith.divf %185, %186 : vector<8x1xf32>
    %cst_89 = arith.constant 9.99999974E-6 : f32
    %188 = vector.broadcast %cst_89 : f32 to vector<8x1xf32>
    %189 = arith.addf %187, %188 : vector<8x1xf32>
    %190 = math.rsqrt %189 : vector<8x1xf32>
    %191 = vector.broadcast %190 : vector<8x1xf32> to vector<8x64xf32>
    %192 = arith.mulf %182, %191 : vector<8x64xf32>
    %193 = vector.broadcast %175 : vector<1x64xf32> to vector<8x64xf32>
    %194 = arith.mulf %192, %193 : vector<8x64xf32>
    %195 = vector.broadcast %176 : vector<1x64xf32> to vector<8x64xf32>
    %196 = arith.addf %194, %195 : vector<8x64xf32>
    %c0_90 = arith.constant 0 : index
    %c0_91 = arith.constant 0 : index
    %c0_92 = arith.constant 0 : index
    %197 = vector.load %arg15[%c0_90, %c0_91, %c0_92] : memref<1x8x64xf32, #tpu.memory_space<vmem>>, vector<1x8x64xf32>
    %198 = vector.shape_cast %197 : vector<1x8x64xf32> to vector<8x64xf32>
    %199 = vector.shape_cast %196 : vector<8x64xf32> to vector<1x8x64xf32>
    tpu.vector_store %arg15[%c0_90, %c0_91, %c0_92], %199 {strides = array<i32>} : memref<1x8x64xf32, #tpu.memory_space<vmem>>, vector<1x8x64xf32>,
    return
  }
  func.func @transform_0(%arg0: i32, %arg1: memref<2xi32, #tpu.memory_space<smem>>) -> (i32, i32, i32) {
    %c0_i32 = arith.constant 0 : i32
    %c0_i32_0 = arith.constant 0 : i32
    %c0_i32_1 = arith.constant 0 : i32
    return %arg0, %c0_i32, %c0_i32_0 : i32, i32, i32
  }
  func.func @transform_1(%arg0: i32, %arg1: memref<2xi32, #tpu.memory_space<smem>>) -> (i32, i32, i32) {
    %c0_i32 = arith.constant 0 : i32
    %c0_i32_0 = arith.constant 0 : i32
    %c0_i32_1 = arith.constant 0 : i32
    %c0_i32_2 = arith.constant 0 : i32
    return %c0_i32, %c0_i32_0, %c0_i32_1 : i32, i32, i32
  }
  func.func @transform_2(%arg0: i32, %arg1: memref<2xi32, #tpu.memory_space<smem>>) -> (i32, i32, i32) {
    %c0_i32 = arith.constant 0 : i32
    %c0_i32_0 = arith.constant 0 : i32
    %c0_i32_1 = arith.constant 0 : i32
    %c0_i32_2 = arith.constant 0 : i32
    return %c0_i32, %c0_i32_0, %c0_i32_1 : i32, i32, i32
  }
  func.func @transform_3(%arg0: i32, %arg1: memref<2xi32, #tpu.memory_space<smem>>) -> (i32, i32) {
    %c0_i32 = arith.constant 0 : i32
    %c0_i32_0 = arith.constant 0 : i32
    %c0_i32_1 = arith.constant 0 : i32
    return %c0_i32, %c0_i32_0 : i32, i32
  }
  func.func @transform_4(%arg0: i32, %arg1: memref<2xi32, #tpu.memory_space<smem>>) -> (i32, i32) {
    %c0_i32 = arith.constant 0 : i32
    %c0_i32_0 = arith.constant 0 : i32
    %c0_i32_1 = arith.constant 0 : i32
    return %c0_i32, %c0_i32_0 : i32, i32
  }
  func.func @transform_5(%arg0: i32, %arg1: memref<2xi32, #tpu.memory_space<smem>>) -> (i32, i32) {
    %c0_i32 = arith.constant 0 : i32
    %c0_i32_0 = arith.constant 0 : i32
    %c0_i32_1 = arith.constant 0 : i32
    return %c0_i32, %c0_i32_0 : i32, i32
  }
  func.func @transform_6(%arg0: i32, %arg1: memref<2xi32, #tpu.memory_space<smem>>) -> (i32, i32) {
    %c0_i32 = arith.constant 0 : i32
    %c0_i32_0 = arith.constant 0 : i32
    %c0_i32_1 = arith.constant 0 : i32
    return %c0_i32, %c0_i32_0 : i32, i32
  }
  func.func @transform_7(%arg0: i32, %arg1: memref<2xi32, #tpu.memory_space<smem>>) -> (i32, i32, i32) {
    %c0_i32 = arith.constant 0 : i32
    %c0_i32_0 = arith.constant 0 : i32
    %c0_i32_1 = arith.constant 0 : i32
    %c0_i32_2 = arith.constant 0 : i32
    return %c0_i32, %c0_i32_0, %c0_i32_1 : i32, i32, i32
  }
  func.func @transform_8(%arg0: i32, %arg1: memref<2xi32, #tpu.memory_space<smem>>) -> (i32, i32) {
    %c0_i32 = arith.constant 0 : i32
    %c0_i32_0 = arith.constant 0 : i32
    %c0_i32_1 = arith.constant 0 : i32
    return %c0_i32, %c0_i32_0 : i32, i32
  }
  func.func @transform_9(%arg0: i32, %arg1: memref<2xi32, #tpu.memory_space<smem>>) -> (i32, i32, i32) {
    %c0_i32 = arith.constant 0 : i32
    %c0_i32_0 = arith.constant 0 : i32
    %c0_i32_1 = arith.constant 0 : i32
    %c0_i32_2 = arith.constant 0 : i32
    return %c0_i32, %c0_i32_0, %c0_i32_1 : i32, i32, i32
  }
  func.func @transform_10(%arg0: i32, %arg1: memref<2xi32, #tpu.memory_space<smem>>) -> (i32, i32) {
    %c0_i32 = arith.constant 0 : i32
    %c0_i32_0 = arith.constant 0 : i32
    %c0_i32_1 = arith.constant 0 : i32
    return %c0_i32, %c0_i32_0 : i32, i32
  }
  func.func @transform_11(%arg0: i32, %arg1: memref<2xi32, #tpu.memory_space<smem>>) -> (i32, i32) {
    %c0_i32 = arith.constant 0 : i32
    %c0_i32_0 = arith.constant 0 : i32
    %c0_i32_1 = arith.constant 0 : i32
    return %c0_i32, %c0_i32_0 : i32, i32
  }
  func.func @transform_12(%arg0: i32, %arg1: memref<2xi32, #tpu.memory_space<smem>>) -> (i32, i32) {
    %c0_i32 = arith.constant 0 : i32
    %c0_i32_0 = arith.constant 0 : i32
    %c0_i32_1 = arith.constant 0 : i32
    return %c0_i32, %c0_i32_0 : i32, i32
  }
  func.func @transform_13(%arg0: i32, %arg1: memref<2xi32, #tpu.memory_space<smem>>) -> (i32, i32, i32) {
    %c0_i32 = arith.constant 0 : i32
    %c0_i32_0 = arith.constant 0 : i32
    %c0_i32_1 = arith.constant 0 : i32
    return %arg0, %c0_i32, %c0_i32_0 : i32, i32, i32
  }
}

module attributes {stable_mosaic.version = 11 : i64} {
  func.func @_encoder_layer_kernel(%arg0: i32, %arg1: memref<2xi32, #tpu.memory_space<smem>>, %arg2: memref<1x16x64xf32, #tpu.memory_space<vmem>>, %arg3: memref<3x64x64xbf16, #tpu.memory_space<vmem>>, %arg4: memref<3x1x64xf32, #tpu.memory_space<vmem>>, %arg5: memref<64x64xbf16, #tpu.memory_space<vmem>>, %arg6: memref<1x64xf32, #tpu.memory_space<vmem>>, %arg7: memref<1x64xf32, #tpu.memory_space<vmem>>, %arg8: memref<1x64xf32, #tpu.memory_space<vmem>>, %arg9: memref<3x64x128xbf16, #tpu.memory_space<vmem>>, %arg10: memref<1x128xf32, #tpu.memory_space<vmem>>, %arg11: memref<3x128x64xbf16, #tpu.memory_space<vmem>>, %arg12: memref<1x64xf32, #tpu.memory_space<vmem>>, %arg13: memref<1x64xf32, #tpu.memory_space<vmem>>, %arg14: memref<1x64xf32, #tpu.memory_space<vmem>>, %arg15: memref<1x16x64xf32, #tpu.memory_space<vmem>>) attributes {dimension_semantics = [#tpu.dimension_semantics<parallel>], iteration_bounds = array<i64: 2>, scalar_prefetch = 1 : i64, scratch_operands = 0 : i64, tpu.core_type = #tpu.core_type<tc>, window_params = [{transform_indices = @transform_0, window_bounds = array<i64: 1, 16, 64>}, {pipeline_mode = #tpu.pipeline_mode<synchronous>, transform_indices = @transform_1, window_bounds = array<i64: 3, 64, 64>}, {pipeline_mode = #tpu.pipeline_mode<synchronous>, transform_indices = @transform_2, window_bounds = array<i64: 3, 1, 64>}, {pipeline_mode = #tpu.pipeline_mode<synchronous>, transform_indices = @transform_3, window_bounds = array<i64: 64, 64>}, {pipeline_mode = #tpu.pipeline_mode<synchronous>, transform_indices = @transform_4, window_bounds = array<i64: 1, 64>}, {pipeline_mode = #tpu.pipeline_mode<synchronous>, transform_indices = @transform_5, window_bounds = array<i64: 1, 64>}, {pipeline_mode = #tpu.pipeline_mode<synchronous>, transform_indices = @transform_6, window_bounds = array<i64: 1, 64>}, {pipeline_mode = #tpu.pipeline_mode<synchronous>, transform_indices = @transform_7, window_bounds = array<i64: 3, 64, 128>}, {pipeline_mode = #tpu.pipeline_mode<synchronous>, transform_indices = @transform_8, window_bounds = array<i64: 1, 128>}, {pipeline_mode = #tpu.pipeline_mode<synchronous>, transform_indices = @transform_9, window_bounds = array<i64: 3, 128, 64>}, {pipeline_mode = #tpu.pipeline_mode<synchronous>, transform_indices = @transform_10, window_bounds = array<i64: 1, 64>}, {pipeline_mode = #tpu.pipeline_mode<synchronous>, transform_indices = @transform_11, window_bounds = array<i64: 1, 64>}, {pipeline_mode = #tpu.pipeline_mode<synchronous>, transform_indices = @transform_12, window_bounds = array<i64: 1, 64>}, {transform_indices = @transform_13, window_bounds = array<i64: 1, 16, 64>}]} {
    %0 = arith.index_cast %arg0 : i32 to index
    %1 = memref.load %arg1[%0] : memref<2xi32, #tpu.memory_space<smem>>
    %c0 = arith.constant 0 : index
    %c0_0 = arith.constant 0 : index
    %c0_1 = arith.constant 0 : index
    %2 = vector.load %arg2[%c0, %c0_0, %c0_1] : memref<1x16x64xf32, #tpu.memory_space<vmem>>, vector<1x16x64xf32>
    %3 = vector.shape_cast %2 : vector<1x16x64xf32> to vector<16x64xf32>
    %4 = tpu.iota {dimensions = array<i32: 0>} : vector<16x1xi32>
    %5 = vector.broadcast %1 : i32 to vector<16x1xi32>
    %6 = arith.cmpi slt, %4, %5 : vector<16x1xi32>
    %7 = tpu.iota {dimensions = array<i32: 1>} : vector<1x16xi32>
    %8 = vector.broadcast %1 : i32 to vector<1x16xi32>
    %9 = arith.cmpi slt, %7, %8 : vector<1x16xi32>
    %cst = arith.constant 0.000000e+00 : f32
    %10 = vector.shape_cast %6 : vector<16x1xi1> to vector<16x1xi1>
    %11 = vector.broadcast %10 : vector<16x1xi1> to vector<16x64xi1>
    %12 = vector.broadcast %cst : f32 to vector<16x64xf32>
    %13 = arith.select %11, %3, %12 : vector<16x64xi1>, vector<16x64xf32>
    %c0_2 = arith.constant 0 : index
    %c0_3 = arith.constant 0 : index
    %14 = vector.load %arg5[%c0_2, %c0_3] : memref<64x64xbf16, #tpu.memory_space<vmem>>, vector<64x64xbf16>
    %c0_4 = arith.constant 0 : index
    %c0_5 = arith.constant 0 : index
    %15 = vector.load %arg6[%c0_4, %c0_5] : memref<1x64xf32, #tpu.memory_space<vmem>>, vector<1x64xf32>
    %16 = arith.truncf %13 : vector<16x64xf32> to vector<16x64xbf16>
    %17 = arith.truncf %13 : vector<16x64xf32> to vector<16x64xbf16>
    %c0_6 = arith.constant 0 : index
    %c0_7 = arith.constant 0 : index
    %c0_8 = arith.constant 0 : index
    %18 = vector.load %arg3[%c0_6, %c0_7, %c0_8] : memref<3x64x64xbf16, #tpu.memory_space<vmem>>, vector<1x64x64xbf16>
    %19 = vector.shape_cast %18 : vector<1x64x64xbf16> to vector<64x64xbf16>
    %cst_9 = arith.constant dense<0.000000e+00> : vector<16x64xf32>
    %20 = tpu.matmul %16, %19, %cst_9 {dimension_numbers = #tpu.dot_dimension_numbers<[1], [0], [0], [1], [0, 0, 1, 1], [], []>} : vector<16x64xbf16>, vector<64x64xbf16>, vector<16x64xf32> -> vector<16x64xf32>
    %c0_10 = arith.constant 0 : index
    %c0_11 = arith.constant 0 : index
    %c0_12 = arith.constant 0 : index
    %21 = vector.load %arg4[%c0_10, %c0_11, %c0_12] : memref<3x1x64xf32, #tpu.memory_space<vmem>>, vector<1x1x64xf32>
    %22 = vector.shape_cast %21 : vector<1x1x64xf32> to vector<1x64xf32>
    %23 = vector.broadcast %22 : vector<1x64xf32> to vector<16x64xf32>
    %24 = arith.addf %20, %23 : vector<16x64xf32>
    %c1 = arith.constant 1 : index
    %c0_13 = arith.constant 0 : index
    %c0_14 = arith.constant 0 : index
    %25 = vector.load %arg3[%c1, %c0_13, %c0_14] : memref<3x64x64xbf16, #tpu.memory_space<vmem>>, vector<1x64x64xbf16>
    %26 = vector.shape_cast %25 : vector<1x64x64xbf16> to vector<64x64xbf16>
    %cst_15 = arith.constant dense<0.000000e+00> : vector<16x64xf32>
    %27 = tpu.matmul %17, %26, %cst_15 {dimension_numbers = #tpu.dot_dimension_numbers<[1], [0], [0], [1], [0, 0, 1, 1], [], []>} : vector<16x64xbf16>, vector<64x64xbf16>, vector<16x64xf32> -> vector<16x64xf32>
    %c1_16 = arith.constant 1 : index
    %c0_17 = arith.constant 0 : index
    %c0_18 = arith.constant 0 : index
    %28 = vector.load %arg4[%c1_16, %c0_17, %c0_18] : memref<3x1x64xf32, #tpu.memory_space<vmem>>, vector<1x1x64xf32>
    %29 = vector.shape_cast %28 : vector<1x1x64xf32> to vector<1x64xf32>
    %30 = vector.broadcast %29 : vector<1x64xf32> to vector<16x64xf32>
    %31 = arith.addf %27, %30 : vector<16x64xf32>
    %c2 = arith.constant 2 : index
    %c0_19 = arith.constant 0 : index
    %c0_20 = arith.constant 0 : index
    %32 = vector.load %arg3[%c2, %c0_19, %c0_20] : memref<3x64x64xbf16, #tpu.memory_space<vmem>>, vector<1x64x64xbf16>
    %33 = vector.shape_cast %32 : vector<1x64x64xbf16> to vector<64x64xbf16>
    %cst_21 = arith.constant dense<0.000000e+00> : vector<16x64xf32>
    %34 = tpu.matmul %17, %33, %cst_21 {dimension_numbers = #tpu.dot_dimension_numbers<[1], [0], [0], [1], [0, 0, 1, 1], [], []>} : vector<16x64xbf16>, vector<64x64xbf16>, vector<16x64xf32> -> vector<16x64xf32>
    %c2_22 = arith.constant 2 : index
    %c0_23 = arith.constant 0 : index
    %c0_24 = arith.constant 0 : index
    %35 = vector.load %arg4[%c2_22, %c0_23, %c0_24] : memref<3x1x64xf32, #tpu.memory_space<vmem>>, vector<1x1x64xf32>
    %36 = vector.shape_cast %35 : vector<1x1x64xf32> to vector<1x64xf32>
    %37 = vector.broadcast %36 : vector<1x64xf32> to vector<16x64xf32>
    %38 = arith.addf %34, %37 : vector<16x64xf32>
    %39 = vector.broadcast %6 : vector<16x1xi1> to vector<16x16xi1>
    %40 = vector.broadcast %9 : vector<1x16xi1> to vector<16x16xi1>
    %41 = arith.andi %39, %40 : vector<16x16xi1>
    %42 = vector.extract_strided_slice %24 {offsets = [0, 0], sizes = [16, 32], strides = [1, 1]} : vector<16x64xf32> to vector<16x32xf32>
    %cst_25 = arith.constant 0.176776692 : f32
    %43 = vector.broadcast %cst_25 : f32 to vector<16x32xf32>
    %44 = arith.mulf %42, %43 : vector<16x32xf32>
    %45 = arith.truncf %44 : vector<16x32xf32> to vector<16x32xbf16>
    %46 = vector.extract_strided_slice %31 {offsets = [0, 0], sizes = [16, 32], strides = [1, 1]} : vector<16x64xf32> to vector<16x32xf32>
    %47 = arith.truncf %46 : vector<16x32xf32> to vector<16x32xbf16>
    %48 = vector.extract_strided_slice %38 {offsets = [0, 0], sizes = [16, 32], strides = [1, 1]} : vector<16x64xf32> to vector<16x32xf32>
    %49 = arith.truncf %48 : vector<16x32xf32> to vector<16x32xbf16>
    %cst_26 = arith.constant dense<0.000000e+00> : vector<16x16xf32>
    %50 = tpu.matmul %45, %47, %cst_26 {dimension_numbers = #tpu.dot_dimension_numbers<[1], [1], [0], [0], [0, 0, 1, 0], [], []>} : vector<16x32xbf16>, vector<16x32xbf16>, vector<16x16xf32> -> vector<16x16xf32>
    %cst_27 = arith.constant -1.000000e+04 : f32
    %51 = vector.broadcast %cst_27 : f32 to vector<16x16xf32>
    %52 = arith.select %41, %50, %51 : vector<16x16xi1>, vector<16x16xf32>
    %cst_28 = arith.constant dense<0xFF800000> : vector<16xf32>
    %53 = vector.multi_reduction <maximumf>, %52, %cst_28 [1] : vector<16x16xf32> to vector<16xf32>
    %54 = vector.shape_cast %53 : vector<16xf32> to vector<16x1xf32>
    %55 = vector.broadcast %54 : vector<16x1xf32> to vector<16x16xf32>
    %56 = arith.subf %52, %55 : vector<16x16xf32>
    %57 = math.exp %56 : vector<16x16xf32>
    %cst_29 = arith.constant dense<0.000000e+00> : vector<16xf32>
    %58 = vector.multi_reduction <add>, %57, %cst_29 [1] : vector<16x16xf32> to vector<16xf32>
    %59 = vector.shape_cast %58 : vector<16xf32> to vector<16x1xf32>
    %60 = tpu.reciprocal %59 {approx = true} : vector<16x1xf32> -> vector<16x1xf32>
    %61 = vector.broadcast %60 : vector<16x1xf32> to vector<16x16xf32>
    %62 = arith.mulf %57, %61 : vector<16x16xf32>
    %63 = arith.truncf %62 : vector<16x16xf32> to vector<16x16xbf16>
    %cst_30 = arith.constant dense<0.000000e+00> : vector<16x32xf32>
    %64 = tpu.matmul %63, %49, %cst_30 {dimension_numbers = #tpu.dot_dimension_numbers<[1], [0], [0], [1], [0, 0, 1, 1], [], []>} : vector<16x16xbf16>, vector<16x32xbf16>, vector<16x32xf32> -> vector<16x32xf32>
    %65 = vector.extract_strided_slice %24 {offsets = [0, 32], sizes = [16, 32], strides = [1, 1]} : vector<16x64xf32> to vector<16x32xf32>
    %cst_31 = arith.constant 0.176776692 : f32
    %66 = vector.broadcast %cst_31 : f32 to vector<16x32xf32>
    %67 = arith.mulf %65, %66 : vector<16x32xf32>
    %68 = arith.truncf %67 : vector<16x32xf32> to vector<16x32xbf16>
    %69 = vector.extract_strided_slice %31 {offsets = [0, 32], sizes = [16, 32], strides = [1, 1]} : vector<16x64xf32> to vector<16x32xf32>
    %70 = arith.truncf %69 : vector<16x32xf32> to vector<16x32xbf16>
    %71 = vector.extract_strided_slice %38 {offsets = [0, 32], sizes = [16, 32], strides = [1, 1]} : vector<16x64xf32> to vector<16x32xf32>
    %72 = arith.truncf %71 : vector<16x32xf32> to vector<16x32xbf16>
    %cst_32 = arith.constant dense<0.000000e+00> : vector<16x16xf32>
    %73 = tpu.matmul %68, %70, %cst_32 {dimension_numbers = #tpu.dot_dimension_numbers<[1], [1], [0], [0], [0, 0, 1, 0], [], []>} : vector<16x32xbf16>, vector<16x32xbf16>, vector<16x16xf32> -> vector<16x16xf32>
    %cst_33 = arith.constant -1.000000e+04 : f32
    %74 = vector.broadcast %cst_33 : f32 to vector<16x16xf32>
    %75 = arith.select %41, %73, %74 : vector<16x16xi1>, vector<16x16xf32>
    %cst_34 = arith.constant dense<0xFF800000> : vector<16xf32>
    %76 = vector.multi_reduction <maximumf>, %75, %cst_34 [1] : vector<16x16xf32> to vector<16xf32>
    %77 = vector.shape_cast %76 : vector<16xf32> to vector<16x1xf32>
    %78 = vector.broadcast %77 : vector<16x1xf32> to vector<16x16xf32>
    %79 = arith.subf %75, %78 : vector<16x16xf32>
    %80 = math.exp %79 : vector<16x16xf32>
    %cst_35 = arith.constant dense<0.000000e+00> : vector<16xf32>
    %81 = vector.multi_reduction <add>, %80, %cst_35 [1] : vector<16x16xf32> to vector<16xf32>
    %82 = vector.shape_cast %81 : vector<16xf32> to vector<16x1xf32>
    %83 = tpu.reciprocal %82 {approx = true} : vector<16x1xf32> -> vector<16x1xf32>
    %84 = vector.broadcast %83 : vector<16x1xf32> to vector<16x16xf32>
    %85 = arith.mulf %80, %84 : vector<16x16xf32>
    %86 = arith.truncf %85 : vector<16x16xf32> to vector<16x16xbf16>
    %cst_36 = arith.constant dense<0.000000e+00> : vector<16x32xf32>
    %87 = tpu.matmul %86, %72, %cst_36 {dimension_numbers = #tpu.dot_dimension_numbers<[1], [0], [0], [1], [0, 0, 1, 1], [], []>} : vector<16x16xbf16>, vector<16x32xbf16>, vector<16x32xf32> -> vector<16x32xf32>
    %88 = tpu.concatenate %64, %87 in 1 : vector<16x32xf32>, vector<16x32xf32> -> vector<16x64xf32>
    %89 = arith.truncf %88 : vector<16x64xf32> to vector<16x64xbf16>
    %cst_37 = arith.constant dense<0.000000e+00> : vector<16x64xf32>
    %90 = tpu.matmul %89, %14, %cst_37 {dimension_numbers = #tpu.dot_dimension_numbers<[1], [0], [0], [1], [0, 0, 1, 1], [], []>} : vector<16x64xbf16>, vector<64x64xbf16>, vector<16x64xf32> -> vector<16x64xf32>
    %91 = vector.broadcast %15 : vector<1x64xf32> to vector<16x64xf32>
    %92 = arith.addf %90, %91 : vector<16x64xf32>
    %93 = arith.addf %13, %92 : vector<16x64xf32>
    %c0_38 = arith.constant 0 : index
    %c0_39 = arith.constant 0 : index
    %94 = vector.load %arg7[%c0_38, %c0_39] : memref<1x64xf32, #tpu.memory_space<vmem>>, vector<1x64xf32>
    %c0_40 = arith.constant 0 : index
    %c0_41 = arith.constant 0 : index
    %95 = vector.load %arg8[%c0_40, %c0_41] : memref<1x64xf32, #tpu.memory_space<vmem>>, vector<1x64xf32>
    %cst_42 = arith.constant dense<0.000000e+00> : vector<16xf32>
    %96 = vector.multi_reduction <add>, %93, %cst_42 [1] : vector<16x64xf32> to vector<16xf32>
    %97 = vector.shape_cast %96 : vector<16xf32> to vector<16x1xf32>
    %cst_43 = arith.constant 6.400000e+01 : f32
    %98 = vector.broadcast %cst_43 : f32 to vector<16x1xf32>
    %99 = arith.divf %97, %98 : vector<16x1xf32>
    %100 = vector.broadcast %99 : vector<16x1xf32> to vector<16x64xf32>
    %101 = arith.subf %93, %100 : vector<16x64xf32>
    %102 = arith.mulf %101, %101 : vector<16x64xf32>
    %cst_44 = arith.constant dense<0.000000e+00> : vector<16xf32>
    %103 = vector.multi_reduction <add>, %102, %cst_44 [1] : vector<16x64xf32> to vector<16xf32>
    %104 = vector.shape_cast %103 : vector<16xf32> to vector<16x1xf32>
    %cst_45 = arith.constant 6.400000e+01 : f32
    %105 = vector.broadcast %cst_45 : f32 to vector<16x1xf32>
    %106 = arith.divf %104, %105 : vector<16x1xf32>
    %cst_46 = arith.constant 9.99999974E-6 : f32
    %107 = vector.broadcast %cst_46 : f32 to vector<16x1xf32>
    %108 = arith.addf %106, %107 : vector<16x1xf32>
    %109 = math.rsqrt %108 : vector<16x1xf32>
    %110 = vector.broadcast %109 : vector<16x1xf32> to vector<16x64xf32>
    %111 = arith.mulf %101, %110 : vector<16x64xf32>
    %112 = vector.broadcast %94 : vector<1x64xf32> to vector<16x64xf32>
    %113 = arith.mulf %111, %112 : vector<16x64xf32>
    %114 = vector.broadcast %95 : vector<1x64xf32> to vector<16x64xf32>
    %115 = arith.addf %113, %114 : vector<16x64xf32>
    %c0_47 = arith.constant 0 : index
    %c0_48 = arith.constant 0 : index
    %116 = vector.load %arg10[%c0_47, %c0_48] : memref<1x128xf32, #tpu.memory_space<vmem>>, vector<1x128xf32>
    %c0_49 = arith.constant 0 : index
    %c0_50 = arith.constant 0 : index
    %117 = vector.load %arg12[%c0_49, %c0_50] : memref<1x64xf32, #tpu.memory_space<vmem>>, vector<1x64xf32>
    %cst_51 = arith.constant 0.000000e+00 : f32
    %118 = vector.shape_cast %6 : vector<16x1xi1> to vector<16x1xi1>
    %119 = vector.broadcast %118 : vector<16x1xi1> to vector<16x64xi1>
    %120 = vector.broadcast %cst_51 : f32 to vector<16x64xf32>
    %121 = arith.select %119, %115, %120 : vector<16x64xi1>, vector<16x64xf32>
    %cst_52 = arith.constant 0.000000e+00 : f32
    %122 = vector.broadcast %cst_52 : f32 to vector<1x64xf32>
    %123 = vector.extract_strided_slice %121 {offsets = [0, 0], sizes = [15, 64], strides = [1, 1]} : vector<16x64xf32> to vector<15x64xf32>
    %124 = tpu.concatenate %122, %123 in 0 : vector<1x64xf32>, vector<15x64xf32> -> vector<16x64xf32>
    %125 = vector.extract_strided_slice %121 {offsets = [1, 0], sizes = [15, 64], strides = [1, 1]} : vector<16x64xf32> to vector<15x64xf32>
    %126 = tpu.concatenate %125, %122 in 0 : vector<15x64xf32>, vector<1x64xf32> -> vector<16x64xf32>
    %127 = arith.truncf %124 : vector<16x64xf32> to vector<16x64xbf16>
    %c0_53 = arith.constant 0 : index
    %c0_54 = arith.constant 0 : index
    %c0_55 = arith.constant 0 : index
    %128 = vector.load %arg9[%c0_53, %c0_54, %c0_55] : memref<3x64x128xbf16, #tpu.memory_space<vmem>>, vector<1x64x128xbf16>
    %129 = vector.shape_cast %128 : vector<1x64x128xbf16> to vector<64x128xbf16>
    %cst_56 = arith.constant dense<0.000000e+00> : vector<16x128xf32>
    %130 = tpu.matmul %127, %129, %cst_56 {dimension_numbers = #tpu.dot_dimension_numbers<[1], [0], [0], [1], [0, 0, 1, 1], [], []>} : vector<16x64xbf16>, vector<64x128xbf16>, vector<16x128xf32> -> vector<16x128xf32>
    %131 = arith.truncf %121 : vector<16x64xf32> to vector<16x64xbf16>
    %c1_57 = arith.constant 1 : index
    %c0_58 = arith.constant 0 : index
    %c0_59 = arith.constant 0 : index
    %132 = vector.load %arg9[%c1_57, %c0_58, %c0_59] : memref<3x64x128xbf16, #tpu.memory_space<vmem>>, vector<1x64x128xbf16>
    %133 = vector.shape_cast %132 : vector<1x64x128xbf16> to vector<64x128xbf16>
    %cst_60 = arith.constant dense<0.000000e+00> : vector<16x128xf32>
    %134 = tpu.matmul %131, %133, %cst_60 {dimension_numbers = #tpu.dot_dimension_numbers<[1], [0], [0], [1], [0, 0, 1, 1], [], []>} : vector<16x64xbf16>, vector<64x128xbf16>, vector<16x128xf32> -> vector<16x128xf32>
    %135 = arith.addf %130, %134 : vector<16x128xf32>
    %136 = arith.truncf %126 : vector<16x64xf32> to vector<16x64xbf16>
    %c2_61 = arith.constant 2 : index
    %c0_62 = arith.constant 0 : index
    %c0_63 = arith.constant 0 : index
    %137 = vector.load %arg9[%c2_61, %c0_62, %c0_63] : memref<3x64x128xbf16, #tpu.memory_space<vmem>>, vector<1x64x128xbf16>
    %138 = vector.shape_cast %137 : vector<1x64x128xbf16> to vector<64x128xbf16>
    %cst_64 = arith.constant dense<0.000000e+00> : vector<16x128xf32>
    %139 = tpu.matmul %136, %138, %cst_64 {dimension_numbers = #tpu.dot_dimension_numbers<[1], [0], [0], [1], [0, 0, 1, 1], [], []>} : vector<16x64xbf16>, vector<64x128xbf16>, vector<16x128xf32> -> vector<16x128xf32>
    %140 = arith.addf %135, %139 : vector<16x128xf32>
    %141 = vector.broadcast %116 : vector<1x128xf32> to vector<16x128xf32>
    %142 = arith.addf %140, %141 : vector<16x128xf32>
    %cst_65 = arith.constant 0.000000e+00 : f32
    %143 = vector.broadcast %cst_65 : f32 to vector<16x128xf32>
    %144 = arith.maximumf %142, %143 : vector<16x128xf32>
    %cst_66 = arith.constant 0.000000e+00 : f32
    %145 = vector.shape_cast %6 : vector<16x1xi1> to vector<16x1xi1>
    %146 = vector.broadcast %145 : vector<16x1xi1> to vector<16x128xi1>
    %147 = vector.broadcast %cst_66 : f32 to vector<16x128xf32>
    %148 = arith.select %146, %144, %147 : vector<16x128xi1>, vector<16x128xf32>
    %cst_67 = arith.constant 0.000000e+00 : f32
    %149 = vector.broadcast %cst_67 : f32 to vector<1x128xf32>
    %150 = vector.extract_strided_slice %148 {offsets = [0, 0], sizes = [15, 128], strides = [1, 1]} : vector<16x128xf32> to vector<15x128xf32>
    %151 = tpu.concatenate %149, %150 in 0 : vector<1x128xf32>, vector<15x128xf32> -> vector<16x128xf32>
    %152 = vector.extract_strided_slice %148 {offsets = [1, 0], sizes = [15, 128], strides = [1, 1]} : vector<16x128xf32> to vector<15x128xf32>
    %153 = tpu.concatenate %152, %149 in 0 : vector<15x128xf32>, vector<1x128xf32> -> vector<16x128xf32>
    %154 = arith.truncf %151 : vector<16x128xf32> to vector<16x128xbf16>
    %c0_68 = arith.constant 0 : index
    %c0_69 = arith.constant 0 : index
    %c0_70 = arith.constant 0 : index
    %155 = vector.load %arg11[%c0_68, %c0_69, %c0_70] : memref<3x128x64xbf16, #tpu.memory_space<vmem>>, vector<1x128x64xbf16>
    %156 = vector.shape_cast %155 : vector<1x128x64xbf16> to vector<128x64xbf16>
    %cst_71 = arith.constant dense<0.000000e+00> : vector<16x64xf32>
    %157 = tpu.matmul %154, %156, %cst_71 {dimension_numbers = #tpu.dot_dimension_numbers<[1], [0], [0], [1], [0, 0, 1, 1], [], []>} : vector<16x128xbf16>, vector<128x64xbf16>, vector<16x64xf32> -> vector<16x64xf32>
    %158 = arith.truncf %148 : vector<16x128xf32> to vector<16x128xbf16>
    %c1_72 = arith.constant 1 : index
    %c0_73 = arith.constant 0 : index
    %c0_74 = arith.constant 0 : index
    %159 = vector.load %arg11[%c1_72, %c0_73, %c0_74] : memref<3x128x64xbf16, #tpu.memory_space<vmem>>, vector<1x128x64xbf16>
    %160 = vector.shape_cast %159 : vector<1x128x64xbf16> to vector<128x64xbf16>
    %cst_75 = arith.constant dense<0.000000e+00> : vector<16x64xf32>
    %161 = tpu.matmul %158, %160, %cst_75 {dimension_numbers = #tpu.dot_dimension_numbers<[1], [0], [0], [1], [0, 0, 1, 1], [], []>} : vector<16x128xbf16>, vector<128x64xbf16>, vector<16x64xf32> -> vector<16x64xf32>
    %162 = arith.addf %157, %161 : vector<16x64xf32>
    %163 = arith.truncf %153 : vector<16x128xf32> to vector<16x128xbf16>
    %c2_76 = arith.constant 2 : index
    %c0_77 = arith.constant 0 : index
    %c0_78 = arith.constant 0 : index
    %164 = vector.load %arg11[%c2_76, %c0_77, %c0_78] : memref<3x128x64xbf16, #tpu.memory_space<vmem>>, vector<1x128x64xbf16>
    %165 = vector.shape_cast %164 : vector<1x128x64xbf16> to vector<128x64xbf16>
    %cst_79 = arith.constant dense<0.000000e+00> : vector<16x64xf32>
    %166 = tpu.matmul %163, %165, %cst_79 {dimension_numbers = #tpu.dot_dimension_numbers<[1], [0], [0], [1], [0, 0, 1, 1], [], []>} : vector<16x128xbf16>, vector<128x64xbf16>, vector<16x64xf32> -> vector<16x64xf32>
    %167 = arith.addf %162, %166 : vector<16x64xf32>
    %168 = vector.broadcast %117 : vector<1x64xf32> to vector<16x64xf32>
    %169 = arith.addf %167, %168 : vector<16x64xf32>
    %cst_80 = arith.constant 0.000000e+00 : f32
    %170 = vector.shape_cast %6 : vector<16x1xi1> to vector<16x1xi1>
    %171 = vector.broadcast %170 : vector<16x1xi1> to vector<16x64xi1>
    %172 = vector.broadcast %cst_80 : f32 to vector<16x64xf32>
    %173 = arith.select %171, %169, %172 : vector<16x64xi1>, vector<16x64xf32>
    %174 = arith.addf %115, %173 : vector<16x64xf32>
    %c0_81 = arith.constant 0 : index
    %c0_82 = arith.constant 0 : index
    %175 = vector.load %arg13[%c0_81, %c0_82] : memref<1x64xf32, #tpu.memory_space<vmem>>, vector<1x64xf32>
    %c0_83 = arith.constant 0 : index
    %c0_84 = arith.constant 0 : index
    %176 = vector.load %arg14[%c0_83, %c0_84] : memref<1x64xf32, #tpu.memory_space<vmem>>, vector<1x64xf32>
    %cst_85 = arith.constant dense<0.000000e+00> : vector<16xf32>
    %177 = vector.multi_reduction <add>, %174, %cst_85 [1] : vector<16x64xf32> to vector<16xf32>
    %178 = vector.shape_cast %177 : vector<16xf32> to vector<16x1xf32>
    %cst_86 = arith.constant 6.400000e+01 : f32
    %179 = vector.broadcast %cst_86 : f32 to vector<16x1xf32>
    %180 = arith.divf %178, %179 : vector<16x1xf32>
    %181 = vector.broadcast %180 : vector<16x1xf32> to vector<16x64xf32>
    %182 = arith.subf %174, %181 : vector<16x64xf32>
    %183 = arith.mulf %182, %182 : vector<16x64xf32>
    %cst_87 = arith.constant dense<0.000000e+00> : vector<16xf32>
    %184 = vector.multi_reduction <add>, %183, %cst_87 [1] : vector<16x64xf32> to vector<16xf32>
    %185 = vector.shape_cast %184 : vector<16xf32> to vector<16x1xf32>
    %cst_88 = arith.constant 6.400000e+01 : f32
    %186 = vector.broadcast %cst_88 : f32 to vector<16x1xf32>
    %187 = arith.divf %185, %186 : vector<16x1xf32>
    %cst_89 = arith.constant 9.99999974E-6 : f32
    %188 = vector.broadcast %cst_89 : f32 to vector<16x1xf32>
    %189 = arith.addf %187, %188 : vector<16x1xf32>
    %190 = math.rsqrt %189 : vector<16x1xf32>
    %191 = vector.broadcast %190 : vector<16x1xf32> to vector<16x64xf32>
    %192 = arith.mulf %182, %191 : vector<16x64xf32>
    %193 = vector.broadcast %175 : vector<1x64xf32> to vector<16x64xf32>
    %194 = arith.mulf %192, %193 : vector<16x64xf32>
    %195 = vector.broadcast %176 : vector<1x64xf32> to vector<16x64xf32>
    %196 = arith.addf %194, %195 : vector<16x64xf32>
    %cst_90 = arith.constant 0.000000e+00 : f32
    %197 = vector.shape_cast %6 : vector<16x1xi1> to vector<16x1xi1>
    %198 = vector.broadcast %197 : vector<16x1xi1> to vector<16x64xi1>
    %199 = vector.broadcast %cst_90 : f32 to vector<16x64xf32>
    %200 = arith.select %198, %196, %199 : vector<16x64xi1>, vector<16x64xf32>
    %c0_91 = arith.constant 0 : index
    %c0_92 = arith.constant 0 : index
    %c0_93 = arith.constant 0 : index
    %201 = vector.load %arg15[%c0_91, %c0_92, %c0_93] : memref<1x16x64xf32, #tpu.memory_space<vmem>>, vector<1x16x64xf32>
    %202 = vector.shape_cast %201 : vector<1x16x64xf32> to vector<16x64xf32>
    %203 = vector.shape_cast %200 : vector<16x64xf32> to vector<1x16x64xf32>
    tpu.vector_store %arg15[%c0_91, %c0_92, %c0_93], %203 {strides = array<i32>} : memref<1x16x64xf32, #tpu.memory_space<vmem>>, vector<1x16x64xf32>,
    return
  }
  func.func @transform_0(%arg0: i32, %arg1: memref<2xi32, #tpu.memory_space<smem>>) -> (i32, i32, i32) {
    %c0_i32 = arith.constant 0 : i32
    %c0_i32_0 = arith.constant 0 : i32
    %c0_i32_1 = arith.constant 0 : i32
    return %arg0, %c0_i32, %c0_i32_0 : i32, i32, i32
  }
  func.func @transform_1(%arg0: i32, %arg1: memref<2xi32, #tpu.memory_space<smem>>) -> (i32, i32, i32) {
    %c0_i32 = arith.constant 0 : i32
    %c0_i32_0 = arith.constant 0 : i32
    %c0_i32_1 = arith.constant 0 : i32
    %c0_i32_2 = arith.constant 0 : i32
    return %c0_i32, %c0_i32_0, %c0_i32_1 : i32, i32, i32
  }
  func.func @transform_2(%arg0: i32, %arg1: memref<2xi32, #tpu.memory_space<smem>>) -> (i32, i32, i32) {
    %c0_i32 = arith.constant 0 : i32
    %c0_i32_0 = arith.constant 0 : i32
    %c0_i32_1 = arith.constant 0 : i32
    %c0_i32_2 = arith.constant 0 : i32
    return %c0_i32, %c0_i32_0, %c0_i32_1 : i32, i32, i32
  }
  func.func @transform_3(%arg0: i32, %arg1: memref<2xi32, #tpu.memory_space<smem>>) -> (i32, i32) {
    %c0_i32 = arith.constant 0 : i32
    %c0_i32_0 = arith.constant 0 : i32
    %c0_i32_1 = arith.constant 0 : i32
    return %c0_i32, %c0_i32_0 : i32, i32
  }
  func.func @transform_4(%arg0: i32, %arg1: memref<2xi32, #tpu.memory_space<smem>>) -> (i32, i32) {
    %c0_i32 = arith.constant 0 : i32
    %c0_i32_0 = arith.constant 0 : i32
    %c0_i32_1 = arith.constant 0 : i32
    return %c0_i32, %c0_i32_0 : i32, i32
  }
  func.func @transform_5(%arg0: i32, %arg1: memref<2xi32, #tpu.memory_space<smem>>) -> (i32, i32) {
    %c0_i32 = arith.constant 0 : i32
    %c0_i32_0 = arith.constant 0 : i32
    %c0_i32_1 = arith.constant 0 : i32
    return %c0_i32, %c0_i32_0 : i32, i32
  }
  func.func @transform_6(%arg0: i32, %arg1: memref<2xi32, #tpu.memory_space<smem>>) -> (i32, i32) {
    %c0_i32 = arith.constant 0 : i32
    %c0_i32_0 = arith.constant 0 : i32
    %c0_i32_1 = arith.constant 0 : i32
    return %c0_i32, %c0_i32_0 : i32, i32
  }
  func.func @transform_7(%arg0: i32, %arg1: memref<2xi32, #tpu.memory_space<smem>>) -> (i32, i32, i32) {
    %c0_i32 = arith.constant 0 : i32
    %c0_i32_0 = arith.constant 0 : i32
    %c0_i32_1 = arith.constant 0 : i32
    %c0_i32_2 = arith.constant 0 : i32
    return %c0_i32, %c0_i32_0, %c0_i32_1 : i32, i32, i32
  }
  func.func @transform_8(%arg0: i32, %arg1: memref<2xi32, #tpu.memory_space<smem>>) -> (i32, i32) {
    %c0_i32 = arith.constant 0 : i32
    %c0_i32_0 = arith.constant 0 : i32
    %c0_i32_1 = arith.constant 0 : i32
    return %c0_i32, %c0_i32_0 : i32, i32
  }
  func.func @transform_9(%arg0: i32, %arg1: memref<2xi32, #tpu.memory_space<smem>>) -> (i32, i32, i32) {
    %c0_i32 = arith.constant 0 : i32
    %c0_i32_0 = arith.constant 0 : i32
    %c0_i32_1 = arith.constant 0 : i32
    %c0_i32_2 = arith.constant 0 : i32
    return %c0_i32, %c0_i32_0, %c0_i32_1 : i32, i32, i32
  }
  func.func @transform_10(%arg0: i32, %arg1: memref<2xi32, #tpu.memory_space<smem>>) -> (i32, i32) {
    %c0_i32 = arith.constant 0 : i32
    %c0_i32_0 = arith.constant 0 : i32
    %c0_i32_1 = arith.constant 0 : i32
    return %c0_i32, %c0_i32_0 : i32, i32
  }
  func.func @transform_11(%arg0: i32, %arg1: memref<2xi32, #tpu.memory_space<smem>>) -> (i32, i32) {
    %c0_i32 = arith.constant 0 : i32
    %c0_i32_0 = arith.constant 0 : i32
    %c0_i32_1 = arith.constant 0 : i32
    return %c0_i32, %c0_i32_0 : i32, i32
  }
  func.func @transform_12(%arg0: i32, %arg1: memref<2xi32, #tpu.memory_space<smem>>) -> (i32, i32) {
    %c0_i32 = arith.constant 0 : i32
    %c0_i32_0 = arith.constant 0 : i32
    %c0_i32_1 = arith.constant 0 : i32
    return %c0_i32, %c0_i32_0 : i32, i32
  }
  func.func @transform_13(%arg0: i32, %arg1: memref<2xi32, #tpu.memory_space<smem>>) -> (i32, i32, i32) {
    %c0_i32 = arith.constant 0 : i32
    %c0_i32_0 = arith.constant 0 : i32
    %c0_i32_1 = arith.constant 0 : i32
    return %arg0, %c0_i32, %c0_i32_0 : i32, i32, i32
  }
}

module attributes {stable_mosaic.version = 11 : i64} {
  func.func @_mrte_kernel(%arg0: i32, %arg1: memref<2xi32, #tpu.memory_space<smem>>, %arg2: memref<2xi32, #tpu.memory_space<smem>>, %arg3: memref<1x16x64xf32, #tpu.memory_space<vmem>>, %arg4: memref<1x8x64xf32, #tpu.memory_space<vmem>>, %arg5: memref<1x1x128xf32, #tpu.memory_space<vmem>>, %arg6: memref<64x128xbf16, #tpu.memory_space<vmem>>, %arg7: memref<1x128xf32, #tpu.memory_space<vmem>>, %arg8: memref<64x128xbf16, #tpu.memory_space<vmem>>, %arg9: memref<1x128xf32, #tpu.memory_space<vmem>>, %arg10: memref<3x128x128xbf16, #tpu.memory_space<vmem>>, %arg11: memref<3x1x128xf32, #tpu.memory_space<vmem>>, %arg12: memref<128x128xbf16, #tpu.memory_space<vmem>>, %arg13: memref<1x128xf32, #tpu.memory_space<vmem>>, %arg14: memref<128x64xbf16, #tpu.memory_space<vmem>>, %arg15: memref<1x64xf32, #tpu.memory_space<vmem>>, %arg16: memref<1x16x64xf32, #tpu.memory_space<vmem>>) attributes {dimension_semantics = [#tpu.dimension_semantics<parallel>], iteration_bounds = array<i64: 2>, scalar_prefetch = 2 : i64, scratch_operands = 0 : i64, tpu.core_type = #tpu.core_type<tc>, window_params = [{transform_indices = @transform_0, window_bounds = array<i64: 1, 16, 64>}, {transform_indices = @transform_1, window_bounds = array<i64: 1, 8, 64>}, {transform_indices = @transform_2, window_bounds = array<i64: 1, 1, 128>}, {pipeline_mode = #tpu.pipeline_mode<synchronous>, transform_indices = @transform_3, window_bounds = array<i64: 64, 128>}, {pipeline_mode = #tpu.pipeline_mode<synchronous>, transform_indices = @transform_4, window_bounds = array<i64: 1, 128>}, {pipeline_mode = #tpu.pipeline_mode<synchronous>, transform_indices = @transform_5, window_bounds = array<i64: 64, 128>}, {pipeline_mode = #tpu.pipeline_mode<synchronous>, transform_indices = @transform_6, window_bounds = array<i64: 1, 128>}, {pipeline_mode = #tpu.pipeline_mode<synchronous>, transform_indices = @transform_7, window_bounds = array<i64: 3, 128, 128>}, {pipeline_mode = #tpu.pipeline_mode<synchronous>, transform_indices = @transform_8, window_bounds = array<i64: 3, 1, 128>}, {pipeline_mode = #tpu.pipeline_mode<synchronous>, transform_indices = @transform_9, window_bounds = array<i64: 128, 128>}, {pipeline_mode = #tpu.pipeline_mode<synchronous>, transform_indices = @transform_10, window_bounds = array<i64: 1, 128>}, {pipeline_mode = #tpu.pipeline_mode<synchronous>, transform_indices = @transform_11, window_bounds = array<i64: 128, 64>}, {pipeline_mode = #tpu.pipeline_mode<synchronous>, transform_indices = @transform_12, window_bounds = array<i64: 1, 64>}, {transform_indices = @transform_13, window_bounds = array<i64: 1, 16, 64>}]} {
    %0 = arith.index_cast %arg0 : i32 to index
    %1 = memref.load %arg1[%0] : memref<2xi32, #tpu.memory_space<smem>>
    %2 = arith.index_cast %arg0 : i32 to index
    %3 = memref.load %arg2[%2] : memref<2xi32, #tpu.memory_space<smem>>
    %c0 = arith.constant 0 : index
    %c0_0 = arith.constant 0 : index
    %c0_1 = arith.constant 0 : index
    %4 = vector.load %arg3[%c0, %c0_0, %c0_1] : memref<1x16x64xf32, #tpu.memory_space<vmem>>, vector<1x16x64xf32>
    %5 = vector.shape_cast %4 : vector<1x16x64xf32> to vector<16x64xf32>
    %c0_2 = arith.constant 0 : index
    %c0_3 = arith.constant 0 : index
    %c0_4 = arith.constant 0 : index
    %6 = vector.load %arg4[%c0_2, %c0_3, %c0_4] : memref<1x8x64xf32, #tpu.memory_space<vmem>>, vector<1x8x64xf32>
    %7 = vector.shape_cast %6 : vector<1x8x64xf32> to vector<8x64xf32>
    %8 = tpu.iota {dimensions = array<i32: 0>} : vector<16x1xi32>
    %9 = vector.broadcast %1 : i32 to vector<16x1xi32>
    %10 = arith.cmpi slt, %8, %9 : vector<16x1xi32>
    %11 = tpu.iota {dimensions = array<i32: 0>} : vector<8x1xi32>
    %12 = vector.broadcast %3 : i32 to vector<8x1xi32>
    %13 = arith.cmpi slt, %11, %12 : vector<8x1xi32>
    %14 = tpu.iota {dimensions = array<i32: 1>} : vector<1x8xi32>
    %15 = vector.broadcast %3 : i32 to vector<1x8xi32>
    %16 = arith.cmpi slt, %14, %15 : vector<1x8xi32>
    %cst = arith.constant 0.000000e+00 : f32
    %17 = vector.shape_cast %10 : vector<16x1xi1> to vector<16x1xi1>
    %18 = vector.broadcast %17 : vector<16x1xi1> to vector<16x64xi1>
    %19 = vector.broadcast %cst : f32 to vector<16x64xf32>
    %20 = arith.select %18, %5, %19 : vector<16x64xi1>, vector<16x64xf32>
    %21 = arith.truncf %20 : vector<16x64xf32> to vector<16x64xbf16>
    %c0_5 = arith.constant 0 : index
    %c0_6 = arith.constant 0 : index
    %22 = vector.load %arg6[%c0_5, %c0_6] : memref<64x128xbf16, #tpu.memory_space<vmem>>, vector<64x128xbf16>
    %cst_7 = arith.constant dense<0.000000e+00> : vector<16x128xf32>
    %23 = tpu.matmul %21, %22, %cst_7 {dimension_numbers = #tpu.dot_dimension_numbers<[1], [0], [0], [1], [0, 0, 1, 1], [], []>} : vector<16x64xbf16>, vector<64x128xbf16>, vector<16x128xf32> -> vector<16x128xf32>
    %c0_8 = arith.constant 0 : index
    %c0_9 = arith.constant 0 : index
    %24 = vector.load %arg7[%c0_8, %c0_9] : memref<1x128xf32, #tpu.memory_space<vmem>>, vector<1x128xf32>
    %25 = vector.broadcast %24 : vector<1x128xf32> to vector<16x128xf32>
    %26 = arith.addf %23, %25 : vector<16x128xf32>
    %cst_10 = arith.constant 0.000000e+00 : f32
    %27 = vector.shape_cast %13 : vector<8x1xi1> to vector<8x1xi1>
    %28 = vector.broadcast %27 : vector<8x1xi1> to vector<8x64xi1>
    %29 = vector.broadcast %cst_10 : f32 to vector<8x64xf32>
    %30 = arith.select %28, %7, %29 : vector<8x64xi1>, vector<8x64xf32>
    %31 = arith.truncf %30 : vector<8x64xf32> to vector<8x64xbf16>
    %c0_11 = arith.constant 0 : index
    %c0_12 = arith.constant 0 : index
    %32 = vector.load %arg8[%c0_11, %c0_12] : memref<64x128xbf16, #tpu.memory_space<vmem>>, vector<64x128xbf16>
    %cst_13 = arith.constant dense<0.000000e+00> : vector<8x128xf32>
    %33 = tpu.matmul %31, %32, %cst_13 {dimension_numbers = #tpu.dot_dimension_numbers<[1], [0], [0], [1], [0, 0, 1, 1], [], []>} : vector<8x64xbf16>, vector<64x128xbf16>, vector<8x128xf32> -> vector<8x128xf32>
    %c0_14 = arith.constant 0 : index
    %c0_15 = arith.constant 0 : index
    %34 = vector.load %arg9[%c0_14, %c0_15] : memref<1x128xf32, #tpu.memory_space<vmem>>, vector<1x128xf32>
    %35 = vector.broadcast %34 : vector<1x128xf32> to vector<8x128xf32>
    %36 = arith.addf %33, %35 : vector<8x128xf32>
    %cst_16 = arith.constant 0.000000e+00 : f32
    %37 = vector.shape_cast %10 : vector<16x1xi1> to vector<16x1xi1>
    %38 = vector.broadcast %37 : vector<16x1xi1> to vector<16x128xi1>
    %39 = vector.broadcast %cst_16 : f32 to vector<16x128xf32>
    %40 = arith.select %38, %26, %39 : vector<16x128xi1>, vector<16x128xf32>
    %cst_17 = arith.constant 0.000000e+00 : f32
    %41 = vector.shape_cast %13 : vector<8x1xi1> to vector<8x1xi1>
    %42 = vector.broadcast %41 : vector<8x1xi1> to vector<8x128xi1>
    %43 = vector.broadcast %cst_17 : f32 to vector<8x128xf32>
    %44 = arith.select %42, %36, %43 : vector<8x128xi1>, vector<8x128xf32>
    %c0_18 = arith.constant 0 : index
    %c0_19 = arith.constant 0 : index
    %45 = vector.load %arg12[%c0_18, %c0_19] : memref<128x128xbf16, #tpu.memory_space<vmem>>, vector<128x128xbf16>
    %c0_20 = arith.constant 0 : index
    %c0_21 = arith.constant 0 : index
    %46 = vector.load %arg13[%c0_20, %c0_21] : memref<1x128xf32, #tpu.memory_space<vmem>>, vector<1x128xf32>
    %47 = arith.truncf %40 : vector<16x128xf32> to vector<16x128xbf16>
    %48 = arith.truncf %44 : vector<8x128xf32> to vector<8x128xbf16>
    %c0_22 = arith.constant 0 : index
    %c0_23 = arith.constant 0 : index
    %c0_24 = arith.constant 0 : index
    %49 = vector.load %arg10[%c0_22, %c0_23, %c0_24] : memref<3x128x128xbf16, #tpu.memory_space<vmem>>, vector<1x128x128xbf16>
    %50 = vector.shape_cast %49 : vector<1x128x128xbf16> to vector<128x128xbf16>
    %cst_25 = arith.constant dense<0.000000e+00> : vector<16x128xf32>
    %51 = tpu.matmul %47, %50, %cst_25 {dimension_numbers = #tpu.dot_dimension_numbers<[1], [0], [0], [1], [0, 0, 1, 1], [], []>} : vector<16x128xbf16>, vector<128x128xbf16>, vector<16x128xf32> -> vector<16x128xf32>
    %c0_26 = arith.constant 0 : index
    %c0_27 = arith.constant 0 : index
    %c0_28 = arith.constant 0 : index
    %52 = vector.load %arg11[%c0_26, %c0_27, %c0_28] : memref<3x1x128xf32, #tpu.memory_space<vmem>>, vector<1x1x128xf32>
    %53 = vector.shape_cast %52 : vector<1x1x128xf32> to vector<1x128xf32>
    %54 = vector.broadcast %53 : vector<1x128xf32> to vector<16x128xf32>
    %55 = arith.addf %51, %54 : vector<16x128xf32>
    %c1 = arith.constant 1 : index
    %c0_29 = arith.constant 0 : index
    %c0_30 = arith.constant 0 : index
    %56 = vector.load %arg10[%c1, %c0_29, %c0_30] : memref<3x128x128xbf16, #tpu.memory_space<vmem>>, vector<1x128x128xbf16>
    %57 = vector.shape_cast %56 : vector<1x128x128xbf16> to vector<128x128xbf16>
    %cst_31 = arith.constant dense<0.000000e+00> : vector<8x128xf32>
    %58 = tpu.matmul %48, %57, %cst_31 {dimension_numbers = #tpu.dot_dimension_numbers<[1], [0], [0], [1], [0, 0, 1, 1], [], []>} : vector<8x128xbf16>, vector<128x128xbf16>, vector<8x128xf32> -> vector<8x128xf32>
    %c1_32 = arith.constant 1 : index
    %c0_33 = arith.constant 0 : index
    %c0_34 = arith.constant 0 : index
    %59 = vector.load %arg11[%c1_32, %c0_33, %c0_34] : memref<3x1x128xf32, #tpu.memory_space<vmem>>, vector<1x1x128xf32>
    %60 = vector.shape_cast %59 : vector<1x1x128xf32> to vector<1x128xf32>
    %61 = vector.broadcast %60 : vector<1x128xf32> to vector<8x128xf32>
    %62 = arith.addf %58, %61 : vector<8x128xf32>
    %c2 = arith.constant 2 : index
    %c0_35 = arith.constant 0 : index
    %c0_36 = arith.constant 0 : index
    %63 = vector.load %arg10[%c2, %c0_35, %c0_36] : memref<3x128x128xbf16, #tpu.memory_space<vmem>>, vector<1x128x128xbf16>
    %64 = vector.shape_cast %63 : vector<1x128x128xbf16> to vector<128x128xbf16>
    %cst_37 = arith.constant dense<0.000000e+00> : vector<8x128xf32>
    %65 = tpu.matmul %48, %64, %cst_37 {dimension_numbers = #tpu.dot_dimension_numbers<[1], [0], [0], [1], [0, 0, 1, 1], [], []>} : vector<8x128xbf16>, vector<128x128xbf16>, vector<8x128xf32> -> vector<8x128xf32>
    %c2_38 = arith.constant 2 : index
    %c0_39 = arith.constant 0 : index
    %c0_40 = arith.constant 0 : index
    %66 = vector.load %arg11[%c2_38, %c0_39, %c0_40] : memref<3x1x128xf32, #tpu.memory_space<vmem>>, vector<1x1x128xf32>
    %67 = vector.shape_cast %66 : vector<1x1x128xf32> to vector<1x128xf32>
    %68 = vector.broadcast %67 : vector<1x128xf32> to vector<8x128xf32>
    %69 = arith.addf %65, %68 : vector<8x128xf32>
    %70 = vector.broadcast %10 : vector<16x1xi1> to vector<16x8xi1>
    %71 = vector.broadcast %16 : vector<1x8xi1> to vector<16x8xi1>
    %72 = arith.andi %70, %71 : vector<16x8xi1>
    %73 = vector.extract_strided_slice %55 {offsets = [0, 0], sizes = [16, 32], strides = [1, 1]} : vector<16x128xf32> to vector<16x32xf32>
    %cst_41 = arith.constant 0.176776692 : f32
    %74 = vector.broadcast %cst_41 : f32 to vector<16x32xf32>
    %75 = arith.mulf %73, %74 : vector<16x32xf32>
    %76 = arith.truncf %75 : vector<16x32xf32> to vector<16x32xbf16>
    %77 = vector.extract_strided_slice %62 {offsets = [0, 0], sizes = [8, 32], strides = [1, 1]} : vector<8x128xf32> to vector<8x32xf32>
    %78 = arith.truncf %77 : vector<8x32xf32> to vector<8x32xbf16>
    %79 = vector.extract_strided_slice %69 {offsets = [0, 0], sizes = [8, 32], strides = [1, 1]} : vector<8x128xf32> to vector<8x32xf32>
    %80 = arith.truncf %79 : vector<8x32xf32> to vector<8x32xbf16>
    %cst_42 = arith.constant dense<0.000000e+00> : vector<16x8xf32>
    %81 = tpu.matmul %76, %78, %cst_42 {dimension_numbers = #tpu.dot_dimension_numbers<[1], [1], [0], [0], [0, 0, 1, 0], [], []>} : vector<16x32xbf16>, vector<8x32xbf16>, vector<16x8xf32> -> vector<16x8xf32>
    %cst_43 = arith.constant -1.000000e+04 : f32
    %82 = vector.broadcast %cst_43 : f32 to vector<16x8xf32>
    %83 = arith.select %72, %81, %82 : vector<16x8xi1>, vector<16x8xf32>
    %cst_44 = arith.constant dense<0xFF800000> : vector<16xf32>
    %84 = vector.multi_reduction <maximumf>, %83, %cst_44 [1] : vector<16x8xf32> to vector<16xf32>
    %85 = vector.shape_cast %84 : vector<16xf32> to vector<16x1xf32>
    %86 = vector.broadcast %85 : vector<16x1xf32> to vector<16x8xf32>
    %87 = arith.subf %83, %86 : vector<16x8xf32>
    %88 = math.exp %87 : vector<16x8xf32>
    %cst_45 = arith.constant dense<0.000000e+00> : vector<16xf32>
    %89 = vector.multi_reduction <add>, %88, %cst_45 [1] : vector<16x8xf32> to vector<16xf32>
    %90 = vector.shape_cast %89 : vector<16xf32> to vector<16x1xf32>
    %91 = tpu.reciprocal %90 {approx = true} : vector<16x1xf32> -> vector<16x1xf32>
    %92 = vector.broadcast %91 : vector<16x1xf32> to vector<16x8xf32>
    %93 = arith.mulf %88, %92 : vector<16x8xf32>
    %94 = arith.truncf %93 : vector<16x8xf32> to vector<16x8xbf16>
    %cst_46 = arith.constant dense<0.000000e+00> : vector<16x32xf32>
    %95 = tpu.matmul %94, %80, %cst_46 {dimension_numbers = #tpu.dot_dimension_numbers<[1], [0], [0], [1], [0, 0, 1, 1], [], []>} : vector<16x8xbf16>, vector<8x32xbf16>, vector<16x32xf32> -> vector<16x32xf32>
    %96 = vector.extract_strided_slice %55 {offsets = [0, 32], sizes = [16, 32], strides = [1, 1]} : vector<16x128xf32> to vector<16x32xf32>
    %cst_47 = arith.constant 0.176776692 : f32
    %97 = vector.broadcast %cst_47 : f32 to vector<16x32xf32>
    %98 = arith.mulf %96, %97 : vector<16x32xf32>
    %99 = arith.truncf %98 : vector<16x32xf32> to vector<16x32xbf16>
    %100 = vector.extract_strided_slice %62 {offsets = [0, 32], sizes = [8, 32], strides = [1, 1]} : vector<8x128xf32> to vector<8x32xf32>
    %101 = arith.truncf %100 : vector<8x32xf32> to vector<8x32xbf16>
    %102 = vector.extract_strided_slice %69 {offsets = [0, 32], sizes = [8, 32], strides = [1, 1]} : vector<8x128xf32> to vector<8x32xf32>
    %103 = arith.truncf %102 : vector<8x32xf32> to vector<8x32xbf16>
    %cst_48 = arith.constant dense<0.000000e+00> : vector<16x8xf32>
    %104 = tpu.matmul %99, %101, %cst_48 {dimension_numbers = #tpu.dot_dimension_numbers<[1], [1], [0], [0], [0, 0, 1, 0], [], []>} : vector<16x32xbf16>, vector<8x32xbf16>, vector<16x8xf32> -> vector<16x8xf32>
    %cst_49 = arith.constant -1.000000e+04 : f32
    %105 = vector.broadcast %cst_49 : f32 to vector<16x8xf32>
    %106 = arith.select %72, %104, %105 : vector<16x8xi1>, vector<16x8xf32>
    %cst_50 = arith.constant dense<0xFF800000> : vector<16xf32>
    %107 = vector.multi_reduction <maximumf>, %106, %cst_50 [1] : vector<16x8xf32> to vector<16xf32>
    %108 = vector.shape_cast %107 : vector<16xf32> to vector<16x1xf32>
    %109 = vector.broadcast %108 : vector<16x1xf32> to vector<16x8xf32>
    %110 = arith.subf %106, %109 : vector<16x8xf32>
    %111 = math.exp %110 : vector<16x8xf32>
    %cst_51 = arith.constant dense<0.000000e+00> : vector<16xf32>
    %112 = vector.multi_reduction <add>, %111, %cst_51 [1] : vector<16x8xf32> to vector<16xf32>
    %113 = vector.shape_cast %112 : vector<16xf32> to vector<16x1xf32>
    %114 = tpu.reciprocal %113 {approx = true} : vector<16x1xf32> -> vector<16x1xf32>
    %115 = vector.broadcast %114 : vector<16x1xf32> to vector<16x8xf32>
    %116 = arith.mulf %111, %115 : vector<16x8xf32>
    %117 = arith.truncf %116 : vector<16x8xf32> to vector<16x8xbf16>
    %cst_52 = arith.constant dense<0.000000e+00> : vector<16x32xf32>
    %118 = tpu.matmul %117, %103, %cst_52 {dimension_numbers = #tpu.dot_dimension_numbers<[1], [0], [0], [1], [0, 0, 1, 1], [], []>} : vector<16x8xbf16>, vector<8x32xbf16>, vector<16x32xf32> -> vector<16x32xf32>
    %119 = vector.extract_strided_slice %55 {offsets = [0, 64], sizes = [16, 32], strides = [1, 1]} : vector<16x128xf32> to vector<16x32xf32>
    %cst_53 = arith.constant 0.176776692 : f32
    %120 = vector.broadcast %cst_53 : f32 to vector<16x32xf32>
    %121 = arith.mulf %119, %120 : vector<16x32xf32>
    %122 = arith.truncf %121 : vector<16x32xf32> to vector<16x32xbf16>
    %123 = vector.extract_strided_slice %62 {offsets = [0, 64], sizes = [8, 32], strides = [1, 1]} : vector<8x128xf32> to vector<8x32xf32>
    %124 = arith.truncf %123 : vector<8x32xf32> to vector<8x32xbf16>
    %125 = vector.extract_strided_slice %69 {offsets = [0, 64], sizes = [8, 32], strides = [1, 1]} : vector<8x128xf32> to vector<8x32xf32>
    %126 = arith.truncf %125 : vector<8x32xf32> to vector<8x32xbf16>
    %cst_54 = arith.constant dense<0.000000e+00> : vector<16x8xf32>
    %127 = tpu.matmul %122, %124, %cst_54 {dimension_numbers = #tpu.dot_dimension_numbers<[1], [1], [0], [0], [0, 0, 1, 0], [], []>} : vector<16x32xbf16>, vector<8x32xbf16>, vector<16x8xf32> -> vector<16x8xf32>
    %cst_55 = arith.constant -1.000000e+04 : f32
    %128 = vector.broadcast %cst_55 : f32 to vector<16x8xf32>
    %129 = arith.select %72, %127, %128 : vector<16x8xi1>, vector<16x8xf32>
    %cst_56 = arith.constant dense<0xFF800000> : vector<16xf32>
    %130 = vector.multi_reduction <maximumf>, %129, %cst_56 [1] : vector<16x8xf32> to vector<16xf32>
    %131 = vector.shape_cast %130 : vector<16xf32> to vector<16x1xf32>
    %132 = vector.broadcast %131 : vector<16x1xf32> to vector<16x8xf32>
    %133 = arith.subf %129, %132 : vector<16x8xf32>
    %134 = math.exp %133 : vector<16x8xf32>
    %cst_57 = arith.constant dense<0.000000e+00> : vector<16xf32>
    %135 = vector.multi_reduction <add>, %134, %cst_57 [1] : vector<16x8xf32> to vector<16xf32>
    %136 = vector.shape_cast %135 : vector<16xf32> to vector<16x1xf32>
    %137 = tpu.reciprocal %136 {approx = true} : vector<16x1xf32> -> vector<16x1xf32>
    %138 = vector.broadcast %137 : vector<16x1xf32> to vector<16x8xf32>
    %139 = arith.mulf %134, %138 : vector<16x8xf32>
    %140 = arith.truncf %139 : vector<16x8xf32> to vector<16x8xbf16>
    %cst_58 = arith.constant dense<0.000000e+00> : vector<16x32xf32>
    %141 = tpu.matmul %140, %126, %cst_58 {dimension_numbers = #tpu.dot_dimension_numbers<[1], [0], [0], [1], [0, 0, 1, 1], [], []>} : vector<16x8xbf16>, vector<8x32xbf16>, vector<16x32xf32> -> vector<16x32xf32>
    %142 = vector.extract_strided_slice %55 {offsets = [0, 96], sizes = [16, 32], strides = [1, 1]} : vector<16x128xf32> to vector<16x32xf32>
    %cst_59 = arith.constant 0.176776692 : f32
    %143 = vector.broadcast %cst_59 : f32 to vector<16x32xf32>
    %144 = arith.mulf %142, %143 : vector<16x32xf32>
    %145 = arith.truncf %144 : vector<16x32xf32> to vector<16x32xbf16>
    %146 = vector.extract_strided_slice %62 {offsets = [0, 96], sizes = [8, 32], strides = [1, 1]} : vector<8x128xf32> to vector<8x32xf32>
    %147 = arith.truncf %146 : vector<8x32xf32> to vector<8x32xbf16>
    %148 = vector.extract_strided_slice %69 {offsets = [0, 96], sizes = [8, 32], strides = [1, 1]} : vector<8x128xf32> to vector<8x32xf32>
    %149 = arith.truncf %148 : vector<8x32xf32> to vector<8x32xbf16>
    %cst_60 = arith.constant dense<0.000000e+00> : vector<16x8xf32>
    %150 = tpu.matmul %145, %147, %cst_60 {dimension_numbers = #tpu.dot_dimension_numbers<[1], [1], [0], [0], [0, 0, 1, 0], [], []>} : vector<16x32xbf16>, vector<8x32xbf16>, vector<16x8xf32> -> vector<16x8xf32>
    %cst_61 = arith.constant -1.000000e+04 : f32
    %151 = vector.broadcast %cst_61 : f32 to vector<16x8xf32>
    %152 = arith.select %72, %150, %151 : vector<16x8xi1>, vector<16x8xf32>
    %cst_62 = arith.constant dense<0xFF800000> : vector<16xf32>
    %153 = vector.multi_reduction <maximumf>, %152, %cst_62 [1] : vector<16x8xf32> to vector<16xf32>
    %154 = vector.shape_cast %153 : vector<16xf32> to vector<16x1xf32>
    %155 = vector.broadcast %154 : vector<16x1xf32> to vector<16x8xf32>
    %156 = arith.subf %152, %155 : vector<16x8xf32>
    %157 = math.exp %156 : vector<16x8xf32>
    %cst_63 = arith.constant dense<0.000000e+00> : vector<16xf32>
    %158 = vector.multi_reduction <add>, %157, %cst_63 [1] : vector<16x8xf32> to vector<16xf32>
    %159 = vector.shape_cast %158 : vector<16xf32> to vector<16x1xf32>
    %160 = tpu.reciprocal %159 {approx = true} : vector<16x1xf32> -> vector<16x1xf32>
    %161 = vector.broadcast %160 : vector<16x1xf32> to vector<16x8xf32>
    %162 = arith.mulf %157, %161 : vector<16x8xf32>
    %163 = arith.truncf %162 : vector<16x8xf32> to vector<16x8xbf16>
    %cst_64 = arith.constant dense<0.000000e+00> : vector<16x32xf32>
    %164 = tpu.matmul %163, %149, %cst_64 {dimension_numbers = #tpu.dot_dimension_numbers<[1], [0], [0], [1], [0, 0, 1, 1], [], []>} : vector<16x8xbf16>, vector<8x32xbf16>, vector<16x32xf32> -> vector<16x32xf32>
    %165 = tpu.concatenate %95, %118, %141, %164 in 1 : vector<16x32xf32>, vector<16x32xf32>, vector<16x32xf32>, vector<16x32xf32> -> vector<16x128xf32>
    %166 = arith.truncf %165 : vector<16x128xf32> to vector<16x128xbf16>
    %cst_65 = arith.constant dense<0.000000e+00> : vector<16x128xf32>
    %167 = tpu.matmul %166, %45, %cst_65 {dimension_numbers = #tpu.dot_dimension_numbers<[1], [0], [0], [1], [0, 0, 1, 1], [], []>} : vector<16x128xbf16>, vector<128x128xbf16>, vector<16x128xf32> -> vector<16x128xf32>
    %168 = vector.broadcast %46 : vector<1x128xf32> to vector<16x128xf32>
    %169 = arith.addf %167, %168 : vector<16x128xf32>
    %170 = arith.addf %169, %26 : vector<16x128xf32>
    %c0_66 = arith.constant 0 : index
    %c0_67 = arith.constant 0 : index
    %c0_68 = arith.constant 0 : index
    %171 = vector.load %arg5[%c0_66, %c0_67, %c0_68] : memref<1x1x128xf32, #tpu.memory_space<vmem>>, vector<1x1x128xf32>
    %172 = vector.shape_cast %171 : vector<1x1x128xf32> to vector<1x128xf32>
    %173 = vector.broadcast %172 : vector<1x128xf32> to vector<16x128xf32>
    %174 = arith.addf %170, %173 : vector<16x128xf32>
    %cst_69 = arith.constant 0.000000e+00 : f32
    %175 = vector.shape_cast %10 : vector<16x1xi1> to vector<16x1xi1>
    %176 = vector.broadcast %175 : vector<16x1xi1> to vector<16x128xi1>
    %177 = vector.broadcast %cst_69 : f32 to vector<16x128xf32>
    %178 = arith.select %176, %174, %177 : vector<16x128xi1>, vector<16x128xf32>
    %179 = arith.truncf %178 : vector<16x128xf32> to vector<16x128xbf16>
    %c0_70 = arith.constant 0 : index
    %c0_71 = arith.constant 0 : index
    %180 = vector.load %arg14[%c0_70, %c0_71] : memref<128x64xbf16, #tpu.memory_space<vmem>>, vector<128x64xbf16>
    %cst_72 = arith.constant dense<0.000000e+00> : vector<16x64xf32>
    %181 = tpu.matmul %179, %180, %cst_72 {dimension_numbers = #tpu.dot_dimension_numbers<[1], [0], [0], [1], [0, 0, 1, 1], [], []>} : vector<16x128xbf16>, vector<128x64xbf16>, vector<16x64xf32> -> vector<16x64xf32>
    %c0_73 = arith.constant 0 : index
    %c0_74 = arith.constant 0 : index
    %182 = vector.load %arg15[%c0_73, %c0_74] : memref<1x64xf32, #tpu.memory_space<vmem>>, vector<1x64xf32>
    %183 = vector.broadcast %182 : vector<1x64xf32> to vector<16x64xf32>
    %184 = arith.addf %181, %183 : vector<16x64xf32>
    %c0_75 = arith.constant 0 : index
    %c0_76 = arith.constant 0 : index
    %c0_77 = arith.constant 0 : index
    %185 = vector.load %arg16[%c0_75, %c0_76, %c0_77] : memref<1x16x64xf32, #tpu.memory_space<vmem>>, vector<1x16x64xf32>
    %186 = vector.shape_cast %185 : vector<1x16x64xf32> to vector<16x64xf32>
    %187 = vector.shape_cast %184 : vector<16x64xf32> to vector<1x16x64xf32>
    tpu.vector_store %arg16[%c0_75, %c0_76, %c0_77], %187 {strides = array<i32>} : memref<1x16x64xf32, #tpu.memory_space<vmem>>, vector<1x16x64xf32>,
    return
  }
  func.func @transform_0(%arg0: i32, %arg1: memref<2xi32, #tpu.memory_space<smem>>, %arg2: memref<2xi32, #tpu.memory_space<smem>>) -> (i32, i32, i32) {
    %c0_i32 = arith.constant 0 : i32
    %c0_i32_0 = arith.constant 0 : i32
    %c0_i32_1 = arith.constant 0 : i32
    return %arg0, %c0_i32, %c0_i32_0 : i32, i32, i32
  }
  func.func @transform_1(%arg0: i32, %arg1: memref<2xi32, #tpu.memory_space<smem>>, %arg2: memref<2xi32, #tpu.memory_space<smem>>) -> (i32, i32, i32) {
    %c0_i32 = arith.constant 0 : i32
    %c0_i32_0 = arith.constant 0 : i32
    %c0_i32_1 = arith.constant 0 : i32
    return %arg0, %c0_i32, %c0_i32_0 : i32, i32, i32
  }
  func.func @transform_2(%arg0: i32, %arg1: memref<2xi32, #tpu.memory_space<smem>>, %arg2: memref<2xi32, #tpu.memory_space<smem>>) -> (i32, i32, i32) {
    %c0_i32 = arith.constant 0 : i32
    %c0_i32_0 = arith.constant 0 : i32
    %c0_i32_1 = arith.constant 0 : i32
    return %arg0, %c0_i32, %c0_i32_0 : i32, i32, i32
  }
  func.func @transform_3(%arg0: i32, %arg1: memref<2xi32, #tpu.memory_space<smem>>, %arg2: memref<2xi32, #tpu.memory_space<smem>>) -> (i32, i32) {
    %c0_i32 = arith.constant 0 : i32
    %c0_i32_0 = arith.constant 0 : i32
    %c0_i32_1 = arith.constant 0 : i32
    return %c0_i32, %c0_i32_0 : i32, i32
  }
  func.func @transform_4(%arg0: i32, %arg1: memref<2xi32, #tpu.memory_space<smem>>, %arg2: memref<2xi32, #tpu.memory_space<smem>>) -> (i32, i32) {
    %c0_i32 = arith.constant 0 : i32
    %c0_i32_0 = arith.constant 0 : i32
    %c0_i32_1 = arith.constant 0 : i32
    return %c0_i32, %c0_i32_0 : i32, i32
  }
  func.func @transform_5(%arg0: i32, %arg1: memref<2xi32, #tpu.memory_space<smem>>, %arg2: memref<2xi32, #tpu.memory_space<smem>>) -> (i32, i32) {
    %c0_i32 = arith.constant 0 : i32
    %c0_i32_0 = arith.constant 0 : i32
    %c0_i32_1 = arith.constant 0 : i32
    return %c0_i32, %c0_i32_0 : i32, i32
  }
  func.func @transform_6(%arg0: i32, %arg1: memref<2xi32, #tpu.memory_space<smem>>, %arg2: memref<2xi32, #tpu.memory_space<smem>>) -> (i32, i32) {
    %c0_i32 = arith.constant 0 : i32
    %c0_i32_0 = arith.constant 0 : i32
    %c0_i32_1 = arith.constant 0 : i32
    return %c0_i32, %c0_i32_0 : i32, i32
  }
  func.func @transform_7(%arg0: i32, %arg1: memref<2xi32, #tpu.memory_space<smem>>, %arg2: memref<2xi32, #tpu.memory_space<smem>>) -> (i32, i32, i32) {
    %c0_i32 = arith.constant 0 : i32
    %c0_i32_0 = arith.constant 0 : i32
    %c0_i32_1 = arith.constant 0 : i32
    %c0_i32_2 = arith.constant 0 : i32
    return %c0_i32, %c0_i32_0, %c0_i32_1 : i32, i32, i32
  }
  func.func @transform_8(%arg0: i32, %arg1: memref<2xi32, #tpu.memory_space<smem>>, %arg2: memref<2xi32, #tpu.memory_space<smem>>) -> (i32, i32, i32) {
    %c0_i32 = arith.constant 0 : i32
    %c0_i32_0 = arith.constant 0 : i32
    %c0_i32_1 = arith.constant 0 : i32
    %c0_i32_2 = arith.constant 0 : i32
    return %c0_i32, %c0_i32_0, %c0_i32_1 : i32, i32, i32
  }
  func.func @transform_9(%arg0: i32, %arg1: memref<2xi32, #tpu.memory_space<smem>>, %arg2: memref<2xi32, #tpu.memory_space<smem>>) -> (i32, i32) {
    %c0_i32 = arith.constant 0 : i32
    %c0_i32_0 = arith.constant 0 : i32
    %c0_i32_1 = arith.constant 0 : i32
    return %c0_i32, %c0_i32_0 : i32, i32
  }
  func.func @transform_10(%arg0: i32, %arg1: memref<2xi32, #tpu.memory_space<smem>>, %arg2: memref<2xi32, #tpu.memory_space<smem>>) -> (i32, i32) {
    %c0_i32 = arith.constant 0 : i32
    %c0_i32_0 = arith.constant 0 : i32
    %c0_i32_1 = arith.constant 0 : i32
    return %c0_i32, %c0_i32_0 : i32, i32
  }
  func.func @transform_11(%arg0: i32, %arg1: memref<2xi32, #tpu.memory_space<smem>>, %arg2: memref<2xi32, #tpu.memory_space<smem>>) -> (i32, i32) {
    %c0_i32 = arith.constant 0 : i32
    %c0_i32_0 = arith.constant 0 : i32
    %c0_i32_1 = arith.constant 0 : i32
    return %c0_i32, %c0_i32_0 : i32, i32
  }
  func.func @transform_12(%arg0: i32, %arg1: memref<2xi32, #tpu.memory_space<smem>>, %arg2: memref<2xi32, #tpu.memory_space<smem>>) -> (i32, i32) {
    %c0_i32 = arith.constant 0 : i32
    %c0_i32_0 = arith.constant 0 : i32
    %c0_i32_1 = arith.constant 0 : i32
    return %c0_i32, %c0_i32_0 : i32, i32
  }
  func.func @transform_13(%arg0: i32, %arg1: memref<2xi32, #tpu.memory_space<smem>>, %arg2: memref<2xi32, #tpu.memory_space<smem>>) -> (i32, i32, i32) {
    %c0_i32 = arith.constant 0 : i32
    %c0_i32_0 = arith.constant 0 : i32
    %c0_i32_1 = arith.constant 0 : i32
    return %arg0, %c0_i32, %c0_i32_0 : i32, i32, i32
  }
}

module attributes {stable_mosaic.version = 11 : i64} {
  func.func @_masked_linear_kernel(%arg0: i32, %arg1: memref<2xi32, #tpu.memory_space<smem>>, %arg2: memref<1x16x64xf32, #tpu.memory_space<vmem>>, %arg3: memref<64x64xbf16, #tpu.memory_space<vmem>>, %arg4: memref<1x64xf32, #tpu.memory_space<vmem>>, %arg5: memref<1x16x64xf32, #tpu.memory_space<vmem>>) attributes {dimension_semantics = [#tpu.dimension_semantics<parallel>], iteration_bounds = array<i64: 2>, scalar_prefetch = 1 : i64, scratch_operands = 0 : i64, tpu.core_type = #tpu.core_type<tc>, window_params = [{transform_indices = @transform_0, window_bounds = array<i64: 1, 16, 64>}, {pipeline_mode = #tpu.pipeline_mode<synchronous>, transform_indices = @transform_1, window_bounds = array<i64: 64, 64>}, {pipeline_mode = #tpu.pipeline_mode<synchronous>, transform_indices = @transform_2, window_bounds = array<i64: 1, 64>}, {transform_indices = @transform_3, window_bounds = array<i64: 1, 16, 64>}]} {
    %0 = arith.index_cast %arg0 : i32 to index
    %1 = memref.load %arg1[%0] : memref<2xi32, #tpu.memory_space<smem>>
    %c0 = arith.constant 0 : index
    %c0_0 = arith.constant 0 : index
    %c0_1 = arith.constant 0 : index
    %2 = vector.load %arg2[%c0, %c0_0, %c0_1] : memref<1x16x64xf32, #tpu.memory_space<vmem>>, vector<1x16x64xf32>
    %3 = vector.shape_cast %2 : vector<1x16x64xf32> to vector<16x64xf32>
    %4 = tpu.iota {dimensions = array<i32: 0>} : vector<16x1xi32>
    %5 = vector.broadcast %1 : i32 to vector<16x1xi32>
    %6 = arith.cmpi slt, %4, %5 : vector<16x1xi32>
    %7 = arith.truncf %3 : vector<16x64xf32> to vector<16x64xbf16>
    %c0_2 = arith.constant 0 : index
    %c0_3 = arith.constant 0 : index
    %8 = vector.load %arg3[%c0_2, %c0_3] : memref<64x64xbf16, #tpu.memory_space<vmem>>, vector<64x64xbf16>
    %cst = arith.constant dense<0.000000e+00> : vector<16x64xf32>
    %9 = tpu.matmul %7, %8, %cst {dimension_numbers = #tpu.dot_dimension_numbers<[1], [0], [0], [1], [0, 0, 1, 1], [], []>} : vector<16x64xbf16>, vector<64x64xbf16>, vector<16x64xf32> -> vector<16x64xf32>
    %c0_4 = arith.constant 0 : index
    %c0_5 = arith.constant 0 : index
    %10 = vector.load %arg4[%c0_4, %c0_5] : memref<1x64xf32, #tpu.memory_space<vmem>>, vector<1x64xf32>
    %11 = vector.broadcast %10 : vector<1x64xf32> to vector<16x64xf32>
    %12 = arith.addf %9, %11 : vector<16x64xf32>
    %cst_6 = arith.constant 0.000000e+00 : f32
    %13 = vector.shape_cast %6 : vector<16x1xi1> to vector<16x1xi1>
    %14 = vector.broadcast %13 : vector<16x1xi1> to vector<16x64xi1>
    %15 = vector.broadcast %cst_6 : f32 to vector<16x64xf32>
    %16 = arith.select %14, %12, %15 : vector<16x64xi1>, vector<16x64xf32>
    %c0_7 = arith.constant 0 : index
    %c0_8 = arith.constant 0 : index
    %c0_9 = arith.constant 0 : index
    %17 = vector.load %arg5[%c0_7, %c0_8, %c0_9] : memref<1x16x64xf32, #tpu.memory_space<vmem>>, vector<1x16x64xf32>
    %18 = vector.shape_cast %17 : vector<1x16x64xf32> to vector<16x64xf32>
    %19 = vector.shape_cast %16 : vector<16x64xf32> to vector<1x16x64xf32>
    tpu.vector_store %arg5[%c0_7, %c0_8, %c0_9], %19 {strides = array<i32>} : memref<1x16x64xf32, #tpu.memory_space<vmem>>, vector<1x16x64xf32>,
    return
  }
  func.func @transform_0(%arg0: i32, %arg1: memref<2xi32, #tpu.memory_space<smem>>) -> (i32, i32, i32) {
    %c0_i32 = arith.constant 0 : i32
    %c0_i32_0 = arith.constant 0 : i32
    %c0_i32_1 = arith.constant 0 : i32
    return %arg0, %c0_i32, %c0_i32_0 : i32, i32, i32
  }
  func.func @transform_1(%arg0: i32, %arg1: memref<2xi32, #tpu.memory_space<smem>>) -> (i32, i32) {
    %c0_i32 = arith.constant 0 : i32
    %c0_i32_0 = arith.constant 0 : i32
    %c0_i32_1 = arith.constant 0 : i32
    return %c0_i32, %c0_i32_0 : i32, i32
  }
  func.func @transform_2(%arg0: i32, %arg1: memref<2xi32, #tpu.memory_space<smem>>) -> (i32, i32) {
    %c0_i32 = arith.constant 0 : i32
    %c0_i32_0 = arith.constant 0 : i32
    %c0_i32_1 = arith.constant 0 : i32
    return %c0_i32, %c0_i32_0 : i32, i32
  }
  func.func @transform_3(%arg0: i32, %arg1: memref<2xi32, #tpu.memory_space<smem>>) -> (i32, i32, i32) {
    %c0_i32 = arith.constant 0 : i32
    %c0_i32_0 = arith.constant 0 : i32
    %c0_i32_1 = arith.constant 0 : i32
    return %arg0, %c0_i32, %c0_i32_0 : i32, i32, i32
  }
}

</mosaic_0001>

<bundles_post_ra>
// kernel: text_encoder_forward.7
= control target key start
LH: loop header
LB: loop body
LE: loop exit
PB: predicated region body
PF: predicated region fallthrough
CT: control target
= control target key end

     0   :  { %s1269_s0 = inlined_call_operand.vmem [shape: s32[2], index: 0, kind: input, shape index: {}]   ;;  %s1270_s1 = inlined_call_operand.vmem [shape: f32[2,16,768], index: 1, kind: input, shape index: {}]   ;;  %s1271_s2 = inlined_call_operand.vmem [shape: bf16[768,64], index: 2, kind: input, shape index: {}]   ;;  %s1272_s3 = inlined_call_operand.vmem [shape: f32[1,64], index: 3, kind: input, shape index: {}]   ;;  %s1273_s4 = inlined_call_operand.vmem [shape: f32[2,16,64], index: 4, kind: output, shape index: {}]  }
   0x1   :  { %s9_s17 = sshll.u32 %s1269_s0, 4  ;;  %s10_s17 = int_to_ptr.vmem [resolvable:$true] %s9_s17 }
   0x2   :  { %s996_s18 = scalar_lea.vmem %s10_s17, 16  ;;  %p1001_p1 = scmp.lt.s32.totalorder %s10_s17, %s10_s17 }
   0x3   :  { %p997_p0 = scmp.ne.s32.totalorder %s10_s17, %s996_s18  ;;  %p1002_p2 = scmp.lt.s32.totalorder %s996_s18, %s996_s18 }
   0x5   :  { %p1003_p3 = por %p1002_p2, %p1001_p1 }
   0x7   :  { %p1004_p4 = pnand %p1003_p3, %p997_p0 }
   0x9   :  { %1007 = shalt.err (!%p1004_p4)  }
   0xa   :  { %s1018_s19 = smov [#allocation3]  }
   0xb   :  { %12 = dma.vmem_to_smem %s10_s17, 16, %s1018_s19, [#allocation2] }
   0xc   :  { %1012 = dma.done.wait [#allocation2], 16 }
   0xd   :  { %1013 = vsyncadd [#allocation2], 4294967280 }
   0xe   :  { %14 = sfence }
   0xf   :  { %s1047_s20 = smov 0  }
  0x10 LB: > { %s1053_s0 = sadd.s32 4294967295, %s1016_s20   ;;  %p798_p5 = scmp.ge.s32.totalorder %s1016_s20, 1  ;;  %s1016_s20 = sphi %s1047_s20, %s20_s20  }
  0x11   : > { %p144_p6 = scmp.lt.s32.totalorder %s1016_s20, 3 }
  0x13   : > { %p145_p7 = pnand %p798_p5, %p144_p6 }
  0x14   : > { %v948_v0 = vld [vmem:[%s1271_s2 + $0x40] sm:$0xff] (!%p145_p7)   ;;  %v952_v4 = vld [vmem:[%s1271_s2 + $0x48] sm:$0xff] (!%p145_p7)   ;;  %v956_v8 = vld [vmem:[%s1271_s2 + $0x50] sm:$0xff] (!%p145_p7)   ;;  %p168_p8 = scmp.lt.s32.totalorder (!%p145_p7), %s1053_s0, 1  ;;  %v192_v17 = vlaneseq (!%p145_p7)  ;;  %s1113_s6 = sld [smem:[#allocation3 + %s1053_s0]] (!%p145_p7)  ;;  %vm736_vm3 = vcmask (!%p145_p7), 523264  }
  0x15   : > { %148 = sbr.rel (%p145_p7) target bundleno = 306 (0x132), region = 32  ;;  %v949_v1 = vld [vmem:[%s1271_s2] sm:$0xff] (!%p145_p7)   ;;  %872 = vmatprep.subr.bf16.mxu0 (!%p145_p7), %v948_v0  ;;  %v953_v5 = vld [vmem:[%s1271_s2 + $0x8] sm:$0xff] (!%p145_p7)   ;;  %v957_v9 = vld [vmem:[%s1271_s2 + $0x10] sm:$0xff] (!%p145_p7)  }
  0x16   : > { %v950_v2 = vld [vmem:[%s1271_s2 + $0xc0] sm:$0xff] (!%p145_p7)   ;;  %873 = vmatpush3.bf16.msra.mxu0 (!%p145_p7), %v949_v1  ;;  %v954_v6 = vld [vmem:[%s1271_s2 + $0xc8] sm:$0xff] (!%p145_p7)   ;;  %v958_v10 = vld [vmem:[%s1271_s2 + $0xd0] sm:$0xff] (!%p145_p7)   ;;  %v193_v22 = vshrl.u32 (!%p145_p7), %v192_v17, 7 }
  0x17   : > { %v951_v3 = vld [vmem:[%s1271_s2 + $0x80] sm:$0xff] (!%p145_p7)   ;;  %894 = vmatprep.subr.bf16.mxu1 (!%p145_p7), %v950_v2  ;;  %874 = vmatprep.subr.bf16.mxu0 (!%p145_p7), %v952_v4  ;;  %v955_v7 = vld [vmem:[%s1271_s2 + $0x88] sm:$0xff] (!%p145_p7)   ;;  %v959_v11 = vld [vmem:[%s1271_s2 + $0x90] sm:$0xff] (!%p145_p7)  }
  0x18   : > { %895 = vmatpush3.bf16.msra.mxu1 (!%p145_p7), %v951_v3  ;;  %v960_v12 = vld [vmem:[%s1271_s2 + $0x58] sm:$0xff] (!%p145_p7)   ;;  %v964_v16 = vld [vmem:[%s1271_s2 + $0x60] sm:$0xff] (!%p145_p7)   ;;  %v968_v21 = vld [vmem:[%s1271_s2 + $0x68] sm:$0xff] (!%p145_p7)   ;;  %v194_v27 = vadd.s32 (!%p145_p7), 8, %v193_v22 }
  0x19   : > { %896 = vmatprep.subr.bf16.mxu1 (!%p145_p7), %v954_v6  ;;  %v961_v13 = vld [vmem:[%s1271_s2 + $0x18] sm:$0xff] (!%p145_p7)   ;;  %v965_v18 = vld [vmem:[%s1271_s2 + $0x20] sm:$0xff] (!%p145_p7)   ;;  %v969_v23 = vld [vmem:[%s1271_s2 + $0x28] sm:$0xff] (!%p145_p7)  }
  0x1a   : > { %875 = vmatpush3.bf16.msra.mxu0 (!%p145_p7), %v953_v5  ;;  %v962_v14 = vld [vmem:[%s1271_s2 + $0xd8] sm:$0xff] (!%p145_p7)   ;;  %v966_v19 = vld [vmem:[%s1271_s2 + $0xe0] sm:$0xff] (!%p145_p7)   ;;  %v970_v24 = vld [vmem:[%s1271_s2 + $0xe8] sm:$0xff] (!%p145_p7)   ;;  %v195_v29 = vstv (!%p145_p7), %s1113_s6 }
  0x1b   : > { %876 = vmatprep.subr.bf16.mxu0 (!%p145_p7), %v956_v8  ;;  %v963_v15 = vld [vmem:[%s1271_s2 + $0x98] sm:$0xff] (!%p145_p7)   ;;  %v967_v20 = vld [vmem:[%s1271_s2 + $0xa0] sm:$0xff] (!%p145_p7)   ;;  %v971_v25 = vld [vmem:[%s1271_s2 + $0xa8] sm:$0xff] (!%p145_p7)   ;;  %vm1158_vm0 = vcmp.lt.s32.totalorder (!%p145_p7), %v193_v22, %v195_v29  ;;  %vm1162_vm1 = vcmp.lt.s32.totalorder (!%p145_p7), %v194_v27, %v195_v29 }
  0x1c   : > { %897 = vmatpush3.bf16.msra.mxu1 %v955_v7  ;;  %s1281_s0 = smov (!%p168_p8, %s1053_s0), 1  ;;  %v972_v26 = vld [vmem:[%s1271_s2 + $0x70] sm:$0xff]   ;;  %v976_v32 = vld [vmem:[%s1271_s2 + $0x78] sm:$0xff]   ;;  %vm1178_vm2 = vmpackc.low %vm1162_vm1, %vm1158_vm0 }
  0x1d   : > { %898 = vmatprep.subr.bf16.mxu1 %v958_v10  ;;  %s938_s19 = smul.u32 96, %s1281_s0  ;;  %v973_v28 = vld [vmem:[%s1271_s2 + $0x30] sm:$0xff]   ;;  %v977_v35 = vld [vmem:[%s1271_s2 + $0x38] sm:$0xff]   ;;  %v980_v45 = vld [vmem:[%s1271_s2 + $0x140] sm:$0xff]  }
  0x1e   : > { %877 = vmatpush3.bf16.msra.mxu0 %v957_v9  ;;  %v974_v30 = vld [vmem:[%s1271_s2 + $0xf0] sm:$0xff]   ;;  %v978_v36 = vld [vmem:[%s1271_s2 + $0xf8] sm:$0xff]   ;;  %v981_v49 = vld [vmem:[%s1271_s2 + $0x100] sm:$0xff]  }
  0x1f   : > { %878 = vmatprep.subr.bf16.mxu0 %v960_v12  ;;  %v975_v31 = vld [vmem:[%s1271_s2 + $0xb0] sm:$0xff]   ;;  %s1156_s8 = scalar_lea.vmem %s1270_s1, %s938_s19  ;;  %v979_v41 = vld [vmem:[%s1271_s2 + $0xb8] sm:$0xff]   ;;  %v982_v53 = vld [vmem:[%s1271_s2 + $0x148] sm:$0xff]  }
  0x20   : > { %899 = vmatpush3.bf16.msra.mxu1 %v959_v11  ;;  %v181_v37 = vld [vmem:[%s1156_s8 + $0x8] sm:$0xff]  ;;  %v187_v38 = vld [vmem:[%s1156_s8 + $0x38] sm:$0xff]  ;;  %v180_v42 = vld [vmem:[%s1156_s8] sm:$0xff] }
  0x21   : > { %900 = vmatprep.subr.bf16.mxu1 %v962_v14  ;;  %v852_v40 = vpack.c.bf16 %v187_v38, %v181_v37  ;;  %v186_v43 = vld [vmem:[%s1156_s8 + $0x30] sm:$0xff]  ;;  %v183_v46 = vld [vmem:[%s1156_s8 + $0x18] sm:$0xff]  ;;  %v189_v47 = vld [vmem:[%s1156_s8 + $0x48] sm:$0xff] }
  0x22   : > { %879 = vmatpush3.bf16.msra.mxu0 %v961_v13  ;;  %v855_v44 = vpack.c.bf16 %v186_v43, %v180_v42  ;;  %v858_v48 = vpack.c.bf16 %v189_v47, %v183_v46  ;;  %v182_v50 = vld [vmem:[%s1156_s8 + $0x10] sm:$0xff]  ;;  %v188_v51 = vld [vmem:[%s1156_s8 + $0x40] sm:$0xff]  ;;  %v983_v54 = vld [vmem:[%s1271_s2 + $0x108] sm:$0xff]  }
  0x23   : > { %880 = vmatprep.subr.bf16.mxu0 %v964_v16  ;;  %853 = vmatprep.mubr.msk.bf16.mxu0 %vm1178_vm2, %v852_v40  ;;  %v861_v52 = vpack.c.bf16 %v188_v51, %v182_v50  ;;  %v984_v55 = vld [vmem:[%s1271_s2 + $0x150] sm:$0xff]   ;;  %v986_v57 = vld [vmem:[%s1271_s2 + $0x158] sm:$0xff]   ;;  %v988_v59 = vld [vmem:[%s1271_s2 + $0x160] sm:$0xff]  }
  0x24   : > { %901 = vmatpush3.bf16.msra.mxu1 %v963_v15  ;;  %859 = vmatprep.mubr.msk.bf16.mxu1 %vm1178_vm2, %v858_v48  ;;  %v985_v56 = vld [vmem:[%s1271_s2 + $0x110] sm:$0xff]   ;;  %v987_v58 = vld [vmem:[%s1271_s2 + $0x118] sm:$0xff]   ;;  %v989_v60 = vld [vmem:[%s1271_s2 + $0x120] sm:$0xff]  }
  0x25   : > { %902 = vmatprep.subr.bf16.mxu1 %v966_v19  ;;  %v990_v61 = vld [vmem:[%s1271_s2 + $0x168] sm:$0xff]   ;;  %v191_v63 = vld [vmem:[%s1156_s8 + $0x58] sm:$0xff]  ;;  %v992_v2 = vld [vmem:[%s1271_s2 + $0x170] sm:$0xff]  }
  0x26   : > { %881 = vmatpush3.bf16.msra.mxu0 %v965_v18  ;;  %v185_v62 = vld [vmem:[%s1156_s8 + $0x28] sm:$0xff]  ;;  %v993_v3 = vld [vmem:[%s1271_s2 + $0x130] sm:$0xff]   ;;  %v994_v4 = vld [vmem:[%s1271_s2 + $0x178] sm:$0xff]  }
  0x27   : > { %882 = vmatprep.subr.bf16.mxu0 %v968_v21  ;;  %v864_v0 = vpack.c.bf16 %v191_v63, %v185_v62  ;;  %v991_v1 = vld [vmem:[%s1271_s2 + $0x128] sm:$0xff]   ;;  %v995_v5 = vld [vmem:[%s1271_s2 + $0x138] sm:$0xff]   ;;  %v184_v6 = vld [vmem:[%s1156_s8 + $0x20] sm:$0xff] }
  0x28   : > { %903 = vmatpush3.bf16.msra.mxu1 %v967_v20  ;;  %v190_v7 = vld [vmem:[%s1156_s8 + $0x50] sm:$0xff]  ;;  %v802_v10 = vld [vmem:[%s1272_s3] ss:$0 sm:$0xff]  ;;  %s871_s8 = sshll.u32 %s1281_s0, 4 }
  0x29   : > { %904 = vmatprep.subr.bf16.mxu1 %v970_v24  ;;  %v867_v8 = vpack.c.bf16 %v190_v7, %v184_v6  ;;  %s177_s27 = scalar_lea.vmem %s1273_s4, %s871_s8 }
  0x2a   : > { %883 = vmatpush3.bf16.msra.mxu0 %v969_v23 }
  0x2b   : > { %884 = vmatprep.subr.bf16.mxu0 %v972_v26 }
  0x2c   : > { %905 = vmatpush3.bf16.msra.mxu1 %v971_v25 }
  0x2d   : > { %906 = vmatprep.subr.bf16.mxu1 %v974_v30 }
  0x2e   : > { %885 = vmatpush3.bf16.msra.mxu0 %v973_v28 }
  0x2f   : > { %886 = vmatprep.subr.bf16.mxu0 %v976_v32 }
  0x30   : > { %907 = vmatpush3.bf16.msra.mxu1 %v975_v31 }
  0x31   : > { %908 = vmatprep.subr.bf16.mxu1 %v978_v36 }
  0x32   : > { %887 = vmatpush3.bf16.msra.mxu0 %v977_v35 }
  0x33   : > { %916 = vmatprep.subr.bf16.mxu0 %v980_v45 }
  0x34   : > { %909 = vmatpush3.bf16.msra.mxu1 %v979_v41 }
  0x35   : > { %856 = vmatmul.mubr.msk.bf16.vlgmr.msra.gmra.mrb[0].mxu0 %vm1178_vm2, %v855_v44 }
  0x36   : > { %917 = vmatpush3.bf16.msra.mxu0 %v981_v49  ;;  %865 = vmatprep.mubr.msk.bf16.mxu0 %vm1178_vm2, %v864_v0 }
  0x37   : > { %862 = vmatmul.mubr.msk.bf16.vlgmr.msra.gmra.mrb[0].mxu1 %vm1178_vm2, %v861_v52  ;;  %918 = vmatprep.subr.bf16.mxu0 %v982_v53 }
  0x3a   : > { %919 = vmatpush3.bf16.msra.mxu0 %v983_v54 }
  0x3b   : > { %920 = vmatprep.subr.bf16.mxu0 %v984_v55 }
  0x3e   : > { %921 = vmatpush3.bf16.msra.mxu0 %v985_v56 }
  0x3f   : > { %922 = vmatprep.subr.bf16.mxu0 %v986_v57 }
  0x42   : > { %923 = vmatpush3.bf16.msra.mxu0 %v987_v58 }
  0x43   : > { %924 = vmatprep.subr.bf16.mxu0 %v988_v59 }
  0x46   : > { %925 = vmatpush3.bf16.msra.mxu0 %v989_v60 }
  0x47   : > { %926 = vmatprep.subr.bf16.mxu0 %v990_v61 }
  0x4a   : > { %927 = vmatpush3.bf16.msra.mxu0 %v991_v1 }
  0x4b   : > { %928 = vmatprep.subr.bf16.mxu0 %v992_v2 }
  0x4e   : > { %929 = vmatpush3.bf16.msra.mxu0 %v993_v3 }
  0x4f   : > { %930 = vmatprep.subr.bf16.mxu0 %v994_v4 }
  0x52   : > { %931 = vmatpush3.bf16.msra.mxu0 %v995_v5 }
  0x55   : > { %868 = vmatmul.mubr.msk.bf16.vlgmr.msra.gmra.mrb[4].mxu0 %vm1178_vm2, %v867_v8 }
 0x108   : > { %v888_v9 = vpop.f32.mrb[0].mxu0 }
 0x109   : > { %v889_v11 = vpop.f32.mrb[1].mxu0 }
 0x10a   : > { %v890_v12 = vadd.f32 %v889_v11, %v888_v9  ;;  %v891_v13 = vpop.f32.mrb[2].mxu0  ;;  %v910_v14 = vpop.f32.mrb[0].mxu1 }
 0x10b   : > { %v892_v15 = vpop.f32.mrb[3].mxu0  ;;  %v911_v18 = vpop.f32.mrb[1].mxu1 }
 0x10c   : > { %v646_v16 = vadd.f32 %v890_v12, %v802_v10  ;;  %v893_v17 = vadd.f32 %v892_v15, %v891_v13  ;;  %v912_v19 = vadd.f32 %v911_v18, %v910_v14  ;;  %v913_v20 = vpop.f32.mrb[2].mxu1 }
 0x10d   : > { %v914_v22 = vpop.f32.mrb[3].mxu1 }
 0x10e   : > { %v649_v21 = vadd.f32 %v893_v17, %v802_v10  ;;  %v687_v23 = vadd.f32 %v912_v19, %v646_v16  ;;  %v915_v24 = vadd.f32 %v914_v22, %v913_v20 }
 0x110   : > { %v690_v25 = vadd.f32 %v915_v24, %v649_v21 }
 0x128   : > { %v932_v26 = vpop.f32.mrb[4].mxu0 }
 0x129   : > { %v933_v27 = vpop.f32.mrb[5].mxu0 }
 0x12a   : > { %v934_v28 = vadd.f32 %v933_v27, %v932_v26  ;;  %v935_v29 = vpop.f32.mrb[6].mxu0 }
 0x12b   : > { %v936_v30 = vpop.f32.mrb[7].mxu0 }
 0x12c   : > { %v728_v31 = vadd.f32 %v934_v28, %v687_v23  ;;  %v937_v32 = vadd.f32 %v936_v30, %v935_v29 }
 0x12e   : > { %v734_v35 = vsel %vm1158_vm0, %v728_v31, 0.0  ;;  %v731_v36 = vadd.f32 %v937_v32, %v690_v25 }
 0x12f   : > { %737 = vst.msk [vmem:[%s177_s27] sm:$0xff] %vm736_vm3, %v734_v35 }
 0x130   : > { %v735_v37 = vsel %vm1162_vm1, %v731_v36, 0.0 }
 0x131   : > { %738 = vst.msk [vmem:[%s177_s27 + $0x8] sm:$0xff] %vm736_vm3, %v735_v37 }
 0x132 PF: > { %s20_s20 = sadd.s32 1, %s1016_s20  }
 0x133   : > { %p17_p9 = scmp.ge.s32.totalorder %s20_s20, 4  }
 0x135   :  { %19 = sbr.rel (!%p17_p9) target bundleno = 16 (0x10), region = 62 }

// kernel: text_encoder_forward.10
= control target key start
LH: loop header
LB: loop body
LE: loop exit
PB: predicated region body
PF: predicated region fallthrough
CT: control target
= control target key end

     0   :  { %s2756_s0 = inlined_call_operand.vmem [shape: s32[2], index: 0, kind: input, shape index: {}]   ;;  %s2757_s1 = inlined_call_operand.vmem [shape: f32[2,8,64], index: 1, kind: input, shape index: {}]   ;;  %s2758_s2 = inlined_call_operand.vmem [shape: bf16[3,64,64], index: 2, kind: input, shape index: {}]   ;;  %s2759_s3 = inlined_call_operand.vmem [shape: f32[3,1,64], index: 3, kind: input, shape index: {}]   ;;  %s2760_s4 = inlined_call_operand.hbm [shape: bf16[64,64], index: 4, kind: input, shape index: {}]   ;;  %s2761_s5 = inlined_call_operand.vmem [shape: f32[1,64], index: 5, kind: input, shape index: {}, may-alias: {5,7,11,13}]   ;;  %s2762_s6 = inlined_call_operand.vmem [shape: f32[1,64], index: 6, kind: input, shape index: {}, may-alias: {6,12}]   ;;  %s2763_s7 = inlined_call_operand.vmem [shape: f32[1,64], index: 7, kind: input, shape index: {}, may-alias: {5,7,11,13}]   ;;  %s2764_s8 = inlined_call_operand.vmem [shape: bf16[3,64,128], index: 8, kind: input, shape index: {}]   ;;  %s2765_s9 = inlined_call_operand.vmem [shape: f32[1,128], index: 9, kind: input, shape index: {}]   ;;  %s2766_s10 = inlined_call_operand.vmem [shape: bf16[3,128,64], index: 10, kind: input, shape index: {}]   ;;  %s2767_s11 = inlined_call_operand.vmem [shape: f32[1,64], index: 11, kind: input, shape index: {}, may-alias: {5,7,11,13}]   ;;  %s2768_s12 = inlined_call_operand.vmem [shape: f32[1,64], index: 12, kind: input, shape index: {}, may-alias: {6,12}]   ;;  %s2769_s13 = inlined_call_operand.vmem [shape: f32[1,64], index: 13, kind: input, shape index: {}, may-alias: {5,7,11,13}]   ;;  %s2770_s14 = inlined_call_operand.vmem [shape: f32[2,8,64], index: 14, kind: output, shape index: {}]  }
   0x1   :  { %s19_s15 = sshll.u32 %s2756_s0, 4  ;;  %s20_s15 = int_to_ptr.vmem [resolvable:$true] %s19_s15 }
   0x2   :  { %s2235_s16 = scalar_lea.vmem %s20_s15, 16  ;;  %p2240_p1 = scmp.lt.s32.totalorder %s20_s15, %s20_s15 }
   0x3   :  { %p2236_p0 = scmp.ne.s32.totalorder %s20_s15, %s2235_s16  ;;  %p2241_p2 = scmp.lt.s32.totalorder %s2235_s16, %s2235_s16 }
   0x5   :  { %p2242_p3 = por %p2241_p2, %p2240_p1 }
   0x7   :  { %p2243_p4 = pnand %p2242_p3, %p2236_p0 }
   0x9   :  { %2246 = shalt.err (!%p2243_p4)  }
   0xa   :  { %s2289_s17 = smov [#allocation3]  }
   0xb   :  { %22 = dma.vmem_to_smem %s20_s15, 16, %s2289_s17, [#allocation2] }
   0xc   :  { %2279 = dma.done.wait [#allocation2], 16 }
   0xd   :  { %2280 = vsyncadd [#allocation2], 4294967280 }
   0xe   :  { %24 = sfence }
   0xf   :  { %25 = vsyncpa [#allocation5], 0  ;;  %s2375_s18 = smov 0  }
  0x10 LB: > { %s2381_s0 = sadd.s32 4294967295, %s2287_s18   ;;  %p1748_p5 = scmp.ge.s32.totalorder %s2287_s18, 1  ;;  %s2287_s18 = sphi %s2375_s18, %s31_s18  }
  0x11   : > { %p340_p6 = scmp.lt.s32.totalorder %s2287_s18, 3  ;;  %s2290_s19 = smov [#allocation4]  }
  0x12   : > { %s358_s20 = sshll.u32 %s2290_s19, 4  ;;  %p2771_p8 = scmp.eq.s32.totalorder %s2381_s0, 0  ;;  %s359_s20 = int_to_ptr.vmem [resolvable:$true] %s358_s20 }
  0x13   : > { %p2385_p7 = pnand %p1748_p5, %p340_p6  ;;  %s2247_s25 = scalar_lea.hbm %s2760_s4, 512 }
  0x14   : > { %p2248_p11 = scmp.ne.s32.totalorder %s2760_s4, %s2247_s25  ;;  %p2254_p1 = scmp.lt.u32.totalorder %s2247_s25, %s2760_s4 }
  0x15   : > { %s2773_s21 = scalar_select %p2385_p7, 1, 0 }
  0x16   : > { %p2149_p9 = pneg %p2385_p7 }
  0x18   : > { %p2394_p10 = pnand %p2771_p8, %p2149_p9 }
  0x1a   : > { %p2249_p12 = pneg %p2394_p10 }
  0x1c   : > { %p2250_p13 = pnand %p2249_p12, %p2248_p11 }
  0x1e   : > { %p2251_p0 = pneg %p2250_p13 }
  0x20   : > { %p2256_p2 = pnand %p2254_p1, %p2251_p0 }
  0x22   : > { %2259 = shalt.err (!%p2256_p2)
}
  0x23   : > { %s2260_s30 = scalar_lea.vmem %s359_s20, 512  ;;  %p2268_p6 = scmp.lt.s32.totalorder %s359_s20, %s359_s20 }
  0x24   : > { %p2261_p3 = scmp.ne.s32.totalorder %s359_s20, %s2260_s30  ;;  %p2269_p9 = scmp.lt.s32.totalorder %s2260_s30, %s2260_s30 }
  0x26   : > { %p2263_p4 = pnand %p2261_p3, %p2249_p12  ;;  %p2270_p8 = por %p2269_p9, %p2268_p6 }
  0x28   : > { %p2264_p5 = pneg %p2263_p4 }
  0x2a   : > { %p2271_p7 = pnand %p2270_p8, %p2264_p5 }
  0x2c   : > { %2274 = shalt.err (!%p2271_p7)
}
  0x2d   : > { %s2291_s15 = smov 64   ;;  %s2292_s16 = smov 4  }
  0x2e   : > { %2152 = dma.hbm_to_vmem [thread:$0]  (!%p2394_p10), %s2760_s4, 512, %s359_s20, [#allocation5], %s2291_s15, %s2291_s15, %s2292_s16  }
  0x2f   : > { %p2775_p11 = scmp.ne.s32.totalorder %s2773_s21, 0 }
  0x30   : > { %p2776_p13 = scmp.eq.s32.totalorder (!%p2775_p11), %s2381_s0, 0 }
  0x31   : > { %408 = sbr.rel (%p2775_p11) target bundleno = 2623 (0xa3f), region = 72 }
  0x38   : > { %2282 = dma.done.wait (%p2776_p13), [#allocation5], 512   ;;  %p2777_p12 = pmov %p2776_p13 }
  0x39   : > { %v2293_v0 = vmov 0.0   ;;  %vm2294_vm0 = vmmov 0   ;;  %p450_p7 = scmp.lt.s32.totalorder %s2381_s0, 1  ;;  %v2171_v1 = vld [vmem:[%s2758_s2] sm:$0xff]   ;;  %v2172_v2 = vld [vmem:[%s2758_s2 + $0x8] sm:$0xff]   ;;  %v2173_v3 = vld [vmem:[%s2758_s2 + $0x10] sm:$0xff]   ;;  %v461_v42 = vlaneseq }
  0x3a   : > { %2284 = vsyncadd (%p2777_p12), [#allocation5], 4294966784  ;;  %1977 = vmatprep.subr.bf16.mxu1 %v2293_v0  ;;  %1985 = vmatprep.mubr.msk.bf16.mxu1 %vm2294_vm0, %v2293_v0  ;;  %v2174_v4 = vld [vmem:[%s2758_s2 + $0x18] sm:$0xff]   ;;  %vm517_vm1 = vcmask 523264   ;;  %v2175_v6 = vld [vmem:[%s2758_s2 + $0x20] sm:$0xff]   ;;  %vm732_vm2 = vcmask 261120  }
  0x3b   : > { %2001 = vmatprep.subr.bf16.mxu0 %v2293_v0  ;;  %2009 = vmatprep.mubr.msk.bf16.mxu0 %vm2294_vm0, %v2293_v0  ;;  %s2428_s20 = scalar_select %p450_p7, %s2381_s0, 1  ;;  %v2176_v8 = vld [vmem:[%s2758_s2 + $0x28] sm:$0xff]   ;;  %v2177_v9 = vld [vmem:[%s2758_s2 + $0x30] sm:$0xff]   ;;  %v2178_v10 = vld [vmem:[%s2758_s2 + $0x38] sm:$0xff]   ;;  %vm796_vm3 = vcmask 1043456   ;;  %v462_v43 = vshrl.u32 %v461_v42, 7 }
  0x3c   : > { %1978 = vmatpush3.bf16.msra.mxu1 %v2171_v1  ;;  %v2179_v11 = vld [vmem:[%s2758_s2 + $0x40] sm:$0xff]   ;;  %v2180_v12 = vld [vmem:[%s2758_s2 + $0x48] sm:$0xff]   ;;  %v2181_v13 = vld [vmem:[%s2758_s2 + $0x50] sm:$0xff]   ;;  %s2295_s27 = smov 96   ;;  %s459_s30 = sld [smem:[#allocation3 + %s2381_s0]]  ;;  %v466_v44 = vand.u32 127, %v461_v42 }
  0x3d   : > { %s1753_s25 = sshll.u32 %s2428_s20, 3  ;;  %1979 = vmatprep.subr.bf16.mxu1 %v2293_v0  ;;  %2002 = vmatpush3.bf16.msra.mxu0 %v2179_v11  ;;  %v2182_v14 = vld [vmem:[%s2758_s2 + $0x58] sm:$0xff]   ;;  %v1755_v19 = vld [vmem:[%s2759_s3] ss:$0 sm:$0xff]  ;;  %v1770_v20 = vld [vmem:[%s2759_s3 + $0x1] ss:$0 sm:$0xff] }
  0x3e   : > { %s453_s28 = scalar_lea.vmem %s2757_s1, %s1753_s25  ;;  %2003 = vmatprep.subr.bf16.mxu0 %v2293_v0  ;;  %v1785_v31 = vld [vmem:[%s2759_s3 + $0x2] ss:$0 sm:$0xff]  ;;  %vm780_vm7 = vcmask 64512   ;;  %s2296_s0 = smov 32   ;;  %vm1070_vm8 = vcmask 1040384   ;;  %vm1074_vm9 = vcmask 1046528  }
  0x3f   : > { %v2450_v5 = vld [vmem:[%s453_s28] sm:$0xff]  ;;  %vm1870_vm11 = vmneg %vm1070_vm8  ;;  %s457_s21 = scalar_lea.vmem %s2770_s14, %s1753_s25 }
  0x40   : > { %1980 = vmatpush3.bf16.msra.mxu1 %v2172_v2  ;;  %v477_v7 = vpack.c.bf16 %v2450_v5, %v2450_v5  ;;  %vm1872_vm12 = vmpackc.low %vm1870_vm11, %vm1870_vm11 }
  0x41   : > { %1981 = vmatprep.subr.bf16.mxu1 %v2293_v0  ;;  %2004 = vmatpush3.bf16.msra.mxu0 %v2180_v12  ;;  %vm1899_vm13 = vmpackc.low %vm1074_vm9, %vm1074_vm9 }
  0x42   : > { %2005 = vmatprep.subr.bf16.mxu0 %v2293_v0  ;;  %v463_v45 = vstv %s459_s30 }
  0x43   : > { %vm2521_vm4 = vcmp.lt.s32.totalorder %v462_v43, %v463_v45  ;;  %vm467_vm5 = vcmp.lt.s32.totalorder %v466_v44, %v463_v45  ;;  %v2187_v45 = vld [vmem:[%s2764_s8 + $0x20] sm:$0xff]  }
  0x44   : > { %1982 = vmatpush3.bf16.msra.mxu1 %v2173_v3  ;;  %vm727_vm6 = vmand %vm2521_vm4, %vm467_vm5 }
  0x45   : > { %1983 = vmatprep.subr.bf16.mxu1 %v2293_v0  ;;  %2006 = vmatpush3.bf16.msra.mxu0 %v2181_v13  ;;  %vm1859_vm10 = vmpackc.low %vm2521_vm4, %vm2521_vm4 }
  0x46   : > { %2007 = vmatprep.subr.bf16.mxu0 %v2293_v0 }
  0x48   : > { %1984 = vmatpush3.bf16.msra.mxu1 %v2174_v4 }
  0x49   : > { %1989 = vmatprep.subr.bf16.mxu1 %v2293_v0  ;;  %2008 = vmatpush3.bf16.msra.mxu0 %v2182_v14 }
  0x4a   : > { %2025 = vmatprep.subr.bf16.mxu0 %v2293_v0 }
  0x4b   : > { %1986 = vmatmul.mubr.msk.bf16.vlgmr.msra.gmra.mrb[0].mxu1 %vm517_vm1, %v477_v7 }
  0x4c   : > { %1990 = vmatpush3.bf16.msra.mxu1 %v2175_v6  ;;  %1997 = vmatprep.mubr.msk.bf16.mxu1 %vm2294_vm0, %v2293_v0 }
  0x4d   : > { %1991 = vmatprep.subr.bf16.mxu1 %v2293_v0  ;;  %2010 = vmatmul.mubr.msk.bf16.vlgmr.msra.gmra.mrb[0].mxu0 %vm517_vm1, %v477_v7 }
  0x4e   : > { %2027 = vmatprep.mubr.msk.bf16.mxu0 %vm2294_vm0, %v2293_v0 }
  0x50   : > { %1992 = vmatpush3.bf16.msra.mxu1 %v2176_v8 }
  0x51   : > { %1993 = vmatprep.subr.bf16.mxu1 %v2293_v0 }
  0x54   : > { %1994 = vmatpush3.bf16.msra.mxu1 %v2177_v9 }
  0x55   : > { %1995 = vmatprep.subr.bf16.mxu1 %v2293_v0 }
  0x58   : > { %1996 = vmatpush3.bf16.msra.mxu1 %v2178_v10 }
  0x59   : > { %2013 = vmatprep.subr.bf16.mxu1 %v2293_v0 }
  0x5b   : > { %1998 = vmatmul.mubr.msk.bf16.vlgmr.msra.gmra.mrb[4].mxu1 %vm517_vm1, %v477_v7 }
  0x5c   : > { %2015 = vmatprep.mubr.msk.bf16.mxu1 %vm2294_vm0, %v2293_v0 }
 0x11e   : > { %v555_v15 = vpop.f32.mrb[0].mxu1 }
 0x11f   : > { %v1987_v16 = vpop.f32.mrb[1].mxu1  ;;  %v556_v21 = vadd.f32 %v1755_v19, %v555_v15  ;;  %v2185_v19 = vld [vmem:[#allocation4 + $0x10] sm:$0xff]  }
 0x120   : > { %v558_v17 = vpop.f32.mrb[2].mxu1  ;;  %v717_v32 = vpop.f32.mrb[0].mxu0 }
 0x121   : > { %v1988_v18 = vpop.f32.mrb[3].mxu1  ;;  %v728_v26 = vmul.f32 0.17677669, %v556_v21  ;;  %v718_v33 = vadd.f32 %v1785_v31, %v717_v32  ;;  %v2011_v34 = vpop.f32.mrb[1].mxu0  ;;  %v2183_v17 = vld [vmem:[#allocation4] sm:$0xff]  }
 0x122   : > { %v720_v35 = vpop.f32.mrb[2].mxu0  ;;  %v2184_v18 = vld [vmem:[#allocation4 + $0x8] sm:$0xff]   ;;  %v1795_v32 = vld [vmem:[%s2761_s5] ss:$0 sm:$0xff] }
 0x123   : > { %v729_v30 = vpack.c.bf16 %v728_v26, %v728_v26  ;;  %v731_v36 = vpack.c.bf16 %v718_v33, %v718_v33  ;;  %v2012_v37 = vpop.f32.mrb[3].mxu0 }
 0x125   : > { %v798_v38 = vsel %vm796_vm3, %v731_v36, 0 }
 0x12e   : > { %v636_v22 = vpop.f32.mrb[4].mxu1 }
 0x12f   : > { %v637_v23 = vadd.f32 %v1770_v20, %v636_v22  ;;  %v1999_v24 = vpop.f32.mrb[5].mxu1 }
 0x130   : > { %v639_v25 = vpop.f32.mrb[6].mxu1  ;;  %v2186_v24 = vld [vmem:[#allocation4 + $0x18] sm:$0xff]  }
 0x131   : > { %v730_v27 = vpack.c.bf16 %v637_v23, %v637_v23  ;;  %v2000_v28 = vpop.f32.mrb[7].mxu1 }
 0x133   : > { %v737_v29 = vsel %vm732_vm2, %v730_v27, 0  ;;  %844 = vrot.lane.b32.xlu0 %v730_v27, %s2295_s27 }
 0x134   : > { %2014 = vmatpush3.bf16.xpose.msra.mxu1 %v737_v29 }
 0x135   : > { %2019 = vmatprep.subr.bf16.mxu1 %v2293_v0 }
 0x137   : > { %841 = vrot.lane.b32.xlu0 %v729_v30, %s2295_s27 }
 0x13b   : > { %2016 = vmatmul.mubr.msk.bf16.vlgmr.msra.gmra.mrb[8].mxu1 %vm732_vm2, %v729_v30 }
 0x13c   : > { %2021 = vmatprep.mubr.msk.bf16.mxu1 %vm2294_vm0, %v2293_v0  ;;  %2020 = vmatpush3.bf16.msra.mxu1 %v798_v38 }
 0x13d   : > { %2031 = vmatprep.subr.bf16.mxu1 %v2293_v0 }
 0x1a5   : > { %v845_v39 = vpop.permute.xlu0 %844 }
 0x1a6   : > { %v850_v40 = vsel %vm732_vm2, %v845_v39, 0 }
 0x1a7   : > { %2026 = vmatpush3.bf16.xpose.msra.mxu0 %v850_v40 }
 0x1a8   : > { %2037 = vmatprep.subr.bf16.mxu0 %v2293_v0 }
 0x1a9   : > { %v842_v41 = vpop.permute.xlu0 %841 }
 0x1ae   : > { %2028 = vmatmul.mubr.msk.bf16.vlgmr.msra.gmra.mrb[4].mxu0 %vm732_vm2, %v842_v41 }
 0x1af   : > { %2045 = vmatprep.mubr.msk.bf16.mxu0 %vm2294_vm0, %v2293_v0  ;;  %2038 = vmatpush3.bf16.msra.mxu0 %v2183_v17  ;;  %v2204_v17 = vld [vmem:[%s2766_s10 + $0x58] sm:$0xff]  }
 0x1b0   : > { %2039 = vmatprep.subr.bf16.mxu0 %v2293_v0 }
 0x1b3   : > { %2040 = vmatpush3.bf16.msra.mxu0 %v2184_v18  ;;  %v2205_v18 = vld [vmem:[%s2766_s10 + $0x10] sm:$0xff]  }
 0x1b4   : > { %2041 = vmatprep.subr.bf16.mxu0 %v2293_v0 }
 0x1b7   : > { %2042 = vmatpush3.bf16.msra.mxu0 %v2185_v19  ;;  %v2206_v19 = vld [vmem:[%s2766_s10 + $0x60] sm:$0xff]  }
 0x1b8   : > { %2043 = vmatprep.subr.bf16.mxu0 %v2293_v0 }
 0x1bb   : > { %2044 = vmatpush3.bf16.msra.mxu0 %v2186_v24  ;;  %v2211_v24 = vld [vmem:[%s2766_s10 + $0x28] sm:$0xff]  }
 0x1bc   : > { %2061 = vmatprep.subr.bf16.mxu0 %v2293_v0 }
 0x20e   : > { %v773_v47 = vpop.f32.mrb[8].mxu1 }
 0x20f   : > { %v779_v48 = vsel %vm727_vm6, %v773_v47, -10000.0  ;;  %v2017_v49 = vpop.f32.mrb[9].mxu1  ;;  %v2189_v47 = vld [vmem:[%s2764_s8] sm:$0xff]  }
 0x210   : > { %v776_v50 = vpop.f32.mrb[10].mxu1  ;;  %v781_v51 = vsel %vm780_vm7, %v779_v48, -inf  ;;  %v2191_v49 = vld [vmem:[%s2764_s8 + $0x8] sm:$0xff]  }
 0x211   : > { %v2018_v52 = vpop.f32.mrb[11].mxu1  ;;  %782 = vmax.xlane.f32.xlu1 %v781_v51  ;;  %v2192_v50 = vld [vmem:[%s2764_s8 + $0x38] sm:$0xff]   ;;  %v2193_v51 = vld [vmem:[%s2764_s8 + $0x10] sm:$0xff]  }
 0x212   : > { %v2194_v52 = vld [vmem:[%s2764_s8 + $0x18] sm:$0xff]  }
 0x281   : > { %v886_v53 = vpop.f32.mrb[4].mxu0 }
 0x282   : > { %v892_v54 = vsel %vm727_vm6, %v886_v53, -10000.0  ;;  %v2029_v55 = vpop.f32.mrb[5].mxu0 }
 0x283   : > { %v889_v56 = vpop.f32.mrb[6].mxu0  ;;  %v893_v57 = vsel %vm780_vm7, %v892_v54, -inf }
 0x284   : > { %v2030_v58 = vpop.f32.mrb[7].mxu0  ;;  %894 = vmax.xlane.f32.xlu1 %v893_v57  ;;  %v1801_v57 = vld [vmem:[%s2762_s6] ss:$0 sm:$0xff] }
 0x29e   : > { %v783_v59 = vpop.xlane.xlu1 %782 }
 0x29f   : > { %v784_v60 = vsub.f32 %v779_v48, %v783_v59  ;;  %v2190_v48 = vld [vmem:[%s2764_s8 + $0x30] sm:$0xff]   ;;  %v1802_v59 = vld [vmem:[%s2763_s7] ss:$0 sm:$0xff] }
 0x2a1   : > { %v785_v61 = vmul.f32 1.442695, %v784_v60 }
 0x2a3   : > { %2223 = vpow2.f32 %v785_v61 }
 0x2ad   : > { %v2224_v62 = vpop.eup %2223 }
 0x2ae   : > { %v787_v63 = vsel %vm780_vm7, %v2224_v62, 0.0 }
 0x2af   : > { %788 = vadd.xlane.f32.xlu0 %v787_v63  ;;  %v2195_v63 = vld [vmem:[%s2764_s8 + $0x40] sm:$0xff]  }
 0x311   : > { %v895_v1 = vpop.xlane.xlu1 %894 }
 0x312   : > { %v896_v2 = vsub.f32 %v892_v54, %v895_v1 }
 0x314   : > { %v897_v3 = vmul.f32 1.442695, %v896_v2 }
 0x316   : > { %2225 = vpow2.f32 %v897_v3 }
 0x320   : > { %v2226_v4 = vpop.eup %2225 }
 0x321   : > { %v899_v6 = vsel %vm780_vm7, %v2226_v4, 0.0 }
 0x322   : > { %900 = vadd.xlane.f32.xlu1 %v899_v6 }
 0x333   : > { %906 = vrot.lane.b32.xlu1 %v731_v36, %s2295_s27 }
 0x33c   : > { %v789_v7 = vpop.xlane.xlu0 %788 }
 0x33d   : > { %2227 = vrcp.f32 %v789_v7  ;;  %v2196_v7 = vld [vmem:[%s2764_s8 + $0x48] sm:$0xff]  }
 0x347   : > { %v2228_v8 = vpop.eup %2227 }
 0x348   : > { %v791_v9 = vmul.f32 %v2228_v8, %v2224_v62  ;;  %v2200_v8 = vld [vmem:[%s2766_s10 + $0x48] sm:$0xff]  }
 0x34a   : > { %v792_v10 = vpack.c.bf16 %v791_v9, %v791_v9  ;;  %v2197_v9 = vld [vmem:[%s2764_s8 + $0x50] sm:$0xff]  }
 0x34c   : > { %2022 = vmatmul.mubr.msk.bf16.vlgmr.msra.gmra.mrb[12].mxu1 %vm780_vm7, %v792_v10 }
 0x34d   : > { %2033 = vmatprep.mubr.msk.bf16.mxu1 %vm2294_vm0, %v2293_v0 }
 0x3af   : > { %v901_v11 = vpop.xlane.xlu1 %900 }
 0x3b0   : > { %2229 = vrcp.f32 %v901_v11  ;;  %v2198_v11 = vld [vmem:[%s2764_s8 + $0x58] sm:$0xff]  }
 0x3b3   : > { %v907_v12 = vpop.permute.xlu1 %906 }
 0x3b4   : > { %v912_v13 = vsel %vm796_vm3, %v907_v12, 0 }
 0x3b5   : > { %2032 = vmatpush3.bf16.msra.mxu1 %v912_v13  ;;  %v2201_v13 = vld [vmem:[%s2766_s10] sm:$0xff]  }
 0x3b6   : > { %2049 = vmatprep.subr.bf16.mxu1 %v2293_v0 }
 0x3ba   : > { %v2230_v14 = vpop.eup %2229 }
 0x3bb   : > { %v903_v15 = vmul.f32 %v2230_v14, %v2226_v4  ;;  %v2199_v4 = vld [vmem:[%s2766_s10 + $0x40] sm:$0xff]  }
 0x3bd   : > { %v904_v16 = vpack.c.bf16 %v903_v15, %v903_v15  ;;  %v2202_v15 = vld [vmem:[%s2766_s10 + $0x50] sm:$0xff]  }
 0x3bf   : > { %2034 = vmatmul.mubr.msk.bf16.vlgmr.msra.gmra.mrb[16].mxu1 %vm780_vm7, %v904_v16  ;;  %v2203_v16 = vld [vmem:[%s2766_s10 + $0x8] sm:$0xff]  }
 0x3c0   : > { %2057 = vmatprep.mubr.msk.bf16.mxu1 %vm2294_vm0, %v2293_v0  ;;  %2050 = vmatpush3.bf16.msra.mxu1 %v2187_v45  ;;  %v2215_v45 = vld [vmem:[%s2766_s10 + $0x80] sm:$0xff]  }
 0x3c1   : > { %2051 = vmatprep.subr.bf16.mxu1 %v2293_v0 }
 0x41f   : > { %v834_v20 = vpop.f32.mrb[12].mxu1 }
 0x420   : > { %v2023_v21 = vpop.f32.mrb[13].mxu1 }
 0x421   : > { %v837_v22 = vpop.f32.mrb[14].mxu1  ;;  %v2208_v21 = vld [vmem:[%s2766_s10 + $0x68] sm:$0xff]  }
 0x422   : > { %v2024_v23 = vpop.f32.mrb[15].mxu1  ;;  %v2209_v22 = vld [vmem:[%s2766_s10 + $0x20] sm:$0xff]  }
 0x423   : > { %v2210_v23 = vld [vmem:[%s2766_s10 + $0x70] sm:$0xff]  }
 0x492   : > { %v948_v25 = vpop.f32.mrb[16].mxu1 }
 0x493   : > { %955 = vrot.lane.b32.xlu1 %v948_v25, %s2296_s0  ;;  %v2035_v26 = vpop.f32.mrb[17].mxu1  ;;  %v2212_v25 = vld [vmem:[%s2766_s10 + $0x78] sm:$0xff]  }
 0x494   : > { %v951_v27 = vpop.f32.mrb[18].mxu1  ;;  %v2213_v26 = vld [vmem:[%s2766_s10 + $0x30] sm:$0xff]  }
 0x495   : > { %v2036_v28 = vpop.f32.mrb[19].mxu1  ;;  %v2214_v27 = vld [vmem:[%s2766_s10 + $0x38] sm:$0xff]  }
 0x505   : > { %v956_v29 = vpop.permute.xlu1 %955 }
 0x506   : > { %v958_v30 = vsel %vm732_vm2, %v834_v20, %v956_v29  ;;  %v2207_v20 = vld [vmem:[%s2766_s10 + $0x18] sm:$0xff]  }
 0x507   : > { %v959_v31 = vpack.c.bf16 %v958_v30, %v958_v30 }
 0x509   : > { %2046 = vmatmul.mubr.msk.bf16.vlgmr.msra.gmra.mrb[8].mxu0 %vm517_vm1, %v959_v31 }
 0x50a   : > { %2069 = vmatprep.mubr.msk.bf16.mxu0 %vm2294_vm0, %v2293_v0  ;;  %2062 = vmatpush3.bf16.msra.mxu0 %v2189_v47 }
 0x50b   : > { %2063 = vmatprep.subr.bf16.mxu0 %v2293_v0 }
 0x50e   : > { %2064 = vmatpush3.bf16.msra.mxu0 %v2191_v49 }
 0x50f   : > { %2065 = vmatprep.subr.bf16.mxu0 %v2293_v0 }
 0x512   : > { %2066 = vmatpush3.bf16.msra.mxu0 %v2193_v51  ;;  %v2217_v51 = vld [vmem:[%s2766_s10 + $0x90] sm:$0xff]  }
 0x513   : > { %2067 = vmatprep.subr.bf16.mxu0 %v2293_v0 }
 0x516   : > { %2068 = vmatpush3.bf16.msra.mxu0 %v2194_v52  ;;  %v2218_v52 = vld [vmem:[%s2766_s10 + $0x98] sm:$0xff]  }
 0x517   : > { %2085 = vmatprep.subr.bf16.mxu0 %v2293_v0 }
 0x5dc   : > { %v1027_v33 = vpop.f32.mrb[8].mxu0 }
 0x5dd   : > { %v1028_v34 = vadd.f32 %v1795_v32, %v1027_v33  ;;  %v2047_v35 = vpop.f32.mrb[9].mxu0 }
 0x5de   : > { %v1030_v36 = vpop.f32.mrb[10].mxu0 }
 0x5df   : > { %v2048_v37 = vpop.f32.mrb[11].mxu0  ;;  %v1033_v38 = vadd.f32 %v1028_v34, %v2450_v5  ;;  %v2188_v5 = vld [vmem:[%s2764_s8 + $0x28] sm:$0xff]  }
 0x5e0   : > { %2052 = vmatpush3.bf16.msra.mxu1 %v2188_v5  ;;  %v1834_v37 = vld [vmem:[%s2765_s9] ss:$0 sm:$0xff] }
 0x5e1   : > { %v1036_v39 = vsel %vm517_vm1, %v1033_v38, 0.0  ;;  %2053 = vmatprep.subr.bf16.mxu1 %v2293_v0 }
 0x5e2   : > { %1037 = vadd.xlane.f32.xlu1 %v1036_v39 }
 0x5e4   : > { %2054 = vmatpush3.bf16.msra.mxu1 %v2190_v48 }
 0x5e5   : > { %2055 = vmatprep.subr.bf16.mxu1 %v2293_v0 }
 0x5e8   : > { %2056 = vmatpush3.bf16.msra.mxu1 %v2192_v50  ;;  %v2216_v50 = vld [vmem:[%s2766_s10 + $0x88] sm:$0xff]  }
 0x5e9   : > { %2073 = vmatprep.subr.bf16.mxu1 %v2293_v0 }
 0x66f   : > { %v1038_v40 = vpop.xlane.xlu1 %1037 }
 0x670   : > { %v1040_v41 = vmul.f32 0.015625, %v1038_v40 }
 0x672   : > { %v1041_v42 = vsub.f32 %v1033_v38, %v1040_v41 }
 0x674   : > { %v1042_v43 = vmul.f32 %v1041_v42, %v1041_v42 }
 0x676   : > { %v1043_v44 = vsel %vm517_vm1, %v1042_v43, 0.0 }
 0x677   : > { %1044 = vadd.xlane.f32.xlu0 %v1043_v44 }
 0x704   : > { %v1045_v53 = vpop.xlane.xlu0 %1044 }
 0x705   : > { %v1046_v54 = vmul.f32 0.015625, %v1045_v53  ;;  %v2219_v53 = vld [vmem:[%s2766_s10 + $0xa0] sm:$0xff]  }
 0x707   : > { %v1047_v55 = vadd.f32 1e-05, %v1046_v54  ;;  %v2220_v54 = vld [vmem:[%s2766_s10 + $0xa8] sm:$0xff]  }
 0x709   : > { %2231 = vrsqrt.f32 %v1047_v55  ;;  %v2221_v55 = vld [vmem:[%s2766_s10 + $0xb0] sm:$0xff]  }
 0x713   : > { %v2232_v56 = vpop.eup %2231 }
 0x714   : > { %v1049_v58 = vmul.f32 %v2232_v56, %v1041_v42  ;;  %v2222_v56 = vld [vmem:[%s2766_s10 + $0xb8] sm:$0xff]  }
 0x716   : > { %v1056_v60 = vmul.f32 %v1801_v57, %v1049_v58 }
 0x718   : > { %v2592_v61 = vadd.f32 %v1802_v59, %v1056_v60 }
 0x71a   : > { %v1066_v62 = vsel %vm2521_vm4, %v2592_v61, 0.0 }
 0x71b   : > { %v1085_v1 = vpack.c.bf16 %v1066_v62, %v1066_v62  ;;  %v1068_v2 = vrot.slane %v1066_v62, 7  ;;  %v1072_v10 = vrot.slane %v1066_v62, 1 }
 0x71d   : > { %2058 = vmatmul.mubr.msk.bf16.vlgmr.msra.gmra.mrb[20].mxu1 %vm517_vm1, %v1085_v1  ;;  %v1071_v3 = vsel %vm1070_vm8, 0.0, %v1068_v2  ;;  %v1075_v12 = vsel %vm1074_vm9, %v1072_v10, 0.0 }
 0x71e   : > { %2074 = vmatpush3.bf16.msra.mxu1 %v2195_v63  ;;  %v1076_v6 = vpack.c.bf16 %v1071_v3, %v1071_v3  ;;  %2081 = vmatprep.mubr.msk.bf16.mxu1 %vm2294_vm0, %v2293_v0  ;;  %v1229_v14 = vpack.c.bf16 %v1075_v12, %v1075_v12 }
 0x71f   : > { %2075 = vmatprep.subr.bf16.mxu1 %v2293_v0 }
 0x720   : > { %2070 = vmatmul.mubr.msk.bf16.vlgmr.msra.gmra.mrb[12].mxu0 %vm517_vm1, %v1076_v6 }
 0x721   : > { %2086 = vmatpush3.bf16.msra.mxu0 %v2199_v4  ;;  %2101 = vmatprep.mubr.msk.bf16.mxu0 %vm2294_vm0, %v2293_v0 }
 0x722   : > { %2076 = vmatpush3.bf16.msra.mxu1 %v2196_v7  ;;  %2087 = vmatprep.subr.bf16.mxu0 %v2293_v0  ;;  %v1902_v7 = vld [vmem:[%s2767_s11] ss:$0 sm:$0xff] }
 0x723   : > { %2077 = vmatprep.subr.bf16.mxu1 %v2293_v0 }
 0x725   : > { %2088 = vmatpush3.bf16.msra.mxu0 %v2200_v8 }
 0x726   : > { %2078 = vmatpush3.bf16.msra.mxu1 %v2197_v9  ;;  %2089 = vmatprep.subr.bf16.mxu0 %v2293_v0 }
 0x727   : > { %2079 = vmatprep.subr.bf16.mxu1 %v2293_v0 }
 0x729   : > { %2090 = vmatpush3.bf16.msra.mxu0 %v2202_v15 }
 0x72a   : > { %2080 = vmatpush3.bf16.msra.mxu1 %v2198_v11  ;;  %2091 = vmatprep.subr.bf16.mxu0 %v2293_v0 }
 0x72b   : > { %2105 = vmatprep.subr.bf16.mxu1 %v2293_v0 }
 0x72d   : > { %2082 = vmatmul.mubr.msk.bf16.vlgmr.msra.gmra.mrb[24].mxu1 %vm517_vm1, %v1229_v14  ;;  %2092 = vmatpush3.bf16.msra.mxu0 %v2204_v17 }
 0x72e   : > { %2106 = vmatpush3.bf16.msra.mxu1 %v2201_v13  ;;  %2121 = vmatprep.mubr.msk.bf16.mxu1 %vm2294_vm0, %v2293_v0 }
 0x72f   : > { %2107 = vmatprep.subr.bf16.mxu1 %v2293_v0  ;;  %2093 = vmatprep.subr.bf16.mxu0 %v2293_v0 }
 0x731   : > { %2094 = vmatpush3.bf16.msra.mxu0 %v2206_v19 }
 0x732   : > { %2108 = vmatpush3.bf16.msra.mxu1 %v2203_v16  ;;  %2095 = vmatprep.subr.bf16.mxu0 %v2293_v0 }
 0x733   : > { %2109 = vmatprep.subr.bf16.mxu1 %v2293_v0 }
 0x735   : > { %2096 = vmatpush3.bf16.msra.mxu0 %v2208_v21 }
 0x736   : > { %2110 = vmatpush3.bf16.msra.mxu1 %v2205_v18  ;;  %2097 = vmatprep.subr.bf16.mxu0 %v2293_v0 }
 0x737   : > { %2111 = vmatprep.subr.bf16.mxu1 %v2293_v0 }
 0x739   : > { %2098 = vmatpush3.bf16.msra.mxu0 %v2210_v23 }
 0x73a   : > { %2112 = vmatpush3.bf16.msra.mxu1 %v2207_v20  ;;  %2099 = vmatprep.subr.bf16.mxu0 %v2293_v0 }
 0x73b   : > { %2113 = vmatprep.subr.bf16.mxu1 %v2293_v0 }
 0x73d   : > { %2100 = vmatpush3.bf16.msra.mxu0 %v2212_v25 }
 0x73e   : > { %2114 = vmatpush3.bf16.msra.mxu1 %v2209_v22  ;;  %2125 = vmatprep.subr.bf16.mxu0 %v2293_v0 }
 0x73f   : > { %2115 = vmatprep.subr.bf16.mxu1 %v2293_v0 }
 0x742   : > { %2116 = vmatpush3.bf16.msra.mxu1 %v2211_v24 }
 0x743   : > { %2117 = vmatprep.subr.bf16.mxu1 %v2293_v0 }
 0x746   : > { %2118 = vmatpush3.bf16.msra.mxu1 %v2213_v26  ;;  %v1904_v26 = vld [vmem:[%s2769_s13] ss:$0 sm:$0xff] }
 0x747   : > { %2119 = vmatprep.subr.bf16.mxu1 %v2293_v0 }
 0x74a   : > { %2120 = vmatpush3.bf16.msra.mxu1 %v2214_v27 }
 0x7f0   : > { %v1156_v28 = vpop.f32.mrb[20].mxu1 }
 0x7f1   : > { %v2059_v29 = vpop.f32.mrb[21].mxu1 }
 0x7f2   : > { %v1159_v30 = vpop.f32.mrb[22].mxu1 }
 0x7f3   : > { %v2060_v31 = vpop.f32.mrb[23].mxu1  ;;  %v1223_v32 = vpop.f32.mrb[12].mxu0 }
 0x7f4   : > { %v1224_v33 = vadd.f32 %v1223_v32, %v1156_v28  ;;  %v2071_v34 = vpop.f32.mrb[13].mxu0 }
 0x7f5   : > { %v1226_v35 = vpop.f32.mrb[14].mxu0 }
 0x7f6   : > { %v2072_v36 = vpop.f32.mrb[15].mxu0 }
 0x800   : > { %v1300_v38 = vpop.f32.mrb[24].mxu1 }
 0x801   : > { %v1306_v39 = vadd.f32 %v1300_v38, %v1224_v33  ;;  %v2083_v40 = vpop.f32.mrb[25].mxu1 }
 0x802   : > { %v1303_v41 = vpop.f32.mrb[26].mxu1 }
 0x803   : > { %v1313_v42 = vadd.f32 %v1834_v37, %v1306_v39  ;;  %v2084_v43 = vpop.f32.mrb[27].mxu1 }
 0x805   : > { %v1314_v44 = vmax.f32 %v1313_v42, 0.0 }
 0x807   : > { %v1315_v5 = vsel %vm2521_vm4, %v1314_v44, 0.0  ;;  %v1860_v47 = vpack.c.bf16 %v1314_v44, %v1314_v44 }
 0x808   : > { %v1317_v48 = vrot.slane %v1315_v5, 7  ;;  %v1320_v57 = vrot.slane %v1315_v5, 1 }
 0x809   : > { %2102 = vmatmul.mubr.msk.bf16.vlgmr.msra.gmra.mrb[16].mxu0 %vm1859_vm10, %v1860_v47 }
 0x80a   : > { %v1873_v49 = vpack.c.bf16 %v1317_v48, %v1317_v48  ;;  %2126 = vmatpush3.bf16.msra.mxu0 %v2215_v45  ;;  %2141 = vmatprep.mubr.msk.bf16.mxu0 %vm2294_vm0, %v2293_v0  ;;  %v1900_v58 = vpack.c.bf16 %v1320_v57, %v1320_v57 }
 0x80b   : > { %2127 = vmatprep.subr.bf16.mxu0 %v2293_v0 }
 0x80c   : > { %2122 = vmatmul.mubr.msk.bf16.vlgmr.msra.gmra.mrb[28].mxu1 %vm1872_vm12, %v1873_v49 }
 0x80e   : > { %2128 = vmatpush3.bf16.msra.mxu0 %v2216_v50 }
 0x80f   : > { %2129 = vmatprep.subr.bf16.mxu0 %v2293_v0 }
 0x812   : > { %2130 = vmatpush3.bf16.msra.mxu0 %v2217_v51 }
 0x813   : > { %2131 = vmatprep.subr.bf16.mxu0 %v2293_v0 }
 0x816   : > { %2132 = vmatpush3.bf16.msra.mxu0 %v2218_v52 }
 0x817   : > { %2133 = vmatprep.subr.bf16.mxu0 %v2293_v0 }
 0x81a   : > { %2134 = vmatpush3.bf16.msra.mxu0 %v2219_v53 }
 0x81b   : > { %2135 = vmatprep.subr.bf16.mxu0 %v2293_v0 }
 0x81e   : > { %2136 = vmatpush3.bf16.msra.mxu0 %v2220_v54 }
 0x81f   : > { %2137 = vmatprep.subr.bf16.mxu0 %v2293_v0 }
 0x822   : > { %2138 = vmatpush3.bf16.msra.mxu0 %v2221_v55 }
 0x823   : > { %2139 = vmatprep.subr.bf16.mxu0 %v2293_v0 }
 0x826   : > { %2140 = vmatpush3.bf16.msra.mxu0 %v2222_v56 }
 0x829   : > { %2142 = vmatmul.mubr.msk.bf16.vlgmr.msra.gmra.mrb[20].mxu0 %vm1899_vm13, %v1900_v58 }
 0x8dc   : > { %v1440_v59 = vpop.f32.mrb[16].mxu0 }
 0x8dd   : > { %v2103_v60 = vpop.f32.mrb[17].mxu0 }
 0x8de   : > { %v1443_v62 = vpop.f32.mrb[18].mxu0 }
 0x8df   : > { %v2104_v63 = vpop.f32.mrb[19].mxu0  ;;  %v1528_v1 = vpop.f32.mrb[28].mxu1 }
 0x8e0   : > { %v1529_v2 = vadd.f32 %v1528_v1, %v1440_v59  ;;  %v2123_v3 = vpop.f32.mrb[29].mxu1 }
 0x8e1   : > { %v1531_v4 = vpop.f32.mrb[30].mxu1 }
 0x8e2   : > { %v2124_v6 = vpop.f32.mrb[31].mxu1 }
 0x8fc   : > { %v1634_v0 = vpop.f32.mrb[20].mxu0 }
 0x8fd   : > { %v1640_v8 = vadd.f32 %v1634_v0, %v1529_v2  ;;  %v2143_v9 = vpop.f32.mrb[21].mxu0 }
 0x8fe   : > { %v1637_v10 = vpop.f32.mrb[22].mxu0 }
 0x8ff   : > { %v1647_v11 = vadd.f32 %v1902_v7, %v1640_v8  ;;  %v2144_v12 = vpop.f32.mrb[23].mxu0 }
 0x901   : > { %v1648_v13 = vsel %vm2521_vm4, %v1647_v11, 0.0 }
 0x902   : > { %v1649_v14 = vadd.f32 %v1648_v13, %v2592_v61  ;;  %v1903_v61 = vld [vmem:[%s2768_s12] ss:$0 sm:$0xff] }
 0x904   : > { %v1652_v15 = vsel %vm517_vm1, %v1649_v14, 0.0 }
 0x905   : > { %1653 = vadd.xlane.f32.xlu0 %v1652_v15 }
 0x992   : > { %v1654_v16 = vpop.xlane.xlu0 %1653 }
 0x993   : > { %v1655_v17 = vmul.f32 0.015625, %v1654_v16 }
 0x995   : > { %v1656_v18 = vsub.f32 %v1649_v14, %v1655_v17 }
 0x997   : > { %v1657_v19 = vmul.f32 %v1656_v18, %v1656_v18 }
 0x999   : > { %v1658_v20 = vsel %vm517_vm1, %v1657_v19, 0.0 }
 0x99a   : > { %1659 = vadd.xlane.f32.xlu0 %v1658_v20 }
 0xa27   : > { %v1660_v21 = vpop.xlane.xlu0 %1659 }
 0xa28   : > { %v1661_v22 = vmul.f32 0.015625, %v1660_v21 }
 0xa2a   : > { %v1662_v23 = vadd.f32 1e-05, %v1661_v22 }
 0xa2c   : > { %2233 = vrsqrt.f32 %v1662_v23 }
 0xa36   : > { %v2234_v24 = vpop.eup %2233 }
 0xa37   : > { %v1664_v25 = vmul.f32 %v2234_v24, %v1656_v18 }
 0xa39   : > { %v1671_v27 = vmul.f32 %v1903_v61, %v1664_v25 }
 0xa3b   : > { %v1678_v28 = vadd.f32 %v1904_v26, %v1671_v27 }
 0xa3d   : > { %v1679_v29 = vsel %vm2521_vm4, %v1678_v28, 0.0 }
 0xa3e   : > { %1680 = vst.msk [vmem:[%s457_s21] sm:$0xff] %vm517_vm1, %v1679_v29 }
 0xa3f PF: > { %s31_s18 = sadd.s32 1, %s2287_s18  }
 0xa40   : > { %p28_p8 = scmp.ge.s32.totalorder %s31_s18, 4  }
 0xa42   :  { %30 = sbr.rel (!%p28_p8) target bundleno = 16 (0x10), region = 115 }
 0xa49   :  { %1700 = vsyncpa [#allocation5], 1 }
 0xa4a   :  { %1702 = vsyncpa [#allocation5 + $0x1], 1 }

// kernel: text_encoder_forward.9
= control target key start
LH: loop header
LB: loop body
LE: loop exit
PB: predicated region body
PF: predicated region fallthrough
CT: control target
= control target key end

     0   :  { %s2866_s0 = inlined_call_operand.vmem [shape: s32[2], index: 0, kind: input, shape index: {}]   ;;  %s2867_s1 = inlined_call_operand.vmem [shape: f32[2,8,64], index: 1, kind: input, shape index: {}]   ;;  %s2868_s2 = inlined_call_operand.hbm [shape: bf16[3,64,64], index: 2, kind: input, shape index: {}]   ;;  %s2869_s3 = inlined_call_operand.vmem [shape: f32[3,1,64], index: 3, kind: input, shape index: {}]   ;;  %s2870_s4 = inlined_call_operand.hbm [shape: bf16[64,64], index: 4, kind: input, shape index: {}]   ;;  %s2871_s5 = inlined_call_operand.vmem [shape: f32[1,64], index: 5, kind: input, shape index: {}, may-alias: {5,7,11,13}]   ;;  %s2872_s6 = inlined_call_operand.vmem [shape: f32[1,64], index: 6, kind: input, shape index: {}, may-alias: {6,12}]   ;;  %s2873_s7 = inlined_call_operand.vmem [shape: f32[1,64], index: 7, kind: input, shape index: {}, may-alias: {5,7,11,13}]   ;;  %s2874_s8 = inlined_call_operand.hbm [shape: bf16[3,64,128], index: 8, kind: input, shape index: {}]   ;;  %s2875_s9 = inlined_call_operand.vmem [shape: f32[1,128], index: 9, kind: input, shape index: {}]   ;;  %s2876_s10 = inlined_call_operand.vmem [shape: bf16[3,128,64], index: 10, kind: input, shape index: {}]   ;;  %s2877_s11 = inlined_call_operand.vmem [shape: f32[1,64], index: 11, kind: input, shape index: {}, may-alias: {5,7,11,13}]   ;;  %s2878_s12 = inlined_call_operand.vmem [shape: f32[1,64], index: 12, kind: input, shape index: {}, may-alias: {6,12}]   ;;  %s2879_s13 = inlined_call_operand.vmem [shape: f32[1,64], index: 13, kind: input, shape index: {}, may-alias: {5,7,11,13}]   ;;  %s2880_s14 = inlined_call_operand.vmem [shape: f32[2,8,64], index: 14, kind: output, shape index: {}]  }
   0x1   :  { %2884 = sst [smem:[#allocation13_spill]] %s2880_s14  ;;  %s19_s15 = sshll.u32 %s2866_s0, 4  ;;  %s20_s15 = int_to_ptr.vmem [resolvable:$true] %s19_s15 }
   0x2   :  { %s2275_s16 = scalar_lea.vmem %s20_s15, 16  ;;  %p2280_p1 = scmp.lt.s32.totalorder %s20_s15, %s20_s15 }
   0x3   :  { %p2276_p0 = scmp.ne.s32.totalorder %s20_s15, %s2275_s16  ;;  %p2281_p2 = scmp.lt.s32.totalorder %s2275_s16, %s2275_s16 }
   0x5   :  { %p2282_p3 = por %p2281_p2, %p2280_p1 }
   0x7   :  { %p2283_p4 = pnand %p2282_p3, %p2276_p0 }
   0x9   :  { %2286 = shalt.err (!%p2283_p4)  }
   0xa   :  { %s2389_s17 = smov [#allocation3]  }
   0xb   :  { %22 = dma.vmem_to_smem %s20_s15, 16, %s2389_s17, [#allocation2] }
   0xc   :  { %2375 = dma.done.wait [#allocation2], 16 }
   0xd   :  { %2376 = vsyncadd [#allocation2], 4294967280 }
   0xe   :  { %24 = sfence }
   0xf   :  { %25 = vsyncpa [#allocation5], 0 }
  0x10   :  { %26 = vsyncpa [#allocation7], 0  ;;  %s2477_s18 = smov 0  }
  0x11 LB: > { %2885 = sst [smem:[#allocation12_spill]] %s2387_s18  ;;  %s2483_s0 = sadd.s32 4294967295, %s2387_s18   ;;  %s2387_s18 = sphi %s2477_s18, %s32_s18  }
  0x12   : > { %p1796_p5 = scmp.ge.s32.totalorder %s2387_s18, 1  ;;  %p341_p6 = scmp.lt.s32.totalorder %s2387_s18, 3 }
  0x13   : > { %p2881_p7 = scmp.eq.s32.totalorder %s2483_s0, 0  ;;  %s2390_s20 = smov [#allocation6]  }
  0x14   : > { %p2488_p8 = pnand %p1796_p5, %p341_p6  ;;  %s369_s21 = sshll.u32 %s2390_s20, 4  ;;  %s370_s21 = int_to_ptr.vmem [resolvable:$true] %s369_s21 }
  0x15   : > { %s2391_s22 = smov [#allocation4]   ;;  %s2392_s25 = smov [#allocation8]  }
  0x16   : > { %s2886_s19 = scalar_select %p2488_p8, 1, 0 }
  0x17   : > { %p2177_p9 = pneg %p2488_p8  ;;  %s353_s23 = sshll.u32 %s2391_s22, 4  ;;  %s2500_s23 = int_to_ptr.vmem [resolvable:$true] %s353_s23 }
  0x18   : > { %s391_s26 = sshll.u32 %s2392_s25, 4  ;;  %s2287_s29 = scalar_lea.hbm %s2870_s4, 512  ;;  %s2502_s26 = int_to_ptr.vmem [resolvable:$true] %s391_s26 }
  0x19   : > { %p2496_p10 = pnand %p2881_p7, %p2177_p9  ;;  %p2288_p11 = scmp.ne.s32.totalorder %s2870_s4, %s2287_s29 }
  0x1a   : > { %p2294_p1 = scmp.lt.u32.totalorder %s2287_s29, %s2870_s4 }
  0x1b   : > { %p2512_p12 = pneg %p2496_p10 }
  0x1d   : > { %p2290_p13 = pnand %p2512_p12, %p2288_p11 }
  0x1f   : > { %p2291_p0 = pneg %p2290_p13 }
  0x21   : > { %p2296_p2 = pnand %p2294_p1, %p2291_p0 }
  0x23   : > { %2299 = shalt.err (!%p2296_p2)
}
  0x24   : > { %s2300_s22 = scalar_lea.vmem %s370_s21, 512  ;;  %p2308_p6 = scmp.lt.s32.totalorder %s370_s21, %s370_s21 }
  0x25   : > { %p2301_p3 = scmp.ne.s32.totalorder %s370_s21, %s2300_s22  ;;  %p2309_p9 = scmp.lt.s32.totalorder %s2300_s22, %s2300_s22 }
  0x27   : > { %p2303_p4 = pnand %p2301_p3, %p2512_p12  ;;  %p2310_p7 = por %p2309_p9, %p2308_p6 }
  0x29   : > { %p2304_p5 = pneg %p2303_p4 }
  0x2b   : > { %p2311_p8 = pnand %p2310_p7, %p2304_p5 }
  0x2d   : > { %2314 = shalt.err (!%p2311_p8)
}
  0x2e   : > { %s2393_s25 = smov 64   ;;  %s2394_s27 = smov 4  }
  0x2f   : > { %2183 = dma.hbm_to_vmem [thread:$0]  (!%p2496_p10), %s2870_s4, 512, %s370_s21, [#allocation7], %s2393_s25, %s2393_s25, %s2394_s27  }
  0x30   : > { %s2315_s17 = scalar_lea.hbm %s2868_s2, 1536 }
  0x31   : > { %p2316_p7 = scmp.ne.s32.totalorder %s2868_s2, %s2315_s17  ;;  %p2322_p13 = scmp.lt.u32.totalorder %s2315_s17, %s2868_s2 }
  0x33   : > { %p2318_p8 = pnand %p2316_p7, %p2512_p12 }
  0x35   : > { %p2319_p11 = pneg %p2318_p8 }
  0x37   : > { %p2324_p0 = pnand %p2322_p13, %p2319_p11 }
  0x39   : > { %2327 = shalt.err (!%p2324_p0)
}
  0x3a   : > { %s2328_s21 = scalar_lea.vmem %s2500_s23, 1536  ;;  %p2336_p4 = scmp.lt.s32.totalorder %s2500_s23, %s2500_s23 }
  0x3b   : > { %p2329_p1 = scmp.ne.s32.totalorder %s2500_s23, %s2328_s21  ;;  %p2337_p5 = scmp.lt.s32.totalorder %s2328_s21, %s2328_s21 }
  0x3d   : > { %p2331_p2 = pnand %p2329_p1, %p2512_p12  ;;  %p2338_p6 = por %p2337_p5, %p2336_p4 }
  0x3f   : > { %p2332_p3 = pneg %p2331_p2 }
  0x41   : > { %p2339_p9 = pnand %p2338_p6, %p2332_p3 }
  0x43   : > { %2342 = shalt.err (!%p2339_p9)
}
  0x44   : > { %2180 = dma.hbm_to_vmem [thread:$0]  (!%p2496_p10), %s2868_s2, 1536, %s2500_s23, [#allocation5], %s2393_s25, %s2393_s25, %s2394_s27  }
  0x45   : > { %s2343_s30 = scalar_lea.hbm %s2874_s8, 1536 }
  0x46   : > { %p2344_p7 = scmp.ne.s32.totalorder %s2874_s8, %s2343_s30  ;;  %p2350_p13 = scmp.lt.u32.totalorder %s2343_s30, %s2874_s8 }
  0x48   : > { %p2346_p8 = pnand %p2344_p7, %p2512_p12 }
  0x4a   : > { %p2347_p11 = pneg %p2346_p8 }
  0x4c   : > { %p2352_p0 = pnand %p2350_p13, %p2347_p11 }
  0x4e   : > { %2355 = shalt.err (!%p2352_p0)
}
  0x4f   : > { %s2356_s23 = scalar_lea.vmem %s2502_s26, 1536  ;;  %p2364_p4 = scmp.lt.s32.totalorder %s2502_s26, %s2502_s26 }
  0x50   : > { %p2357_p1 = scmp.ne.s32.totalorder %s2502_s26, %s2356_s23  ;;  %p2365_p5 = scmp.lt.s32.totalorder %s2356_s23, %s2356_s23 }
  0x52   : > { %p2359_p2 = pnand %p2357_p1, %p2512_p12  ;;  %p2366_p6 = por %p2365_p5, %p2364_p4 }
  0x54   : > { %p2360_p3 = pneg %p2359_p2 }
  0x56   : > { %p2367_p9 = pnand %p2366_p6, %p2360_p3 }
  0x58   : > { %2370 = shalt.err (!%p2367_p9)
}
  0x59   : > { %2186 = dma.hbm_to_vmem [thread:$0]  (!%p2496_p10), %s2874_s8, 1536, %s2502_s26, [#allocation7], %s2393_s25, %s2393_s25, %s2394_s27  }
  0x5a   : > { %p2889_p7 = scmp.ne.s32.totalorder %s2886_s19, 0 }
  0x5b   : > { %p2890_p12 = scmp.eq.s32.totalorder (!%p2889_p7), %s2483_s0, 0 }
  0x5c   : > { %429 = sbr.rel (%p2889_p7) target bundleno = 2669 (0xa6d), region = 72 }
  0x63   : > { %2378 = dma.done.wait (%p2890_p12), [#allocation5], 1536   ;;  %p2891_p8 = pmov %p2890_p12 }
  0x65   : > { %2380 = vsyncadd (%p2891_p8), [#allocation5], 4294965760  ;;  %p2892_p11 = pmov %p2891_p8 }
  0x66   : > { %p2893_p13 = pmov %p2891_p8 }
  0x67   : > { %2382 = dma.done.wait (%p2892_p11), [#allocation7], 2048  }
  0x68   : > { %2384 = vsyncadd (%p2893_p13), [#allocation7], 4294965248  ;;  %p479_p0 = scmp.lt.s32.totalorder %s2483_s0, 1  ;;  %v2395_v0 = vmov 0.0   ;;  %vm2396_vm0 = vmmov 0   ;;  %s2598_s19 = sld [smem:[#allocation3 + %s2483_s0]]  ;;  %v490_v1 = vlaneseq }
  0x69   : > { %1997 = vmatprep.subr.bf16.mxu1 %v2395_v0  ;;  %2005 = vmatprep.mubr.msk.bf16.mxu1 %vm2396_vm0, %v2395_v0  ;;  %v2211_v2 = vld [vmem:[#allocation4] sm:$0xff]   ;;  %v2212_v4 = vld [vmem:[#allocation4 + $0x8] sm:$0xff]   ;;  %v2213_v8 = vld [vmem:[#allocation4 + $0x10] sm:$0xff]   ;;  %vm549_vm2 = vcmask 523264   ;;  %vm762_vm3 = vcmask 261120   ;;  %s2397_s30 = smov 96  }
  0x6a   : > { %s2899_s0 = smov (!%p479_p0, %s2483_s0), 1  ;;  %2021 = vmatprep.subr.bf16.mxu0 %v2395_v0  ;;  %2029 = vmatprep.mubr.msk.bf16.mxu0 %vm2396_vm0, %v2395_v0  ;;  %v491_v3 = vshrl.u32 %v490_v1, 7  ;;  %v2214_v9 = vld [vmem:[#allocation4 + $0x18] sm:$0xff]   ;;  %v2215_v11 = vld [vmem:[#allocation4 + $0x20] sm:$0xff]   ;;  %v2216_v13 = vld [vmem:[#allocation4 + $0x28] sm:$0xff]   ;;  %vm826_vm4 = vcmask 1043456  }
  0x6b   : > { %s1805_s24 = sshll.u32 %s2899_s0, 3  ;;  %1998 = vmatpush3.bf16.msra.mxu1 %v2211_v2  ;;  %v2217_v14 = vld [vmem:[#allocation4 + $0x30] sm:$0xff]   ;;  %v2218_v15 = vld [vmem:[#allocation4 + $0x38] sm:$0xff]   ;;  %v2219_v16 = vld [vmem:[#allocation4 + $0x40] sm:$0xff]   ;;  %v495_v47 = vand.u32 127, %v490_v1  ;;  %vm810_vm7 = vcmask 64512  }
  0x6c   : > { %s482_s25 = scalar_lea.vmem %s2867_s1, %s1805_s24  ;;  %1999 = vmatprep.subr.bf16.mxu1 %v2395_v0  ;;  %2022 = vmatpush3.bf16.msra.mxu0 %v2219_v16  ;;  %v2220_v17 = vld [vmem:[#allocation4 + $0x48] sm:$0xff]   ;;  %v2221_v18 = vld [vmem:[#allocation4 + $0x50] sm:$0xff]   ;;  %v2222_v19 = vld [vmem:[#allocation4 + $0x58] sm:$0xff]   ;;  %s2398_s20 = smov 32   ;;  %vm1100_vm8 = vcmask 1040384   ;;  %vm1104_vm9 = vcmask 1046528  }
  0x6d   : > { %v489_v6 = vld [vmem:[%s482_s25] sm:$0xff]  ;;  %2023 = vmatprep.subr.bf16.mxu0 %v2395_v0  ;;  %vm1890_vm11 = vmneg %vm1100_vm8  ;;  %s2896_s22 = sld [smem:[#allocation13_spill]] }
  0x6e   : > { %v492_v5 = vstv %s2598_s19  ;;  %v1807_v24 = vld [vmem:[%s2869_s3] ss:$0 sm:$0xff]  ;;  %v1814_v25 = vld [vmem:[%s2869_s3 + $0x1] ss:$0 sm:$0xff]  ;;  %v1821_v36 = vld [vmem:[%s2869_s3 + $0x2] ss:$0 sm:$0xff] }
  0x6f   : > { %vm2617_vm1 = vcmp.lt.s32.totalorder %v491_v3, %v492_v5  ;;  %2000 = vmatpush3.bf16.msra.mxu1 %v2212_v4  ;;  %vm496_vm5 = vcmp.lt.s32.totalorder %v495_v47, %v492_v5  ;;  %v2227_v47 = vld [vmem:[#allocation8 + $0x20] sm:$0xff]   ;;  %vm1892_vm12 = vmpackc.low %vm1890_vm11, %vm1890_vm11 }
  0x70   : > { %2001 = vmatprep.subr.bf16.mxu1 %v2395_v0  ;;  %v2624_v10 = vsel %vm2617_vm1, %v489_v6, 0.0  ;;  %2024 = vmatpush3.bf16.msra.mxu0 %v2220_v17  ;;  %vm757_vm6 = vmand %vm2617_vm1, %vm496_vm5  ;;  %v1923_v7 = vld [vmem:[%s2878_s12] ss:$0 sm:$0xff] }
  0x71   : > { %v509_v12 = vpack.c.bf16 %v2624_v10, %v2624_v10  ;;  %2025 = vmatprep.subr.bf16.mxu0 %v2395_v0  ;;  %vm1879_vm10 = vmpackc.low %vm2617_vm1, %vm2617_vm1 }
  0x72   : > { %vm1919_vm13 = vmpackc.low %vm1104_vm9, %vm1104_vm9 }
  0x73   : > { %2002 = vmatpush3.bf16.msra.mxu1 %v2213_v8  ;;  %s486_s23 = scalar_lea.vmem %s2896_s22, %s1805_s24 }
  0x74   : > { %2003 = vmatprep.subr.bf16.mxu1 %v2395_v0  ;;  %2026 = vmatpush3.bf16.msra.mxu0 %v2221_v18 }
  0x75   : > { %2027 = vmatprep.subr.bf16.mxu0 %v2395_v0 }
  0x77   : > { %2004 = vmatpush3.bf16.msra.mxu1 %v2214_v9 }
  0x78   : > { %2009 = vmatprep.subr.bf16.mxu1 %v2395_v0  ;;  %2028 = vmatpush3.bf16.msra.mxu0 %v2222_v19  ;;  %v2223_v19 = vld [vmem:[#allocation6] sm:$0xff]  }
  0x79   : > { %2045 = vmatprep.subr.bf16.mxu0 %v2395_v0 }
  0x7a   : > { %2006 = vmatmul.mubr.msk.bf16.vlgmr.msra.gmra.mrb[0].mxu1 %vm549_vm2, %v509_v12 }
  0x7b   : > { %2010 = vmatpush3.bf16.msra.mxu1 %v2215_v11  ;;  %2017 = vmatprep.mubr.msk.bf16.mxu1 %vm2396_vm0, %v2395_v0 }
  0x7c   : > { %2011 = vmatprep.subr.bf16.mxu1 %v2395_v0  ;;  %2030 = vmatmul.mubr.msk.bf16.vlgmr.msra.gmra.mrb[0].mxu0 %vm549_vm2, %v509_v12 }
  0x7d   : > { %2047 = vmatprep.mubr.msk.bf16.mxu0 %vm2396_vm0, %v2395_v0 }
  0x7f   : > { %2012 = vmatpush3.bf16.msra.mxu1 %v2216_v13 }
  0x80   : > { %2013 = vmatprep.subr.bf16.mxu1 %v2395_v0 }
  0x83   : > { %2014 = vmatpush3.bf16.msra.mxu1 %v2217_v14 }
  0x84   : > { %2015 = vmatprep.subr.bf16.mxu1 %v2395_v0 }
  0x87   : > { %2016 = vmatpush3.bf16.msra.mxu1 %v2218_v15 }
  0x88   : > { %2033 = vmatprep.subr.bf16.mxu1 %v2395_v0 }
  0x8a   : > { %2018 = vmatmul.mubr.msk.bf16.vlgmr.msra.gmra.mrb[4].mxu1 %vm549_vm2, %v509_v12 }
  0x8b   : > { %2035 = vmatprep.mubr.msk.bf16.mxu1 %vm2396_vm0, %v2395_v0 }
 0x14d   : > { %v587_v20 = vpop.f32.mrb[0].mxu1 }
 0x14e   : > { %v2007_v21 = vpop.f32.mrb[1].mxu1  ;;  %v588_v26 = vadd.f32 %v1807_v24, %v587_v20  ;;  %v2224_v20 = vld [vmem:[#allocation6 + $0x8] sm:$0xff]  }
 0x14f   : > { %v590_v22 = vpop.f32.mrb[2].mxu1  ;;  %v749_v37 = vpop.f32.mrb[0].mxu0  ;;  %v2225_v21 = vld [vmem:[#allocation6 + $0x10] sm:$0xff]  }
 0x150   : > { %v2008_v23 = vpop.f32.mrb[3].mxu1  ;;  %v758_v31 = vmul.f32 0.17677669, %v588_v26  ;;  %v750_v38 = vadd.f32 %v1821_v36, %v749_v37  ;;  %v2031_v39 = vpop.f32.mrb[1].mxu0  ;;  %v2226_v26 = vld [vmem:[#allocation6 + $0x18] sm:$0xff]  }
 0x151   : > { %v752_v40 = vpop.f32.mrb[2].mxu0 }
 0x152   : > { %v759_v35 = vpack.c.bf16 %v758_v31, %v758_v31  ;;  %v761_v41 = vpack.c.bf16 %v750_v38, %v750_v38  ;;  %v2032_v42 = vpop.f32.mrb[3].mxu0 }
 0x154   : > { %v828_v43 = vsel %vm826_vm4, %v761_v41, 0 }
 0x15d   : > { %v668_v27 = vpop.f32.mrb[4].mxu1 }
 0x15e   : > { %v669_v28 = vadd.f32 %v1814_v25, %v668_v27  ;;  %v2019_v29 = vpop.f32.mrb[5].mxu1 }
 0x15f   : > { %v671_v30 = vpop.f32.mrb[6].mxu1 }
 0x160   : > { %v760_v32 = vpack.c.bf16 %v669_v28, %v669_v28  ;;  %v2020_v33 = vpop.f32.mrb[7].mxu1 }
 0x162   : > { %v767_v34 = vsel %vm762_vm3, %v760_v32, 0  ;;  %874 = vrot.lane.b32.xlu0 %v760_v32, %s2397_s30 }
 0x163   : > { %2034 = vmatpush3.bf16.xpose.msra.mxu1 %v767_v34  ;;  %v1831_v34 = vld [vmem:[%s2871_s5] ss:$0 sm:$0xff] }
 0x164   : > { %2039 = vmatprep.subr.bf16.mxu1 %v2395_v0 }
 0x166   : > { %871 = vrot.lane.b32.xlu0 %v759_v35, %s2397_s30 }
 0x16a   : > { %2036 = vmatmul.mubr.msk.bf16.vlgmr.msra.gmra.mrb[8].mxu1 %vm762_vm3, %v759_v35 }
 0x16b   : > { %2041 = vmatprep.mubr.msk.bf16.mxu1 %vm2396_vm0, %v2395_v0  ;;  %2040 = vmatpush3.bf16.msra.mxu1 %v828_v43 }
 0x16c   : > { %2051 = vmatprep.subr.bf16.mxu1 %v2395_v0 }
 0x1d4   : > { %v875_v44 = vpop.permute.xlu0 %874 }
 0x1d5   : > { %v880_v45 = vsel %vm762_vm3, %v875_v44, 0 }
 0x1d6   : > { %2046 = vmatpush3.bf16.xpose.msra.mxu0 %v880_v45 }
 0x1d7   : > { %2057 = vmatprep.subr.bf16.mxu0 %v2395_v0 }
 0x1d8   : > { %v872_v46 = vpop.permute.xlu0 %871 }
 0x1dd   : > { %2048 = vmatmul.mubr.msk.bf16.vlgmr.msra.gmra.mrb[4].mxu0 %vm762_vm3, %v872_v46 }
 0x1de   : > { %2065 = vmatprep.mubr.msk.bf16.mxu0 %vm2396_vm0, %v2395_v0  ;;  %2058 = vmatpush3.bf16.msra.mxu0 %v2223_v19  ;;  %v2244_v19 = vld [vmem:[%s2876_s10 + $0x58] sm:$0xff]  }
 0x1df   : > { %2059 = vmatprep.subr.bf16.mxu0 %v2395_v0 }
 0x1e2   : > { %2060 = vmatpush3.bf16.msra.mxu0 %v2224_v20  ;;  %v2245_v20 = vld [vmem:[%s2876_s10 + $0x10] sm:$0xff]  }
 0x1e3   : > { %2061 = vmatprep.subr.bf16.mxu0 %v2395_v0 }
 0x1e6   : > { %2062 = vmatpush3.bf16.msra.mxu0 %v2225_v21  ;;  %v2246_v21 = vld [vmem:[%s2876_s10 + $0x60] sm:$0xff]  }
 0x1e7   : > { %2063 = vmatprep.subr.bf16.mxu0 %v2395_v0 }
 0x1ea   : > { %2064 = vmatpush3.bf16.msra.mxu0 %v2226_v26  ;;  %v2251_v26 = vld [vmem:[%s2876_s10 + $0x28] sm:$0xff]  }
 0x1eb   : > { %2081 = vmatprep.subr.bf16.mxu0 %v2395_v0 }
 0x23d   : > { %v803_v48 = vpop.f32.mrb[8].mxu1 }
 0x23e   : > { %v809_v49 = vsel %vm757_vm6, %v803_v48, -10000.0  ;;  %v2037_v50 = vpop.f32.mrb[9].mxu1  ;;  %v2228_v48 = vld [vmem:[#allocation8 + $0x28] sm:$0xff]  }
 0x23f   : > { %v806_v51 = vpop.f32.mrb[10].mxu1  ;;  %v811_v52 = vsel %vm810_vm7, %v809_v49, -inf  ;;  %v2231_v50 = vld [vmem:[#allocation8 + $0x8] sm:$0xff]  }
 0x240   : > { %812 = vmax.xlane.f32.xlu1 %v811_v52  ;;  %v2038_v53 = vpop.f32.mrb[11].mxu1  ;;  %v2232_v51 = vld [vmem:[#allocation8 + $0x38] sm:$0xff]   ;;  %v2233_v52 = vld [vmem:[#allocation8 + $0x10] sm:$0xff]  }
 0x241   : > { %v2234_v53 = vld [vmem:[#allocation8 + $0x18] sm:$0xff]  }
 0x2b0   : > { %v916_v54 = vpop.f32.mrb[4].mxu0 }
 0x2b1   : > { %v922_v55 = vsel %vm757_vm6, %v916_v54, -10000.0  ;;  %v2049_v56 = vpop.f32.mrb[5].mxu0 }
 0x2b2   : > { %v919_v57 = vpop.f32.mrb[6].mxu0  ;;  %v923_v58 = vsel %vm810_vm7, %v922_v55, -inf }
 0x2b3   : > { %v2050_v59 = vpop.f32.mrb[7].mxu0  ;;  %924 = vmax.xlane.f32.xlu1 %v923_v58  ;;  %v1837_v58 = vld [vmem:[%s2872_s6] ss:$0 sm:$0xff] }
 0x2cd   : > { %v813_v60 = vpop.xlane.xlu1 %812 }
 0x2ce   : > { %v814_v61 = vsub.f32 %v809_v49, %v813_v60  ;;  %v2229_v49 = vld [vmem:[#allocation8] sm:$0xff]  }
 0x2cf   : > { %v1838_v60 = vld [vmem:[%s2873_s7] ss:$0 sm:$0xff] }
 0x2d0   : > { %v815_v62 = vmul.f32 1.442695, %v814_v61 }
 0x2d2   : > { %2263 = vpow2.f32 %v815_v62 }
 0x2dc   : > { %v2264_v63 = vpop.eup %2263 }
 0x2dd   : > { %v817_v1 = vsel %vm810_vm7, %v2264_v63, 0.0 }
 0x2de   : > { %818 = vadd.xlane.f32.xlu0 %v817_v1  ;;  %v2235_v1 = vld [vmem:[#allocation8 + $0x40] sm:$0xff]  }
 0x340   : > { %v925_v2 = vpop.xlane.xlu1 %924 }
 0x341   : > { %v926_v3 = vsub.f32 %v922_v55, %v925_v2 }
 0x343   : > { %v927_v4 = vmul.f32 1.442695, %v926_v3 }
 0x345   : > { %2265 = vpow2.f32 %v927_v4 }
 0x34f   : > { %v2266_v5 = vpop.eup %2265 }
 0x350   : > { %v929_v6 = vsel %vm810_vm7, %v2266_v5, 0.0 }
 0x351   : > { %930 = vadd.xlane.f32.xlu1 %v929_v6 }
 0x362   : > { %936 = vrot.lane.b32.xlu1 %v761_v41, %s2397_s30 }
 0x36b   : > { %v819_v8 = vpop.xlane.xlu0 %818 }
 0x36c   : > { %2267 = vrcp.f32 %v819_v8  ;;  %v2236_v8 = vld [vmem:[#allocation8 + $0x48] sm:$0xff]  }
 0x376   : > { %v2268_v9 = vpop.eup %2267 }
 0x377   : > { %v821_v11 = vmul.f32 %v2268_v9, %v2264_v63  ;;  %v2240_v9 = vld [vmem:[%s2876_s10 + $0x48] sm:$0xff]  }
 0x379   : > { %v822_v12 = vpack.c.bf16 %v821_v11, %v821_v11  ;;  %v2237_v11 = vld [vmem:[#allocation8 + $0x50] sm:$0xff]  }
 0x37b   : > { %2042 = vmatmul.mubr.msk.bf16.vlgmr.msra.gmra.mrb[12].mxu1 %vm810_vm7, %v822_v12 }
 0x37c   : > { %2053 = vmatprep.mubr.msk.bf16.mxu1 %vm2396_vm0, %v2395_v0 }
 0x3de   : > { %v931_v13 = vpop.xlane.xlu1 %930 }
 0x3df   : > { %2269 = vrcp.f32 %v931_v13  ;;  %v2238_v13 = vld [vmem:[#allocation8 + $0x58] sm:$0xff]  }
 0x3e2   : > { %v937_v14 = vpop.permute.xlu1 %936 }
 0x3e3   : > { %v942_v15 = vsel %vm826_vm4, %v937_v14, 0 }
 0x3e4   : > { %2052 = vmatpush3.bf16.msra.mxu1 %v942_v15  ;;  %v2241_v15 = vld [vmem:[%s2876_s10] sm:$0xff]  }
 0x3e5   : > { %2069 = vmatprep.subr.bf16.mxu1 %v2395_v0 }
 0x3e9   : > { %v2270_v16 = vpop.eup %2269 }
 0x3ea   : > { %v933_v17 = vmul.f32 %v2270_v16, %v2266_v5  ;;  %v2239_v5 = vld [vmem:[%s2876_s10 + $0x40] sm:$0xff]  }
 0x3ec   : > { %v934_v18 = vpack.c.bf16 %v933_v17, %v933_v17  ;;  %v2242_v17 = vld [vmem:[%s2876_s10 + $0x50] sm:$0xff]  }
 0x3ee   : > { %2054 = vmatmul.mubr.msk.bf16.vlgmr.msra.gmra.mrb[16].mxu1 %vm810_vm7, %v934_v18  ;;  %v2243_v18 = vld [vmem:[%s2876_s10 + $0x8] sm:$0xff]  }
 0x3ef   : > { %2077 = vmatprep.mubr.msk.bf16.mxu1 %vm2396_vm0, %v2395_v0  ;;  %2070 = vmatpush3.bf16.msra.mxu1 %v2227_v47  ;;  %v2255_v47 = vld [vmem:[%s2876_s10 + $0x80] sm:$0xff]  }
 0x3f0   : > { %2071 = vmatprep.subr.bf16.mxu1 %v2395_v0 }
 0x3f3   : > { %2072 = vmatpush3.bf16.msra.mxu1 %v2228_v48 }
 0x3f4   : > { %2073 = vmatprep.subr.bf16.mxu1 %v2395_v0 }
 0x44e   : > { %v864_v22 = vpop.f32.mrb[12].mxu1 }
 0x44f   : > { %v2043_v23 = vpop.f32.mrb[13].mxu1 }
 0x450   : > { %v867_v24 = vpop.f32.mrb[14].mxu1  ;;  %v2248_v23 = vld [vmem:[%s2876_s10 + $0x68] sm:$0xff]  }
 0x451   : > { %v2044_v25 = vpop.f32.mrb[15].mxu1  ;;  %v2249_v24 = vld [vmem:[%s2876_s10 + $0x20] sm:$0xff]  }
 0x452   : > { %v2250_v25 = vld [vmem:[%s2876_s10 + $0x70] sm:$0xff]  }
 0x4c1   : > { %v978_v27 = vpop.f32.mrb[16].mxu1 }
 0x4c2   : > { %985 = vrot.lane.b32.xlu1 %v978_v27, %s2398_s20  ;;  %v2055_v28 = vpop.f32.mrb[17].mxu1  ;;  %v2252_v27 = vld [vmem:[%s2876_s10 + $0x78] sm:$0xff]  }
 0x4c3   : > { %v981_v29 = vpop.f32.mrb[18].mxu1  ;;  %v2253_v28 = vld [vmem:[%s2876_s10 + $0x30] sm:$0xff]  }
 0x4c4   : > { %v2056_v30 = vpop.f32.mrb[19].mxu1  ;;  %v2254_v29 = vld [vmem:[%s2876_s10 + $0x38] sm:$0xff]  }
 0x534   : > { %v986_v31 = vpop.permute.xlu1 %985 }
 0x535   : > { %v988_v32 = vsel %vm762_vm3, %v864_v22, %v986_v31  ;;  %v2247_v22 = vld [vmem:[%s2876_s10 + $0x18] sm:$0xff]  }
 0x536   : > { %v989_v33 = vpack.c.bf16 %v988_v32, %v988_v32 }
 0x538   : > { %2066 = vmatmul.mubr.msk.bf16.vlgmr.msra.gmra.mrb[8].mxu0 %vm549_vm2, %v989_v33 }
 0x539   : > { %2089 = vmatprep.mubr.msk.bf16.mxu0 %vm2396_vm0, %v2395_v0  ;;  %2082 = vmatpush3.bf16.msra.mxu0 %v2229_v49 }
 0x53a   : > { %2083 = vmatprep.subr.bf16.mxu0 %v2395_v0 }
 0x53d   : > { %2084 = vmatpush3.bf16.msra.mxu0 %v2231_v50 }
 0x53e   : > { %2085 = vmatprep.subr.bf16.mxu0 %v2395_v0 }
 0x541   : > { %2086 = vmatpush3.bf16.msra.mxu0 %v2233_v52  ;;  %v2257_v52 = vld [vmem:[%s2876_s10 + $0x90] sm:$0xff]  }
 0x542   : > { %2087 = vmatprep.subr.bf16.mxu0 %v2395_v0 }
 0x545   : > { %2088 = vmatpush3.bf16.msra.mxu0 %v2234_v53  ;;  %v2258_v53 = vld [vmem:[%s2876_s10 + $0x98] sm:$0xff]  }
 0x546   : > { %2105 = vmatprep.subr.bf16.mxu0 %v2395_v0 }
 0x60b   : > { %v1057_v35 = vpop.f32.mrb[8].mxu0 }
 0x60c   : > { %v1058_v36 = vadd.f32 %v1831_v34, %v1057_v35  ;;  %v2067_v37 = vpop.f32.mrb[9].mxu0 }
 0x60d   : > { %v1060_v38 = vpop.f32.mrb[10].mxu0 }
 0x60e   : > { %v2068_v39 = vpop.f32.mrb[11].mxu0  ;;  %v1063_v40 = vadd.f32 %v1058_v36, %v2624_v10  ;;  %v2230_v10 = vld [vmem:[#allocation8 + $0x30] sm:$0xff]  }
 0x60f   : > { %2074 = vmatpush3.bf16.msra.mxu1 %v2230_v10  ;;  %v1854_v39 = vld [vmem:[%s2875_s9] ss:$0 sm:$0xff] }
 0x610   : > { %v1066_v41 = vsel %vm549_vm2, %v1063_v40, 0.0  ;;  %2075 = vmatprep.subr.bf16.mxu1 %v2395_v0 }
 0x611   : > { %1067 = vadd.xlane.f32.xlu1 %v1066_v41 }
 0x613   : > { %2076 = vmatpush3.bf16.msra.mxu1 %v2232_v51  ;;  %v2256_v51 = vld [vmem:[%s2876_s10 + $0x88] sm:$0xff]  }
 0x614   : > { %2093 = vmatprep.subr.bf16.mxu1 %v2395_v0 }
 0x69e   : > { %v1068_v42 = vpop.xlane.xlu1 %1067 }
 0x69f   : > { %v1070_v43 = vmul.f32 0.015625, %v1068_v42 }
 0x6a1   : > { %v1071_v44 = vsub.f32 %v1063_v40, %v1070_v43 }
 0x6a3   : > { %v1072_v45 = vmul.f32 %v1071_v44, %v1071_v44 }
 0x6a5   : > { %v1073_v46 = vsel %vm549_vm2, %v1072_v45, 0.0 }
 0x6a6   : > { %1074 = vadd.xlane.f32.xlu0 %v1073_v46 }
 0x733   : > { %v1075_v54 = vpop.xlane.xlu0 %1074 }
 0x734   : > { %v1076_v55 = vmul.f32 0.015625, %v1075_v54  ;;  %v2259_v54 = vld [vmem:[%s2876_s10 + $0xa0] sm:$0xff]  }
 0x736   : > { %v1077_v56 = vadd.f32 1e-05, %v1076_v55  ;;  %v2260_v55 = vld [vmem:[%s2876_s10 + $0xa8] sm:$0xff]  }
 0x738   : > { %2271 = vrsqrt.f32 %v1077_v56  ;;  %v2261_v56 = vld [vmem:[%s2876_s10 + $0xb0] sm:$0xff]  }
 0x742   : > { %v2272_v57 = vpop.eup %2271 }
 0x743   : > { %v1079_v59 = vmul.f32 %v2272_v57, %v1071_v44  ;;  %v2262_v57 = vld [vmem:[%s2876_s10 + $0xb8] sm:$0xff]  }
 0x745   : > { %v1086_v61 = vmul.f32 %v1837_v58, %v1079_v59 }
 0x747   : > { %v2716_v62 = vadd.f32 %v1838_v60, %v1086_v61 }
 0x749   : > { %v1096_v63 = vsel %vm2617_vm1, %v2716_v62, 0.0 }
 0x74a   : > { %v1115_v2 = vpack.c.bf16 %v1096_v63, %v1096_v63  ;;  %v1098_v3 = vrot.slane %v1096_v63, 7  ;;  %v1102_v12 = vrot.slane %v1096_v63, 1 }
 0x74c   : > { %2078 = vmatmul.mubr.msk.bf16.vlgmr.msra.gmra.mrb[20].mxu1 %vm549_vm2, %v1115_v2  ;;  %v1101_v4 = vsel %vm1100_vm8, 0.0, %v1098_v3  ;;  %v1105_v14 = vsel %vm1104_vm9, %v1102_v12, 0.0 }
 0x74d   : > { %2094 = vmatpush3.bf16.msra.mxu1 %v2235_v1  ;;  %v1106_v6 = vpack.c.bf16 %v1101_v4, %v1101_v4  ;;  %2101 = vmatprep.mubr.msk.bf16.mxu1 %vm2396_vm0, %v2395_v0  ;;  %v1259_v16 = vpack.c.bf16 %v1105_v14, %v1105_v14 }
 0x74e   : > { %2095 = vmatprep.subr.bf16.mxu1 %v2395_v0 }
 0x74f   : > { %2090 = vmatmul.mubr.msk.bf16.vlgmr.msra.gmra.mrb[12].mxu0 %vm549_vm2, %v1106_v6 }
 0x750   : > { %2106 = vmatpush3.bf16.msra.mxu0 %v2239_v5  ;;  %2121 = vmatprep.mubr.msk.bf16.mxu0 %vm2396_vm0, %v2395_v0 }
 0x751   : > { %2096 = vmatpush3.bf16.msra.mxu1 %v2236_v8  ;;  %2107 = vmatprep.subr.bf16.mxu0 %v2395_v0  ;;  %v1922_v8 = vld [vmem:[%s2877_s11] ss:$0 sm:$0xff] }
 0x752   : > { %2097 = vmatprep.subr.bf16.mxu1 %v2395_v0 }
 0x754   : > { %2108 = vmatpush3.bf16.msra.mxu0 %v2240_v9 }
 0x755   : > { %2098 = vmatpush3.bf16.msra.mxu1 %v2237_v11  ;;  %2109 = vmatprep.subr.bf16.mxu0 %v2395_v0 }
 0x756   : > { %2099 = vmatprep.subr.bf16.mxu1 %v2395_v0 }
 0x758   : > { %2110 = vmatpush3.bf16.msra.mxu0 %v2242_v17 }
 0x759   : > { %2100 = vmatpush3.bf16.msra.mxu1 %v2238_v13  ;;  %2111 = vmatprep.subr.bf16.mxu0 %v2395_v0 }
 0x75a   : > { %2125 = vmatprep.subr.bf16.mxu1 %v2395_v0 }
 0x75c   : > { %2102 = vmatmul.mubr.msk.bf16.vlgmr.msra.gmra.mrb[24].mxu1 %vm549_vm2, %v1259_v16  ;;  %2112 = vmatpush3.bf16.msra.mxu0 %v2244_v19 }
 0x75d   : > { %2126 = vmatpush3.bf16.msra.mxu1 %v2241_v15  ;;  %2141 = vmatprep.mubr.msk.bf16.mxu1 %vm2396_vm0, %v2395_v0 }
 0x75e   : > { %2127 = vmatprep.subr.bf16.mxu1 %v2395_v0  ;;  %2113 = vmatprep.subr.bf16.mxu0 %v2395_v0 }
 0x760   : > { %2114 = vmatpush3.bf16.msra.mxu0 %v2246_v21 }
 0x761   : > { %2128 = vmatpush3.bf16.msra.mxu1 %v2243_v18  ;;  %2115 = vmatprep.subr.bf16.mxu0 %v2395_v0 }
 0x762   : > { %2129 = vmatprep.subr.bf16.mxu1 %v2395_v0 }
 0x764   : > { %2116 = vmatpush3.bf16.msra.mxu0 %v2248_v23 }
 0x765   : > { %2130 = vmatpush3.bf16.msra.mxu1 %v2245_v20  ;;  %2117 = vmatprep.subr.bf16.mxu0 %v2395_v0 }
 0x766   : > { %2131 = vmatprep.subr.bf16.mxu1 %v2395_v0 }
 0x768   : > { %2118 = vmatpush3.bf16.msra.mxu0 %v2250_v25 }
 0x769   : > { %2132 = vmatpush3.bf16.msra.mxu1 %v2247_v22  ;;  %2119 = vmatprep.subr.bf16.mxu0 %v2395_v0 }
 0x76a   : > { %2133 = vmatprep.subr.bf16.mxu1 %v2395_v0 }
 0x76c   : > { %2120 = vmatpush3.bf16.msra.mxu0 %v2252_v27  ;;  %v1924_v27 = vld [vmem:[%s2879_s13] ss:$0 sm:$0xff] }
 0x76d   : > { %2134 = vmatpush3.bf16.msra.mxu1 %v2249_v24  ;;  %2145 = vmatprep.subr.bf16.mxu0 %v2395_v0 }
 0x76e   : > { %2135 = vmatprep.subr.bf16.mxu1 %v2395_v0 }
 0x771   : > { %2136 = vmatpush3.bf16.msra.mxu1 %v2251_v26 }
 0x772   : > { %2137 = vmatprep.subr.bf16.mxu1 %v2395_v0 }
 0x775   : > { %2138 = vmatpush3.bf16.msra.mxu1 %v2253_v28 }
 0x776   : > { %2139 = vmatprep.subr.bf16.mxu1 %v2395_v0 }
 0x779   : > { %2140 = vmatpush3.bf16.msra.mxu1 %v2254_v29 }
 0x81f   : > { %v1186_v30 = vpop.f32.mrb[20].mxu1 }
 0x820   : > { %v2079_v31 = vpop.f32.mrb[21].mxu1 }
 0x821   : > { %v1189_v32 = vpop.f32.mrb[22].mxu1 }
 0x822   : > { %v2080_v33 = vpop.f32.mrb[23].mxu1  ;;  %v1253_v34 = vpop.f32.mrb[12].mxu0 }
 0x823   : > { %v1254_v35 = vadd.f32 %v1253_v34, %v1186_v30  ;;  %v2091_v36 = vpop.f32.mrb[13].mxu0 }
 0x824   : > { %v1256_v37 = vpop.f32.mrb[14].mxu0 }
 0x825   : > { %v2092_v38 = vpop.f32.mrb[15].mxu0 }
 0x82f   : > { %v1330_v40 = vpop.f32.mrb[24].mxu1 }
 0x830   : > { %v1336_v41 = vadd.f32 %v1330_v40, %v1254_v35  ;;  %v2103_v42 = vpop.f32.mrb[25].mxu1 }
 0x831   : > { %v1333_v43 = vpop.f32.mrb[26].mxu1 }
 0x832   : > { %v1343_v44 = vadd.f32 %v1854_v39, %v1336_v41  ;;  %v2104_v45 = vpop.f32.mrb[27].mxu1 }
 0x834   : > { %v1344_v46 = vmax.f32 %v1343_v44, 0.0 }
 0x836   : > { %v1345_v48 = vsel %vm2617_vm1, %v1344_v46, 0.0  ;;  %v1880_v49 = vpack.c.bf16 %v1344_v46, %v1344_v46 }
 0x837   : > { %v1347_v10 = vrot.slane %v1345_v48, 7  ;;  %v1350_v58 = vrot.slane %v1345_v48, 1 }
 0x838   : > { %2122 = vmatmul.mubr.msk.bf16.vlgmr.msra.gmra.mrb[16].mxu0 %vm1879_vm10, %v1880_v49 }
 0x839   : > { %v1893_v50 = vpack.c.bf16 %v1347_v10, %v1347_v10  ;;  %2146 = vmatpush3.bf16.msra.mxu0 %v2255_v47  ;;  %2161 = vmatprep.mubr.msk.bf16.mxu0 %vm2396_vm0, %v2395_v0  ;;  %v1920_v59 = vpack.c.bf16 %v1350_v58, %v1350_v58 }
 0x83a   : > { %2147 = vmatprep.subr.bf16.mxu0 %v2395_v0 }
 0x83b   : > { %2142 = vmatmul.mubr.msk.bf16.vlgmr.msra.gmra.mrb[28].mxu1 %vm1892_vm12, %v1893_v50 }
 0x83d   : > { %2148 = vmatpush3.bf16.msra.mxu0 %v2256_v51 }
 0x83e   : > { %2149 = vmatprep.subr.bf16.mxu0 %v2395_v0 }
 0x841   : > { %2150 = vmatpush3.bf16.msra.mxu0 %v2257_v52 }
 0x842   : > { %2151 = vmatprep.subr.bf16.mxu0 %v2395_v0 }
 0x845   : > { %2152 = vmatpush3.bf16.msra.mxu0 %v2258_v53 }
 0x846   : > { %2153 = vmatprep.subr.bf16.mxu0 %v2395_v0 }
 0x849   : > { %2154 = vmatpush3.bf16.msra.mxu0 %v2259_v54 }
 0x84a   : > { %2155 = vmatprep.subr.bf16.mxu0 %v2395_v0 }
 0x84d   : > { %2156 = vmatpush3.bf16.msra.mxu0 %v2260_v55 }
 0x84e   : > { %2157 = vmatprep.subr.bf16.mxu0 %v2395_v0 }
 0x851   : > { %2158 = vmatpush3.bf16.msra.mxu0 %v2261_v56 }
 0x852   : > { %2159 = vmatprep.subr.bf16.mxu0 %v2395_v0 }
 0x855   : > { %2160 = vmatpush3.bf16.msra.mxu0 %v2262_v57 }
 0x858   : > { %2162 = vmatmul.mubr.msk.bf16.vlgmr.msra.gmra.mrb[20].mxu0 %vm1919_vm13, %v1920_v59 }
 0x90b   : > { %v1470_v60 = vpop.f32.mrb[16].mxu0 }
 0x90c   : > { %v2123_v61 = vpop.f32.mrb[17].mxu0 }
 0x90d   : > { %v1473_v63 = vpop.f32.mrb[18].mxu0 }
 0x90e   : > { %v2124_v1 = vpop.f32.mrb[19].mxu0  ;;  %v1558_v2 = vpop.f32.mrb[28].mxu1 }
 0x90f   : > { %v1559_v3 = vadd.f32 %v1558_v2, %v1470_v60  ;;  %v2143_v4 = vpop.f32.mrb[29].mxu1 }
 0x910   : > { %v1561_v5 = vpop.f32.mrb[30].mxu1 }
 0x911   : > { %v2144_v6 = vpop.f32.mrb[31].mxu1 }
 0x92b   : > { %v1664_v0 = vpop.f32.mrb[20].mxu0 }
 0x92c   : > { %v1670_v9 = vadd.f32 %v1664_v0, %v1559_v3  ;;  %v2163_v11 = vpop.f32.mrb[21].mxu0 }
 0x92d   : > { %v1667_v12 = vpop.f32.mrb[22].mxu0 }
 0x92e   : > { %v1677_v13 = vadd.f32 %v1922_v8, %v1670_v9  ;;  %v2164_v14 = vpop.f32.mrb[23].mxu0 }
 0x930   : > { %v1678_v15 = vsel %vm2617_vm1, %v1677_v13, 0.0 }
 0x931   : > { %v1679_v16 = vadd.f32 %v1678_v15, %v2716_v62 }
 0x933   : > { %v1682_v17 = vsel %vm549_vm2, %v1679_v16, 0.0 }
 0x934   : > { %1683 = vadd.xlane.f32.xlu0 %v1682_v17 }
 0x9c1   : > { %v1684_v18 = vpop.xlane.xlu0 %1683 }
 0x9c2   : > { %v1685_v19 = vmul.f32 0.015625, %v1684_v18 }
 0x9c4   : > { %v1686_v20 = vsub.f32 %v1679_v16, %v1685_v19 }
 0x9c6   : > { %v1687_v21 = vmul.f32 %v1686_v20, %v1686_v20 }
 0x9c8   : > { %v1688_v22 = vsel %vm549_vm2, %v1687_v21, 0.0 }
 0x9c9   : > { %1689 = vadd.xlane.f32.xlu0 %v1688_v22 }
 0xa56   : > { %v1690_v23 = vpop.xlane.xlu0 %1689 }
 0xa57   : > { %v1691_v24 = vmul.f32 0.015625, %v1690_v23 }
 0xa59   : > { %v1692_v25 = vadd.f32 1e-05, %v1691_v24 }
 0xa5b   : > { %2273 = vrsqrt.f32 %v1692_v25 }
 0xa65   : > { %v2274_v26 = vpop.eup %2273 }
 0xa66   : > { %v1694_v62 = vmul.f32 %v2274_v26, %v1686_v20 }
 0xa68   : > { %v1701_v28 = vmul.f32 %v1923_v7, %v1694_v62 }
 0xa6a   : > { %v1708_v29 = vadd.f32 %v1924_v27, %v1701_v28 }
 0xa6c   : > { %1709 = vst.msk [vmem:[%s486_s23] sm:$0xff] %vm549_vm2, %v1708_v29 }
 0xa6d PF: > { %s2897_s21 = sld [smem:[#allocation12_spill]] }
 0xa73   : > { %s32_s18 = sadd.s32 1, %s2897_s21  }
 0xa74   : > { %p29_p10 = scmp.ge.s32.totalorder %s32_s18, 4  }
 0xa76   :  { %31 = sbr.rel (!%p29_p10) target bundleno = 17 (0x11), region = 123 }
 0xa7d   :  { %1729 = vsyncpa [#allocation5], 1 }
 0xa7e   :  { %1731 = vsyncpa [#allocation5 + $0x1], 1 }
 0xa7f   :  { %1732 = vsyncpa [#allocation7], 1 }

// kernel: text_encoder_forward.8
= control target key start
LH: loop header
LB: loop body
LE: loop exit
PB: predicated region body
PF: predicated region fallthrough
CT: control target
= control target key end

     0   :  { %s2828_s0 = inlined_call_operand.vmem [shape: s32[2], index: 0, kind: input, shape index: {}]   ;;  %s2829_s1 = inlined_call_operand.vmem [shape: f32[2,16,64], index: 1, kind: input, shape index: {}]   ;;  %s2830_s2 = inlined_call_operand.vmem [shape: bf16[3,64,64], index: 2, kind: input, shape index: {}]   ;;  %s2831_s3 = inlined_call_operand.vmem [shape: f32[3,1,64], index: 3, kind: input, shape index: {}]   ;;  %s2832_s4 = inlined_call_operand.vmem [shape: bf16[64,64], index: 4, kind: input, shape index: {}]   ;;  %s2833_s5 = inlined_call_operand.vmem [shape: f32[1,64], index: 5, kind: input, shape index: {}, may-alias: {5,7,11,13}]   ;;  %s2834_s6 = inlined_call_operand.vmem [shape: f32[1,64], index: 6, kind: input, shape index: {}, may-alias: {6,12}]   ;;  %s2835_s7 = inlined_call_operand.vmem [shape: f32[1,64], index: 7, kind: input, shape index: {}, may-alias: {5,7,11,13}]   ;;  %s2836_s8 = inlined_call_operand.vmem [shape: bf16[3,64,128], index: 8, kind: input, shape index: {}]   ;;  %s2837_s9 = inlined_call_operand.vmem [shape: f32[1,128], index: 9, kind: input, shape index: {}]   ;;  %s2838_s10 = inlined_call_operand.vmem [shape: bf16[3,128,64], index: 10, kind: input, shape index: {}]   ;;  %s2839_s11 = inlined_call_operand.vmem [shape: f32[1,64], index: 11, kind: input, shape index: {}, may-alias: {5,7,11,13}]   ;;  %s2840_s12 = inlined_call_operand.vmem [shape: f32[1,64], index: 12, kind: input, shape index: {}, may-alias: {6,12}]   ;;  %s2841_s13 = inlined_call_operand.vmem [shape: f32[1,64], index: 13, kind: input, shape index: {}, may-alias: {5,7,11,13}]   ;;  %s2842_s14 = inlined_call_operand.vmem [shape: f32[2,16,64], index: 14, kind: output, shape index: {}]  }
   0x1   :  { %s19_s15 = sshll.u32 %s2828_s0, 4  ;;  %s20_s15 = int_to_ptr.vmem [resolvable:$true] %s19_s15 }
   0x2   :  { %s2323_s16 = scalar_lea.vmem %s20_s15, 16  ;;  %p2328_p1 = scmp.lt.s32.totalorder %s20_s15, %s20_s15 }
   0x3   :  { %p2324_p0 = scmp.ne.s32.totalorder %s20_s15, %s2323_s16  ;;  %p2329_p2 = scmp.lt.s32.totalorder %s2323_s16, %s2323_s16 }
   0x5   :  { %p2330_p3 = por %p2329_p2, %p2328_p1 }
   0x7   :  { %p2331_p4 = pnand %p2330_p3, %p2324_p0 }
   0x9   :  { %2334 = shalt.err (!%p2331_p4)  }
   0xa   :  { %s2345_s17 = smov [#allocation3]  }
   0xb   :  { %22 = dma.vmem_to_smem %s20_s15, 16, %s2345_s17, [#allocation2] }
   0xc   :  { %2339 = dma.done.wait [#allocation2], 16 }
   0xd   :  { %2340 = vsyncadd [#allocation2], 4294967280 }
   0xe   :  { %24 = sfence }
   0xf   :  { %s2429_s18 = smov 0  }
  0x10 LB: > { %s1828_s0 = sadd.s32 4294967295, %s2343_s18   ;;  %p1832_p5 = scmp.ge.s32.totalorder %s2343_s18, 1  ;;  %s2343_s18 = sphi %s2429_s18, %s30_s18  }
  0x11   : > { %p394_p6 = scmp.lt.s32.totalorder %s2343_s18, 3 }
  0x13   : > { %p395_p7 = pnand %p1832_p5, %p394_p6 }
  0x14   : > { %v2247_v0 = vld [vmem:[%s2830_s2] sm:$0xff] (!%p395_p7)   ;;  %v452_v1 = vlaneseq (!%p395_p7)  ;;  %v2346_v2 = vmov (!%p395_p7), 0.0   ;;  %v2248_v3 = vld [vmem:[%s2830_s2 + $0x8] sm:$0xff] (!%p395_p7)   ;;  %vm2347_vm0 = vmmov (!%p395_p7), 0   ;;  %p438_p8 = scmp.lt.s32.totalorder (!%p395_p7), %s1828_s0, 1  ;;  %s449_s23 = sld [smem:[#allocation3 + %s1828_s0]] (!%p395_p7) }
  0x15   : > { %398 = sbr.rel (%p395_p7) target bundleno = 2605 (0xa2d), region = 72  ;;  %2060 = vmatprep.subr.bf16.mxu1 (!%p395_p7), %v2346_v2  ;;  %2084 = vmatprep.subr.bf16.mxu0 (!%p395_p7), %v2346_v2  ;;  %v2249_v5 = vld [vmem:[%s2830_s2 + $0x10] sm:$0xff] (!%p395_p7)   ;;  %v2250_v9 = vld [vmem:[%s2830_s2 + $0x18] sm:$0xff] (!%p395_p7)   ;;  %vm516_vm1 = vcmask (!%p395_p7), 523264   ;;  %v2251_v15 = vld [vmem:[%s2830_s2 + $0x20] sm:$0xff] (!%p395_p7)   ;;  %vm734_vm4 = vcmask (!%p395_p7), 261120  }
  0x16   : > { %2061 = vmatpush3.bf16.msra.mxu1 (!%p395_p7), %v2247_v0  ;;  %2068 = vmatprep.mubr.msk.bf16.mxu1 (!%p395_p7), %vm2347_vm0, %v2346_v2  ;;  %v453_v4 = vshrl.u32 (!%p395_p7), %v452_v1, 7  ;;  %v2252_v17 = vld [vmem:[%s2830_s2 + $0x28] sm:$0xff] (!%p395_p7)   ;;  %v2253_v18 = vld [vmem:[%s2830_s2 + $0x30] sm:$0xff] (!%p395_p7)   ;;  %v2254_v19 = vld [vmem:[%s2830_s2 + $0x38] sm:$0xff] (!%p395_p7)   ;;  %v459_v54 = vand.u32 (!%p395_p7), 127, %v452_v1  ;;  %vm784_vm7 = vcmask (!%p395_p7), 130048  }
  0x17   : > { %2062 = vmatprep.subr.bf16.mxu1 (!%p395_p7), %v2346_v2  ;;  %2092 = vmatprep.mubr.msk.bf16.mxu0 (!%p395_p7), %vm2347_vm0, %v2346_v2  ;;  %v2255_v20 = vld [vmem:[%s2830_s2 + $0x40] sm:$0xff] (!%p395_p7)   ;;  %v2256_v21 = vld [vmem:[%s2830_s2 + $0x48] sm:$0xff] (!%p395_p7)   ;;  %v2257_v22 = vld [vmem:[%s2830_s2 + $0x50] sm:$0xff] (!%p395_p7)   ;;  %s2349_s20 = smov (!%p395_p7), 32   ;;  %vm1116_vm9 = vcmask (!%p395_p7), 1040384   ;;  %vm1123_vm10 = vcmask (!%p395_p7), 1046528  }
  0x18   : > { %v454_v6 = vadd.s32 (!%p395_p7), 8, %v453_v4  ;;  %2085 = vmatpush3.bf16.msra.mxu0 (!%p395_p7), %v2255_v20  ;;  %v2258_v23 = vld [vmem:[%s2830_s2 + $0x58] sm:$0xff] (!%p395_p7)   ;;  %v1837_v24 = vld [vmem:[%s2831_s3] ss:$0 sm:$0xff] (!%p395_p7)  ;;  %v1852_v34 = vld [vmem:[%s2831_s3 + $0x1] ss:$0 sm:$0xff] (!%p395_p7) }
  0x19   : > { %2086 = vmatprep.subr.bf16.mxu0 (!%p395_p7), %v2346_v2  ;;  %v1867_v43 = vld [vmem:[%s2831_s3 + $0x2] ss:$0 sm:$0xff] (!%p395_p7)  ;;  %vm1952_vm12 = vmneg (!%p395_p7), %vm1116_vm9  ;;  %vm2350_vm13 = vmmov (!%p395_p7), 1  }
  0x1a   : > { %2063 = vmatpush3.bf16.msra.mxu1 (!%p395_p7), %v2248_v3  ;;  %v2466_v10 = vstv (!%p395_p7), %s449_s23  ;;  %s2348_s23 = smov (!%p395_p7), 96   ;;  %vm1953_vm14 = vmpackc.low (!%p395_p7), %vm2350_vm13, %vm1952_vm12 }
  0x1b   : > { %2064 = vmatprep.subr.bf16.mxu1 (!%p395_p7), %v2346_v2  ;;  %vm2469_vm2 = vcmp.lt.s32.totalorder (!%p395_p7), %v453_v4, %v2466_v10  ;;  %vm2474_vm3 = vcmp.lt.s32.totalorder (!%p395_p7), %v454_v6, %v2466_v10  ;;  %vm460_vm5 = vcmp.lt.s32.totalorder (!%p395_p7), %v459_v54, %v2466_v10  ;;  %v2262_v54 = vld [vmem:[%s2832_s4 + $0x18] sm:$0xff] (!%p395_p7)   ;;  %vm1980_vm15 = vmpackc.low (!%p395_p7), %vm1123_vm10, %vm2350_vm13 }
  0x1c   : > { %s2848_s0 = smov (!%p438_p8, %s1828_s0), 1  ;;  %2087 = vmatpush3.bf16.msra.mxu0 %v2256_v21  ;;  %vm727_vm6 = vmand %vm2469_vm2, %vm460_vm5 }
  0x1d   : > { %s1988_s26 = sshll.u32 %s2848_s0, 4  ;;  %2088 = vmatprep.subr.bf16.mxu0 %v2346_v2  ;;  %vm728_vm8 = vmand %vm2474_vm3, %vm460_vm5 }
  0x1e   : > { %s442_s29 = scalar_lea.vmem %s2829_s1, %s1988_s26  ;;  %2065 = vmatpush3.bf16.msra.mxu1 %v2249_v5  ;;  %vm1941_vm11 = vmpackc.low %vm2474_vm3, %vm2469_vm2  ;;  %s447_s25 = scalar_lea.vmem %s2842_s14, %s1988_s26 }
  0x1f   : > { %v450_v7 = vld [vmem:[%s442_s29] sm:$0xff]  ;;  %v451_v8 = vld [vmem:[%s442_s29 + $0x8] sm:$0xff]  ;;  %2066 = vmatprep.subr.bf16.mxu1 %v2346_v2 }
  0x20   : > { %v2481_v13 = vsel %vm2469_vm2, %v450_v7, 0.0  ;;  %v2485_v14 = vsel %vm2474_vm3, %v451_v8, 0.0  ;;  %2089 = vmatpush3.bf16.msra.mxu0 %v2257_v22 }
  0x21   : > { %v476_v16 = vpack.c.bf16 %v2485_v14, %v2481_v13  ;;  %2090 = vmatprep.subr.bf16.mxu0 %v2346_v2 }
  0x22   : > { %2067 = vmatpush3.bf16.msra.mxu1 %v2250_v9 }
  0x23   : > { %2072 = vmatprep.subr.bf16.mxu1 %v2346_v2 }
  0x24   : > { %2091 = vmatpush3.bf16.msra.mxu0 %v2258_v23 }
  0x25   : > { %2069 = vmatmul.mubr.msk.bf16.vlgmr.msra.gmra.mrb[0].mxu1 %vm516_vm1, %v476_v16  ;;  %2108 = vmatprep.subr.bf16.mxu0 %v2346_v2 }
  0x26   : > { %2073 = vmatpush3.bf16.msra.mxu1 %v2251_v15  ;;  %2080 = vmatprep.mubr.msk.bf16.mxu1 %vm2347_vm0, %v2346_v2 }
  0x27   : > { %2074 = vmatprep.subr.bf16.mxu1 %v2346_v2  ;;  %2093 = vmatmul.mubr.msk.bf16.vlgmr.msra.gmra.mrb[0].mxu0 %vm516_vm1, %v476_v16 }
  0x28   : > { %2110 = vmatprep.mubr.msk.bf16.mxu0 %vm2347_vm0, %v2346_v2 }
  0x2a   : > { %2075 = vmatpush3.bf16.msra.mxu1 %v2252_v17 }
  0x2b   : > { %2076 = vmatprep.subr.bf16.mxu1 %v2346_v2 }
  0x2e   : > { %2077 = vmatpush3.bf16.msra.mxu1 %v2253_v18 }
  0x2f   : > { %2078 = vmatprep.subr.bf16.mxu1 %v2346_v2 }
  0x32   : > { %2079 = vmatpush3.bf16.msra.mxu1 %v2254_v19 }
  0x33   : > { %2096 = vmatprep.subr.bf16.mxu1 %v2346_v2 }
  0x35   : > { %2081 = vmatmul.mubr.msk.bf16.vlgmr.msra.gmra.mrb[4].mxu1 %vm516_vm1, %v476_v16 }
  0x36   : > { %2098 = vmatprep.mubr.msk.bf16.mxu1 %vm2347_vm0, %v2346_v2 }
  0xf8   : > { %v554_v25 = vpop.f32.mrb[0].mxu1 }
  0xf9   : > { %v555_v26 = vadd.f32 %v1837_v24, %v554_v25  ;;  %v2070_v27 = vpop.f32.mrb[1].mxu1 }
  0xfa   : > { %v557_v28 = vpop.f32.mrb[2].mxu1  ;;  %v718_v44 = vpop.f32.mrb[0].mxu0 }
  0xfb   : > { %v729_v29 = vmul.f32 0.17677669, %v555_v26  ;;  %v558_v30 = vadd.f32 %v1837_v24, %v557_v28  ;;  %v2071_v31 = vpop.f32.mrb[3].mxu1  ;;  %v719_v45 = vadd.f32 %v1867_v43, %v718_v44  ;;  %v2094_v46 = vpop.f32.mrb[1].mxu0 }
  0xfc   : > { %v721_v47 = vpop.f32.mrb[2].mxu0 }
  0xfd   : > { %v730_v32 = vmul.f32 0.17677669, %v558_v30  ;;  %v722_v48 = vadd.f32 %v1867_v43, %v721_v47  ;;  %v2095_v49 = vpop.f32.mrb[3].mxu0  ;;  %v2259_v47 = vld [vmem:[%s2832_s4] sm:$0xff]  }
  0xfe   : > { %v2261_v49 = vld [vmem:[%s2832_s4 + $0x10] sm:$0xff]  }
  0xff   : > { %v731_v33 = vpack.c.bf16 %v730_v32, %v729_v29  ;;  %v733_v50 = vpack.c.bf16 %v722_v48, %v719_v45  ;;  %v2260_v48 = vld [vmem:[%s2832_s4 + $0x8] sm:$0xff]  }
 0x108   : > { %v636_v35 = vpop.f32.mrb[4].mxu1 }
 0x109   : > { %v2082_v36 = vpop.f32.mrb[5].mxu1  ;;  %v637_v38 = vadd.f32 %v1852_v34, %v636_v35 }
 0x10a   : > { %v639_v37 = vpop.f32.mrb[6].mxu1 }
 0x10b   : > { %v640_v39 = vadd.f32 %v1852_v34, %v639_v37  ;;  %v2083_v40 = vpop.f32.mrb[7].mxu1 }
 0x10d   : > { %v732_v41 = vpack.c.bf16 %v640_v39, %v637_v38 }
 0x10f   : > { %856 = vrot.lane.b32.xlu0 %v732_v41, %s2348_s23  ;;  %v739_v42 = vsel %vm734_vm4, %v732_v41, 0 }
 0x110   : > { %2097 = vmatpush3.bf16.xpose.msra.mxu1 %v739_v42 }
 0x111   : > { %2102 = vmatprep.subr.bf16.mxu1 %v2346_v2 }
 0x113   : > { %853 = vrot.lane.b32.xlu0 %v731_v33, %s2348_s23 }
 0x117   : > { %2099 = vmatmul.mubr.msk.bf16.vlgmr.msra.gmra.mrb[8].mxu1 %vm734_vm4, %v731_v33 }
 0x118   : > { %2104 = vmatprep.mubr.msk.bf16.mxu1 %vm2347_vm0, %v2346_v2  ;;  %2103 = vmatpush3.bf16.msra.mxu1 %v733_v50 }
 0x119   : > { %2114 = vmatprep.subr.bf16.mxu1 %v2346_v2 }
 0x181   : > { %v857_v51 = vpop.permute.xlu0 %856 }
 0x182   : > { %v862_v52 = vsel %vm734_vm4, %v857_v51, 0 }
 0x183   : > { %2109 = vmatpush3.bf16.xpose.msra.mxu0 %v862_v52 }
 0x184   : > { %2120 = vmatprep.subr.bf16.mxu0 %v2346_v2 }
 0x185   : > { %v854_v53 = vpop.permute.xlu0 %853 }
 0x18a   : > { %2111 = vmatmul.mubr.msk.bf16.vlgmr.msra.gmra.mrb[4].mxu0 %vm734_vm4, %v854_v53 }
 0x18b   : > { %2128 = vmatprep.mubr.msk.bf16.mxu0 %vm2347_vm0, %v2346_v2  ;;  %2121 = vmatpush3.bf16.msra.mxu0 %v2259_v47 }
 0x18c   : > { %2122 = vmatprep.subr.bf16.mxu0 %v2346_v2 }
 0x18f   : > { %2123 = vmatpush3.bf16.msra.mxu0 %v2260_v48 }
 0x190   : > { %2124 = vmatprep.subr.bf16.mxu0 %v2346_v2 }
 0x193   : > { %2125 = vmatpush3.bf16.msra.mxu0 %v2261_v49 }
 0x194   : > { %2126 = vmatprep.subr.bf16.mxu0 %v2346_v2 }
 0x197   : > { %2127 = vmatpush3.bf16.msra.mxu0 %v2262_v54 }
 0x198   : > { %2144 = vmatprep.subr.bf16.mxu0 %v2346_v2 }
 0x1ea   : > { %v775_v55 = vpop.f32.mrb[8].mxu1 }
 0x1eb   : > { %v782_v56 = vsel %vm727_vm6, %v775_v55, -10000.0  ;;  %v2100_v57 = vpop.f32.mrb[9].mxu1 }
 0x1ec   : > { %v778_v58 = vpop.f32.mrb[10].mxu1  ;;  %v785_v59 = vsel %vm784_vm7, %v782_v56, -inf }
 0x1ed   : > { %v783_v60 = vsel %vm728_vm8, %v778_v58, -10000.0  ;;  %786 = vmax.xlane.f32.xlu1 %v785_v59  ;;  %v2101_v61 = vpop.f32.mrb[11].mxu1 }
 0x1ee   : > { %v788_v62 = vsel %vm784_vm7, %v783_v60, -inf }
 0x1f1   : > { %789 = vmax.xlane.f32.xlu1 %v788_v62 }
 0x25d   : > { %v898_v63 = vpop.f32.mrb[4].mxu0 }
 0x25e   : > { %v905_v0 = vsel %vm727_vm6, %v898_v63, -10000.0  ;;  %v2112_v1 = vpop.f32.mrb[5].mxu0 }
 0x25f   : > { %v901_v3 = vpop.f32.mrb[6].mxu0  ;;  %v907_v4 = vsel %vm784_vm7, %v905_v0, -inf }
 0x260   : > { %v906_v5 = vsel %vm728_vm8, %v901_v3, -10000.0  ;;  %908 = vmax.xlane.f32.xlu0 %v907_v4  ;;  %v2113_v6 = vpop.f32.mrb[7].mxu0  ;;  %v1877_v3 = vld [vmem:[%s2833_s5] ss:$0 sm:$0xff] }
 0x261   : > { %v910_v7 = vsel %vm784_vm7, %v906_v5, -inf }
 0x262   : > { %911 = vmax.xlane.f32.xlu1 %v910_v7 }
 0x27a   : > { %v787_v8 = vpop.xlane.xlu1 %786 }
 0x27b   : > { %v791_v9 = vsub.f32 %v782_v56, %v787_v8 }
 0x27d   : > { %v793_v10 = vmul.f32 1.442695, %v791_v9 }
 0x27e   : > { %v790_v15 = vpop.xlane.xlu1 %789 }
 0x27f   : > { %2299 = vpow2.f32 %v793_v10  ;;  %v792_v16 = vsub.f32 %v783_v60, %v790_v15 }
 0x281   : > { %v795_v17 = vmul.f32 1.442695, %v792_v16 }
 0x283   : > { %2301 = vpow2.f32 %v795_v17 }
 0x289   : > { %v2300_v18 = vpop.eup %2299 }
 0x28a   : > { %v797_v19 = vsel %vm784_vm7, %v2300_v18, 0.0 }
 0x28b   : > { %798 = vadd.xlane.f32.xlu1 %v797_v19 }
 0x28d   : > { %v2302_v20 = vpop.eup %2301 }
 0x28e   : > { %v800_v21 = vsel %vm784_vm7, %v2302_v20, 0.0 }
 0x28f   : > { %801 = vadd.xlane.f32.xlu1 %v800_v21 }
 0x2ed   : > { %v909_v22 = vpop.xlane.xlu0 %908 }
 0x2ee   : > { %v913_v23 = vsub.f32 %v905_v0, %v909_v22 }
 0x2ef   : > { %v912_v24 = vpop.xlane.xlu1 %911 }
 0x2f0   : > { %v915_v25 = vmul.f32 1.442695, %v913_v23  ;;  %v914_v26 = vsub.f32 %v906_v5, %v912_v24 }
 0x2f2   : > { %2303 = vpow2.f32 %v915_v25  ;;  %v917_v27 = vmul.f32 1.442695, %v914_v26 }
 0x2f4   : > { %2305 = vpow2.f32 %v917_v27  ;;  %v2264_v27 = vld [vmem:[%s2836_s8 + $0x28] sm:$0xff]  }
 0x2fc   : > { %v2304_v28 = vpop.eup %2303 }
 0x2fd   : > { %v919_v29 = vsel %vm784_vm7, %v2304_v28, 0.0 }
 0x2fe   : > { %v2306_v30 = vpop.eup %2305  ;;  %920 = vadd.xlane.f32.xlu1 %v919_v29  ;;  %v2266_v29 = vld [vmem:[%s2836_s8 + $0x30] sm:$0xff]  }
 0x2ff   : > { %v922_v31 = vsel %vm784_vm7, %v2306_v30, 0.0 }
 0x302   : > { %923 = vadd.xlane.f32.xlu1 %v922_v31  ;;  %v2268_v31 = vld [vmem:[%s2836_s8 + $0x38] sm:$0xff]  }
 0x313   : > { %931 = vrot.lane.b32.xlu1 %v733_v50, %s2348_s23 }
 0x318   : > { %v799_v32 = vpop.xlane.xlu1 %798 }
 0x319   : > { %2307 = vrcp.f32 %v799_v32  ;;  %v2269_v32 = vld [vmem:[%s2836_s8 + $0x10] sm:$0xff]  }
 0x31c   : > { %v802_v33 = vpop.xlane.xlu1 %801 }
 0x31d   : > { %2309 = vrcp.f32 %v802_v33  ;;  %v2270_v33 = vld [vmem:[%s2836_s8 + $0x18] sm:$0xff]  }
 0x323   : > { %v2308_v34 = vpop.eup %2307 }
 0x324   : > { %v805_v36 = vmul.f32 %v2308_v34, %v2300_v18 }
 0x327   : > { %v2310_v35 = vpop.eup %2309 }
 0x328   : > { %v806_v37 = vmul.f32 %v2310_v35, %v2302_v20 }
 0x32a   : > { %v807_v38 = vpack.c.bf16 %v806_v37, %v805_v36 }
 0x32c   : > { %2105 = vmatmul.mubr.msk.bf16.vlgmr.msra.gmra.mrb[12].mxu1 %vm784_vm7, %v807_v38 }
 0x32d   : > { %2116 = vmatprep.mubr.msk.bf16.mxu1 %vm2347_vm0, %v2346_v2 }
 0x38b   : > { %v921_v39 = vpop.xlane.xlu1 %920 }
 0x38c   : > { %2311 = vrcp.f32 %v921_v39 }
 0x38f   : > { %v924_v40 = vpop.xlane.xlu1 %923 }
 0x390   : > { %2313 = vrcp.f32 %v924_v40 }
 0x393   : > { %v932_v41 = vpop.permute.xlu1 %931 }
 0x394   : > { %2115 = vmatpush3.bf16.msra.mxu1 %v932_v41  ;;  %v1883_v41 = vld [vmem:[%s2834_s6] ss:$0 sm:$0xff] }
 0x395   : > { %2132 = vmatprep.subr.bf16.mxu1 %v2346_v2 }
 0x396   : > { %v2312_v42 = vpop.eup %2311 }
 0x397   : > { %v927_v44 = vmul.f32 %v2312_v42, %v2304_v28  ;;  %v2265_v28 = vld [vmem:[%s2836_s8] sm:$0xff]  }
 0x39a   : > { %v2314_v43 = vpop.eup %2313 }
 0x39b   : > { %v928_v45 = vmul.f32 %v2314_v43, %v2306_v30  ;;  %v2267_v30 = vld [vmem:[%s2836_s8 + $0x8] sm:$0xff]   ;;  %v1884_v43 = vld [vmem:[%s2835_s7] ss:$0 sm:$0xff] }
 0x39d   : > { %v929_v46 = vpack.c.bf16 %v928_v45, %v927_v44 }
 0x39f   : > { %2117 = vmatmul.mubr.msk.bf16.vlgmr.msra.gmra.mrb[16].mxu1 %vm784_vm7, %v929_v46 }
 0x3a0   : > { %2140 = vmatprep.mubr.msk.bf16.mxu1 %vm2347_vm0, %v2346_v2 }
 0x3ff   : > { %v845_v50 = vpop.f32.mrb[12].mxu1 }
 0x400   : > { %v2106_v51 = vpop.f32.mrb[13].mxu1 }
 0x401   : > { %v848_v52 = vpop.f32.mrb[14].mxu1 }
 0x402   : > { %v2107_v53 = vpop.f32.mrb[15].mxu1 }
 0x403   : > { %v2271_v53 = vld [vmem:[%s2836_s8 + $0x40] sm:$0xff]  }
 0x472   : > { %v971_v55 = vpop.f32.mrb[16].mxu1 }
 0x473   : > { %v2118_v56 = vpop.f32.mrb[17].mxu1 }
 0x474   : > { %v974_v57 = vpop.f32.mrb[18].mxu1 }
 0x475   : > { %v2242_v58 = vpack.i.bf16 %v974_v57, %v971_v55  ;;  %v2119_v59 = vpop.f32.mrb[19].mxu1 }
 0x477   : > { %2243 = vrot.lane.b32.xlu0 %v2242_v58, %s2349_s20  ;;  %v2275_v58 = vld [vmem:[%s2838_s10 + $0x40] sm:$0xff]  }
 0x4e9   : > { %v2244_v60 = vpop.permute.xlu0 %2243 }
 0x4ea   : > { %v2246_v61 = vunpack.i.h.bf16 %v2244_v60  ;;  %v2245_v62 = vunpack.i.l.bf16 %v2244_v60  ;;  %v2272_v60 = vld [vmem:[%s2836_s8 + $0x48] sm:$0xff]  }
 0x4ec   : > { %v987_v63 = vsel %vm734_vm4, %v848_v52, %v2246_v61  ;;  %v986_v0 = vsel %vm734_vm4, %v845_v50, %v2245_v62  ;;  %v2276_v61 = vld [vmem:[%s2838_s10 + $0x48] sm:$0xff]   ;;  %v2273_v62 = vld [vmem:[%s2836_s8 + $0x50] sm:$0xff]  }
 0x4ed   : > { %v988_v1 = vpack.c.bf16 %v987_v63, %v986_v0 }
 0x4ef   : > { %2129 = vmatmul.mubr.msk.bf16.vlgmr.msra.gmra.mrb[8].mxu0 %vm516_vm1, %v988_v1  ;;  %v2274_v1 = vld [vmem:[%s2836_s8 + $0x58] sm:$0xff]  }
 0x4f0   : > { %2152 = vmatprep.mubr.msk.bf16.mxu0 %vm2347_vm0, %v2346_v2  ;;  %2145 = vmatpush3.bf16.msra.mxu0 %v2265_v28 }
 0x4f1   : > { %2146 = vmatprep.subr.bf16.mxu0 %v2346_v2 }
 0x4f4   : > { %2147 = vmatpush3.bf16.msra.mxu0 %v2267_v30 }
 0x4f5   : > { %2148 = vmatprep.subr.bf16.mxu0 %v2346_v2 }
 0x4f8   : > { %2149 = vmatpush3.bf16.msra.mxu0 %v2269_v32  ;;  %v1916_v32 = vld [vmem:[%s2837_s9] ss:$0 sm:$0xff] }
 0x4f9   : > { %2150 = vmatprep.subr.bf16.mxu0 %v2346_v2 }
 0x4fc   : > { %2151 = vmatpush3.bf16.msra.mxu0 %v2270_v33 }
 0x4fd   : > { %2168 = vmatprep.subr.bf16.mxu0 %v2346_v2 }
 0x5c2   : > { %v1056_v4 = vpop.f32.mrb[8].mxu0 }
 0x5c3   : > { %v1057_v5 = vadd.f32 %v1877_v3, %v1056_v4  ;;  %v2130_v6 = vpop.f32.mrb[9].mxu0 }
 0x5c4   : > { %v1059_v7 = vpop.f32.mrb[10].mxu0 }
 0x5c5   : > { %v1060_v8 = vadd.f32 %v1877_v3, %v1059_v7  ;;  %v2131_v9 = vpop.f32.mrb[11].mxu0  ;;  %v1063_v10 = vadd.f32 %v1057_v5, %v2481_v13  ;;  %v2277_v5 = vld [vmem:[%s2838_s10] sm:$0xff]   ;;  %v2278_v7 = vld [vmem:[%s2838_s10 + $0x50] sm:$0xff]  }
 0x5c6   : > { %v2280_v9 = vld [vmem:[%s2838_s10 + $0x58] sm:$0xff]  }
 0x5c7   : > { %v1067_v15 = vsel %vm516_vm1, %v1063_v10, 0.0  ;;  %v1064_v16 = vadd.f32 %v1060_v8, %v2485_v14  ;;  %v2263_v14 = vld [vmem:[%s2836_s8 + $0x20] sm:$0xff]   ;;  %v2279_v8 = vld [vmem:[%s2838_s10 + $0x8] sm:$0xff]  }
 0x5c8   : > { %1068 = vadd.xlane.f32.xlu1 %v1067_v15  ;;  %2133 = vmatpush3.bf16.msra.mxu1 %v2263_v14  ;;  %v2282_v15 = vld [vmem:[%s2838_s10 + $0x60] sm:$0xff]  }
 0x5c9   : > { %v1070_v17 = vsel %vm516_vm1, %v1064_v16, 0.0  ;;  %2134 = vmatprep.subr.bf16.mxu1 %v2346_v2 }
 0x5ca   : > { %1071 = vadd.xlane.f32.xlu0 %v1070_v17  ;;  %v2284_v17 = vld [vmem:[%s2838_s10 + $0x68] sm:$0xff]  }
 0x5cc   : > { %2135 = vmatpush3.bf16.msra.mxu1 %v2264_v27 }
 0x5cd   : > { %2136 = vmatprep.subr.bf16.mxu1 %v2346_v2 }
 0x5d0   : > { %2137 = vmatpush3.bf16.msra.mxu1 %v2266_v29 }
 0x5d1   : > { %2138 = vmatprep.subr.bf16.mxu1 %v2346_v2 }
 0x5d4   : > { %2139 = vmatpush3.bf16.msra.mxu1 %v2268_v31 }
 0x5d5   : > { %2156 = vmatprep.subr.bf16.mxu1 %v2346_v2 }
 0x655   : > { %v1069_v18 = vpop.xlane.xlu1 %1068 }
 0x656   : > { %v1074_v19 = vmul.f32 0.015625, %v1069_v18  ;;  %v2285_v18 = vld [vmem:[%s2838_s10 + $0x20] sm:$0xff]  }
 0x657   : > { %v1072_v20 = vpop.xlane.xlu0 %1071 }
 0x658   : > { %v1076_v21 = vsub.f32 %v1063_v10, %v1074_v19  ;;  %v1075_v22 = vmul.f32 0.015625, %v1072_v20  ;;  %v2281_v10 = vld [vmem:[%s2838_s10 + $0x10] sm:$0xff]   ;;  %v2287_v20 = vld [vmem:[%s2838_s10 + $0x28] sm:$0xff]  }
 0x659   : > { %v2286_v19 = vld [vmem:[%s2838_s10 + $0x70] sm:$0xff]  }
 0x65a   : > { %v1077_v23 = vsub.f32 %v1064_v16, %v1075_v22  ;;  %v1078_v24 = vmul.f32 %v1076_v21, %v1076_v21  ;;  %v2283_v16 = vld [vmem:[%s2838_s10 + $0x18] sm:$0xff]   ;;  %v2289_v22 = vld [vmem:[%s2838_s10 + $0x30] sm:$0xff]  }
 0x65c   : > { %v1080_v25 = vsel %vm516_vm1, %v1078_v24, 0.0  ;;  %v1079_v26 = vmul.f32 %v1077_v23, %v1077_v23 }
 0x65d   : > { %1081 = vadd.xlane.f32.xlu1 %v1080_v25 }
 0x65e   : > { %v1083_v13 = vsel %vm516_vm1, %v1079_v26, 0.0 }
 0x661   : > { %1084 = vadd.xlane.f32.xlu1 %v1083_v13 }
 0x6ea   : > { %v1082_v34 = vpop.xlane.xlu1 %1081 }
 0x6eb   : > { %v1086_v35 = vmul.f32 0.015625, %v1082_v34 }
 0x6ed   : > { %v1088_v36 = vadd.f32 1e-05, %v1086_v35 }
 0x6ee   : > { %v1085_v37 = vpop.xlane.xlu1 %1084 }
 0x6ef   : > { %2315 = vrsqrt.f32 %v1088_v36  ;;  %v1087_v38 = vmul.f32 0.015625, %v1085_v37 }
 0x6f1   : > { %v1089_v39 = vadd.f32 1e-05, %v1087_v38 }
 0x6f3   : > { %2317 = vrsqrt.f32 %v1089_v39 }
 0x6f9   : > { %v2316_v40 = vpop.eup %2315 }
 0x6fa   : > { %v1092_v42 = vmul.f32 %v2316_v40, %v1076_v21  ;;  %v2288_v21 = vld [vmem:[%s2838_s10 + $0x78] sm:$0xff]  }
 0x6fc   : > { %v1100_v44 = vmul.f32 %v1883_v41, %v1092_v42 }
 0x6fd   : > { %v2318_v45 = vpop.eup %2317 }
 0x6fe   : > { %v1093_v46 = vmul.f32 %v2318_v45, %v1077_v23  ;;  %v2643_v47 = vadd.f32 %v1884_v43, %v1100_v44  ;;  %v2291_v23 = vld [vmem:[%s2838_s10 + $0x38] sm:$0xff]   ;;  %v2290_v44 = vld [vmem:[%s2838_s10 + $0x80] sm:$0xff]  }
 0x700   : > { %v1101_v48 = vmul.f32 %v1883_v41, %v1093_v46  ;;  %v1112_v49 = vsel %vm2469_vm2, %v2643_v47, 0.0 }
 0x701   : > { %v1117_v51 = vrot.slane %v1112_v49, 7  ;;  %v1124_v0 = vrot.slane %v1112_v49, 1 }
 0x702   : > { %v2648_v50 = vadd.f32 %v1884_v43, %v1101_v48 }
 0x703   : > { %v1122_v57 = vsel %vm1116_vm9, 0.0, %v1117_v51 }
 0x704   : > { %v1113_v52 = vsel %vm2474_vm3, %v2648_v50, 0.0 }
 0x705   : > { %v1118_v54 = vrot.slane %v1113_v52, 7  ;;  %v1139_v55 = vpack.c.bf16 %v1113_v52, %v1112_v49  ;;  %v1125_v63 = vrot.slane %v1113_v52, 1 }
 0x707   : > { %2141 = vmatmul.mubr.msk.bf16.vlgmr.msra.gmra.mrb[20].mxu1 %vm516_vm1, %v1139_v55  ;;  %v1119_v56 = vsel %vm1116_vm9, %v1117_v51, %v1118_v54  ;;  %v1126_v3 = vsel %vm1123_vm10, %v1124_v0, %v1125_v63  ;;  %v1129_v4 = vsel %vm1123_vm10, %v1125_v63, 0.0  ;;  %v2292_v55 = vld [vmem:[%s2838_s10 + $0x88] sm:$0xff]   ;;  %v2298_v63 = vld [vmem:[%s2838_s10 + $0xb8] sm:$0xff]  }
 0x708   : > { %2157 = vmatpush3.bf16.msra.mxu1 %v2271_v53  ;;  %v1130_v59 = vpack.c.bf16 %v1119_v56, %v1122_v57  ;;  %2164 = vmatprep.mubr.msk.bf16.mxu1 %vm2347_vm0, %v2346_v2  ;;  %v1285_v6 = vpack.c.bf16 %v1129_v4, %v1126_v3 }
 0x709   : > { %2158 = vmatprep.subr.bf16.mxu1 %v2346_v2 }
 0x70a   : > { %2153 = vmatmul.mubr.msk.bf16.vlgmr.msra.gmra.mrb[12].mxu0 %vm516_vm1, %v1130_v59  ;;  %v2294_v59 = vld [vmem:[%s2838_s10 + $0x98] sm:$0xff]  }
 0x70b   : > { %2169 = vmatpush3.bf16.msra.mxu0 %v2275_v58  ;;  %2184 = vmatprep.mubr.msk.bf16.mxu0 %vm2347_vm0, %v2346_v2  ;;  %v2293_v58 = vld [vmem:[%s2838_s10 + $0x90] sm:$0xff]  }
 0x70c   : > { %2159 = vmatpush3.bf16.msra.mxu1 %v2272_v60  ;;  %2170 = vmatprep.subr.bf16.mxu0 %v2346_v2  ;;  %v2295_v60 = vld [vmem:[%s2838_s10 + $0xa0] sm:$0xff]  }
 0x70d   : > { %2160 = vmatprep.subr.bf16.mxu1 %v2346_v2 }
 0x70f   : > { %2171 = vmatpush3.bf16.msra.mxu0 %v2276_v61  ;;  %v2296_v61 = vld [vmem:[%s2838_s10 + $0xa8] sm:$0xff]  }
 0x710   : > { %2161 = vmatpush3.bf16.msra.mxu1 %v2273_v62  ;;  %2172 = vmatprep.subr.bf16.mxu0 %v2346_v2  ;;  %v2297_v62 = vld [vmem:[%s2838_s10 + $0xb0] sm:$0xff]  }
 0x711   : > { %2162 = vmatprep.subr.bf16.mxu1 %v2346_v2 }
 0x713   : > { %2173 = vmatpush3.bf16.msra.mxu0 %v2278_v7 }
 0x714   : > { %2163 = vmatpush3.bf16.msra.mxu1 %v2274_v1  ;;  %2174 = vmatprep.subr.bf16.mxu0 %v2346_v2 }
 0x715   : > { %2188 = vmatprep.subr.bf16.mxu1 %v2346_v2 }
 0x717   : > { %2165 = vmatmul.mubr.msk.bf16.vlgmr.msra.gmra.mrb[24].mxu1 %vm516_vm1, %v1285_v6  ;;  %2175 = vmatpush3.bf16.msra.mxu0 %v2280_v9 }
 0x718   : > { %2189 = vmatpush3.bf16.msra.mxu1 %v2277_v5  ;;  %2204 = vmatprep.mubr.msk.bf16.mxu1 %vm2347_vm0, %v2346_v2 }
 0x719   : > { %2190 = vmatprep.subr.bf16.mxu1 %v2346_v2  ;;  %2176 = vmatprep.subr.bf16.mxu0 %v2346_v2 }
 0x71b   : > { %2177 = vmatpush3.bf16.msra.mxu0 %v2282_v15  ;;  %v1983_v15 = vld [vmem:[%s2839_s11] ss:$0 sm:$0xff] }
 0x71c   : > { %2191 = vmatpush3.bf16.msra.mxu1 %v2279_v8  ;;  %2178 = vmatprep.subr.bf16.mxu0 %v2346_v2 }
 0x71d   : > { %2192 = vmatprep.subr.bf16.mxu1 %v2346_v2 }
 0x71f   : > { %2179 = vmatpush3.bf16.msra.mxu0 %v2284_v17 }
 0x720   : > { %2193 = vmatpush3.bf16.msra.mxu1 %v2281_v10  ;;  %2180 = vmatprep.subr.bf16.mxu0 %v2346_v2 }
 0x721   : > { %2194 = vmatprep.subr.bf16.mxu1 %v2346_v2 }
 0x723   : > { %2181 = vmatpush3.bf16.msra.mxu0 %v2286_v19 }
 0x724   : > { %2195 = vmatpush3.bf16.msra.mxu1 %v2283_v16  ;;  %2182 = vmatprep.subr.bf16.mxu0 %v2346_v2 }
 0x725   : > { %2196 = vmatprep.subr.bf16.mxu1 %v2346_v2 }
 0x727   : > { %2183 = vmatpush3.bf16.msra.mxu0 %v2288_v21 }
 0x728   : > { %2197 = vmatpush3.bf16.msra.mxu1 %v2285_v18  ;;  %2208 = vmatprep.subr.bf16.mxu0 %v2346_v2 }
 0x729   : > { %2198 = vmatprep.subr.bf16.mxu1 %v2346_v2 }
 0x72c   : > { %2199 = vmatpush3.bf16.msra.mxu1 %v2287_v20 }
 0x72d   : > { %2200 = vmatprep.subr.bf16.mxu1 %v2346_v2 }
 0x730   : > { %2201 = vmatpush3.bf16.msra.mxu1 %v2289_v22 }
 0x731   : > { %2202 = vmatprep.subr.bf16.mxu1 %v2346_v2 }
 0x734   : > { %2203 = vmatpush3.bf16.msra.mxu1 %v2291_v23 }
 0x7da   : > { %v1210_v24 = vpop.f32.mrb[20].mxu1 }
 0x7db   : > { %v2142_v25 = vpop.f32.mrb[21].mxu1 }
 0x7dc   : > { %v1213_v26 = vpop.f32.mrb[22].mxu1 }
 0x7dd   : > { %v2143_v13 = vpop.f32.mrb[23].mxu1  ;;  %v1278_v14 = vpop.f32.mrb[12].mxu0 }
 0x7de   : > { %v1279_v27 = vadd.f32 %v1278_v14, %v1210_v24  ;;  %v2154_v28 = vpop.f32.mrb[13].mxu0 }
 0x7df   : > { %v1281_v29 = vpop.f32.mrb[14].mxu0 }
 0x7e0   : > { %v1282_v30 = vadd.f32 %v1281_v29, %v1213_v26  ;;  %v2155_v31 = vpop.f32.mrb[15].mxu0 }
 0x7ea   : > { %v1356_v33 = vpop.f32.mrb[24].mxu1 }
 0x7eb   : > { %v1363_v34 = vadd.f32 %v1356_v33, %v1279_v27  ;;  %v2166_v35 = vpop.f32.mrb[25].mxu1 }
 0x7ec   : > { %v1359_v36 = vpop.f32.mrb[26].mxu1 }
 0x7ed   : > { %v1371_v37 = vadd.f32 %v1916_v32, %v1363_v34  ;;  %v1364_v38 = vadd.f32 %v1359_v36, %v1282_v30  ;;  %v2167_v39 = vpop.f32.mrb[27].mxu1 }
 0x7ef   : > { %v1373_v40 = vmax.f32 %v1371_v37, 0.0  ;;  %v1372_v41 = vadd.f32 %v1916_v32, %v1364_v38 }
 0x7f1   : > { %v1375_v42 = vsel %vm2469_vm2, %v1373_v40, 0.0  ;;  %v1374_v43 = vmax.f32 %v1372_v41, 0.0 }
 0x7f2   : > { %v1379_v48 = vrot.slane %v1375_v42, 7  ;;  %v1385_v49 = vrot.slane %v1375_v42, 1  ;;  %v1984_v42 = vld [vmem:[%s2840_s12] ss:$0 sm:$0xff] }
 0x7f3   : > { %v1376_v45 = vsel %vm2474_vm3, %v1374_v43, 0.0  ;;  %v1942_v46 = vpack.c.bf16 %v1374_v43, %v1373_v40 }
 0x7f4   : > { %v1380_v51 = vrot.slane %v1376_v45, 7  ;;  %v1386_v52 = vrot.slane %v1376_v45, 1  ;;  %v1985_v45 = vld [vmem:[%s2841_s13] ss:$0 sm:$0xff] }
 0x7f5   : > { %2185 = vmatmul.mubr.msk.bf16.vlgmr.msra.gmra.mrb[16].mxu0 %vm1941_vm11, %v1942_v46 }
 0x7f6   : > { %v1381_v53 = vsel %vm1116_vm9, %v1379_v48, %v1380_v51  ;;  %v1387_v54 = vsel %vm1123_vm10, %v1385_v49, %v1386_v52  ;;  %2209 = vmatpush3.bf16.msra.mxu0 %v2290_v44  ;;  %2224 = vmatprep.mubr.msk.bf16.mxu0 %vm2347_vm0, %v2346_v2 }
 0x7f7   : > { %v1954_v56 = vpack.c.bf16 %v1381_v53, %v1379_v48  ;;  %v1981_v57 = vpack.c.bf16 %v1386_v52, %v1387_v54  ;;  %2210 = vmatprep.subr.bf16.mxu0 %v2346_v2 }
 0x7f9   : > { %2205 = vmatmul.mubr.msk.bf16.vlgmr.msra.gmra.mrb[28].mxu1 %vm1953_vm14, %v1954_v56 }
 0x7fa   : > { %2211 = vmatpush3.bf16.msra.mxu0 %v2292_v55 }
 0x7fb   : > { %2212 = vmatprep.subr.bf16.mxu0 %v2346_v2 }
 0x7fe   : > { %2213 = vmatpush3.bf16.msra.mxu0 %v2293_v58 }
 0x7ff   : > { %2214 = vmatprep.subr.bf16.mxu0 %v2346_v2 }
 0x802   : > { %2215 = vmatpush3.bf16.msra.mxu0 %v2294_v59 }
 0x803   : > { %2216 = vmatprep.subr.bf16.mxu0 %v2346_v2 }
 0x806   : > { %2217 = vmatpush3.bf16.msra.mxu0 %v2295_v60 }
 0x807   : > { %2218 = vmatprep.subr.bf16.mxu0 %v2346_v2 }
 0x80a   : > { %2219 = vmatpush3.bf16.msra.mxu0 %v2296_v61 }
 0x80b   : > { %2220 = vmatprep.subr.bf16.mxu0 %v2346_v2 }
 0x80e   : > { %2221 = vmatpush3.bf16.msra.mxu0 %v2297_v62 }
 0x80f   : > { %2222 = vmatprep.subr.bf16.mxu0 %v2346_v2 }
 0x812   : > { %2223 = vmatpush3.bf16.msra.mxu0 %v2298_v63 }
 0x815   : > { %2225 = vmatmul.mubr.msk.bf16.vlgmr.msra.gmra.mrb[20].mxu0 %vm1980_vm15, %v1981_v57 }
 0x8c8   : > { %v1508_v0 = vpop.f32.mrb[16].mxu0 }
 0x8c9   : > { %v2186_v1 = vpop.f32.mrb[17].mxu0 }
 0x8ca   : > { %v1511_v3 = vpop.f32.mrb[18].mxu0 }
 0x8cb   : > { %v2187_v4 = vpop.f32.mrb[19].mxu0 }
 0x8cc   : > { %v1597_v5 = vpop.f32.mrb[28].mxu1 }
 0x8cd   : > { %v1598_v6 = vadd.f32 %v1597_v5, %v1508_v0  ;;  %v2206_v7 = vpop.f32.mrb[29].mxu1 }
 0x8ce   : > { %v1600_v8 = vpop.f32.mrb[30].mxu1 }
 0x8cf   : > { %v1601_v9 = vadd.f32 %v1600_v8, %v1511_v3  ;;  %v2207_v10 = vpop.f32.mrb[31].mxu1 }
 0x8e8   : > { %v1704_v2 = vpop.f32.mrb[20].mxu0 }
 0x8e9   : > { %v1711_v16 = vadd.f32 %v1704_v2, %v1598_v6  ;;  %v2226_v17 = vpop.f32.mrb[21].mxu0 }
 0x8ea   : > { %v1707_v18 = vpop.f32.mrb[22].mxu0 }
 0x8eb   : > { %v1719_v19 = vadd.f32 %v1983_v15, %v1711_v16  ;;  %v1712_v20 = vadd.f32 %v1707_v18, %v1601_v9  ;;  %v2227_v21 = vpop.f32.mrb[23].mxu0 }
 0x8ed   : > { %v1720_v22 = vadd.f32 %v1983_v15, %v1712_v20  ;;  %v1721_v23 = vsel %vm2469_vm2, %v1719_v19, 0.0 }
 0x8ee   : > { %v1723_v24 = vadd.f32 %v1721_v23, %v2643_v47 }
 0x8ef   : > { %v1722_v25 = vsel %vm2474_vm3, %v1720_v22, 0.0 }
 0x8f0   : > { %v1727_v26 = vsel %vm516_vm1, %v1723_v24, 0.0  ;;  %v1724_v13 = vadd.f32 %v1722_v25, %v2648_v50 }
 0x8f1   : > { %1728 = vadd.xlane.f32.xlu1 %v1727_v26 }
 0x8f2   : > { %v1730_v14 = vsel %vm516_vm1, %v1724_v13, 0.0 }
 0x8f3   : > { %1731 = vadd.xlane.f32.xlu0 %v1730_v14 }
 0x97e   : > { %v1729_v27 = vpop.xlane.xlu1 %1728 }
 0x97f   : > { %v1733_v28 = vmul.f32 0.015625, %v1729_v27 }
 0x980   : > { %v1732_v29 = vpop.xlane.xlu0 %1731 }
 0x981   : > { %v1735_v30 = vsub.f32 %v1723_v24, %v1733_v28  ;;  %v1734_v31 = vmul.f32 0.015625, %v1732_v29 }
 0x983   : > { %v1736_v32 = vsub.f32 %v1724_v13, %v1734_v31  ;;  %v1737_v33 = vmul.f32 %v1735_v30, %v1735_v30 }
 0x985   : > { %v1739_v47 = vsel %vm516_vm1, %v1737_v33, 0.0  ;;  %v1738_v34 = vmul.f32 %v1736_v32, %v1736_v32 }
 0x986   : > { %1740 = vadd.xlane.f32.xlu1 %v1739_v47 }
 0x987   : > { %v1742_v35 = vsel %vm516_vm1, %v1738_v34, 0.0 }
 0x988   : > { %1743 = vadd.xlane.f32.xlu0 %v1742_v35 }
 0xa13   : > { %v1741_v50 = vpop.xlane.xlu1 %1740 }
 0xa14   : > { %v1745_v36 = vmul.f32 0.015625, %v1741_v50 }
 0xa15   : > { %v1744_v37 = vpop.xlane.xlu0 %1743 }
 0xa16   : > { %v1747_v38 = vadd.f32 1e-05, %v1745_v36  ;;  %v1746_v39 = vmul.f32 0.015625, %v1744_v37 }
 0xa18   : > { %2319 = vrsqrt.f32 %v1747_v38  ;;  %v1748_v40 = vadd.f32 1e-05, %v1746_v39 }
 0xa1a   : > { %2321 = vrsqrt.f32 %v1748_v40 }
 0xa22   : > { %v2320_v41 = vpop.eup %2319 }
 0xa23   : > { %v1751_v43 = vmul.f32 %v2320_v41, %v1735_v30 }
 0xa24   : > { %v2322_v44 = vpop.eup %2321 }
 0xa25   : > { %v1759_v46 = vmul.f32 %v1984_v42, %v1751_v43  ;;  %v1752_v48 = vmul.f32 %v2322_v44, %v1736_v32 }
 0xa27   : > { %v1767_v49 = vadd.f32 %v1985_v45, %v1759_v46  ;;  %v1760_v51 = vmul.f32 %v1984_v42, %v1752_v48 }
 0xa29   : > { %v1769_v52 = vsel %vm2469_vm2, %v1767_v49, 0.0  ;;  %v1768_v53 = vadd.f32 %v1985_v45, %v1760_v51 }
 0xa2a   : > { %1771 = vst.msk [vmem:[%s447_s25] sm:$0xff] %vm516_vm1, %v1769_v52 }
 0xa2b   : > { %v1770_v54 = vsel %vm2474_vm3, %v1768_v53, 0.0 }
 0xa2c   : > { %1772 = vst.msk [vmem:[%s447_s25 + $0x8] sm:$0xff] %vm516_vm1, %v1770_v54 }
 0xa2d PF: > { %s30_s18 = sadd.s32 1, %s2343_s18  }
 0xa2e   : > { %p27_p9 = scmp.ge.s32.totalorder %s30_s18, 4  }
 0xa30   :  { %29 = sbr.rel (!%p27_p9) target bundleno = 16 (0x10), region = 110 }

// kernel: text_encoder_forward.13
= control target key start
LH: loop header
LB: loop body
LE: loop exit
PB: predicated region body
PF: predicated region fallthrough
CT: control target
= control target key end

     0   :  { %s475_s0 = inlined_call_operand.vmem [shape: s32[2], index: 0, kind: input, shape index: {}]   ;;  %s476_s1 = inlined_call_operand.vmem [shape: f32[2,16,64], index: 1, kind: input, shape index: {}]   ;;  %s477_s2 = inlined_call_operand.vmem [shape: bf16[64,64], index: 2, kind: input, shape index: {}]   ;;  %s478_s3 = inlined_call_operand.vmem [shape: f32[1,64], index: 3, kind: input, shape index: {}]   ;;  %s479_s4 = inlined_call_operand.vmem [shape: f32[2,16,64], index: 4, kind: output, shape index: {}]  }
   0x1   :  { %s9_s17 = sshll.u32 %s475_s0, 4  ;;  %s10_s17 = int_to_ptr.vmem [resolvable:$true] %s9_s17 }
   0x2   :  { %s387_s18 = scalar_lea.vmem %s10_s17, 16  ;;  %p392_p1 = scmp.lt.s32.totalorder %s10_s17, %s10_s17 }
   0x3   :  { %p388_p0 = scmp.ne.s32.totalorder %s10_s17, %s387_s18  ;;  %p393_p2 = scmp.lt.s32.totalorder %s387_s18, %s387_s18 }
   0x5   :  { %p394_p3 = por %p393_p2, %p392_p1 }
   0x7   :  { %p395_p4 = pnand %p394_p3, %p388_p0 }
   0x9   :  { %398 = shalt.err (!%p395_p4)  }
   0xa   :  { %s409_s19 = smov [#allocation3]  }
   0xb   :  { %12 = dma.vmem_to_smem %s10_s17, 16, %s409_s19, [#allocation2] }
   0xc   :  { %403 = dma.done.wait [#allocation2], 16 }
   0xd   :  { %404 = vsyncadd [#allocation2], 4294967280 }
   0xe   :  { %14 = sfence }
   0xf   :  { %s440_s20 = smov 0  }
  0x10 LB: > { %s336_s0 = sadd.s32 4294967295, %s407_s20   ;;  %p340_p5 = scmp.ge.s32.totalorder %s407_s20, 1  ;;  %s407_s20 = sphi %s440_s20, %s20_s20  }
  0x11   : > { %p144_p6 = scmp.lt.s32.totalorder %s407_s20, 3 }
  0x13   : > { %p145_p7 = pnand %p340_p5, %p144_p6 }
  0x14   : > { %v383_v0 = vld [vmem:[%s477_s2] sm:$0xff] (!%p145_p7)   ;;  %v410_v1 = vmov (!%p145_p7), 0.0   ;;  %v384_v2 = vld [vmem:[%s477_s2 + $0x8] sm:$0xff] (!%p145_p7)   ;;  %vm411_vm0 = vmmov (!%p145_p7), 0   ;;  %p168_p8 = scmp.lt.s32.totalorder (!%p145_p7), %s336_s0, 1  ;;  %v385_v3 = vld [vmem:[%s477_s2 + $0x10] sm:$0xff] (!%p145_p7)   ;;  %v182_v8 = vlaneseq (!%p145_p7) }
  0x15   : > { %148 = sbr.rel (%p145_p7) target bundleno = 255 (0xff), region = 32  ;;  %360 = vmatprep.subr.bf16.mxu0 (!%p145_p7), %v410_v1  ;;  %368 = vmatprep.mubr.msk.bf16.mxu0 (!%p145_p7), %vm411_vm0, %v410_v1  ;;  %v386_v4 = vld [vmem:[%s477_s2 + $0x18] sm:$0xff] (!%p145_p7)   ;;  %vm228_vm1 = vcmask (!%p145_p7), 523264   ;;  %s179_s8 = sld [smem:[#allocation3 + %s336_s0]] (!%p145_p7)  ;;  %v345_v11 = vld [vmem:[%s478_s3] ss:$0 sm:$0xff] (!%p145_p7) }
  0x16   : > { %361 = vmatpush3.bf16.msra.mxu0 (!%p145_p7), %v383_v0  ;;  %v183_v9 = vshrl.u32 (!%p145_p7), %v182_v8, 7 }
  0x17   : > { %362 = vmatprep.subr.bf16.mxu0 (!%p145_p7), %v410_v1 }
  0x18   : > { %v184_v12 = vadd.s32 (!%p145_p7), 8, %v183_v9 }
  0x1a   : > { %363 = vmatpush3.bf16.msra.mxu0 (!%p145_p7), %v384_v2 }
  0x1b   : > { %364 = vmatprep.subr.bf16.mxu0 (!%p145_p7), %v410_v1  ;;  %v185_v10 = vstv (!%p145_p7), %s179_s8 }
  0x1c   : > { %s169_s25 = scalar_select %p168_p8, %s336_s0, 1  ;;  %vm186_vm2 = vcmp.lt.s32.totalorder %v183_v9, %v185_v10  ;;  %vm187_vm3 = vcmp.lt.s32.totalorder %v184_v12, %v185_v10 }
  0x1e   : > { %s353_s28 = sshll.u32 %s169_s25, 4  ;;  %365 = vmatpush3.bf16.msra.mxu0 %v385_v3 }
  0x1f   : > { %s172_s5 = scalar_lea.vmem %s476_s1, %s353_s28  ;;  %366 = vmatprep.subr.bf16.mxu0 %v410_v1  ;;  %s177_s13 = scalar_lea.vmem %s479_s4, %s353_s28 }
  0x20   : > { %v180_v5 = vld [vmem:[%s172_s5] sm:$0xff]  ;;  %v181_v6 = vld [vmem:[%s172_s5 + $0x8] sm:$0xff] }
  0x21   : > { %v188_v7 = vpack.c.bf16 %v181_v6, %v180_v5 }
  0x22   : > { %367 = vmatpush3.bf16.msra.mxu0 %v386_v4 }
  0x25   : > { %369 = vmatmul.mubr.msk.bf16.vlgmr.msra.gmra.mrb[0].mxu0 %vm228_vm1, %v188_v7 }
  0xf8   : > { %v266_v13 = vpop.f32.mrb[0].mxu0 }
  0xf9   : > { %v267_v14 = vadd.f32 %v345_v11, %v266_v13  ;;  %v370_v15 = vpop.f32.mrb[1].mxu0 }
  0xfa   : > { %v269_v16 = vpop.f32.mrb[2].mxu0 }
  0xfb   : > { %v277_v17 = vsel %vm186_vm2, %v267_v14, 0.0  ;;  %v270_v18 = vadd.f32 %v345_v11, %v269_v16  ;;  %v371_v19 = vpop.f32.mrb[3].mxu0 }
  0xfc   : > { %279 = vst.msk [vmem:[%s177_s13] sm:$0xff] %vm228_vm1, %v277_v17 }
  0xfd   : > { %v278_v20 = vsel %vm187_vm3, %v270_v18, 0.0 }
  0xfe   : > { %280 = vst.msk [vmem:[%s177_s13 + $0x8] sm:$0xff] %vm228_vm1, %v278_v20 }
  0xff PF: > { %s20_s20 = sadd.s32 1, %s407_s20  }
 0x100   : > { %p17_p9 = scmp.ge.s32.totalorder %s20_s20, 4  }
 0x102   :  { %19 = sbr.rel (!%p17_p9) target bundleno = 16 (0x10), region = 62 }

// kernel: text_encoder_forward.11
= control target key start
LH: loop header
LB: loop body
LE: loop exit
PB: predicated region body
PF: predicated region fallthrough
CT: control target
= control target key end

     0   :  { %s2927_s0 = inlined_call_operand.vmem [shape: s32[2], index: 0, kind: input, shape index: {}]   ;;  %s2928_s2 = inlined_call_operand.vmem [shape: f32[2,16,64], index: 2, kind: input, shape index: {}]   ;;  %s2929_s3 = inlined_call_operand.vmem [shape: f32[2,8,64], index: 3, kind: input, shape index: {}]   ;;  %s2930_s4 = inlined_call_operand.vmem [shape: f32[2,1,128], index: 4, kind: input, shape index: {}]   ;;  %s2931_s5 = inlined_call_operand.vmem [shape: bf16[64,128], index: 5, kind: input, shape index: {}]   ;;  %s2932_s6 = inlined_call_operand.vmem [shape: f32[1,128], index: 6, kind: input, shape index: {}, may-alias: {6,8,12}]   ;;  %s2933_s7 = inlined_call_operand.vmem [shape: bf16[64,128], index: 7, kind: input, shape index: {}]   ;;  %s2934_s8 = inlined_call_operand.vmem [shape: f32[1,128], index: 8, kind: input, shape index: {}, may-alias: {6,8,12}]   ;;  %s2935_s9 = inlined_call_operand.vmem [shape: bf16[3,128,128], index: 9, kind: input, shape index: {}]   ;;  %s2936_s10 = inlined_call_operand.vmem [shape: f32[3,1,128], index: 10, kind: input, shape index: {}]   ;;  %s2937_s11 = inlined_call_operand.vmem [shape: bf16[128,128], index: 11, kind: input, shape index: {}]   ;;  %s2938_s12 = inlined_call_operand.vmem [shape: f32[1,128], index: 12, kind: input, shape index: {}, may-alias: {6,8,12}]   ;;  %s2939_s13 = inlined_call_operand.vmem [shape: bf16[128,64], index: 13, kind: input, shape index: {}]   ;;  %s2940_s14 = inlined_call_operand.vmem [shape: f32[1,64], index: 14, kind: input, shape index: {}]   ;;  %s2941_s15 = inlined_call_operand.vmem [shape: f32[2,16,64], index: 15, kind: output, shape index: {}]   ;;  %s2942_s1 = inlined_call_operand.vmem [shape: s32[2], index: 1, kind: input, shape index: {}]  }
   0x1   :  { %s20_s20 = sshll.u32 %s2927_s0, 4  ;;  %s24_s23 = sshll.u32 %s2942_s1, 4  ;;  %s21_s20 = int_to_ptr.vmem [resolvable:$true] %s20_s20  ;;  %s25_s23 = int_to_ptr.vmem [resolvable:$true] %s24_s23 }
   0x2   :  { %s2357_s24 = scalar_lea.vmem %s21_s20, 16  ;;  %p2362_p1 = scmp.lt.s32.totalorder %s21_s20, %s21_s20 }
   0x3   :  { %p2358_p0 = scmp.ne.s32.totalorder %s21_s20, %s2357_s24  ;;  %p2363_p2 = scmp.lt.s32.totalorder %s2357_s24, %s2357_s24 }
   0x5   :  { %p2364_p3 = por %p2363_p2, %p2362_p1 }
   0x7   :  { %p2365_p4 = pnand %p2364_p3, %p2358_p0 }
   0x9   :  { %2368 = shalt.err (!%p2365_p4)  }
   0xa   :  { %s2391_s25 = smov [#allocation3]   ;;  %s2369_s26 = scalar_lea.vmem %s25_s23, 16 }
   0xb   :  { %23 = dma.vmem_to_smem %s21_s20, 16, %s2391_s25, [#allocation2] }
   0xc   :  { %p2370_p5 = scmp.ne.s32.totalorder %s25_s23, %s2369_s26  ;;  %p2374_p6 = scmp.lt.s32.totalorder %s25_s23, %s25_s23 }
   0xd   :  { %p2375_p7 = scmp.lt.s32.totalorder %s2369_s26, %s2369_s26 }
   0xf   :  { %p2376_p8 = por %p2375_p7, %p2374_p6 }
  0x11   :  { %p2377_p9 = pnand %p2376_p8, %p2370_p5 }
  0x13   :  { %2380 = shalt.err (!%p2377_p9)  }
  0x14   :  { %s2392_s0 = smov [#allocation4]  }
  0x15   :  { %27 = dma.vmem_to_smem %s25_s23, 16, %s2392_s0, [#allocation2] }
  0x16   :  { %2385 = dma.done.wait [#allocation2], 32 }
  0x17   :  { %2386 = vsyncadd [#allocation2], 4294967264 }
  0x18   :  { %29 = sfence }
  0x19   :  { %s2484_s1 = smov 0  }
  0x1a LB: > { %s2490_s27 = sadd.s32 4294967295, %s2389_s1   ;;  %p1882_p10 = scmp.ge.s32.totalorder %s2389_s1, 1  ;;  %s2389_s1 = sphi %s2484_s1, %s35_s1  }
  0x1b   : > { %p416_p11 = scmp.lt.s32.totalorder %s2389_s1, 3 }
  0x1d   : > { %p417_p12 = pnand %p1882_p10, %p416_p11 }
  0x1e   : > { %v2277_v0 = vld [vmem:[%s2931_s5] sm:$0xff] (!%p417_p12)   ;;  %v2393_v1 = vmov (!%p417_p12), 0.0   ;;  %v490_v3 = vlaneseq (!%p417_p12)  ;;  %v2279_v4 = vld [vmem:[%s2931_s5 + $0x8] sm:$0xff] (!%p417_p12)   ;;  %vm2394_vm0 = vmmov (!%p417_p12), 0   ;;  %p467_p13 = scmp.lt.s32.totalorder (!%p417_p12), %s2490_s27, 1  ;;  %s485_s21 = sld [smem:[#allocation3 + %s2490_s27]] (!%p417_p12) }
  0x1f   : > { %420 = sbr.rel (%p417_p12) target bundleno = 2367 (0x93f), region = 72  ;;  %2075 = vmatprep.subr.bf16.mxu0 (!%p417_p12), %v2393_v1  ;;  %2087 = vmatprep.subr.bf16.mxu1 (!%p417_p12), %v2393_v1  ;;  %v2278_v2 = vld [vmem:[%s2933_s7] sm:$0xff] (!%p417_p12)   ;;  %v2280_v5 = vld [vmem:[%s2933_s7 + $0x8] sm:$0xff] (!%p417_p12)   ;;  %v2281_v7 = vld [vmem:[%s2931_s5 + $0x10] sm:$0xff] (!%p417_p12)   ;;  %s2536_s17 = sld [smem:[#allocation4 + %s2490_s27]] (!%p417_p12)  ;;  %vm547_vm3 = vcmask (!%p417_p12), 523264  }
  0x20   : > { %2076 = vmatpush3.bf16.msra.mxu0 (!%p417_p12), %v2277_v0  ;;  %2083 = vmatprep.mubr.msk.bf16.mxu0 (!%p417_p12), %vm2394_vm0, %v2393_v1  ;;  %v491_v6 = vshrl.u32 (!%p417_p12), %v490_v3, 7  ;;  %v2282_v8 = vld [vmem:[%s2933_s7 + $0x10] sm:$0xff] (!%p417_p12)   ;;  %v2283_v13 = vld [vmem:[%s2931_s5 + $0x18] sm:$0xff] (!%p417_p12)   ;;  %v2286_v22 = vld [vmem:[%s2935_s9] sm:$0xff] (!%p417_p12)   ;;  %vm1047_vm7 = vcmask (!%p417_p12), 261120   ;;  %vm1124_vm8 = vcmask (!%p417_p12), 1043456  }
  0x21   : > { %2088 = vmatpush3.bf16.msra.mxu1 (!%p417_p12), %v2278_v2  ;;  %2077 = vmatprep.subr.bf16.mxu0 (!%p417_p12), %v2393_v1  ;;  %v2284_v14 = vld [vmem:[%s2933_s7 + $0x18] sm:$0xff] (!%p417_p12)   ;;  %v2285_v25 = vld [vmem:[%s2935_s9 + $0x40] sm:$0xff] (!%p417_p12)   ;;  %v2288_v27 = vld [vmem:[%s2935_s9 + $0x8] sm:$0xff] (!%p417_p12)   ;;  %vm1097_vm11 = vcmask (!%p417_p12), 64512   ;;  %s2396_s18 = smov (!%p417_p12), 32   ;;  %s2397_s19 = smov (!%p417_p12), 64  }
  0x22   : > { %2089 = vmatprep.subr.bf16.mxu1 (!%p417_p12), %v2393_v1  ;;  %2095 = vmatprep.mubr.msk.bf16.mxu1 (!%p417_p12), %vm2394_vm0, %v2393_v1  ;;  %v492_v9 = vadd.s32 (!%p417_p12), 8, %v491_v6  ;;  %v2287_v28 = vld [vmem:[%s2935_s9 + $0x48] sm:$0xff] (!%p417_p12)   ;;  %v2290_v29 = vld [vmem:[%s2935_s9 + $0x10] sm:$0xff] (!%p417_p12)   ;;  %v2292_v31 = vld [vmem:[%s2935_s9 + $0x18] sm:$0xff] (!%p417_p12)   ;;  %vm1575_vm13 = vcmask (!%p417_p12), 785408  }
  0x23   : > { %v2289_v30 = vld [vmem:[%s2935_s9 + $0x50] sm:$0xff] (!%p417_p12)   ;;  %v2291_v32 = vld [vmem:[%s2935_s9 + $0x58] sm:$0xff] (!%p417_p12)   ;;  %v2294_v33 = vld [vmem:[%s2935_s9 + $0x20] sm:$0xff] (!%p417_p12)  }
  0x24   : > { %2078 = vmatpush3.bf16.msra.mxu0 (!%p417_p12), %v2279_v4  ;;  %v493_v12 = vstv (!%p417_p12), %s485_s21  ;;  %v2293_v34 = vld [vmem:[%s2935_s9 + $0x60] sm:$0xff] (!%p417_p12)   ;;  %v2296_v35 = vld [vmem:[%s2935_s9 + $0x28] sm:$0xff] (!%p417_p12)   ;;  %v2298_v37 = vld [vmem:[%s2935_s9 + $0x30] sm:$0xff] (!%p417_p12)  }
  0x25   : > { %2090 = vmatpush3.bf16.msra.mxu1 (!%p417_p12), %v2280_v5  ;;  %2079 = vmatprep.subr.bf16.mxu0 (!%p417_p12), %v2393_v1  ;;  %vm2544_vm1 = vcmp.lt.s32.totalorder (!%p417_p12), %v491_v6, %v493_v12  ;;  %vm2548_vm2 = vcmp.lt.s32.totalorder (!%p417_p12), %v492_v9, %v493_v12  ;;  %v496_v21 = vstv (!%p417_p12), %s2536_s17  ;;  %v2295_v36 = vld [vmem:[%s2935_s9 + $0x68] sm:$0xff] (!%p417_p12)   ;;  %v2297_v38 = vld [vmem:[%s2935_s9 + $0x70] sm:$0xff] (!%p417_p12)   ;;  %v2299_v39 = vld [vmem:[%s2935_s9 + $0x78] sm:$0xff] (!%p417_p12)   ;;  %s2395_s17 = smov (!%p417_p12), 96  }
  0x26   : > { %s2517_s22 = scalar_select %p467_p13, %s2490_s27, 1  ;;  %2091 = vmatprep.subr.bf16.mxu1 %v2393_v1  ;;  %vm2567_vm4 = vcmp.lt.s32.totalorder %v491_v6, %v496_v21  ;;  %v2300_v40 = vld [vmem:[%s2935_s9 + $0x38] sm:$0xff]   ;;  %v1888_v41 = vld [vmem:[%s2932_s6] ss:$0 sm:$0xff]  ;;  %vm1909_vm6 = vmpackc.low %vm2548_vm2, %vm2544_vm1 }
  0x27   : > { %v1894_v43 = vld [vmem:[%s2934_s8] ss:$0 sm:$0xff]  ;;  %vm1938_vm5 = vmpackc.low %vm2567_vm4, %vm2567_vm4  ;;  %v2302_v57 = vld [vmem:[%s2935_s9 + $0x88] sm:$0xff]  }
  0x28   : > { %s2002_s25 = sshll.u32 %s2517_s22, 4  ;;  %s1885_s16 = sshll.u32 %s2517_s22, 3  ;;  %2080 = vmatpush3.bf16.msra.mxu0 %v2281_v7  ;;  %v2301_v53 = vld [vmem:[%s2935_s9 + $0x80] sm:$0xff]   ;;  %v2303_v58 = vld [vmem:[%s2935_s9 + $0x90] sm:$0xff]   ;;  %v2304_v59 = vld [vmem:[%s2935_s9 + $0x98] sm:$0xff]  }
  0x29   : > { %s471_s30 = scalar_lea.vmem %s2928_s2, %s2002_s25  ;;  %s475_s24 = scalar_lea.vmem %s2929_s3, %s1885_s16  ;;  %2092 = vmatpush3.bf16.msra.mxu1 %v2282_v8  ;;  %2081 = vmatprep.subr.bf16.mxu0 %v2393_v1  ;;  %v2305_v60 = vld [vmem:[%s2935_s9 + $0xa0] sm:$0xff]   ;;  %v2306_v61 = vld [vmem:[%s2935_s9 + $0xa8] sm:$0xff]   ;;  %v2307_v62 = vld [vmem:[%s2935_s9 + $0xb0] sm:$0xff]  }
  0x2a   : > { %v487_v10 = vld [vmem:[%s471_s30] sm:$0xff]  ;;  %v488_v11 = vld [vmem:[%s471_s30 + $0x8] sm:$0xff]  ;;  %2093 = vmatprep.subr.bf16.mxu1 %v2393_v1  ;;  %v2308_v63 = vld [vmem:[%s2935_s9 + $0xb8] sm:$0xff]   ;;  %s483_s27 = scalar_lea.vmem %s2941_s15, %s2002_s25 }
  0x2b   : > { %v505_v17 = vsel %vm2544_vm1, %v487_v10, 0.0  ;;  %v506_v18 = vsel %vm2548_vm2, %v488_v11, 0.0  ;;  %v489_v20 = vld [vmem:[%s475_s24] sm:$0xff] }
  0x2c   : > { %v507_v19 = vpack.c.bf16 %v506_v18, %v505_v17  ;;  %2082 = vmatpush3.bf16.msra.mxu0 %v2283_v13  ;;  %v594_v24 = vsel %vm2567_vm4, %v489_v20, 0.0  ;;  %v1929_v0 = vld [vmem:[%s2936_s10 + $0x1] ss:$0 sm:$0xff]  ;;  %v1900_v2 = vld [vmem:[%s2936_s10] ss:$0 sm:$0xff] }
  0x2d   : > { %2094 = vmatpush3.bf16.msra.mxu1 %v2284_v14  ;;  %2099 = vmatprep.subr.bf16.mxu0 %v2393_v1  ;;  %v595_v26 = vpack.c.bf16 %v594_v24, %v594_v24  ;;  %v1958_v23 = vld [vmem:[%s2936_s10 + $0x2] ss:$0 sm:$0xff] }
  0x2e   : > { %2119 = vmatprep.subr.bf16.mxu1 %v2393_v1 }
  0x2f   : > { %2084 = vmatmul.mubr.msk.bf16.vlgmr.msra.gmra.mrb[0].mxu0 %vm547_vm3, %v507_v19 }
  0x30   : > { %2100 = vmatpush3.bf16.msra.mxu0 %v2286_v22  ;;  %2115 = vmatprep.mubr.msk.bf16.mxu0 %vm2394_vm0, %v2393_v1 }
  0x31   : > { %2096 = vmatmul.mubr.msk.bf16.vlgmr.msra.gmra.mrb[0].mxu1 %vm547_vm3, %v595_v26  ;;  %2101 = vmatprep.subr.bf16.mxu0 %v2393_v1 }
  0x32   : > { %2120 = vmatpush3.bf16.msra.mxu1 %v2285_v25  ;;  %2135 = vmatprep.mubr.msk.bf16.mxu1 %vm2394_vm0, %v2393_v1 }
  0x33   : > { %2121 = vmatprep.subr.bf16.mxu1 %v2393_v1 }
  0x34   : > { %2102 = vmatpush3.bf16.msra.mxu0 %v2288_v27 }
  0x35   : > { %2103 = vmatprep.subr.bf16.mxu0 %v2393_v1 }
  0x36   : > { %2122 = vmatpush3.bf16.msra.mxu1 %v2287_v28 }
  0x37   : > { %2123 = vmatprep.subr.bf16.mxu1 %v2393_v1 }
  0x38   : > { %2104 = vmatpush3.bf16.msra.mxu0 %v2290_v29 }
  0x39   : > { %2105 = vmatprep.subr.bf16.mxu0 %v2393_v1 }
  0x3a   : > { %2124 = vmatpush3.bf16.msra.mxu1 %v2289_v30 }
  0x3b   : > { %2125 = vmatprep.subr.bf16.mxu1 %v2393_v1 }
  0x3c   : > { %2106 = vmatpush3.bf16.msra.mxu0 %v2292_v31  ;;  %v499_v31 = vand.u32 127, %v490_v3 }
  0x3d   : > { %2107 = vmatprep.subr.bf16.mxu0 %v2393_v1 }
  0x3e   : > { %2126 = vmatpush3.bf16.msra.mxu1 %v2291_v32  ;;  %vm500_vm9 = vcmp.lt.s32.totalorder %v499_v31, %v496_v21 }
  0x3f   : > { %2127 = vmatprep.subr.bf16.mxu1 %v2393_v1  ;;  %vm2738_vm10 = vmand %vm2544_vm1, %vm500_vm9 }
  0x40   : > { %2108 = vmatpush3.bf16.msra.mxu0 %v2294_v33  ;;  %vm2744_vm12 = vmand %vm2548_vm2, %vm500_vm9 }
  0x41   : > { %2109 = vmatprep.subr.bf16.mxu0 %v2393_v1 }
  0x42   : > { %2128 = vmatpush3.bf16.msra.mxu1 %v2293_v34 }
  0x43   : > { %2129 = vmatprep.subr.bf16.mxu1 %v2393_v1 }
  0x44   : > { %2110 = vmatpush3.bf16.msra.mxu0 %v2296_v35 }
  0x45   : > { %2111 = vmatprep.subr.bf16.mxu0 %v2393_v1 }
  0x46   : > { %2130 = vmatpush3.bf16.msra.mxu1 %v2295_v36 }
  0x47   : > { %2131 = vmatprep.subr.bf16.mxu1 %v2393_v1 }
  0x48   : > { %2112 = vmatpush3.bf16.msra.mxu0 %v2298_v37 }
  0x49   : > { %2113 = vmatprep.subr.bf16.mxu0 %v2393_v1 }
  0x4a   : > { %2132 = vmatpush3.bf16.msra.mxu1 %v2297_v38 }
  0x4b   : > { %2133 = vmatprep.subr.bf16.mxu1 %v2393_v1 }
  0x4c   : > { %2114 = vmatpush3.bf16.msra.mxu0 %v2300_v40 }
  0x4d   : > { %2139 = vmatprep.subr.bf16.mxu0 %v2393_v1 }
  0x4e   : > { %2134 = vmatpush3.bf16.msra.mxu1 %v2299_v39 }
  0x4f   : > { %2159 = vmatprep.subr.bf16.mxu1 %v2393_v1 }
 0x102   : > { %v585_v42 = vpop.f32.mrb[0].mxu0 }
 0x103   : > { %v2648_v44 = vadd.f32 %v1888_v41, %v585_v42  ;;  %v2085_v45 = vpop.f32.mrb[1].mxu0 }
 0x104   : > { %v672_v46 = vpop.f32.mrb[0].mxu1  ;;  %v588_v47 = vpop.f32.mrb[2].mxu0 }
 0x105   : > { %v673_v48 = vadd.f32 %v1894_v43, %v672_v46  ;;  %v2097_v49 = vpop.f32.mrb[1].mxu1  ;;  %v2650_v50 = vadd.f32 %v1888_v41, %v588_v47  ;;  %v2086_v51 = vpop.f32.mrb[3].mxu0 }
 0x106   : > { %v675_v52 = vpop.f32.mrb[2].mxu1 }
 0x107   : > { %v1939_v54 = vpack.c.bf16 %v673_v48, %v673_v48  ;;  %v1910_v55 = vpack.c.bf16 %v2650_v50, %v2648_v44  ;;  %v2098_v56 = vpop.f32.mrb[3].mxu1 }
 0x109   : > { %2136 = vmatmul.mubr.msk.bf16.vlgmr.msra.gmra.mrb[4].mxu1 %vm1938_vm5, %v1939_v54  ;;  %2116 = vmatmul.mubr.msk.bf16.vlgmr.msra.gmra.mrb[4].mxu0 %vm1909_vm6, %v1910_v55 }
 0x10a   : > { %2140 = vmatpush3.bf16.msra.mxu0 %v2301_v53  ;;  %2155 = vmatprep.mubr.msk.bf16.mxu0 %vm2394_vm0, %v2393_v1 }
 0x10b   : > { %2141 = vmatprep.subr.bf16.mxu0 %v2393_v1  ;;  %2161 = vmatprep.mubr.msk.bf16.mxu1 %vm2394_vm0, %v2393_v1 }
 0x10e   : > { %2142 = vmatpush3.bf16.msra.mxu0 %v2302_v57 }
 0x10f   : > { %2143 = vmatprep.subr.bf16.mxu0 %v2393_v1 }
 0x112   : > { %2144 = vmatpush3.bf16.msra.mxu0 %v2303_v58 }
 0x113   : > { %2145 = vmatprep.subr.bf16.mxu0 %v2393_v1 }
 0x116   : > { %2146 = vmatpush3.bf16.msra.mxu0 %v2304_v59 }
 0x117   : > { %2147 = vmatprep.subr.bf16.mxu0 %v2393_v1 }
 0x11a   : > { %2148 = vmatpush3.bf16.msra.mxu0 %v2305_v60 }
 0x11b   : > { %2149 = vmatprep.subr.bf16.mxu0 %v2393_v1 }
 0x11e   : > { %2150 = vmatpush3.bf16.msra.mxu0 %v2306_v61 }
 0x11f   : > { %2151 = vmatprep.subr.bf16.mxu0 %v2393_v1 }
 0x122   : > { %2152 = vmatpush3.bf16.msra.mxu0 %v2307_v62 }
 0x123   : > { %2153 = vmatprep.subr.bf16.mxu0 %v2393_v1 }
 0x126   : > { %2154 = vmatpush3.bf16.msra.mxu0 %v2308_v63 }
 0x127   : > { %2183 = vmatprep.subr.bf16.mxu0 %v2393_v1 }
 0x129   : > { %2156 = vmatmul.mubr.msk.bf16.vlgmr.msra.gmra.mrb[8].mxu0 %vm1938_vm5, %v1939_v54 }
 0x12a   : > { %2185 = vmatprep.mubr.msk.bf16.mxu0 %vm2394_vm0, %v2393_v1 }
 0x1dc   : > { %v919_v4 = vpop.f32.mrb[4].mxu1  ;;  %v805_v5 = vpop.f32.mrb[4].mxu0 }
 0x1dd   : > { %v920_v6 = vadd.f32 %v1929_v0, %v919_v4  ;;  %v2137_v7 = vpop.f32.mrb[5].mxu1  ;;  %v806_v8 = vadd.f32 %v1900_v2, %v805_v5  ;;  %v2117_v9 = vpop.f32.mrb[5].mxu0 }
 0x1de   : > { %v922_v10 = vpop.f32.mrb[6].mxu1  ;;  %v808_v11 = vpop.f32.mrb[6].mxu0 }
 0x1df   : > { %v1045_v12 = vpack.c.bf16 %v920_v6, %v920_v6  ;;  %v2138_v13 = vpop.f32.mrb[7].mxu1  ;;  %v809_v14 = vadd.f32 %v1900_v2, %v808_v11  ;;  %v2118_v17 = vpop.f32.mrb[7].mxu0  ;;  %v1042_v18 = vmul.f32 0.17677669, %v806_v8 }
 0x1e1   : > { %v1043_v19 = vmul.f32 0.17677669, %v809_v14  ;;  %v1052_v20 = vsel %vm1047_vm7, %v1045_v12, 0 }
 0x1e2   : > { %2160 = vmatpush3.bf16.xpose.msra.mxu1 %v1052_v20 }
 0x1e3   : > { %v1044_v22 = vpack.c.bf16 %v1043_v19, %v1042_v18  ;;  %2165 = vmatprep.subr.bf16.mxu1 %v2393_v1 }
 0x1e9   : > { %2162 = vmatmul.mubr.msk.bf16.vlgmr.msra.gmra.mrb[8].mxu1 %vm1047_vm7, %v1044_v22 }
 0x1ea   : > { %2167 = vmatprep.mubr.msk.bf16.mxu1 %vm2394_vm0, %v2393_v1 }
 0x1fc   : > { %v1032_v24 = vpop.f32.mrb[8].mxu0 }
 0x1fd   : > { %v1033_v25 = vadd.f32 %v1958_v23, %v1032_v24  ;;  %v2157_v26 = vpop.f32.mrb[9].mxu0 }
 0x1fe   : > { %v1035_v27 = vpop.f32.mrb[10].mxu0 }
 0x1ff   : > { %v2728_v28 = vpack.c.bf16 %v1033_v25, %v1033_v25  ;;  %v2158_v29 = vpop.f32.mrb[11].mxu0 }
 0x201   : > { %v1126_v30 = vsel %vm1124_vm8, %v2728_v28, 0 }
 0x202   : > { %2166 = vmatpush3.bf16.msra.mxu1 %v1126_v30 }
 0x203   : > { %2171 = vmatprep.subr.bf16.mxu1 %v2393_v1 }
 0x2bc   : > { %v1088_v33 = vpop.f32.mrb[8].mxu1 }
 0x2bd   : > { %v1095_v35 = vsel %vm2738_vm10, %v1088_v33, -10000.0  ;;  %v2163_v3 = vpop.f32.mrb[9].mxu1 }
 0x2be   : > { %v1091_v36 = vpop.f32.mrb[10].mxu1  ;;  %v1098_v21 = vsel %vm1097_vm11, %v1095_v35, -inf }
 0x2bf   : > { %v1096_v37 = vsel %vm2744_vm12, %v1091_v36, -10000.0  ;;  %1099 = vmax.xlane.f32.xlu0 %v1098_v21  ;;  %v2164_v38 = vpop.f32.mrb[11].mxu1 }
 0x2c0   : > { %v1101_v39 = vsel %vm1097_vm11, %v1096_v37, -inf }
 0x2c3   : > { %1102 = vmax.xlane.f32.xlu0 %v1101_v39 }
 0x2d9   : > { %1173 = vrot.lane.b32.xlu0 %v1045_v12, %s2395_s17 }
 0x2dd   : > { %1424 = vrot.lane.b32.xlu0 %v1045_v12, %s2396_s18 }
 0x34c   : > { %v1100_v40 = vpop.xlane.xlu0 %1099 }
 0x34d   : > { %v1104_v41 = vsub.f32 %v1095_v35, %v1100_v40 }
 0x34f   : > { %v1106_v42 = vmul.f32 1.442695, %v1104_v41 }
 0x350   : > { %v1103_v43 = vpop.xlane.xlu0 %1102 }
 0x351   : > { %2325 = vpow2.f32 %v1106_v42  ;;  %v1105_v45 = vsub.f32 %v1096_v37, %v1103_v43 }
 0x353   : > { %v1108_v46 = vmul.f32 1.442695, %v1105_v45 }
 0x354   : > { %v1174_v55 = vpop.permute.xlu0 %1173 }
 0x355   : > { %2327 = vpow2.f32 %v1108_v46  ;;  %v1179_v0 = vsel %vm1047_vm7, %v1174_v55, 0 }
 0x358   : > { %v1425_v62 = vpop.permute.xlu0 %1424 }
 0x359   : > { %v1430_v4 = vsel %vm1047_vm7, %v1425_v62, 0 }
 0x35b   : > { %v2326_v47 = vpop.eup %2325 }
 0x35c   : > { %v1110_v48 = vsel %vm1097_vm11, %v2326_v47, 0.0 }
 0x35d   : > { %1111 = vadd.xlane.f32.xlu1 %v1110_v48 }
 0x35f   : > { %v2328_v49 = vpop.eup %2327 }
 0x360   : > { %v1113_v51 = vsel %vm1097_vm11, %v2328_v49, 0.0 }
 0x361   : > { %1114 = vadd.xlane.f32.xlu1 %v1113_v51 }
 0x372   : > { %1170 = vrot.lane.b32.xlu1 %v1044_v22, %s2395_s17 }
 0x376   : > { %1299 = vrot.lane.b32.xlu1 %v1045_v12, %s2397_s19 }
 0x37a   : > { %1297 = vrot.lane.b32.xlu1 %v1044_v22, %s2397_s19 }
 0x37e   : > { %1422 = vrot.lane.b32.xlu1 %v1044_v22, %s2396_s18 }
 0x3ea   : > { %v1112_v52 = vpop.xlane.xlu1 %1111 }
 0x3eb   : > { %2329 = vrcp.f32 %v1112_v52 }
 0x3ee   : > { %v1115_v53 = vpop.xlane.xlu1 %1114 }
 0x3ef   : > { %2331 = vrcp.f32 %v1115_v53 }
 0x3f2   : > { %v1171_v54 = vpop.permute.xlu1 %1170 }
 0x3f5   : > { %v2330_v57 = vpop.eup %2329 }
 0x3f6   : > { %v1300_v56 = vpop.permute.xlu1 %1299  ;;  %v1118_v60 = vmul.f32 %v2330_v57, %v2326_v47 }
 0x3f7   : > { %v1305_v58 = vsel %vm1047_vm7, %v1300_v56, 0 }
 0x3f8   : > { %2184 = vmatpush3.bf16.xpose.msra.mxu0 %v1305_v58 }
 0x3f9   : > { %v2332_v59 = vpop.eup %2331  ;;  %2195 = vmatprep.subr.bf16.mxu0 %v2393_v1 }
 0x3fa   : > { %v1119_v61 = vmul.f32 %v2332_v59, %v2328_v49  ;;  %v1298_v2 = vpop.permute.xlu1 %1297 }
 0x3fc   : > { %v1120_v63 = vpack.c.bf16 %v1119_v61, %v1118_v60 }
 0x3fe   : > { %2168 = vmatmul.mubr.msk.bf16.vlgmr.msra.gmra.mrb[12].mxu1 %vm1097_vm11, %v1120_v63  ;;  %v1423_v5 = vpop.permute.xlu1 %1422 }
 0x3ff   : > { %2172 = vmatpush3.bf16.xpose.msra.mxu1 %v1179_v0  ;;  %2186 = vmatmul.mubr.msk.bf16.vlgmr.msra.gmra.mrb[12].mxu0 %vm1047_vm7, %v1298_v2 }
 0x400   : > { %2196 = vmatpush3.bf16.xpose.msra.mxu0 %v1430_v4  ;;  %2173 = vmatprep.mubr.msk.bf16.mxu1 %vm2394_vm0, %v2393_v1 }
 0x401   : > { %2197 = vmatprep.mubr.msk.bf16.mxu0 %vm2394_vm0, %v2393_v1  ;;  %2177 = vmatprep.subr.bf16.mxu1 %v2393_v1 }
 0x402   : > { %2207 = vmatprep.subr.bf16.mxu0 %v2393_v1 }
 0x406   : > { %2174 = vmatmul.mubr.msk.bf16.vlgmr.msra.gmra.mrb[16].mxu1 %vm1047_vm7, %v1171_v54 }
 0x407   : > { %2198 = vmatmul.mubr.msk.bf16.vlgmr.msra.gmra.mrb[16].mxu0 %vm1047_vm7, %v1423_v5  ;;  %2179 = vmatprep.mubr.msk.bf16.mxu1 %vm2394_vm0, %v2393_v1 }
 0x408   : > { %2223 = vmatprep.mubr.msk.bf16.mxu0 %vm2394_vm0, %v2393_v1 }
 0x4d1   : > { %v2780_v6 = vpop.f32.mrb[12].mxu1 }
 0x4d2   : > { %v2169_v7 = vpop.f32.mrb[13].mxu1  ;;  %v1341_v8 = vpop.f32.mrb[12].mxu0 }
 0x4d3   : > { %v2782_v9 = vpop.f32.mrb[14].mxu1  ;;  %v2187_v10 = vpop.f32.mrb[13].mxu0  ;;  %v1348_v24 = vsel %vm2738_vm10, %v1341_v8, -10000.0 }
 0x4d4   : > { %v2170_v11 = vpop.f32.mrb[15].mxu1  ;;  %v1344_v12 = vpop.f32.mrb[14].mxu0  ;;  %v1350_v33 = vsel %vm1097_vm11, %v1348_v24, -inf }
 0x4d5   : > { %v2188_v13 = vpop.f32.mrb[15].mxu0  ;;  %v1349_v35 = vsel %vm2744_vm12, %v1344_v12, -10000.0 }
 0x4d6   : > { %v1353_v36 = vsel %vm1097_vm11, %v1349_v35, -inf }
 0x4d9   : > { %v1215_v14 = vpop.f32.mrb[16].mxu1 }
 0x4da   : > { %v1222_v17 = vsel %vm2738_vm10, %v1215_v14, -10000.0  ;;  %v2175_v18 = vpop.f32.mrb[17].mxu1  ;;  %v1466_v19 = vpop.f32.mrb[16].mxu0 }
 0x4db   : > { %v1218_v20 = vpop.f32.mrb[18].mxu1  ;;  %v2199_v22 = vpop.f32.mrb[17].mxu0  ;;  %v1224_v23 = vsel %vm1097_vm11, %v1222_v17, -inf  ;;  %v1473_v21 = vsel %vm2738_vm10, %v1466_v19, -10000.0 }
 0x4dc   : > { %v1223_v25 = vsel %vm2744_vm12, %v1218_v20, -10000.0  ;;  %1225 = vmax.xlane.f32.xlu0 %v1224_v23  ;;  %v2176_v26 = vpop.f32.mrb[19].mxu1  ;;  %v1469_v27 = vpop.f32.mrb[18].mxu0  ;;  %v1475_v37 = vsel %vm1097_vm11, %v1473_v21, -inf }
 0x4dd   : > { %v2200_v29 = vpop.f32.mrb[19].mxu0  ;;  %v1227_v30 = vsel %vm1097_vm11, %v1223_v25, -inf  ;;  %v1474_v31 = vsel %vm2744_vm12, %v1469_v27, -10000.0 }
 0x4de   : > { %1228 = vmax.xlane.f32.xlu1 %v1227_v30  ;;  %v1478_v3 = vsel %vm1097_vm11, %v1474_v31, -inf }
 0x4e0   : > { %1351 = vmax.xlane.f32.xlu0 %v1350_v33 }
 0x4e2   : > { %1479 = vmax.xlane.f32.xlu1 %v1478_v3 }
 0x4e4   : > { %1354 = vmax.xlane.f32.xlu0 %v1353_v36 }
 0x4e8   : > { %1476 = vmax.xlane.f32.xlu0 %v1475_v37 }
 0x569   : > { %v1226_v38 = vpop.xlane.xlu0 %1225 }
 0x56a   : > { %v1230_v47 = vsub.f32 %v1222_v17, %v1226_v38  ;;  %v2309_v38 = vld [vmem:[%s2937_s11] sm:$0xff]  }
 0x56b   : > { %v1229_v39 = vpop.xlane.xlu1 %1228  ;;  %2208 = vmatpush3.bf16.msra.mxu0 %v2309_v38  ;;  %v1988_v38 = vld [vmem:[%s2940_s14] ss:$0 sm:$0xff] }
 0x56c   : > { %v1231_v48 = vsub.f32 %v1223_v25, %v1229_v39  ;;  %v1232_v53 = vmul.f32 1.442695, %v1230_v47  ;;  %v2310_v39 = vld [vmem:[%s2937_s11 + $0x8] sm:$0xff]   ;;  %2209 = vmatprep.subr.bf16.mxu0 %v2393_v1 }
 0x56d   : > { %v1352_v40 = vpop.xlane.xlu0 %1351 }
 0x56e   : > { %v1356_v41 = vsub.f32 %v1348_v24, %v1352_v40  ;;  %v1234_v54 = vmul.f32 1.442695, %v1231_v48  ;;  %v2311_v40 = vld [vmem:[%s2937_s11 + $0x10] sm:$0xff]  }
 0x56f   : > { %v1480_v42 = vpop.xlane.xlu1 %1479  ;;  %2210 = vmatpush3.bf16.msra.mxu0 %v2310_v39 }
 0x570   : > { %v1358_v34 = vmul.f32 1.442695, %v1356_v41  ;;  %v1482_v43 = vsub.f32 %v1474_v31, %v1480_v42  ;;  %2211 = vmatprep.subr.bf16.mxu0 %v2393_v1  ;;  %v2312_v41 = vld [vmem:[%s2937_s11 + $0x18] sm:$0xff]   ;;  %v2313_v42 = vld [vmem:[%s2937_s11 + $0x20] sm:$0xff]  }
 0x571   : > { %v1355_v45 = vpop.xlane.xlu0 %1354 }
 0x572   : > { %2333 = vpow2.f32 %v1358_v34  ;;  %v1357_v46 = vsub.f32 %v1349_v35, %v1355_v45  ;;  %v1485_v49 = vmul.f32 1.442695, %v1482_v43  ;;  %v2314_v45 = vld [vmem:[%s2937_s11 + $0x28] sm:$0xff]  }
 0x573   : > { %2212 = vmatpush3.bf16.msra.mxu0 %v2311_v40 }
 0x574   : > { %v1360_v51 = vmul.f32 1.442695, %v1357_v46  ;;  %2213 = vmatprep.subr.bf16.mxu0 %v2393_v1 }
 0x575   : > { %v1477_v32 = vpop.xlane.xlu0 %1476 }
 0x576   : > { %2335 = vpow2.f32 %v1360_v51  ;;  %v1481_v52 = vsub.f32 %v1473_v21, %v1477_v32 }
 0x577   : > { %2337 = vpow2.f32 %v1485_v49  ;;  %2214 = vmatpush3.bf16.msra.mxu0 %v2312_v41  ;;  %v2315_v49 = vld [vmem:[%s2937_s11 + $0x30] sm:$0xff]  }
 0x578   : > { %v1483_v55 = vmul.f32 1.442695, %v1481_v52  ;;  %2215 = vmatprep.subr.bf16.mxu0 %v2393_v1  ;;  %v2316_v52 = vld [vmem:[%s2937_s11 + $0x38] sm:$0xff]  }
 0x57a   : > { %2339 = vpow2.f32 %v1483_v55 }
 0x57b   : > { %2341 = vpow2.f32 %v1232_v53  ;;  %2216 = vmatpush3.bf16.msra.mxu0 %v2313_v42 }
 0x57c   : > { %v2334_v56 = vpop.eup %2333  ;;  %2343 = vpow2.f32 %v1234_v54  ;;  %2217 = vmatprep.subr.bf16.mxu0 %v2393_v1 }
 0x57d   : > { %v1362_v57 = vsel %vm1097_vm11, %v2334_v56, 0.0 }
 0x57e   : > { %1363 = vadd.xlane.f32.xlu0 %v1362_v57  ;;  %v2318_v57 = vld [vmem:[%s2939_s13 + $0x8] sm:$0xff]  }
 0x57f   : > { %2218 = vmatpush3.bf16.msra.mxu0 %v2314_v45 }
 0x580   : > { %v2336_v58 = vpop.eup %2335  ;;  %2219 = vmatprep.subr.bf16.mxu0 %v2393_v1 }
 0x581   : > { %v1365_v59 = vsel %vm1097_vm11, %v2336_v58, 0.0  ;;  %v2338_v60 = vpop.eup %2337 }
 0x582   : > { %1366 = vadd.xlane.f32.xlu1 %v1365_v59  ;;  %v1490_v0 = vsel %vm1097_vm11, %v2338_v60, 0.0 }
 0x583   : > { %2220 = vmatpush3.bf16.msra.mxu0 %v2315_v49 }
 0x584   : > { %v2340_v61 = vpop.eup %2339  ;;  %2221 = vmatprep.subr.bf16.mxu0 %v2393_v1 }
 0x585   : > { %v2342_v62 = vpop.eup %2341  ;;  %v1487_v63 = vsel %vm1097_vm11, %v2340_v61, 0.0 }
 0x586   : > { %v2344_v2 = vpop.eup %2343  ;;  %1488 = vadd.xlane.f32.xlu0 %v1487_v63  ;;  %1491 = vadd.xlane.f32.xlu1 %v1490_v0  ;;  %v1236_v4 = vsel %vm1097_vm11, %v2342_v62, 0.0  ;;  %v2319_v63 = vld [vmem:[%s2939_s13 + $0x10] sm:$0xff]   ;;  %v2320_v0 = vld [vmem:[%s2939_s13 + $0x18] sm:$0xff]  }
 0x587   : > { %v1239_v5 = vsel %vm1097_vm11, %v2344_v2, 0.0  ;;  %2222 = vmatpush3.bf16.msra.mxu0 %v2316_v52 }
 0x58a   : > { %1237 = vadd.xlane.f32.xlu0 %v1236_v4  ;;  %1240 = vadd.xlane.f32.xlu1 %v1239_v5 }
 0x59b   : > { %1373 = vrot.lane.b32.xlu1 %v2728_v28, %s2397_s19 }
 0x59f   : > { %1498 = vrot.lane.b32.xlu1 %v2728_v28, %s2396_s18 }
 0x5a0   : > { %1248 = vrot.lane.b32.xlu0 %v2728_v28, %s2395_s17 }
 0x60b   : > { %v1364_v7 = vpop.xlane.xlu0 %1363 }
 0x60f   : > { %v1367_v8 = vpop.xlane.xlu1 %1366 }
 0x613   : > { %v1489_v10 = vpop.xlane.xlu0 %1488  ;;  %v1492_v11 = vpop.xlane.xlu1 %1491 }
 0x617   : > { %v1238_v12 = vpop.xlane.xlu0 %1237  ;;  %v1241_v13 = vpop.xlane.xlu1 %1240 }
 0x618   : > { %2345 = vrcp.f32 %v1238_v12 }
 0x619   : > { %2347 = vrcp.f32 %v1241_v13 }
 0x61a   : > { %2349 = vrcp.f32 %v1367_v8 }
 0x61b   : > { %v1249_v14 = vpop.permute.xlu0 %1248  ;;  %2351 = vrcp.f32 %v1364_v7  ;;  %v1374_v22 = vpop.permute.xlu1 %1373 }
 0x61c   : > { %v1254_v17 = vsel %vm1124_vm8, %v1249_v14, 0  ;;  %2353 = vrcp.f32 %v1489_v10  ;;  %v1379_v25 = vsel %vm1124_vm8, %v1374_v22, 0 }
 0x61d   : > { %2178 = vmatpush3.bf16.msra.mxu1 %v1254_v17  ;;  %2355 = vrcp.f32 %v1492_v11 }
 0x61e   : > { %2189 = vmatprep.subr.bf16.mxu1 %v2393_v1 }
 0x61f   : > { %v1499_v30 = vpop.permute.xlu1 %1498 }
 0x620   : > { %v1504_v3 = vsel %vm1124_vm8, %v1499_v30, 0 }
 0x622   : > { %v2346_v18 = vpop.eup %2345 }
 0x623   : > { %v2348_v19 = vpop.eup %2347  ;;  %v1244_v20 = vmul.f32 %v2346_v18, %v2342_v62 }
 0x624   : > { %v1245_v28 = vmul.f32 %v2348_v19, %v2344_v2  ;;  %v2350_v24 = vpop.eup %2349  ;;  %v2321_v2 = vld [vmem:[%s2939_s13 + $0x20] sm:$0xff]  }
 0x625   : > { %v2352_v26 = vpop.eup %2351  ;;  %v1371_v27 = vmul.f32 %v2350_v24, %v2336_v58  ;;  %v2322_v24 = vld [vmem:[%s2939_s13 + $0x28] sm:$0xff]  }
 0x626   : > { %v1246_v23 = vpack.c.bf16 %v1245_v28, %v1244_v20  ;;  %v1370_v29 = vmul.f32 %v2352_v26, %v2334_v56  ;;  %v2354_v31 = vpop.eup %2353  ;;  %v2317_v56 = vld [vmem:[%s2939_s13] sm:$0xff]  }
 0x627   : > { %v2356_v35 = vpop.eup %2355  ;;  %v1495_v36 = vmul.f32 %v2354_v31, %v2340_v61 }
 0x628   : > { %2180 = vmatmul.mubr.msk.bf16.vlgmr.msra.gmra.mrb[20].mxu1 %vm1097_vm11, %v1246_v23  ;;  %v1372_v33 = vpack.c.bf16 %v1371_v27, %v1370_v29  ;;  %v1496_v21 = vmul.f32 %v2356_v35, %v2338_v60 }
 0x629   : > { %2190 = vmatpush3.bf16.msra.mxu1 %v1379_v25  ;;  %2191 = vmatprep.mubr.msk.bf16.mxu1 %vm2394_vm0, %v2393_v1  ;;  %v1978_v25 = vld [vmem:[%s2938_s12] ss:$0 sm:$0xff] }
 0x62a   : > { %2201 = vmatprep.subr.bf16.mxu1 %v2393_v1  ;;  %v1497_v37 = vpack.c.bf16 %v1496_v21, %v1495_v36 }
 0x630   : > { %2192 = vmatmul.mubr.msk.bf16.vlgmr.msra.gmra.mrb[24].mxu1 %vm1097_vm11, %v1372_v33 }
 0x631   : > { %2202 = vmatpush3.bf16.msra.mxu1 %v1504_v3  ;;  %2203 = vmatprep.mubr.msk.bf16.mxu1 %vm2394_vm0, %v2393_v1 }
 0x632   : > { %2227 = vmatprep.subr.bf16.mxu1 %v2393_v1 }
 0x638   : > { %2204 = vmatmul.mubr.msk.bf16.vlgmr.msra.gmra.mrb[28].mxu1 %vm1097_vm11, %v1497_v37 }
 0x639   : > { %2243 = vmatprep.mubr.msk.bf16.mxu1 %vm2394_vm0, %v2393_v1  ;;  %2228 = vmatpush3.bf16.msra.mxu1 %v2317_v56 }
 0x63a   : > { %2229 = vmatprep.subr.bf16.mxu1 %v2393_v1 }
 0x63d   : > { %2230 = vmatpush3.bf16.msra.mxu1 %v2318_v57 }
 0x63e   : > { %2231 = vmatprep.subr.bf16.mxu1 %v2393_v1 }
 0x641   : > { %2232 = vmatpush3.bf16.msra.mxu1 %v2319_v63 }
 0x642   : > { %2233 = vmatprep.subr.bf16.mxu1 %v2393_v1 }
 0x645   : > { %2234 = vmatpush3.bf16.msra.mxu1 %v2320_v0 }
 0x646   : > { %2235 = vmatprep.subr.bf16.mxu1 %v2393_v1 }
 0x649   : > { %2236 = vmatpush3.bf16.msra.mxu1 %v2321_v2 }
 0x64a   : > { %2237 = vmatprep.subr.bf16.mxu1 %v2393_v1 }
 0x64d   : > { %2238 = vmatpush3.bf16.msra.mxu1 %v2322_v24 }
 0x64e   : > { %2239 = vmatprep.subr.bf16.mxu1 %v2393_v1 }
 0x6fb   : > { %v1290_v34 = vpop.f32.mrb[20].mxu1 }
 0x6fc   : > { %v2181_v43 = vpop.f32.mrb[21].mxu1 }
 0x6fd   : > { %v1293_v46 = vpop.f32.mrb[22].mxu1 }
 0x6fe   : > { %v2262_v47 = vpack.i.bf16 %v1293_v46, %v1290_v34  ;;  %v2182_v48 = vpop.f32.mrb[23].mxu1 }
 0x700   : > { %2263 = vrot.lane.b32.xlu1 %v2262_v47, %s2396_s18 }
 0x703   : > { %v1415_v51 = vpop.f32.mrb[24].mxu1 }
 0x704   : > { %v2193_v32 = vpop.f32.mrb[25].mxu1 }
 0x705   : > { %v1418_v53 = vpop.f32.mrb[26].mxu1 }
 0x706   : > { %v2267_v54 = vpack.i.bf16 %v1418_v53, %v1415_v51  ;;  %v2194_v55 = vpop.f32.mrb[27].mxu1 }
 0x708   : > { %2268 = vrot.lane.b32.xlu0 %v2267_v54, %s2397_s19  ;;  %s478_s19 = scalar_lea.vmem %s2930_s4, %s2517_s22 }
 0x709   : > { %v1987_v35 = vld [vmem:[%s478_s19] ss:$0 sm:$0xff] }
 0x70b   : > { %v1540_v58 = vpop.f32.mrb[28].mxu1 }
 0x70c   : > { %v2205_v59 = vpop.f32.mrb[29].mxu1 }
 0x70d   : > { %v1543_v60 = vpop.f32.mrb[30].mxu1 }
 0x70e   : > { %v2272_v61 = vpack.i.bf16 %v1543_v60, %v1540_v58  ;;  %v2206_v62 = vpop.f32.mrb[31].mxu1 }
 0x710   : > { %2273 = vrot.lane.b32.xlu1 %v2272_v61, %s2395_s17 }
 0x772   : > { %v2264_v4 = vpop.permute.xlu1 %2263 }
 0x773   : > { %v2266_v7 = vunpack.i.h.bf16 %v2264_v4  ;;  %v2265_v8 = vunpack.i.l.bf16 %v2264_v4 }
 0x775   : > { %v1572_v13 = vsel %vm1047_vm7, %v2782_v9, %v2266_v7  ;;  %v1571_v14 = vsel %vm1047_vm7, %v2780_v6, %v2265_v8  ;;  %v2323_v6 = vld [vmem:[%s2939_s13 + $0x30] sm:$0xff]   ;;  %v2324_v9 = vld [vmem:[%s2939_s13 + $0x38] sm:$0xff]  }
 0x776   : > { %2240 = vmatpush3.bf16.msra.mxu1 %v2323_v6 }
 0x777   : > { %2241 = vmatprep.subr.bf16.mxu1 %v2393_v1 }
 0x77a   : > { %v2269_v5 = vpop.permute.xlu0 %2268  ;;  %2242 = vmatpush3.bf16.msra.mxu1 %v2324_v9 }
 0x77b   : > { %v2271_v10 = vunpack.i.h.bf16 %v2269_v5  ;;  %v2270_v11 = vunpack.i.l.bf16 %v2269_v5 }
 0x77d   : > { %v1573_v19 = vsel %vm547_vm3, %v1571_v14, %v2270_v11  ;;  %v1574_v20 = vsel %vm547_vm3, %v1572_v13, %v2271_v10 }
 0x782   : > { %v2274_v12 = vpop.permute.xlu1 %2273 }
 0x783   : > { %v2276_v17 = vunpack.i.h.bf16 %v2274_v12  ;;  %v2275_v18 = vunpack.i.l.bf16 %v2274_v12 }
 0x785   : > { %v1576_v28 = vsel %vm1575_vm13, %v1573_v19, %v2275_v18  ;;  %v1577_v22 = vsel %vm1575_vm13, %v1574_v20, %v2276_v17 }
 0x786   : > { %v1578_v23 = vpack.c.bf16 %v1577_v22, %v1576_v28 }
 0x788   : > { %2224 = vmatmul.mubr.bf16.vlgmr.msra.gmra.mrb[20].mxu0 %v1578_v23 }
 0x85b   : > { %v1667_v26 = vpop.f32.mrb[20].mxu0 }
 0x85c   : > { %v1668_v27 = vadd.f32 %v1978_v25, %v1667_v26  ;;  %v2225_v29 = vpop.f32.mrb[21].mxu0 }
 0x85d   : > { %v1670_v30 = vpop.f32.mrb[22].mxu0 }
 0x85e   : > { %v1674_v1 = vadd.f32 %v1668_v27, %v2648_v44  ;;  %v1671_v31 = vadd.f32 %v1978_v25, %v1670_v30  ;;  %v2226_v33 = vpop.f32.mrb[23].mxu0 }
 0x860   : > { %v1675_v3 = vadd.f32 %v1671_v31, %v2650_v50  ;;  %v1683_v36 = vadd.f32 %v1987_v35, %v1674_v1 }
 0x862   : > { %v1684_v21 = vadd.f32 %v1987_v35, %v1675_v3 }
 0x864   : > { %v1998_v37 = vpack.c.bf16 %v1684_v21, %v1683_v36 }
 0x866   : > { %2244 = vmatmul.mubr.msk.bf16.vlgmr.msra.gmra.mrb[32].mxu1 %vm1909_vm6, %v1998_v37 }
 0x939   : > { %v1793_v44 = vpop.f32.mrb[32].mxu1 }
 0x93a   : > { %v1794_v50 = vadd.f32 %v1988_v38, %v1793_v44  ;;  %v2245_v39 = vpop.f32.mrb[33].mxu1 }
 0x93b   : > { %v1796_v40 = vpop.f32.mrb[34].mxu1 }
 0x93c   : > { %1800 = vst.msk [vmem:[%s483_s27] sm:$0xff] %vm547_vm3, %v1794_v50  ;;  %v1797_v16 = vadd.f32 %v1988_v38, %v1796_v40  ;;  %v2246_v41 = vpop.f32.mrb[35].mxu1 }
 0x93e   : > { %1801 = vst.msk [vmem:[%s483_s27 + $0x8] sm:$0xff] %vm547_vm3, %v1797_v16 }
 0x93f PF: > { %s35_s1 = sadd.s32 1, %s2389_s1  }
 0x940   : > { %p32_p0 = scmp.ge.s32.totalorder %s35_s1, 4  }
 0x942   :  { %34 = sbr.rel (!%p32_p0) target bundleno = 26 (0x1a), region = 112 }

</bundles_post_ra>
